<compile_context>
chip_gen: v5e
topology: v5e:2x2
jax: 0.10.0
libtpu: 0.0.40
codegen_flags: <defaults>
</compile_context>

<pallas_src>
import functools

import jax
import jax.numpy as jnp
from jax.experimental import pallas as pl
from jax.experimental.pallas import tpu as pltpu


# ---------------------------------------------------------------------------
# Fused kernel: conv1+BN1+ReLU -> conv2+BN2+residual+ReLU, B images per step
# ---------------------------------------------------------------------------
def _make_basic_block_kernel(B, H, W, C, P):
    BHW = B * H * W

    def kernel(x_ref, w1_ref, w2_ref, bn_ref, out_ref, xp_ref, out1p_ref):
        # x_ref    : (B, H, W, C) bf16      unpadded NHWC input tile
        # w1_ref   : (9, C, P) bf16         conv1 taps, tap = kh*3+kw
        # w2_ref   : (9, P, P) bf16         conv2 taps
        # bn_ref   : (4, P) f32             rows = [scale1, bias1, scale2, bias2]
        # out_ref  : (B, H, W, P) bf16
        # xp_ref   : (B, H+2, W+2, C) bf16  VMEM, zero-bordered halo'd input
        # out1p_ref: (B, H+2, W+2, P) bf16  VMEM, zero-bordered halo'd out1

        # Zero ONLY the 1-px border of both scratches (interior is fully
        # rewritten below).  Done every step so megacore-sharded ("parallel")
        # per-core scratch is always correct; cost = 8 thin slab stores.
        for ref, ch in ((xp_ref, C), (out1p_ref, P)):
            ref[:, 0:1, :, :] = jnp.zeros((B, 1, W + 2, ch), jnp.bfloat16)
            ref[:, H + 1:H + 2, :, :] = jnp.zeros((B, 1, W + 2, ch), jnp.bfloat16)
            ref[:, :, 0:1, :] = jnp.zeros((B, H + 2, 1, ch), jnp.bfloat16)
            ref[:, :, W + 1:W + 2, :] = jnp.zeros((B, H + 2, 1, ch), jnp.bfloat16)

        # On-chip halo insertion (replaces the HBM-side jnp.pad copy).
        xp_ref[:, 1:H + 1, 1:W + 1, :] = x_ref[...]

        # ---- conv1 (3x3, stride 1, pad 1): 9 tap matmuls, value accumulation ----
        acc = None
        center = None
        for kh in range(3):
            for kw in range(3):
                patch = xp_ref[:, kh:kh + H, kw:kw + W, :].reshape(BHW, C)
                if kh == 1 and kw == 1:
                    center = patch           # reused as the identity residual
                d = jnp.dot(patch, w1_ref[kh * 3 + kw],
                            preferred_element_type=jnp.float32)
                acc = d if acc is None else acc + d

        # BN1 affine + activation in f32, single bf16 cast for conv2's operand.
        # TODO(synk): utils.activation is not defined in the snippet; assumed ReLU.
        out1 = jnp.maximum(acc * bn_ref[0:1, :] + bn_ref[1:2, :], 0.0)
        out1p_ref[:, 1:H + 1, 1:W + 1, :] = (
            out1.astype(jnp.bfloat16).reshape(B, H, W, P))

        # ---- conv2 (3x3, stride 1, pad 1): bf16 operands, value accumulation ----
        acc = None
        for kh in range(3):
            for kw in range(3):
                patch = out1p_ref[:, kh:kh + H, kw:kw + W, :].reshape(BHW, P)
                d = jnp.dot(patch, w2_ref[kh * 3 + kw],
                            preferred_element_type=jnp.float32)
                acc = d if acc is None else acc + d

        # BN2 affine + identity shortcut + activation in f32; bf16 store.
        out2 = jnp.maximum(
            acc * bn_ref[2:3, :] + bn_ref[3:4, :] + center.astype(jnp.float32),
            0.0)
        out_ref[...] = out2.reshape(B, H, W, P).astype(out_ref.dtype)

    return kernel


# ---------------------------------------------------------------------------
# Wrappers
# ---------------------------------------------------------------------------
def _bn_fold(bn, eps=1e-5):
    # eval-mode BatchNorm: y = (x - mean) / sqrt(var + eps) * gamma + beta
    scale = bn["gamma"] / jnp.sqrt(bn["var"] + eps)
    bias = bn["beta"] - bn["mean"] * scale
    return scale.astype(jnp.float32), bias.astype(jnp.float32)


def _pick_batch_block(n, max_b=8):
    """Largest divisor of n that is <= max_b (VMEM-safe on v7x at CIFAR
    planes=64) while keeping the grid >= 2 so both v7x TensorCores get work."""
    best = 1
    for cand in range(1, min(max_b, n) + 1):
        if n % cand == 0 and (n < 2 or n // cand >= 2):
            best = cand
    return best


def basic_block_forward_nhwc(params, x_nhwc, max_batch_block=8):
    """BasicBlock forward in NHWC, bf16 output (no boundary relayouts if the
    caller stays NHWC/bf16)."""
    n, h, w, c = x_nhwc.shape
    p, c_in = params["w1"].shape[0], params["w1"].shape[1]
    assert c == c_in
    # TODO(synk): stride != 1 and option 'A'/'B'/'wide' projection shortcuts
    # (and dropout > 0) are not implemented; identity-shortcut config only.
    assert c == p, "identity shortcut requires in_planes == planes (stride=1)"

    b = _pick_batch_block(n, max_batch_block)
    grid = n // b

    # PyTorch conv weight (Cout, Cin, 3, 3) -> (9, Cin, Cout); bf16 MXU operands.
    w1t = jnp.transpose(params["w1"], (2, 3, 1, 0)).reshape(9, c, p).astype(jnp.bfloat16)
    w2t = jnp.transpose(params["w2"], (2, 3, 1, 0)).reshape(9, p, p).astype(jnp.bfloat16)
    s1, b1 = _bn_fold(params["bn1"])
    s2, b2 = _bn_fold(params["bn2"])
    bn = jnp.stack([s1, b1, s2, b2], axis=0).astype(jnp.float32)       # (4, P)

    # Single bf16 cast; NO HBM-side spatial pad (halo is built in-kernel).
    xb = x_nhwc.astype(jnp.bfloat16)

    kernel = _make_basic_block_kernel(b, h, w, c, p)
    return pl.pallas_call(
        kernel,
        out_shape=jax.ShapeDtypeStruct((n, h, w, p), jnp.bfloat16),
        grid_spec=pltpu.PrefetchScalarGridSpec(
            num_scalar_prefetch=0,
            grid=(grid,),                              # >= 2 steps when N >= 2
            in_specs=[
                pl.BlockSpec((b, h, w, c), lambda i: (i, 0, 0, 0)),
                pl.BlockSpec((9, c, p), lambda i: (0, 0, 0)),
                pl.BlockSpec((9, p, p), lambda i: (0, 0, 0)),
                pl.BlockSpec((4, p), lambda i: (0, 0)),
            ],
            out_specs=pl.BlockSpec((b, h, w, p), lambda i: (i, 0, 0, 0)),
            scratch_shapes=[
                pltpu.VMEM((b, h + 2, w + 2, c), jnp.bfloat16),   # halo'd x
                pltpu.VMEM((b, h + 2, w + 2, p), jnp.bfloat16),   # halo'd out1
            ],
        ),
        compiler_params=pltpu.CompilerParams(
            dimension_semantics=("parallel",)),
    )(xb, w1t, w2t, bn)


def basic_block_forward(params, x_nchw):
    """PyTorch-parity NCHW boundary.  If the surrounding model is NHWC/bf16,
    call basic_block_forward_nhwc directly and skip both HBM relayouts."""
    x_nhwc = jnp.transpose(x_nchw, (0, 2, 3, 1))
    out_nhwc = basic_block_forward_nhwc(params, x_nhwc)
    return jnp.transpose(out_nhwc, (0, 3, 1, 2))


# ---------------------------------------------------------------------------
# Parameter init (deterministic) and pure-JAX reference
# ---------------------------------------------------------------------------
def init_basic_block_params(key, in_planes, planes):
    ks = jax.random.split(key, 10)
    fan1 = in_planes * 9
    fan2 = planes * 9
    w1 = jax.random.uniform(ks[0], (planes, in_planes, 3, 3), jnp.float32,
                            -1.0, 1.0) / jnp.sqrt(jnp.float32(fan1))
    w2 = jax.random.uniform(ks[1], (planes, planes, 3, 3), jnp.float32,
                            -1.0, 1.0) / jnp.sqrt(jnp.float32(fan2))
    bn1 = dict(gamma=1.0 + 0.1 * jax.random.normal(ks[2], (planes,)),
               beta=0.1 * jax.random.normal(ks[3], (planes,)),
               mean=0.05 * jax.random.normal(ks[4], (planes,)),
               var=jnp.abs(1.0 + 0.1 * jax.random.normal(ks[5], (planes,))))
    bn2 = dict(gamma=1.0 + 0.1 * jax.random.normal(ks[6], (planes,)),
               beta=0.1 * jax.random.normal(ks[7], (planes,)),
               mean=0.05 * jax.random.normal(ks[8], (planes,)),
               var=jnp.abs(1.0 + 0.1 * jax.random.normal(ks[9], (planes,))))
    return dict(w1=w1, w2=w2, bn1=bn1, bn2=bn2)


def reference_forward(params, x_nchw, eps=1e-5):
    """Pure-JAX reference with the same mixed-precision policy as the kernel
    (bf16 conv operands incl. the identity residual; f32 accumulation, BN,
    ReLU; bf16 output), so the comparison isolates kernel correctness from
    the stated dtype policy."""
    def q(t):  # bf16 operand rounding, exact once lifted back to f32
        return t.astype(jnp.bfloat16).astype(jnp.float32)

    def conv(x, w):
        return jax.lax.conv_general_dilated(
            q(x), q(w), (1, 1), "SAME",
            dimension_numbers=("NCHW", "OIHW", "NCHW"),
            precision=jax.lax.Precision.HIGHEST)

    def bn(x, prm):
        g = prm["gamma"][None, :, None, None]
        b = prm["beta"][None, :, None, None]
        m = prm["mean"][None, :, None, None]
        v = prm["var"][None, :, None, None]
        return (x - m) / jnp.sqrt(v + eps) * g + b

    out = jax.nn.relu(bn(conv(x_nchw, params["w1"]), params["bn1"]))
    out = bn(conv(out, params["w2"]), params["bn2"])
    out = out + q(x_nchw)                   # identity shortcut (same bf16 tile)
    out = jax.nn.relu(out)
    return q(out)                           # kernel emits a bf16 output tile


if __name__ == "__main__":
    key = jax.random.PRNGKey(0)
    kx, kp = jax.random.split(key)

    N, C, H, W = 2, 4, 16, 16                       # in_planes == planes == 4
    x = jax.random.normal(kx, (N, C, H, W), jnp.float32)
    params = init_basic_block_params(kp, C, C)

    fwd = jax.jit(functools.partial(basic_block_forward, params))
    out = jax.block_until_ready(fwd(x))

    ref = reference_forward(params, x)
    assert out.shape == ref.shape == (N, C, H, W)
    out_f32 = out.astype(jnp.float32)
    max_err = float(jnp.max(jnp.abs(out_f32 - ref)))
    assert jnp.allclose(out_f32, ref, atol=5e-3, rtol=5e-3), f"max_err={max_err}"

    print("KERNEL_OK")
</pallas_src>

<mosaic_0001>
module attributes {stable_mosaic.version = 11 : i64} {
  func.func @kernel(%arg0: i32, %arg1: memref<1x16x16x4xbf16, #tpu.memory_space<vmem>>, %arg2: memref<9x4x4xbf16, #tpu.memory_space<vmem>>, %arg3: memref<9x4x4xbf16, #tpu.memory_space<vmem>>, %arg4: memref<4x4xf32, #tpu.memory_space<vmem>>, %arg5: memref<1x16x16x4xbf16, #tpu.memory_space<vmem>>, %arg6: memref<1x18x18x4xbf16, #tpu.memory_space<vmem>>, %arg7: memref<1x18x18x4xbf16, #tpu.memory_space<vmem>>) attributes {dimension_semantics = [#tpu.dimension_semantics<parallel>], iteration_bounds = array<i64: 2>, scalar_prefetch = 0 : i64, scratch_operands = 2 : i64, tpu.core_type = #tpu.core_type<tc>, window_params = [{transform_indices = @transform_0, window_bounds = array<i64: 1, 16, 16, 4>}, {pipeline_mode = #tpu.pipeline_mode<synchronous>, transform_indices = @transform_1, window_bounds = array<i64: 9, 4, 4>}, {pipeline_mode = #tpu.pipeline_mode<synchronous>, transform_indices = @transform_2, window_bounds = array<i64: 9, 4, 4>}, {pipeline_mode = #tpu.pipeline_mode<synchronous>, transform_indices = @transform_3, window_bounds = array<i64: 4, 4>}, {transform_indices = @transform_4, window_bounds = array<i64: 1, 16, 16, 4>}]} {
    %cst = arith.constant 0.000000e+00 : bf16
    %0 = vector.broadcast %cst : bf16 to vector<1x1x18x4xbf16>
    %c0 = arith.constant 0 : index
    %c0_0 = arith.constant 0 : index
    %c0_1 = arith.constant 0 : index
    %c0_2 = arith.constant 0 : index
    %1 = vector.load %arg6[%c0, %c0_0, %c0_1, %c0_2] : memref<1x18x18x4xbf16, #tpu.memory_space<vmem>>, vector<1x1x18x4xbf16>
    tpu.vector_store %arg6[%c0, %c0_0, %c0_1, %c0_2], %0 {strides = array<i32>} : memref<1x18x18x4xbf16, #tpu.memory_space<vmem>>, vector<1x1x18x4xbf16>,
    %cst_3 = arith.constant 0.000000e+00 : bf16
    %2 = vector.broadcast %cst_3 : bf16 to vector<1x1x18x4xbf16>
    %c0_4 = arith.constant 0 : index
    %c17 = arith.constant 17 : index
    %c0_5 = arith.constant 0 : index
    %c0_6 = arith.constant 0 : index
    %3 = vector.load %arg6[%c0_4, %c17, %c0_5, %c0_6] : memref<1x18x18x4xbf16, #tpu.memory_space<vmem>>, vector<1x1x18x4xbf16>
    tpu.vector_store %arg6[%c0_4, %c17, %c0_5, %c0_6], %2 {strides = array<i32>} : memref<1x18x18x4xbf16, #tpu.memory_space<vmem>>, vector<1x1x18x4xbf16>,
    %cst_7 = arith.constant 0.000000e+00 : bf16
    %4 = vector.broadcast %cst_7 : bf16 to vector<1x18x1x4xbf16>
    %c0_8 = arith.constant 0 : index
    %c0_9 = arith.constant 0 : index
    %c0_10 = arith.constant 0 : index
    %c0_11 = arith.constant 0 : index
    %5 = vector.load %arg6[%c0_8, %c0_9, %c0_10, %c0_11] : memref<1x18x18x4xbf16, #tpu.memory_space<vmem>>, vector<1x18x1x4xbf16>
    tpu.vector_store %arg6[%c0_8, %c0_9, %c0_10, %c0_11], %4 {strides = array<i32>} : memref<1x18x18x4xbf16, #tpu.memory_space<vmem>>, vector<1x18x1x4xbf16>,
    %cst_12 = arith.constant 0.000000e+00 : bf16
    %6 = vector.broadcast %cst_12 : bf16 to vector<1x18x1x4xbf16>
    %c0_13 = arith.constant 0 : index
    %c0_14 = arith.constant 0 : index
    %c17_15 = arith.constant 17 : index
    %c0_16 = arith.constant 0 : index
    %7 = vector.load %arg6[%c0_13, %c0_14, %c17_15, %c0_16] : memref<1x18x18x4xbf16, #tpu.memory_space<vmem>>, vector<1x18x1x4xbf16>
    tpu.vector_store %arg6[%c0_13, %c0_14, %c17_15, %c0_16], %6 {strides = array<i32>} : memref<1x18x18x4xbf16, #tpu.memory_space<vmem>>, vector<1x18x1x4xbf16>,
    %cst_17 = arith.constant 0.000000e+00 : bf16
    %8 = vector.broadcast %cst_17 : bf16 to vector<1x1x18x4xbf16>
    %c0_18 = arith.constant 0 : index
    %c0_19 = arith.constant 0 : index
    %c0_20 = arith.constant 0 : index
    %c0_21 = arith.constant 0 : index
    %9 = vector.load %arg7[%c0_18, %c0_19, %c0_20, %c0_21] : memref<1x18x18x4xbf16, #tpu.memory_space<vmem>>, vector<1x1x18x4xbf16>
    tpu.vector_store %arg7[%c0_18, %c0_19, %c0_20, %c0_21], %8 {strides = array<i32>} : memref<1x18x18x4xbf16, #tpu.memory_space<vmem>>, vector<1x1x18x4xbf16>,
    %cst_22 = arith.constant 0.000000e+00 : bf16
    %10 = vector.broadcast %cst_22 : bf16 to vector<1x1x18x4xbf16>
    %c0_23 = arith.constant 0 : index
    %c17_24 = arith.constant 17 : index
    %c0_25 = arith.constant 0 : index
    %c0_26 = arith.constant 0 : index
    %11 = vector.load %arg7[%c0_23, %c17_24, %c0_25, %c0_26] : memref<1x18x18x4xbf16, #tpu.memory_space<vmem>>, vector<1x1x18x4xbf16>
    tpu.vector_store %arg7[%c0_23, %c17_24, %c0_25, %c0_26], %10 {strides = array<i32>} : memref<1x18x18x4xbf16, #tpu.memory_space<vmem>>, vector<1x1x18x4xbf16>,
    %cst_27 = arith.constant 0.000000e+00 : bf16
    %12 = vector.broadcast %cst_27 : bf16 to vector<1x18x1x4xbf16>
    %c0_28 = arith.constant 0 : index
    %c0_29 = arith.constant 0 : index
    %c0_30 = arith.constant 0 : index
    %c0_31 = arith.constant 0 : index
    %13 = vector.load %arg7[%c0_28, %c0_29, %c0_30, %c0_31] : memref<1x18x18x4xbf16, #tpu.memory_space<vmem>>, vector<1x18x1x4xbf16>
    tpu.vector_store %arg7[%c0_28, %c0_29, %c0_30, %c0_31], %12 {strides = array<i32>} : memref<1x18x18x4xbf16, #tpu.memory_space<vmem>>, vector<1x18x1x4xbf16>,
    %cst_32 = arith.constant 0.000000e+00 : bf16
    %14 = vector.broadcast %cst_32 : bf16 to vector<1x18x1x4xbf16>
    %c0_33 = arith.constant 0 : index
    %c0_34 = arith.constant 0 : index
    %c17_35 = arith.constant 17 : index
    %c0_36 = arith.constant 0 : index
    %15 = vector.load %arg7[%c0_33, %c0_34, %c17_35, %c0_36] : memref<1x18x18x4xbf16, #tpu.memory_space<vmem>>, vector<1x18x1x4xbf16>
    tpu.vector_store %arg7[%c0_33, %c0_34, %c17_35, %c0_36], %14 {strides = array<i32>} : memref<1x18x18x4xbf16, #tpu.memory_space<vmem>>, vector<1x18x1x4xbf16>,
    %c0_37 = arith.constant 0 : index
    %c0_38 = arith.constant 0 : index
    %c0_39 = arith.constant 0 : index
    %c0_40 = arith.constant 0 : index
    %16 = vector.load %arg1[%c0_37, %c0_38, %c0_39, %c0_40] : memref<1x16x16x4xbf16, #tpu.memory_space<vmem>>, vector<1x16x16x4xbf16>
    %c0_41 = arith.constant 0 : index
    %c1 = arith.constant 1 : index
    %c1_42 = arith.constant 1 : index
    %c0_43 = arith.constant 0 : index
    %17 = vector.load %arg6[%c0_41, %c1, %c1_42, %c0_43] : memref<1x18x18x4xbf16, #tpu.memory_space<vmem>>, vector<1x16x16x4xbf16>
    tpu.vector_store %arg6[%c0_41, %c1, %c1_42, %c0_43], %16 {strides = array<i32>} : memref<1x18x18x4xbf16, #tpu.memory_space<vmem>>, vector<1x16x16x4xbf16>,
    %c0_44 = arith.constant 0 : index
    %c0_45 = arith.constant 0 : index
    %c0_46 = arith.constant 0 : index
    %c0_47 = arith.constant 0 : index
    %18 = vector.load %arg6[%c0_44, %c0_45, %c0_46, %c0_47] : memref<1x18x18x4xbf16, #tpu.memory_space<vmem>>, vector<1x16x16x4xbf16>
    %19 = vector.shape_cast %18 : vector<1x16x16x4xbf16> to vector<256x4xbf16>
    %c0_48 = arith.constant 0 : index
    %c0_49 = arith.constant 0 : index
    %c0_50 = arith.constant 0 : index
    %20 = vector.load %arg2[%c0_48, %c0_49, %c0_50] : memref<9x4x4xbf16, #tpu.memory_space<vmem>>, vector<1x4x4xbf16>
    %21 = vector.shape_cast %20 : vector<1x4x4xbf16> to vector<4x4xbf16>
    %cst_51 = arith.constant dense<0.000000e+00> : vector<256x4xf32>
    %22 = tpu.matmul %19, %21, %cst_51 {dimension_numbers = #tpu.dot_dimension_numbers<[1], [0], [0], [1], [0, 0, 1, 1], [], []>} : vector<256x4xbf16>, vector<4x4xbf16>, vector<256x4xf32> -> vector<256x4xf32>
    %c0_52 = arith.constant 0 : index
    %c0_53 = arith.constant 0 : index
    %c1_54 = arith.constant 1 : index
    %c0_55 = arith.constant 0 : index
    %23 = vector.load %arg6[%c0_52, %c0_53, %c1_54, %c0_55] : memref<1x18x18x4xbf16, #tpu.memory_space<vmem>>, vector<1x16x16x4xbf16>
    %24 = vector.shape_cast %23 : vector<1x16x16x4xbf16> to vector<256x4xbf16>
    %c1_56 = arith.constant 1 : index
    %c0_57 = arith.constant 0 : index
    %c0_58 = arith.constant 0 : index
    %25 = vector.load %arg2[%c1_56, %c0_57, %c0_58] : memref<9x4x4xbf16, #tpu.memory_space<vmem>>, vector<1x4x4xbf16>
    %26 = vector.shape_cast %25 : vector<1x4x4xbf16> to vector<4x4xbf16>
    %cst_59 = arith.constant dense<0.000000e+00> : vector<256x4xf32>
    %27 = tpu.matmul %24, %26, %cst_59 {dimension_numbers = #tpu.dot_dimension_numbers<[1], [0], [0], [1], [0, 0, 1, 1], [], []>} : vector<256x4xbf16>, vector<4x4xbf16>, vector<256x4xf32> -> vector<256x4xf32>
    %28 = arith.addf %22, %27 : vector<256x4xf32>
    %c0_60 = arith.constant 0 : index
    %c0_61 = arith.constant 0 : index
    %c2 = arith.constant 2 : index
    %c0_62 = arith.constant 0 : index
    %29 = vector.load %arg6[%c0_60, %c0_61, %c2, %c0_62] : memref<1x18x18x4xbf16, #tpu.memory_space<vmem>>, vector<1x16x16x4xbf16>
    %30 = vector.shape_cast %29 : vector<1x16x16x4xbf16> to vector<256x4xbf16>
    %c2_63 = arith.constant 2 : index
    %c0_64 = arith.constant 0 : index
    %c0_65 = arith.constant 0 : index
    %31 = vector.load %arg2[%c2_63, %c0_64, %c0_65] : memref<9x4x4xbf16, #tpu.memory_space<vmem>>, vector<1x4x4xbf16>
    %32 = vector.shape_cast %31 : vector<1x4x4xbf16> to vector<4x4xbf16>
    %cst_66 = arith.constant dense<0.000000e+00> : vector<256x4xf32>
    %33 = tpu.matmul %30, %32, %cst_66 {dimension_numbers = #tpu.dot_dimension_numbers<[1], [0], [0], [1], [0, 0, 1, 1], [], []>} : vector<256x4xbf16>, vector<4x4xbf16>, vector<256x4xf32> -> vector<256x4xf32>
    %34 = arith.addf %28, %33 : vector<256x4xf32>
    %c0_67 = arith.constant 0 : index
    %c1_68 = arith.constant 1 : index
    %c0_69 = arith.constant 0 : index
    %c0_70 = arith.constant 0 : index
    %35 = vector.load %arg6[%c0_67, %c1_68, %c0_69, %c0_70] : memref<1x18x18x4xbf16, #tpu.memory_space<vmem>>, vector<1x16x16x4xbf16>
    %36 = vector.shape_cast %35 : vector<1x16x16x4xbf16> to vector<256x4xbf16>
    %c3 = arith.constant 3 : index
    %c0_71 = arith.constant 0 : index
    %c0_72 = arith.constant 0 : index
    %37 = vector.load %arg2[%c3, %c0_71, %c0_72] : memref<9x4x4xbf16, #tpu.memory_space<vmem>>, vector<1x4x4xbf16>
    %38 = vector.shape_cast %37 : vector<1x4x4xbf16> to vector<4x4xbf16>
    %cst_73 = arith.constant dense<0.000000e+00> : vector<256x4xf32>
    %39 = tpu.matmul %36, %38, %cst_73 {dimension_numbers = #tpu.dot_dimension_numbers<[1], [0], [0], [1], [0, 0, 1, 1], [], []>} : vector<256x4xbf16>, vector<4x4xbf16>, vector<256x4xf32> -> vector<256x4xf32>
    %40 = arith.addf %34, %39 : vector<256x4xf32>
    %c0_74 = arith.constant 0 : index
    %c1_75 = arith.constant 1 : index
    %c1_76 = arith.constant 1 : index
    %c0_77 = arith.constant 0 : index
    %41 = vector.load %arg6[%c0_74, %c1_75, %c1_76, %c0_77] : memref<1x18x18x4xbf16, #tpu.memory_space<vmem>>, vector<1x16x16x4xbf16>
    %42 = vector.shape_cast %41 : vector<1x16x16x4xbf16> to vector<256x4xbf16>
    %c4 = arith.constant 4 : index
    %c0_78 = arith.constant 0 : index
    %c0_79 = arith.constant 0 : index
    %43 = vector.load %arg2[%c4, %c0_78, %c0_79] : memref<9x4x4xbf16, #tpu.memory_space<vmem>>, vector<1x4x4xbf16>
    %44 = vector.shape_cast %43 : vector<1x4x4xbf16> to vector<4x4xbf16>
    %cst_80 = arith.constant dense<0.000000e+00> : vector<256x4xf32>
    %45 = tpu.matmul %42, %44, %cst_80 {dimension_numbers = #tpu.dot_dimension_numbers<[1], [0], [0], [1], [0, 0, 1, 1], [], []>} : vector<256x4xbf16>, vector<4x4xbf16>, vector<256x4xf32> -> vector<256x4xf32>
    %46 = arith.addf %40, %45 : vector<256x4xf32>
    %c0_81 = arith.constant 0 : index
    %c1_82 = arith.constant 1 : index
    %c2_83 = arith.constant 2 : index
    %c0_84 = arith.constant 0 : index
    %47 = vector.load %arg6[%c0_81, %c1_82, %c2_83, %c0_84] : memref<1x18x18x4xbf16, #tpu.memory_space<vmem>>, vector<1x16x16x4xbf16>
    %48 = vector.shape_cast %47 : vector<1x16x16x4xbf16> to vector<256x4xbf16>
    %c5 = arith.constant 5 : index
    %c0_85 = arith.constant 0 : index
    %c0_86 = arith.constant 0 : index
    %49 = vector.load %arg2[%c5, %c0_85, %c0_86] : memref<9x4x4xbf16, #tpu.memory_space<vmem>>, vector<1x4x4xbf16>
    %50 = vector.shape_cast %49 : vector<1x4x4xbf16> to vector<4x4xbf16>
    %cst_87 = arith.constant dense<0.000000e+00> : vector<256x4xf32>
    %51 = tpu.matmul %48, %50, %cst_87 {dimension_numbers = #tpu.dot_dimension_numbers<[1], [0], [0], [1], [0, 0, 1, 1], [], []>} : vector<256x4xbf16>, vector<4x4xbf16>, vector<256x4xf32> -> vector<256x4xf32>
    %52 = arith.addf %46, %51 : vector<256x4xf32>
    %c0_88 = arith.constant 0 : index
    %c2_89 = arith.constant 2 : index
    %c0_90 = arith.constant 0 : index
    %c0_91 = arith.constant 0 : index
    %53 = vector.load %arg6[%c0_88, %c2_89, %c0_90, %c0_91] : memref<1x18x18x4xbf16, #tpu.memory_space<vmem>>, vector<1x16x16x4xbf16>
    %54 = vector.shape_cast %53 : vector<1x16x16x4xbf16> to vector<256x4xbf16>
    %c6 = arith.constant 6 : index
    %c0_92 = arith.constant 0 : index
    %c0_93 = arith.constant 0 : index
    %55 = vector.load %arg2[%c6, %c0_92, %c0_93] : memref<9x4x4xbf16, #tpu.memory_space<vmem>>, vector<1x4x4xbf16>
    %56 = vector.shape_cast %55 : vector<1x4x4xbf16> to vector<4x4xbf16>
    %cst_94 = arith.constant dense<0.000000e+00> : vector<256x4xf32>
    %57 = tpu.matmul %54, %56, %cst_94 {dimension_numbers = #tpu.dot_dimension_numbers<[1], [0], [0], [1], [0, 0, 1, 1], [], []>} : vector<256x4xbf16>, vector<4x4xbf16>, vector<256x4xf32> -> vector<256x4xf32>
    %58 = arith.addf %52, %57 : vector<256x4xf32>
    %c0_95 = arith.constant 0 : index
    %c2_96 = arith.constant 2 : index
    %c1_97 = arith.constant 1 : index
    %c0_98 = arith.constant 0 : index
    %59 = vector.load %arg6[%c0_95, %c2_96, %c1_97, %c0_98] : memref<1x18x18x4xbf16, #tpu.memory_space<vmem>>, vector<1x16x16x4xbf16>
    %60 = vector.shape_cast %59 : vector<1x16x16x4xbf16> to vector<256x4xbf16>
    %c7 = arith.constant 7 : index
    %c0_99 = arith.constant 0 : index
    %c0_100 = arith.constant 0 : index
    %61 = vector.load %arg2[%c7, %c0_99, %c0_100] : memref<9x4x4xbf16, #tpu.memory_space<vmem>>, vector<1x4x4xbf16>
    %62 = vector.shape_cast %61 : vector<1x4x4xbf16> to vector<4x4xbf16>
    %cst_101 = arith.constant dense<0.000000e+00> : vector<256x4xf32>
    %63 = tpu.matmul %60, %62, %cst_101 {dimension_numbers = #tpu.dot_dimension_numbers<[1], [0], [0], [1], [0, 0, 1, 1], [], []>} : vector<256x4xbf16>, vector<4x4xbf16>, vector<256x4xf32> -> vector<256x4xf32>
    %64 = arith.addf %58, %63 : vector<256x4xf32>
    %c0_102 = arith.constant 0 : index
    %c2_103 = arith.constant 2 : index
    %c2_104 = arith.constant 2 : index
    %c0_105 = arith.constant 0 : index
    %65 = vector.load %arg6[%c0_102, %c2_103, %c2_104, %c0_105] : memref<1x18x18x4xbf16, #tpu.memory_space<vmem>>, vector<1x16x16x4xbf16>
    %66 = vector.shape_cast %65 : vector<1x16x16x4xbf16> to vector<256x4xbf16>
    %c8 = arith.constant 8 : index
    %c0_106 = arith.constant 0 : index
    %c0_107 = arith.constant 0 : index
    %67 = vector.load %arg2[%c8, %c0_106, %c0_107] : memref<9x4x4xbf16, #tpu.memory_space<vmem>>, vector<1x4x4xbf16>
    %68 = vector.shape_cast %67 : vector<1x4x4xbf16> to vector<4x4xbf16>
    %cst_108 = arith.constant dense<0.000000e+00> : vector<256x4xf32>
    %69 = tpu.matmul %66, %68, %cst_108 {dimension_numbers = #tpu.dot_dimension_numbers<[1], [0], [0], [1], [0, 0, 1, 1], [], []>} : vector<256x4xbf16>, vector<4x4xbf16>, vector<256x4xf32> -> vector<256x4xf32>
    %70 = arith.addf %64, %69 : vector<256x4xf32>
    %c0_109 = arith.constant 0 : index
    %c0_110 = arith.constant 0 : index
    %71 = vector.load %arg4[%c0_109, %c0_110] : memref<4x4xf32, #tpu.memory_space<vmem>>, vector<1x4xf32>
    %72 = vector.broadcast %71 : vector<1x4xf32> to vector<256x4xf32>
    %73 = arith.mulf %70, %72 : vector<256x4xf32>
    %c1_111 = arith.constant 1 : index
    %c0_112 = arith.constant 0 : index
    %74 = vector.load %arg4[%c1_111, %c0_112] : memref<4x4xf32, #tpu.memory_space<vmem>>, vector<1x4xf32>
    %75 = vector.broadcast %74 : vector<1x4xf32> to vector<256x4xf32>
    %76 = arith.addf %73, %75 : vector<256x4xf32>
    %cst_113 = arith.constant 0.000000e+00 : f32
    %77 = vector.broadcast %cst_113 : f32 to vector<256x4xf32>
    %78 = arith.maximumf %76, %77 : vector<256x4xf32>
    %79 = arith.truncf %78 : vector<256x4xf32> to vector<256x4xbf16>
    %80 = vector.shape_cast %79 : vector<256x4xbf16> to vector<1x16x16x4xbf16>
    %c0_114 = arith.constant 0 : index
    %c1_115 = arith.constant 1 : index
    %c1_116 = arith.constant 1 : index
    %c0_117 = arith.constant 0 : index
    %81 = vector.load %arg7[%c0_114, %c1_115, %c1_116, %c0_117] : memref<1x18x18x4xbf16, #tpu.memory_space<vmem>>, vector<1x16x16x4xbf16>
    tpu.vector_store %arg7[%c0_114, %c1_115, %c1_116, %c0_117], %80 {strides = array<i32>} : memref<1x18x18x4xbf16, #tpu.memory_space<vmem>>, vector<1x16x16x4xbf16>,
    %c0_118 = arith.constant 0 : index
    %c0_119 = arith.constant 0 : index
    %c0_120 = arith.constant 0 : index
    %c0_121 = arith.constant 0 : index
    %82 = vector.load %arg7[%c0_118, %c0_119, %c0_120, %c0_121] : memref<1x18x18x4xbf16, #tpu.memory_space<vmem>>, vector<1x16x16x4xbf16>
    %83 = vector.shape_cast %82 : vector<1x16x16x4xbf16> to vector<256x4xbf16>
    %c0_122 = arith.constant 0 : index
    %c0_123 = arith.constant 0 : index
    %c0_124 = arith.constant 0 : index
    %84 = vector.load %arg3[%c0_122, %c0_123, %c0_124] : memref<9x4x4xbf16, #tpu.memory_space<vmem>>, vector<1x4x4xbf16>
    %85 = vector.shape_cast %84 : vector<1x4x4xbf16> to vector<4x4xbf16>
    %cst_125 = arith.constant dense<0.000000e+00> : vector<256x4xf32>
    %86 = tpu.matmul %83, %85, %cst_125 {dimension_numbers = #tpu.dot_dimension_numbers<[1], [0], [0], [1], [0, 0, 1, 1], [], []>} : vector<256x4xbf16>, vector<4x4xbf16>, vector<256x4xf32> -> vector<256x4xf32>
    %c0_126 = arith.constant 0 : index
    %c0_127 = arith.constant 0 : index
    %c1_128 = arith.constant 1 : index
    %c0_129 = arith.constant 0 : index
    %87 = vector.load %arg7[%c0_126, %c0_127, %c1_128, %c0_129] : memref<1x18x18x4xbf16, #tpu.memory_space<vmem>>, vector<1x16x16x4xbf16>
    %88 = vector.shape_cast %87 : vector<1x16x16x4xbf16> to vector<256x4xbf16>
    %c1_130 = arith.constant 1 : index
    %c0_131 = arith.constant 0 : index
    %c0_132 = arith.constant 0 : index
    %89 = vector.load %arg3[%c1_130, %c0_131, %c0_132] : memref<9x4x4xbf16, #tpu.memory_space<vmem>>, vector<1x4x4xbf16>
    %90 = vector.shape_cast %89 : vector<1x4x4xbf16> to vector<4x4xbf16>
    %cst_133 = arith.constant dense<0.000000e+00> : vector<256x4xf32>
    %91 = tpu.matmul %88, %90, %cst_133 {dimension_numbers = #tpu.dot_dimension_numbers<[1], [0], [0], [1], [0, 0, 1, 1], [], []>} : vector<256x4xbf16>, vector<4x4xbf16>, vector<256x4xf32> -> vector<256x4xf32>
    %92 = arith.addf %86, %91 : vector<256x4xf32>
    %c0_134 = arith.constant 0 : index
    %c0_135 = arith.constant 0 : index
    %c2_136 = arith.constant 2 : index
    %c0_137 = arith.constant 0 : index
    %93 = vector.load %arg7[%c0_134, %c0_135, %c2_136, %c0_137] : memref<1x18x18x4xbf16, #tpu.memory_space<vmem>>, vector<1x16x16x4xbf16>
    %94 = vector.shape_cast %93 : vector<1x16x16x4xbf16> to vector<256x4xbf16>
    %c2_138 = arith.constant 2 : index
    %c0_139 = arith.constant 0 : index
    %c0_140 = arith.constant 0 : index
    %95 = vector.load %arg3[%c2_138, %c0_139, %c0_140] : memref<9x4x4xbf16, #tpu.memory_space<vmem>>, vector<1x4x4xbf16>
    %96 = vector.shape_cast %95 : vector<1x4x4xbf16> to vector<4x4xbf16>
    %cst_141 = arith.constant dense<0.000000e+00> : vector<256x4xf32>
    %97 = tpu.matmul %94, %96, %cst_141 {dimension_numbers = #tpu.dot_dimension_numbers<[1], [0], [0], [1], [0, 0, 1, 1], [], []>} : vector<256x4xbf16>, vector<4x4xbf16>, vector<256x4xf32> -> vector<256x4xf32>
    %98 = arith.addf %92, %97 : vector<256x4xf32>
    %c0_142 = arith.constant 0 : index
    %c1_143 = arith.constant 1 : index
    %c0_144 = arith.constant 0 : index
    %c0_145 = arith.constant 0 : index
    %99 = vector.load %arg7[%c0_142, %c1_143, %c0_144, %c0_145] : memref<1x18x18x4xbf16, #tpu.memory_space<vmem>>, vector<1x16x16x4xbf16>
    %100 = vector.shape_cast %99 : vector<1x16x16x4xbf16> to vector<256x4xbf16>
    %c3_146 = arith.constant 3 : index
    %c0_147 = arith.constant 0 : index
    %c0_148 = arith.constant 0 : index
    %101 = vector.load %arg3[%c3_146, %c0_147, %c0_148] : memref<9x4x4xbf16, #tpu.memory_space<vmem>>, vector<1x4x4xbf16>
    %102 = vector.shape_cast %101 : vector<1x4x4xbf16> to vector<4x4xbf16>
    %cst_149 = arith.constant dense<0.000000e+00> : vector<256x4xf32>
    %103 = tpu.matmul %100, %102, %cst_149 {dimension_numbers = #tpu.dot_dimension_numbers<[1], [0], [0], [1], [0, 0, 1, 1], [], []>} : vector<256x4xbf16>, vector<4x4xbf16>, vector<256x4xf32> -> vector<256x4xf32>
    %104 = arith.addf %98, %103 : vector<256x4xf32>
    %c0_150 = arith.constant 0 : index
    %c1_151 = arith.constant 1 : index
    %c1_152 = arith.constant 1 : index
    %c0_153 = arith.constant 0 : index
    %105 = vector.load %arg7[%c0_150, %c1_151, %c1_152, %c0_153] : memref<1x18x18x4xbf16, #tpu.memory_space<vmem>>, vector<1x16x16x4xbf16>
    %106 = vector.shape_cast %105 : vector<1x16x16x4xbf16> to vector<256x4xbf16>
    %c4_154 = arith.constant 4 : index
    %c0_155 = arith.constant 0 : index
    %c0_156 = arith.constant 0 : index
    %107 = vector.load %arg3[%c4_154, %c0_155, %c0_156] : memref<9x4x4xbf16, #tpu.memory_space<vmem>>, vector<1x4x4xbf16>
    %108 = vector.shape_cast %107 : vector<1x4x4xbf16> to vector<4x4xbf16>
    %cst_157 = arith.constant dense<0.000000e+00> : vector<256x4xf32>
    %109 = tpu.matmul %106, %108, %cst_157 {dimension_numbers = #tpu.dot_dimension_numbers<[1], [0], [0], [1], [0, 0, 1, 1], [], []>} : vector<256x4xbf16>, vector<4x4xbf16>, vector<256x4xf32> -> vector<256x4xf32>
    %110 = arith.addf %104, %109 : vector<256x4xf32>
    %c0_158 = arith.constant 0 : index
    %c1_159 = arith.constant 1 : index
    %c2_160 = arith.constant 2 : index
    %c0_161 = arith.constant 0 : index
    %111 = vector.load %arg7[%c0_158, %c1_159, %c2_160, %c0_161] : memref<1x18x18x4xbf16, #tpu.memory_space<vmem>>, vector<1x16x16x4xbf16>
    %112 = vector.shape_cast %111 : vector<1x16x16x4xbf16> to vector<256x4xbf16>
    %c5_162 = arith.constant 5 : index
    %c0_163 = arith.constant 0 : index
    %c0_164 = arith.constant 0 : index
    %113 = vector.load %arg3[%c5_162, %c0_163, %c0_164] : memref<9x4x4xbf16, #tpu.memory_space<vmem>>, vector<1x4x4xbf16>
    %114 = vector.shape_cast %113 : vector<1x4x4xbf16> to vector<4x4xbf16>
    %cst_165 = arith.constant dense<0.000000e+00> : vector<256x4xf32>
    %115 = tpu.matmul %112, %114, %cst_165 {dimension_numbers = #tpu.dot_dimension_numbers<[1], [0], [0], [1], [0, 0, 1, 1], [], []>} : vector<256x4xbf16>, vector<4x4xbf16>, vector<256x4xf32> -> vector<256x4xf32>
    %116 = arith.addf %110, %115 : vector<256x4xf32>
    %c0_166 = arith.constant 0 : index
    %c2_167 = arith.constant 2 : index
    %c0_168 = arith.constant 0 : index
    %c0_169 = arith.constant 0 : index
    %117 = vector.load %arg7[%c0_166, %c2_167, %c0_168, %c0_169] : memref<1x18x18x4xbf16, #tpu.memory_space<vmem>>, vector<1x16x16x4xbf16>
    %118 = vector.shape_cast %117 : vector<1x16x16x4xbf16> to vector<256x4xbf16>
    %c6_170 = arith.constant 6 : index
    %c0_171 = arith.constant 0 : index
    %c0_172 = arith.constant 0 : index
    %119 = vector.load %arg3[%c6_170, %c0_171, %c0_172] : memref<9x4x4xbf16, #tpu.memory_space<vmem>>, vector<1x4x4xbf16>
    %120 = vector.shape_cast %119 : vector<1x4x4xbf16> to vector<4x4xbf16>
    %cst_173 = arith.constant dense<0.000000e+00> : vector<256x4xf32>
    %121 = tpu.matmul %118, %120, %cst_173 {dimension_numbers = #tpu.dot_dimension_numbers<[1], [0], [0], [1], [0, 0, 1, 1], [], []>} : vector<256x4xbf16>, vector<4x4xbf16>, vector<256x4xf32> -> vector<256x4xf32>
    %122 = arith.addf %116, %121 : vector<256x4xf32>
    %c0_174 = arith.constant 0 : index
    %c2_175 = arith.constant 2 : index
    %c1_176 = arith.constant 1 : index
    %c0_177 = arith.constant 0 : index
    %123 = vector.load %arg7[%c0_174, %c2_175, %c1_176, %c0_177] : memref<1x18x18x4xbf16, #tpu.memory_space<vmem>>, vector<1x16x16x4xbf16>
    %124 = vector.shape_cast %123 : vector<1x16x16x4xbf16> to vector<256x4xbf16>
    %c7_178 = arith.constant 7 : index
    %c0_179 = arith.constant 0 : index
    %c0_180 = arith.constant 0 : index
    %125 = vector.load %arg3[%c7_178, %c0_179, %c0_180] : memref<9x4x4xbf16, #tpu.memory_space<vmem>>, vector<1x4x4xbf16>
    %126 = vector.shape_cast %125 : vector<1x4x4xbf16> to vector<4x4xbf16>
    %cst_181 = arith.constant dense<0.000000e+00> : vector<256x4xf32>
    %127 = tpu.matmul %124, %126, %cst_181 {dimension_numbers = #tpu.dot_dimension_numbers<[1], [0], [0], [1], [0, 0, 1, 1], [], []>} : vector<256x4xbf16>, vector<4x4xbf16>, vector<256x4xf32> -> vector<256x4xf32>
    %128 = arith.addf %122, %127 : vector<256x4xf32>
    %c0_182 = arith.constant 0 : index
    %c2_183 = arith.constant 2 : index
    %c2_184 = arith.constant 2 : index
    %c0_185 = arith.constant 0 : index
    %129 = vector.load %arg7[%c0_182, %c2_183, %c2_184, %c0_185] : memref<1x18x18x4xbf16, #tpu.memory_space<vmem>>, vector<1x16x16x4xbf16>
    %130 = vector.shape_cast %129 : vector<1x16x16x4xbf16> to vector<256x4xbf16>
    %c8_186 = arith.constant 8 : index
    %c0_187 = arith.constant 0 : index
    %c0_188 = arith.constant 0 : index
    %131 = vector.load %arg3[%c8_186, %c0_187, %c0_188] : memref<9x4x4xbf16, #tpu.memory_space<vmem>>, vector<1x4x4xbf16>
    %132 = vector.shape_cast %131 : vector<1x4x4xbf16> to vector<4x4xbf16>
    %cst_189 = arith.constant dense<0.000000e+00> : vector<256x4xf32>
    %133 = tpu.matmul %130, %132, %cst_189 {dimension_numbers = #tpu.dot_dimension_numbers<[1], [0], [0], [1], [0, 0, 1, 1], [], []>} : vector<256x4xbf16>, vector<4x4xbf16>, vector<256x4xf32> -> vector<256x4xf32>
    %134 = arith.addf %128, %133 : vector<256x4xf32>
    %c2_190 = arith.constant 2 : index
    %c0_191 = arith.constant 0 : index
    %135 = vector.load %arg4[%c2_190, %c0_191] : memref<4x4xf32, #tpu.memory_space<vmem>>, vector<1x4xf32>
    %136 = vector.broadcast %135 : vector<1x4xf32> to vector<256x4xf32>
    %137 = arith.mulf %134, %136 : vector<256x4xf32>
    %c3_192 = arith.constant 3 : index
    %c0_193 = arith.constant 0 : index
    %138 = vector.load %arg4[%c3_192, %c0_193] : memref<4x4xf32, #tpu.memory_space<vmem>>, vector<1x4xf32>
    %139 = vector.broadcast %138 : vector<1x4xf32> to vector<256x4xf32>
    %140 = arith.addf %137, %139 : vector<256x4xf32>
    %141 = arith.extf %42 : vector<256x4xbf16> to vector<256x4xf32>
    %142 = arith.addf %140, %141 : vector<256x4xf32>
    %cst_194 = arith.constant 0.000000e+00 : f32
    %143 = vector.broadcast %cst_194 : f32 to vector<256x4xf32>
    %144 = arith.maximumf %142, %143 : vector<256x4xf32>
    %145 = vector.shape_cast %144 : vector<256x4xf32> to vector<1x16x16x4xf32>
    %146 = arith.truncf %145 : vector<1x16x16x4xf32> to vector<1x16x16x4xbf16>
    %c0_195 = arith.constant 0 : index
    %c0_196 = arith.constant 0 : index
    %c0_197 = arith.constant 0 : index
    %c0_198 = arith.constant 0 : index
    %147 = vector.load %arg5[%c0_195, %c0_196, %c0_197, %c0_198] : memref<1x16x16x4xbf16, #tpu.memory_space<vmem>>, vector<1x16x16x4xbf16>
    tpu.vector_store %arg5[%c0_195, %c0_196, %c0_197, %c0_198], %146 {strides = array<i32>} : memref<1x16x16x4xbf16, #tpu.memory_space<vmem>>, vector<1x16x16x4xbf16>,
    return
  }
  func.func @transform_0(%arg0: i32) -> (i32, i32, i32, i32) {
    %c0_i32 = arith.constant 0 : i32
    %c0_i32_0 = arith.constant 0 : i32
    %c0_i32_1 = arith.constant 0 : i32
    %c0_i32_2 = arith.constant 0 : i32
    return %arg0, %c0_i32, %c0_i32_0, %c0_i32_1 : i32, i32, i32, i32
  }
  func.func @transform_1(%arg0: i32) -> (i32, i32, i32) {
    %c0_i32 = arith.constant 0 : i32
    %c0_i32_0 = arith.constant 0 : i32
    %c0_i32_1 = arith.constant 0 : i32
    %c0_i32_2 = arith.constant 0 : i32
    return %c0_i32, %c0_i32_0, %c0_i32_1 : i32, i32, i32
  }
  func.func @transform_2(%arg0: i32) -> (i32, i32, i32) {
    %c0_i32 = arith.constant 0 : i32
    %c0_i32_0 = arith.constant 0 : i32
    %c0_i32_1 = arith.constant 0 : i32
    %c0_i32_2 = arith.constant 0 : i32
    return %c0_i32, %c0_i32_0, %c0_i32_1 : i32, i32, i32
  }
  func.func @transform_3(%arg0: i32) -> (i32, i32) {
    %c0_i32 = arith.constant 0 : i32
    %c0_i32_0 = arith.constant 0 : i32
    %c0_i32_1 = arith.constant 0 : i32
    return %c0_i32, %c0_i32_0 : i32, i32
  }
  func.func @transform_4(%arg0: i32) -> (i32, i32, i32, i32) {
    %c0_i32 = arith.constant 0 : i32
    %c0_i32_0 = arith.constant 0 : i32
    %c0_i32_1 = arith.constant 0 : i32
    %c0_i32_2 = arith.constant 0 : i32
    return %arg0, %c0_i32, %c0_i32_0, %c0_i32_1 : i32, i32, i32, i32
  }
}

</mosaic_0001>

<bundles_post_ra>
// kernel: basic_block_forward.1
= control target key start
LH: loop header
LB: loop body
LE: loop exit
PB: predicated region body
PF: predicated region fallthrough
CT: control target
= control target key end

     0   :  { %s10573_s15 = smov 0   ;;  %s14736_s0 = inlined_call_operand.vmem [shape: bf16[2,16,16,4], index: 0, kind: input, shape index: {}]   ;;  %s14737_s1 = inlined_call_operand.vmem [shape: bf16[9,4,4], index: 1, kind: input, shape index: {}]   ;;  %s14738_s2 = inlined_call_operand.vmem [shape: bf16[9,4,4], index: 2, kind: input, shape index: {}]   ;;  %s14739_s3 = inlined_call_operand.vmem [shape: f32[4,4], index: 3, kind: input, shape index: {}]   ;;  %s14740_s4 = inlined_call_operand.vmem [shape: bf16[2,16,16,4], index: 4, kind: output, shape index: {}]  }
   0x1 LB: > { %s9597_s16 = sadd.s32 4294967295, %s10545_s15   ;;  %p9601_p0 = scmp.ge.s32.totalorder %s10545_s15, 1  ;;  %s10545_s15 = sphi %s10573_s15, %s14_s15  }
   0x2   : > { %p162_p1 = scmp.lt.s32.totalorder %s10545_s15, 3 }
   0x4   : > { %p163_p2 = pnand %p9601_p0, %p162_p1 }
   0x6   : > { %166 = sbr.rel (%p163_p2) target bundleno = 1525 (0x5f5), region = 36 }
   0xb   : > { %v937_v0 = vld [vmem:[%s14737_s1] sm:$0x3]  ;;  %vm1440_vm0 = vcmask 1041408   ;;  %p188_p3 = scmp.lt.s32.totalorder %s9597_s16, 1  ;;  %vm199_vm1 = vcmask 27648   ;;  %vm202_vm2 = vcmask 24576  }
   0xc   : > { %v1662_v1 = vsel %vm1440_vm0, %v937_v0, 0  ;;  %vm209_vm3 = vsmask.f32 256  ;;  %v235_v2 = vld [vmem:[#allocation2 + $0x60] sm:$0x1]  ;;  %v14776_v3 = vmov 0 }
   0xd   : > { %10491 = vmatpush.bf16.msra.mxu3 %v1662_v1  ;;  %s15076_s16 = smov (!%p188_p3, %s9597_s16), 1  ;;  %vm10589_vm4 = vmand %vm202_vm2, %vm209_vm3  ;;  %1671 = vmatpush.bf16.msra.mxu1 %v1662_v1  ;;  %v9606_v5 = vld [vmem:[%s14737_s1 + $0x2] sm:$0x3]  ;;  %v10547_v6 = vmov 0   ;;  %vm468_vm5 = vsmask.f32 4368 }
   0xe   : > { %v14777_v3 = vsel %vm10589_vm4, 4294967295, %v14776_v3  ;;  %v236_v4 = vsel %vm10589_vm4, 0, %v235_v2  ;;  %200 = vst.msk [vmem:[#allocation2] sm:$0xf] %vm199_vm1, %v10547_v6  ;;  %s10392_s21 = sshll.u32 %s15076_s16, 7  ;;  %v1442_v7 = vsel %vm1440_vm0, %v9606_v5, 0  ;;  %vm10620_vm7 = vmor %vm209_vm3, %vm468_vm5 }
   0xf   : > { %14778 = vst [vmem:[#allocation4_spill] sm:$0xff] %v14777_v3  ;;  %s10607_s24 = scalar_lea.vmem %s14736_s0, %s10392_s21  ;;  %1451 = vmatpush.bf16.msra.mxu0 %v1442_v7  ;;  %10490 = vmatpush.bf16.msra.mxu2 %v1442_v7  ;;  %vm265_vm6 = vsmask.f32 7938  ;;  %v291_v26 = vld [vmem:[#allocation2 + $0x68] sm:$0x1]  ;;  %v14783_v28 = vmov 0  ;;  %s14437_s29 = scalar_lea.vmem %s14740_s4, %s10392_s21 }
  0x10   : > { %237 = vst [vmem:[#allocation2 + $0x60] sm:$0x1] %v236_v4  ;;  %v450_v8 = vld [vmem:[%s10607_s24 + $0x38] sm:$0xf]  ;;  %v451_v9 = vld [vmem:[%s10607_s24 + $0x3c] sm:$0xf]  ;;  %vm10630_vm8 = vmand %vm199_vm1, %vm265_vm6 }
  0x11   : > { %201 = vst.msk [vmem:[#allocation2 + $0x4] sm:$0xf] %vm199_vm1, %v10547_v6  ;;  %v590_v10 = vshrl.u32 %v450_v8, 16  ;;  %v593_v11 = vshll.u32 %v450_v8, 16  ;;  %v598_v12 = vshrl.u32 %v451_v9, 16  ;;  %v601_v13 = vshll.u32 %v451_v9, 16  ;;  %vm10649_vm9 = vmand %vm202_vm2, %vm265_vm6 }
  0x12   : > { %203 = vst.msk [vmem:[#allocation2 + $0x8] sm:$0x1] %vm202_vm2, %v10547_v6  ;;  %v10637_v19 = vld [vmem:[%s10607_s24 + $0x40] sm:$0xf]  ;;  %v14784_v28 = vsel %vm10649_vm9, 4294967295, %v14783_v28  ;;  %vm1391_vm10 = vcmask 31744  }
  0x13   : > { %205 = vst.msk [vmem:[#allocation2 + $0xcc] sm:$0xf] %vm199_vm1, %v10547_v6  ;;  %v592_v15 = vrot.slane %v590_v10, 7  ;;  %v10624_v16 = vrot.slane %v598_v12, 7  ;;  %v607_v27 = vshrl.u32 %v10637_v19, 16  ;;  %v292_v43 = vsel %vm10649_vm9, 0, %v291_v26 }
  0x14   : > { %206 = vst.msk [vmem:[#allocation2 + $0xd0] sm:$0xf] %vm199_vm1, %v10547_v6  ;;  %v238_v34 = vld [vmem:[#allocation2 + $0x6c] sm:$0x1]  ;;  %vm954_vm11 = vsmask.f32 3328 }
  0x15   : > { %207 = vst.msk [vmem:[#allocation2 + $0xd4] sm:$0x1] %vm202_vm2, %v10547_v6  ;;  %v211_v18 = vld [vmem:[#allocation2] sm:$0x1]  ;;  %v595_v20 = vor.u32 %v593_v11, %v592_v15  ;;  %v596_v21 = vrot.slane %v592_v15, 4  ;;  %v603_v22 = vor.u32 %v601_v13, %v10624_v16  ;;  %v609_v40 = vrot.slane %v607_v27, 7 }
  0x16   : > { %321 = vst.msk [vmem:[#allocation3] sm:$0xf] %vm199_vm1, %v10547_v6  ;;  %v212_v24 = vsel %vm10589_vm4, 0, %v211_v18  ;;  %v9719_v36 = vld [vmem:[%s14737_s1 + $0x4] sm:$0x3]  ;;  %v239_v46 = vsel %vm10589_vm4, 0, %v238_v34 }
  0x17   : > { %v842_v23 = vld [vmem:[#allocation2 + $0x60] sm:$0xf]  ;;  %322 = vst.msk [vmem:[#allocation3 + $0x4] sm:$0xf] %vm199_vm1, %v10547_v6  ;;  %v604_v29 = vsel %vm10620_vm7, %v596_v21, %v603_v22  ;;  %v2015_v39 = vsel %vm1440_vm0, %v9719_v36, 0  ;;  %v610_v50 = vshll.u32 %v10637_v19, 16 }
  0x18   : > { %v906_v25 = vld [vmem:[#allocation2 + $0x4] sm:$0xf]  ;;  %323 = vst.msk [vmem:[#allocation3 + $0x8] sm:$0x1] %vm202_vm2, %v10547_v6  ;;  %v843_v30 = vsel %vm10630_vm8, %v595_v20, %v842_v23  ;;  %2024 = vmatpush.bf16.msrb.mxu2 %v2015_v39  ;;  %v9817_v45 = vld [vmem:[%s14737_s1 + $0x8] sm:$0x3] }
  0x19   : > { %14785 = vst [vmem:[#allocation5_spill] sm:$0xff] %v14784_v28  ;;  %v267_v31 = vld [vmem:[#allocation2 + $0x8] sm:$0x1]  ;;  %v967_v32 = vshll.u32 %v906_v25, 16  ;;  %v971_v33 = vshrl.u32 %v906_v25, 16  ;;  %v2987_v49 = vsel %vm1440_vm0, %v9817_v45, 0  ;;  %v612_v18 = vor.u32 %v610_v50, %v609_v40 }
  0x1a   : > { %213 = vst [vmem:[#allocation2] sm:$0x1] %v212_v24  ;;  %v268_v35 = vsel %vm10649_vm9, 0, %v267_v31  ;;  %v9736_v41 = vld [vmem:[%s14737_s1 + $0x6] sm:$0x3]  ;;  %v613_v51 = vrot.slane %v609_v40, 4  ;;  %2996 = vmatpush.bf16.msrb.mxu0 %v2987_v49 }
  0x1b   : > { %844 = vst [vmem:[#allocation2 + $0x60] sm:$0xf] %v843_v30  ;;  %v10663_v37 = vrot.slane %v967_v32, 5  ;;  %v973_v38 = vrot.slane %v971_v33, 4  ;;  %v453_v42 = vld [vmem:[%s10607_s24 + $0x44] sm:$0xf] }
  0x1c   : > { %845 = vst.msk [vmem:[#allocation2 + $0x64] sm:$0xf] %vm199_vm1, %v604_v29  ;;  %v2301_v44 = vsel %vm1440_vm0, %v9736_v41, 0  ;;  %v615_v47 = vshrl.u32 %v453_v42, 16  ;;  %v618_v48 = vshll.u32 %v453_v42, 16  ;;  %v605_v60 = vrot.slane %v10624_v16, 4 }
  0x1d   : > { %269 = vst [vmem:[#allocation2 + $0x8] sm:$0x1] %v268_v35  ;;  %2310 = vmatpush.bf16.msrb.mxu3 %v2301_v44  ;;  %vm955_vm12 = vsmask.f32 7440  ;;  %v974_v53 = vor.u32 %v973_v38, %v10663_v37  ;;  %v214_v59 = vld [vmem:[#allocation2 + $0xc] sm:$0x1] }
  0x1e   : > { %325 = vst.msk [vmem:[#allocation3 + $0xcc] sm:$0xf] %vm199_vm1, %v10547_v6  ;;  %v10687_v55 = vrot.slane %v615_v47, 7  ;;  %v270_v12 = vld [vmem:[#allocation2 + $0x14] sm:$0x1]  ;;  %vm10695_vm13 = vmor %vm954_vm11, %vm955_vm12  ;;  %v215_v24 = vsel %vm10589_vm4, 0, %v214_v59 }
  0x1f   : > { %326 = vst.msk [vmem:[#allocation3 + $0xd0] sm:$0xf] %vm199_vm1, %v10547_v6  ;;  %v975_v8 = vrot.slane %v974_v53, 4  ;;  %v436_v20 = vld [vmem:[%s10607_s24] sm:$0xf]  ;;  %v271_v25 = vsel %vm10649_vm9, 0, %v270_v12 }
  0x20   : > { %327 = vst.msk [vmem:[#allocation3 + $0xd4] sm:$0x1] %vm202_vm2, %v10547_v6  ;;  %v620_v1 = vor.u32 %v618_v48, %v10687_v55  ;;  %v437_v21 = vld [vmem:[%s10607_s24 + $0x4] sm:$0xf]  ;;  %v471_v30 = vshrl.u32 %v436_v20, 16  ;;  %v474_v34 = vshll.u32 %v436_v20, 16 }
  0x21   : > { %v905_v52 = vld [vmem:[#allocation2] sm:$0xf]  ;;  %293 = vst [vmem:[#allocation2 + $0x68] sm:$0x1] %v292_v43  ;;  %v294_v39 = vld [vmem:[#allocation2 + $0x74] sm:$0x1] }
  0x22   : > { %v10394_v54 = vld [vmem:[#allocation2] sm:$0xff]  ;;  %v958_v56 = vshrl.u32 %v905_v52, 16  ;;  %v961_v57 = vshll.u32 %v905_v52, 16  ;;  %240 = vst [vmem:[#allocation2 + $0x6c] sm:$0x1] %v239_v46  ;;  %v621_v19 = vsel %vm10620_vm7, %v613_v51, %v620_v1  ;;  %v473_v42 = vrot.slane %v471_v30, 7 }
  0x23   : > { %v921_v58 = vld [vmem:[#allocation2 + $0x60] sm:$0xf]  ;;  %v922_v62 = vld [vmem:[#allocation2 + $0x64] sm:$0xf]  ;;  %9687 = vmatmul.msk.bf16.vlgmr.msra.gmra.mxu1 %vm1391_vm10, %v10394_v54  ;;  %852 = vst.msk [vmem:[#allocation2 + $0x70] sm:$0xf] %vm199_vm1, %v621_v19 }
  0x24   : > { %v10402_v61 = vld [vmem:[#allocation2 + $0x60] sm:$0xff]  ;;  %v1150_v63 = vshrl.u32 %v921_v58, 16  ;;  %v1153_v0 = vshll.u32 %v921_v58, 16  ;;  %v938_v2 = vld [vmem:[#allocation2 + $0x8] sm:$0x1]  ;;  %v960_v4 = vrot.slane %v958_v56, 4  ;;  %v476_v50 = vor.u32 %v474_v34, %v473_v42 }
  0x25   : > { %v963_v5 = vrot.slane %v961_v57, 5  ;;  %v1159_v6 = vshll.u32 %v922_v62, 16  ;;  %v1163_v7 = vshrl.u32 %v922_v62, 16  ;;  %9695 = vmatmul.msk.bf16.vlgmr.msra.gmra.mxu3 %vm1391_vm10, %v10402_v61  ;;  %v977_v9 = vshll.u32 %v938_v2, 16  ;;  %216 = vst [vmem:[#allocation2 + $0xc] sm:$0x1] %v215_v24 }
  0x26   : > { %v1152_v10 = vrot.slane %v1150_v63, 4  ;;  %v1155_v11 = vrot.slane %v1153_v0, 5  ;;  %272 = vst [vmem:[#allocation2 + $0x14] sm:$0x1] %v271_v25  ;;  %v479_v43 = vshrl.u32 %v437_v21, 16  ;;  %v482_v46 = vshll.u32 %v437_v21, 16 }
  0x27   : > { %v964_v15 = vor.u32 %v963_v5, %v960_v4  ;;  %v10699_v16 = vrot.slane %v1159_v6, 5  ;;  %v979_v22 = vrot.slane %v977_v9, 5  ;;  %v1165_v23 = vrot.slane %v1163_v7, 4  ;;  %v241_v44 = vld [vmem:[#allocation2 + $0x78] sm:$0x1] }
  0x28   : > { %v846_v27 = vld [vmem:[#allocation2 + $0x68] sm:$0x1]  ;;  %v1156_v29 = vor.u32 %v1155_v11, %v1152_v10  ;;  %v295_v47 = vsel %vm10649_vm9, 0, %v294_v39  ;;  %v477_v51 = vrot.slane %v473_v42, 4  ;;  %v481_v52 = vrot.slane %v479_v43, 7 }
  0x29   : > { %v965_v26 = vrot.slane %v964_v15, 4  ;;  %v980_v31 = vsel %vm10695_vm13, %v975_v8, %v979_v22  ;;  %v847_v32 = vsel %vm10589_vm4, %v605_v60, %v846_v27  ;;  %v849_v33 = vld [vmem:[#allocation2 + $0x6c] sm:$0xf]  ;;  %v1166_v41 = vor.u32 %v1165_v23, %v10699_v16  ;;  %v454_v48 = vld [vmem:[%s10607_s24 + $0x48] sm:$0xf] }
  0x2a   : > { %v1344_v36 = vunpack.c.l.b16 %v980_v31  ;;  %848 = vst [vmem:[#allocation2 + $0x68] sm:$0x1] %v847_v32  ;;  %v850_v38 = vsel %vm10630_vm8, %v612_v18, %v849_v33  ;;  %v1157_v45 = vrot.slane %v1156_v29, 4  ;;  %v455_v53 = vld [vmem:[%s10607_s24 + $0x4c] sm:$0xf]  ;;  %v624_v56 = vshrl.u32 %v454_v48, 16 }
  0x2b   : > { %v970_v35 = vsel %vm10695_vm13, %v965_v26, %v10663_v37  ;;  %851 = vst [vmem:[#allocation2 + $0x6c] sm:$0xf] %v850_v38  ;;  %v242_v37 = vsel %vm10589_vm4, 0, %v241_v44  ;;  %v924_v54 = vld [vmem:[#allocation2 + $0x70] sm:$0xf]  ;;  %v627_v57 = vshll.u32 %v454_v48, 16  ;;  %v484_v59 = vor.u32 %v482_v46, %v481_v52 }
  0x2c   : > { %v1343_v40 = vunpack.c.l.b16 %v970_v35  ;;  %296 = vst [vmem:[#allocation2 + $0x74] sm:$0x1] %v295_v47  ;;  %v622_v58 = vrot.slane %v10687_v55, 4  ;;  %v486_v60 = vrot.slane %v481_v52, 4  ;;  %v793_v61 = vld [vmem:[#allocation2 + $0xc] sm:$0xf]  ;;  %v1162_v9 = vsel %vm10695_vm13, %v1157_v45, %v10699_v16 }
  0x2d   : > { %243 = vst [vmem:[#allocation2 + $0x78] sm:$0x1] %v242_v37  ;;  %v1183_v62 = vshll.u32 %v924_v54, 16  ;;  %v794_v63 = vsel %vm10630_vm8, %v476_v50, %v793_v61  ;;  %v797_v0 = vld [vmem:[#allocation2 + $0x14] sm:$0x1]  ;;  %v1187_v1 = vshrl.u32 %v924_v54, 16  ;;  %v485_v7 = vsel %vm10620_vm7, %v477_v51, %v484_v59 }
  0x2e   : > { %v1375_v49 = vpack.c.b16 %v1344_v36, %v1343_v40  ;;  %v626_v2 = vrot.slane %v624_v56, 7  ;;  %v632_v4 = vshrl.u32 %v455_v53, 16  ;;  %v1167_v6 = vrot.slane %v1166_v41, 4  ;;  %795 = vst [vmem:[#allocation2 + $0xc] sm:$0xf] %v794_v63 }
  0x2f   : > { %v798_v55 = vsel %vm10589_vm4, %v486_v60, %v797_v0  ;;  %v635_v8 = vshll.u32 %v455_v53, 16  ;;  %796 = vst.msk [vmem:[#allocation2 + $0x10] sm:$0xf] %vm199_vm1, %v485_v7  ;;  %v10738_v12 = vrot.slane %v1183_v62, 5  ;;  %v1189_v25 = vrot.slane %v1187_v1, 4 }
  0x30   : > { %9607 = vmatmul.msk.bf16.vlgmr.msra.gmra.mxu0 %vm1391_vm10, %v1375_v49  ;;  %v629_v15 = vor.u32 %v627_v57, %v626_v2  ;;  %799 = vst [vmem:[#allocation2 + $0x14] sm:$0x1] %v798_v55  ;;  %v630_v19 = vrot.slane %v626_v2, 4  ;;  %v10740_v20 = vrot.slane %v632_v4, 7  ;;  %v1359_v26 = vunpack.c.l.b16 %v1162_v9  ;;  %v217_v30 = vld [vmem:[#allocation2 + $0x18] sm:$0x1] }
  0x31   : > { %v946_v5 = vld [vmem:[#allocation2 + $0x68] sm:$0x1]  ;;  %v273_v35 = vld [vmem:[#allocation2 + $0x20] sm:$0x1]  ;;  %v218_v39 = vsel %vm10589_vm4, 0, %v217_v30  ;;  %v1190_v44 = vor.u32 %v1189_v25, %v10738_v12  ;;  %vm1801_vm14 = vcmask 1042432  }
  0x32   : > { %v1169_v10 = vshll.u32 %v946_v5, 16  ;;  %v10403_v11 = vld [vmem:[#allocation2 + $0x6c] sm:$0xff]  ;;  %v637_v27 = vor.u32 %v635_v8, %v10740_v20  ;;  %v274_v40 = vsel %vm10649_vm9, 0, %v273_v35  ;;  %v438_v41 = vld [vmem:[%s10607_s24 + $0x8] sm:$0xf]  ;;  %vm1802_vm15 = vcmask 1046532  }
  0x33   : > { %v923_v18 = vld [vmem:[#allocation2 + $0x6c] sm:$0xf]  ;;  %v853_v22 = vld [vmem:[#allocation2 + $0x74] sm:$0x1]  ;;  %v488_v50 = vshrl.u32 %v438_v41, 16  ;;  %v491_v56 = vshll.u32 %v438_v41, 16  ;;  %vm11082_vm2 = vmor %vm1801_vm14, %vm1802_vm15 }
  0x34   : > { %v1171_v21 = vrot.slane %v1169_v10, 5  ;;  %v1174_v23 = vshrl.u32 %v923_v18, 16  ;;  %v1177_v24 = vshll.u32 %v923_v18, 16  ;;  %v854_v16 = vsel %vm10589_vm4, %v622_v58, %v853_v22  ;;  %v856_v29 = vld [vmem:[#allocation2 + $0x78] sm:$0xf] }
  0x35   : > { %9696 = vmatmul.msk.bf16.gmra.mxu3 %vm1391_vm10, %v10403_v11  ;;  %855 = vst [vmem:[#allocation2 + $0x74] sm:$0x1] %v854_v16  ;;  %v857_v34 = vsel %vm10630_vm8, %v629_v15, %v856_v29  ;;  %v638_v38 = vsel %vm10620_vm7, %v630_v19, %v637_v27  ;;  %v907_v42 = vld [vmem:[#allocation2 + $0xc] sm:$0xf]  ;;  %v490_v60 = vrot.slane %v488_v50, 7  ;;  %v1191_v5 = vrot.slane %v1190_v44, 4 }
  0x36   : > { %v1172_v31 = vsel %vm10695_vm13, %v1167_v6, %v1171_v21  ;;  %v1176_v32 = vrot.slane %v1174_v23, 4  ;;  %v1179_v33 = vrot.slane %v1177_v24, 5  ;;  %858 = vst [vmem:[#allocation2 + $0x78] sm:$0xf] %v857_v34  ;;  %v439_v45 = vld [vmem:[%s10607_s24 + $0xc] sm:$0xf] }
  0x37   : > { %v1360_v36 = vunpack.c.l.b16 %v1172_v31  ;;  %859 = vst.msk [vmem:[#allocation2 + $0x7c] sm:$0xf] %vm199_vm1, %v638_v38  ;;  %v908_v47 = vld [vmem:[#allocation2 + $0x10] sm:$0xf]  ;;  %v982_v37 = vshrl.u32 %v907_v42, 16  ;;  %v985_v48 = vshll.u32 %v907_v42, 16  ;;  %v493_v8 = vor.u32 %v491_v56, %v490_v60 }
  0x38   : > { %v1180_v43 = vor.u32 %v1179_v33, %v1176_v32  ;;  %v10395_v49 = vld [vmem:[#allocation2 + $0xc] sm:$0xff]  ;;  %v939_v51 = vld [vmem:[#allocation2 + $0x14] sm:$0x1]  ;;  %v991_v52 = vshll.u32 %v908_v47, 16  ;;  %v995_v53 = vshrl.u32 %v908_v47, 16  ;;  %v496_v63 = vshrl.u32 %v439_v45, 16 }
  0x39   : > { %v1383_v46 = vpack.c.b16 %v1360_v36, %v1359_v26  ;;  %v984_v57 = vrot.slane %v982_v37, 4  ;;  %v987_v58 = vrot.slane %v985_v48, 5  ;;  %v1001_v59 = vshll.u32 %v939_v51, 16  ;;  %9688 = vmatmul.msk.bf16.gmra.mxu1 %vm1391_vm10, %v10395_v49  ;;  %219 = vst [vmem:[#allocation2 + $0x18] sm:$0x1] %v218_v39 }
  0x3a   : > { %v1181_v54 = vrot.slane %v1180_v43, 4  ;;  %v993_v61 = vrot.slane %v991_v52, 5  ;;  %v997_v62 = vrot.slane %v995_v53, 4  ;;  %275 = vst [vmem:[#allocation2 + $0x20] sm:$0x1] %v274_v40  ;;  %v494_v9 = vrot.slane %v490_v60, 4 }
  0x3b   : > { %9615 = vmatmul.msk.bf16.vlgmr.msra.gmra.mxu2 %vm1391_vm10, %v1383_v46  ;;  %v988_v0 = vor.u32 %v987_v58, %v984_v57  ;;  %v1003_v1 = vrot.slane %v1001_v59, 5  ;;  %v297_v6 = vld [vmem:[#allocation2 + $0x80] sm:$0x1]  ;;  %v498_v15 = vrot.slane %v496_v63, 7  ;;  %v499_v18 = vshll.u32 %v439_v45, 16 }
  0x3c   : > { %v947_v2 = vld [vmem:[#allocation2 + $0x74] sm:$0x1]  ;;  %v1186_v4 = vsel %vm10695_vm13, %v1181_v54, %v10738_v12  ;;  %v998_v7 = vor.u32 %v997_v62, %v993_v61  ;;  %v298_v19 = vsel %vm10649_vm9, 0, %v297_v6  ;;  %v639_v24 = vrot.slane %v10740_v20, 4  ;;  %v244_v34 = vld [vmem:[#allocation2 + $0x84] sm:$0x1] }
  0x3d   : > { %v1193_v55 = vshll.u32 %v947_v2, 16  ;;  %v925_v10 = vld [vmem:[#allocation2 + $0x78] sm:$0xf]  ;;  %v989_v11 = vrot.slane %v988_v0, 4  ;;  %v1361_v23 = vunpack.c.l.b16 %v1186_v4  ;;  %299 = vst [vmem:[#allocation2 + $0x80] sm:$0x1] %v298_v19  ;;  %v501_v26 = vor.u32 %v499_v18, %v498_v15 }
  0x3e   : > { %v999_v21 = vrot.slane %v998_v7, 4  ;;  %v10404_v25 = vld [vmem:[#allocation2 + $0x78] sm:$0xff]  ;;  %v503_v16 = vrot.slane %v498_v15, 4  ;;  %v1198_v29 = vshrl.u32 %v925_v10, 16  ;;  %v1201_v20 = vshll.u32 %v925_v10, 16 }
  0x3f   : > { %v1195_v22 = vrot.slane %v1193_v55, 5  ;;  %v994_v12 = vsel %vm10695_vm13, %v989_v11, %v993_v61  ;;  %v926_v27 = vld [vmem:[#allocation2 + $0x7c] sm:$0xf]  ;;  %v502_v38 = vsel %vm10620_vm7, %v494_v9, %v501_v26  ;;  %v456_v41 = vld [vmem:[%s10607_s24 + $0x50] sm:$0xf]  ;;  %v245_v50 = vsel %vm10589_vm4, 0, %v244_v34 }
  0x40   : > { %v1004_v30 = vsel %vm10695_vm13, %v999_v21, %v1003_v1  ;;  %v1345_v31 = vunpack.c.l.b16 %v994_v12  ;;  %v800_v33 = vld [vmem:[#allocation2 + $0x18] sm:$0xf]  ;;  %v457_v42 = vld [vmem:[%s10607_s24 + $0x54] sm:$0xf]  ;;  %v1200_v44 = vrot.slane %v1198_v29, 4  ;;  %v1203_v45 = vrot.slane %v1201_v20, 5 }
  0x41   : > { %v1196_v32 = vsel %vm10695_vm13, %v1191_v5, %v1195_v22  ;;  %v1346_v35 = vunpack.c.l.b16 %v1004_v30  ;;  %v801_v39 = vsel %vm10630_vm8, %v493_v8, %v800_v33  ;;  %v804_v40 = vld [vmem:[#allocation2 + $0x20] sm:$0x1]  ;;  %v1207_v46 = vshll.u32 %v926_v27, 16  ;;  %v220_v47 = vld [vmem:[#allocation2 + $0x24] sm:$0x1] }
  0x42   : > { %v1362_v36 = vunpack.c.l.b16 %v1196_v32  ;;  %802 = vst [vmem:[#allocation2 + $0x18] sm:$0xf] %v801_v39  ;;  %v805_v43 = vsel %vm10589_vm4, %v503_v16, %v804_v40  ;;  %v276_v37 = vld [vmem:[#allocation2 + $0x2c] sm:$0x1]  ;;  %v1211_v49 = vshrl.u32 %v926_v27, 16  ;;  %v1204_v52 = vor.u32 %v1203_v45, %v1200_v44 }
  0x43   : > { %v1376_v48 = vpack.c.b16 %v1346_v35, %v1345_v31  ;;  %803 = vst.msk [vmem:[#allocation2 + $0x1c] sm:$0xf] %vm199_vm1, %v502_v38  ;;  %v440_v51 = vld [vmem:[%s10607_s24 + $0x10] sm:$0xf]  ;;  %v10787_v53 = vrot.slane %v1207_v46, 5  ;;  %v641_v54 = vshrl.u32 %v456_v41, 16 }
  0x44   : > { %806 = vst [vmem:[#allocation2 + $0x20] sm:$0x1] %v805_v43  ;;  %v644_v56 = vshll.u32 %v456_v41, 16  ;;  %v1384_v57 = vpack.c.b16 %v1362_v36, %v1361_v23  ;;  %v860_v58 = vld [vmem:[#allocation2 + $0x80] sm:$0x1]  ;;  %v1213_v59 = vrot.slane %v1211_v49, 4 }
  0x45   : > { %9697 = vmatmul.msk.bf16.gmra.mxu3 %vm1391_vm10, %v10404_v25  ;;  %9608 = vmatmul.msk.bf16.gmra.mxu0 %vm1391_vm10, %v1376_v48  ;;  %246 = vst [vmem:[#allocation2 + $0x84] sm:$0x1] %v245_v50  ;;  %v649_v60 = vshrl.u32 %v457_v42, 16  ;;  %v861_v61 = vsel %vm10589_vm4, %v639_v24, %v860_v58  ;;  %v643_v62 = vrot.slane %v641_v54, 7  ;;  %v652_v63 = vshll.u32 %v457_v42, 16 }
  0x46   : > { %862 = vst [vmem:[#allocation2 + $0x80] sm:$0x1] %v861_v61  ;;  %v221_v1 = vsel %vm10589_vm4, 0, %v220_v47  ;;  %v277_v2 = vsel %vm10649_vm9, 0, %v276_v37  ;;  %v1205_v4 = vrot.slane %v1204_v52, 4  ;;  %v1214_v5 = vor.u32 %v1213_v59, %v10787_v53 }
  0x47   : > { %v10792_v0 = vrot.slane %v649_v60, 7  ;;  %v647_v6 = vrot.slane %v643_v62, 4  ;;  %222 = vst [vmem:[#allocation2 + $0x24] sm:$0x1] %v221_v1  ;;  %v505_v7 = vshrl.u32 %v440_v51, 16  ;;  %v646_v8 = vor.u32 %v644_v56, %v643_v62 }
  0x48   : > { %278 = vst [vmem:[#allocation2 + $0x2c] sm:$0x1] %v277_v2  ;;  %v441_v10 = vld [vmem:[%s10607_s24 + $0x14] sm:$0xf]  ;;  %v508_v25 = vshll.u32 %v440_v51, 16  ;;  %v1215_v30 = vrot.slane %v1214_v5, 4  ;;  %v1210_v39 = vsel %vm10695_vm13, %v1205_v4, %v10787_v53 }
  0x49   : > { %v909_v55 = vld [vmem:[#allocation2 + $0x18] sm:$0xf]  ;;  %v654_v9 = vor.u32 %v652_v63, %v10792_v0  ;;  %v507_v21 = vrot.slane %v505_v7, 7  ;;  %v300_v26 = vld [vmem:[#allocation2 + $0x8c] sm:$0x1]  ;;  %v513_v41 = vshrl.u32 %v441_v10, 16  ;;  %v1363_v53 = vunpack.c.l.b16 %v1210_v39 }
  0x4a   : > { %v910_v11 = vld [vmem:[#allocation2 + $0x1c] sm:$0xf]  ;;  %v1006_v15 = vshrl.u32 %v909_v55, 16  ;;  %v1009_v18 = vshll.u32 %v909_v55, 16  ;;  %v247_v35 = vld [vmem:[#allocation2 + $0x90] sm:$0x1] }
  0x4b   : > { %9616 = vmatmul.msk.bf16.gmra.mxu2 %vm1391_vm10, %v1384_v57  ;;  %v10396_v19 = vld [vmem:[#allocation2 + $0x18] sm:$0xff]  ;;  %v940_v22 = vld [vmem:[#allocation2 + $0x20] sm:$0x1]  ;;  %v1015_v23 = vshll.u32 %v910_v11, 16  ;;  %v1019_v24 = vshrl.u32 %v910_v11, 16  ;;  %v655_v12 = vsel %vm10620_vm7, %v647_v6, %v654_v9  ;;  %v510_v34 = vor.u32 %v508_v25, %v507_v21 }
  0x4c   : > { %v1008_v16 = vrot.slane %v1006_v15, 4  ;;  %v1011_v27 = vrot.slane %v1009_v18, 5  ;;  %v1025_v29 = vshll.u32 %v940_v22, 16  ;;  %9689 = vmatmul.msk.bf16.gmra.mxu1 %vm1391_vm10, %v10396_v19  ;;  %v863_v31 = vld [vmem:[#allocation2 + $0x84] sm:$0xf]  ;;  %v511_v40 = vrot.slane %v507_v21, 4 }
  0x4d   : > { %v1017_v32 = vrot.slane %v1015_v23, 5  ;;  %v1021_v33 = vrot.slane %v1019_v24, 4  ;;  %v864_v20 = vsel %vm10630_vm8, %v646_v8, %v863_v31  ;;  %866 = vst.msk [vmem:[#allocation2 + $0x88] sm:$0xf] %vm199_vm1, %v655_v12  ;;  %v948_v38 = vld [vmem:[#allocation2 + $0x80] sm:$0x1] }
  0x4e   : > { %v1012_v36 = vor.u32 %v1011_v27, %v1008_v16  ;;  %865 = vst [vmem:[#allocation2 + $0x84] sm:$0xf] %v864_v20  ;;  %v1027_v43 = vrot.slane %v1025_v29, 5  ;;  %v1217_v44 = vshll.u32 %v948_v38, 16  ;;  %v516_v45 = vshll.u32 %v441_v10, 16 }
  0x4f   : > { %v1022_v42 = vor.u32 %v1021_v33, %v1017_v32  ;;  %v807_v46 = vld [vmem:[#allocation2 + $0x24] sm:$0xf]  ;;  %v515_v37 = vrot.slane %v513_v41, 7  ;;  %v811_v49 = vld [vmem:[#allocation2 + $0x2c] sm:$0x1]  ;;  %v301_v50 = vsel %vm10649_vm9, 0, %v300_v26 }
  0x50   : > { %v1013_v47 = vrot.slane %v1012_v36, 4  ;;  %v808_v48 = vsel %vm10630_vm8, %v510_v34, %v807_v46  ;;  %v1219_v52 = vrot.slane %v1217_v44, 5  ;;  %v248_v54 = vsel %vm10589_vm4, 0, %v247_v35  ;;  %302 = vst [vmem:[#allocation2 + $0x8c] sm:$0x1] %v301_v50 }
  0x51   : > { %v1023_v51 = vrot.slane %v1022_v42, 4  ;;  %809 = vst [vmem:[#allocation2 + $0x24] sm:$0xf] %v808_v48  ;;  %v656_v57 = vrot.slane %v10792_v0, 4  ;;  %v518_v58 = vor.u32 %v516_v45, %v515_v37  ;;  %v520_v59 = vrot.slane %v515_v37, 4 }
  0x52   : > { %v1018_v56 = vsel %vm10695_vm13, %v1013_v47, %v1017_v32  ;;  %v458_v60 = vld [vmem:[%s10607_s24 + $0x58] sm:$0xf]  ;;  %v1220_v63 = vsel %vm10695_vm13, %v1215_v30, %v1219_v52  ;;  %249 = vst [vmem:[#allocation2 + $0x90] sm:$0x1] %v248_v54  ;;  %v459_v7 = vld [vmem:[%s10607_s24 + $0x5c] sm:$0xf] }
  0x53   : > { %v1028_v61 = vsel %vm10695_vm13, %v1023_v51, %v1027_v43  ;;  %v1347_v62 = vunpack.c.l.b16 %v1018_v56  ;;  %v658_v1 = vshrl.u32 %v458_v60, 16  ;;  %v1364_v4 = vunpack.c.l.b16 %v1220_v63  ;;  %v223_v27 = vld [vmem:[#allocation2 + $0x30] sm:$0x1]  ;;  %v279_v39 = vld [vmem:[#allocation2 + $0x38] sm:$0x1] }
  0x54   : > { %v1348_v2 = vunpack.c.l.b16 %v1028_v61  ;;  %v519_v5 = vsel %vm10620_vm7, %v511_v40, %v518_v58  ;;  %v812_v0 = vsel %vm10589_vm4, %v520_v59, %v811_v49  ;;  %v928_v6 = vld [vmem:[#allocation2 + $0x88] sm:$0xf]  ;;  %v661_v23 = vshll.u32 %v458_v60, 16  ;;  %v442_v44 = vld [vmem:[%s10607_s24 + $0x18] sm:$0xf] }
  0x55   : > { %v10405_v55 = vld [vmem:[#allocation2 + $0x84] sm:$0xff]  ;;  %810 = vst.msk [vmem:[#allocation2 + $0x28] sm:$0xf] %vm199_vm1, %v519_v5  ;;  %v1231_v9 = vshll.u32 %v928_v6, 16  ;;  %v1385_v11 = vpack.c.b16 %v1364_v4, %v1363_v53  ;;  %v1235_v21 = vshrl.u32 %v928_v6, 16  ;;  %v660_v22 = vrot.slane %v658_v1, 7 }
  0x56   : > { %v927_v8 = vld [vmem:[#allocation2 + $0x84] sm:$0xf]  ;;  %v1377_v10 = vpack.c.b16 %v1348_v2, %v1347_v62  ;;  %813 = vst [vmem:[#allocation2 + $0x2c] sm:$0x1] %v812_v0  ;;  %9698 = vmatmul.msk.bf16.gmra.mxu3 %vm1391_vm10, %v10405_v55  ;;  %v666_v26 = vshrl.u32 %v459_v7, 16  ;;  %v669_v16 = vshll.u32 %v459_v7, 16 }
  0x57   : > { %v1222_v15 = vshrl.u32 %v927_v8, 16  ;;  %v1225_v18 = vshll.u32 %v927_v8, 16  ;;  %v10832_v19 = vrot.slane %v1231_v9, 5  ;;  %v867_v31 = vld [vmem:[#allocation2 + $0x8c] sm:$0x1]  ;;  %v1237_v32 = vrot.slane %v1235_v21, 4 }
  0x58   : > { %9609 = vmatmul.msk.bf16.gmra.mxu0 %vm1391_vm10, %v1377_v10  ;;  %v911_v24 = vld [vmem:[#allocation2 + $0x24] sm:$0xf]  ;;  %v663_v33 = vor.u32 %v661_v23, %v660_v22  ;;  %v868_v20 = vsel %vm10589_vm4, %v656_v57, %v867_v31  ;;  %v664_v35 = vrot.slane %v660_v22, 4  ;;  %v10838_v36 = vrot.slane %v666_v26, 7  ;;  %v443_v45 = vld [vmem:[%s10607_s24 + $0x1c] sm:$0xf] }
  0x59   : > { %v1224_v12 = vrot.slane %v1222_v15, 4  ;;  %v1227_v25 = vrot.slane %v1225_v18, 5  ;;  %v1030_v29 = vshrl.u32 %v911_v24, 16  ;;  %v1033_v30 = vshll.u32 %v911_v24, 16  ;;  %v870_v38 = vld [vmem:[#allocation2 + $0x90] sm:$0xf] }
  0x5a   : > { %869 = vst [vmem:[#allocation2 + $0x8c] sm:$0x1] %v868_v20  ;;  %v1238_v42 = vor.u32 %v1237_v32, %v10832_v19  ;;  %v871_v43 = vsel %vm10630_vm8, %v663_v33, %v870_v38  ;;  %v671_v48 = vor.u32 %v669_v16, %v10838_v36  ;;  %v673_v49 = vrot.slane %v10838_v36, 4  ;;  %v303_v50 = vld [vmem:[#allocation2 + $0x98] sm:$0x1] }
  0x5b   : > { %9617 = vmatmul.msk.bf16.gmra.mxu2 %vm1391_vm10, %v1385_v11  ;;  %v1228_v34 = vor.u32 %v1227_v25, %v1224_v12  ;;  %v1032_v40 = vrot.slane %v1030_v29, 4  ;;  %v1035_v41 = vrot.slane %v1033_v30, 5  ;;  %v224_v56 = vsel %vm10589_vm4, 0, %v223_v27  ;;  %872 = vst [vmem:[#allocation2 + $0x90] sm:$0xf] %v871_v43 }
  0x5c   : > { %v912_v46 = vld [vmem:[#allocation2 + $0x28] sm:$0xf]  ;;  %v1239_v58 = vrot.slane %v1238_v42, 4  ;;  %v672_v59 = vsel %vm10620_vm7, %v664_v35, %v671_v48  ;;  %v280_v60 = vsel %vm10649_vm9, 0, %v279_v39  ;;  %v250_v61 = vld [vmem:[#allocation2 + $0x9c] sm:$0x1] }
  0x5d   : > { %v1229_v47 = vrot.slane %v1228_v34, 4  ;;  %v10397_v37 = vld [vmem:[#allocation2 + $0x24] sm:$0xff]  ;;  %v941_v51 = vld [vmem:[#allocation2 + $0x2c] sm:$0x1]  ;;  %v1036_v52 = vor.u32 %v1035_v41, %v1032_v40  ;;  %v1039_v53 = vshll.u32 %v912_v46, 16  ;;  %v1043_v54 = vshrl.u32 %v912_v46, 16 }
  0x5e   : > { %v1049_v57 = vshll.u32 %v941_v51, 16  ;;  %9690 = vmatmul.msk.bf16.gmra.mxu1 %vm1391_vm10, %v10397_v37  ;;  %873 = vst.msk [vmem:[#allocation2 + $0x94] sm:$0xf] %vm199_vm1, %v672_v59  ;;  %v522_v5 = vshrl.u32 %v442_v44, 16  ;;  %v525_v0 = vshll.u32 %v442_v44, 16  ;;  %v530_v6 = vshrl.u32 %v443_v45, 16 }
  0x5f   : > { %v1037_v62 = vrot.slane %v1036_v52, 4  ;;  %v1041_v63 = vrot.slane %v1039_v53, 5  ;;  %v1045_v1 = vrot.slane %v1043_v54, 4  ;;  %v1234_v2 = vsel %vm10695_vm13, %v1229_v47, %v10832_v19  ;;  %225 = vst [vmem:[#allocation2 + $0x30] sm:$0x1] %v224_v56 }
  0x60   : > { %v1051_v4 = vrot.slane %v1049_v57, 5  ;;  %281 = vst [vmem:[#allocation2 + $0x38] sm:$0x1] %v280_v60  ;;  %v533_v8 = vshll.u32 %v443_v45, 16  ;;  %v304_v9 = vsel %vm10649_vm9, 0, %v303_v50  ;;  %v1365_v15 = vunpack.c.l.b16 %v1234_v2 }
  0x61   : > { %v1042_v7 = vsel %vm10695_vm13, %v1037_v62, %v1041_v63  ;;  %v1046_v55 = vor.u32 %v1045_v1, %v1041_v63  ;;  %v460_v10 = vld [vmem:[%s10607_s24 + $0x60] sm:$0xf]  ;;  %v949_v11 = vld [vmem:[#allocation2 + $0x8c] sm:$0x1]  ;;  %v524_v18 = vrot.slane %v522_v5, 7  ;;  %v532_v19 = vrot.slane %v530_v6, 7 }
  0x62   : > { %305 = vst [vmem:[#allocation2 + $0x98] sm:$0x1] %v304_v9  ;;  %v1349_v22 = vunpack.c.l.b16 %v1042_v7  ;;  %v1241_v23 = vshll.u32 %v949_v11, 16  ;;  %v251_v24 = vsel %vm10589_vm4, 0, %v250_v61  ;;  %v929_v30 = vld [vmem:[#allocation2 + $0x90] sm:$0xf] }
  0x63   : > { %v1047_v21 = vrot.slane %v1046_v55, 4  ;;  %v527_v12 = vor.u32 %v525_v0, %v524_v18  ;;  %v528_v25 = vrot.slane %v524_v18, 4  ;;  %v535_v26 = vor.u32 %v533_v8, %v532_v19  ;;  %252 = vst [vmem:[#allocation2 + $0x9c] sm:$0x1] %v251_v24  ;;  %v461_v40 = vld [vmem:[%s10607_s24 + $0x64] sm:$0xf] }
  0x64   : > { %v537_v16 = vrot.slane %v532_v19, 4  ;;  %v1243_v29 = vrot.slane %v1241_v23, 5  ;;  %v675_v31 = vshrl.u32 %v460_v10, 16  ;;  %v678_v32 = vshll.u32 %v460_v10, 16  ;;  %v226_v45 = vld [vmem:[#allocation2 + $0x3c] sm:$0x1] }
  0x65   : > { %v1052_v27 = vsel %vm10695_vm13, %v1047_v21, %v1051_v4  ;;  %v10406_v20 = vld [vmem:[#allocation2 + $0x90] sm:$0xff]  ;;  %v536_v34 = vsel %vm10620_vm7, %v528_v25, %v535_v26  ;;  %v1246_v38 = vshrl.u32 %v929_v30, 16  ;;  %v1249_v39 = vshll.u32 %v929_v30, 16  ;;  %v282_v51 = vld [vmem:[#allocation2 + $0x44] sm:$0x1] }
  0x66   : > { %v1350_v33 = vunpack.c.l.b16 %v1052_v27  ;;  %v930_v35 = vld [vmem:[#allocation2 + $0x94] sm:$0xf]  ;;  %v1244_v41 = vsel %vm10695_vm13, %v1239_v58, %v1243_v29  ;;  %v814_v42 = vld [vmem:[#allocation2 + $0x30] sm:$0xf]  ;;  %817 = vst.msk [vmem:[#allocation2 + $0x34] sm:$0xf] %vm199_vm1, %v536_v34  ;;  %9699 = vmatmul.msk.bf16.gmra.mxu3 %vm1391_vm10, %v10406_v20 }
  0x67   : > { %v1255_v43 = vshll.u32 %v930_v35, 16  ;;  %v1259_v44 = vshrl.u32 %v930_v35, 16  ;;  %v1366_v47 = vunpack.c.l.b16 %v1244_v41  ;;  %v815_v37 = vsel %vm10630_vm8, %v527_v12, %v814_v42  ;;  %v818_v48 = vld [vmem:[#allocation2 + $0x38] sm:$0x1]  ;;  %v444_v61 = vld [vmem:[%s10607_s24 + $0x20] sm:$0xf] }
  0x68   : > { %v1378_v46 = vpack.c.b16 %v1350_v33, %v1349_v22  ;;  %v1248_v50 = vrot.slane %v1246_v38, 4  ;;  %816 = vst [vmem:[#allocation2 + $0x30] sm:$0xf] %v815_v37  ;;  %v819_v52 = vsel %vm10589_vm4, %v537_v16, %v818_v48  ;;  %v1251_v54 = vrot.slane %v1249_v39, 5  ;;  %v445_v6 = vld [vmem:[%s10607_s24 + $0x24] sm:$0xf] }
  0x69   : > { %v874_v53 = vld [vmem:[#allocation2 + $0x98] sm:$0x1]  ;;  %v1257_v56 = vrot.slane %v1255_v43, 5  ;;  %v1386_v57 = vpack.c.b16 %v1366_v47, %v1365_v15  ;;  %820 = vst [vmem:[#allocation2 + $0x38] sm:$0x1] %v819_v52  ;;  %v1261_v59 = vrot.slane %v1259_v44, 4 }
  0x6a   : > { %9610 = vmatmul.msk.bf16.gmra.mxu0 %vm1391_vm10, %v1378_v46  ;;  %v875_v58 = vsel %vm10589_vm4, %v673_v49, %v874_v53  ;;  %v677_v60 = vrot.slane %v675_v31, 7  ;;  %v1252_v62 = vor.u32 %v1251_v54, %v1248_v50  ;;  %v683_v63 = vshrl.u32 %v461_v40, 16  ;;  %v877_v2 = vld [vmem:[#allocation2 + $0x9c] sm:$0xf]  ;;  %v306_v31 = vld [vmem:[#allocation2 + $0xa4] sm:$0x1] }
  0x6b   : > { %876 = vst [vmem:[#allocation2 + $0x98] sm:$0x1] %v875_v58  ;;  %v686_v1 = vshll.u32 %v461_v40, 16  ;;  %9618 = vmatmul.msk.bf16.gmra.mxu2 %vm1391_vm10, %v1386_v57  ;;  %v1262_v4 = vor.u32 %v1261_v59, %v1257_v56  ;;  %v227_v0 = vsel %vm10589_vm4, 0, %v226_v45  ;;  %v283_v49 = vsel %vm10649_vm9, 0, %v282_v51 }
  0x6c   : > { %v680_v5 = vor.u32 %v678_v32, %v677_v60  ;;  %v1253_v36 = vrot.slane %v1252_v62, 4  ;;  %v10888_v7 = vrot.slane %v683_v63, 7  ;;  %228 = vst [vmem:[#allocation2 + $0x3c] sm:$0x1] %v227_v0  ;;  %v539_v55 = vshrl.u32 %v444_v61, 16 }
  0x6d   : > { %v914_v8 = vld [vmem:[#allocation2 + $0x34] sm:$0xf]  ;;  %v681_v9 = vrot.slane %v677_v60, 4  ;;  %284 = vst [vmem:[#allocation2 + $0x44] sm:$0x1] %v283_v49  ;;  %v542_v11 = vshll.u32 %v444_v61, 16 }
  0x6e   : > { %v878_v10 = vsel %vm10630_vm8, %v680_v5, %v877_v2  ;;  %v1063_v15 = vshll.u32 %v914_v8, 16  ;;  %v1067_v18 = vshrl.u32 %v914_v8, 16  ;;  %v1258_v19 = vsel %vm10695_vm13, %v1253_v36, %v1257_v56  ;;  %v253_v38 = vld [vmem:[#allocation2 + $0xa8] sm:$0x1]  ;;  %v463_v0 = vld [vmem:[%s10607_s24 + $0x6c] sm:$0xf] }
  0x6f   : > { %v688_v21 = vor.u32 %v686_v1, %v10888_v7  ;;  %879 = vst [vmem:[#allocation2 + $0x9c] sm:$0xf] %v878_v10  ;;  %v913_v22 = vld [vmem:[#allocation2 + $0x30] sm:$0xf]  ;;  %v1263_v23 = vrot.slane %v1262_v4, 4  ;;  %v541_v12 = vrot.slane %v539_v55, 7  ;;  %v1367_v20 = vunpack.c.l.b16 %v1258_v19 }
  0x70   : > { %v10398_v24 = vld [vmem:[#allocation2 + $0x30] sm:$0xff]  ;;  %v547_v25 = vshrl.u32 %v445_v6, 16  ;;  %v942_v26 = vld [vmem:[#allocation2 + $0x38] sm:$0x1]  ;;  %v1054_v16 = vshrl.u32 %v913_v22, 16  ;;  %v1057_v27 = vshll.u32 %v913_v22, 16 }
  0x71   : > { %v1065_v29 = vrot.slane %v1063_v15, 5  ;;  %v1069_v30 = vrot.slane %v1067_v18, 4  ;;  %v1073_v32 = vshll.u32 %v942_v26, 16  ;;  %9691 = vmatmul.msk.bf16.gmra.mxu1 %vm1391_vm10, %v10398_v24  ;;  %v689_v34 = vsel %vm10620_vm7, %v681_v9, %v688_v21  ;;  %v462_v37 = vld [vmem:[%s10607_s24 + $0x68] sm:$0xf] }
  0x72   : > { %v950_v33 = vld [vmem:[#allocation2 + $0x98] sm:$0x1]  ;;  %v544_v35 = vor.u32 %v542_v11, %v541_v12  ;;  %v1056_v39 = vrot.slane %v1054_v16, 4  ;;  %v1059_v40 = vrot.slane %v1057_v27, 5  ;;  %880 = vst.msk [vmem:[#allocation2 + $0xa0] sm:$0xf] %vm199_vm1, %v689_v34 }
  0x73   : > { %v1070_v41 = vor.u32 %v1069_v30, %v1065_v29  ;;  %v1265_v42 = vshll.u32 %v950_v33, 16  ;;  %v1075_v43 = vrot.slane %v1073_v32, 5  ;;  %v690_v44 = vrot.slane %v10888_v7, 4  ;;  %v821_v47 = vld [vmem:[#allocation2 + $0x3c] sm:$0xf] }
  0x74   : > { %v545_v45 = vrot.slane %v541_v12, 4  ;;  %v549_v46 = vrot.slane %v547_v25, 7  ;;  %v1060_v48 = vor.u32 %v1059_v40, %v1056_v39  ;;  %v550_v52 = vshll.u32 %v445_v6, 16  ;;  %v825_v53 = vld [vmem:[#allocation2 + $0x44] sm:$0x1] }
  0x75   : > { %v1071_v50 = vrot.slane %v1070_v41, 4  ;;  %v1267_v51 = vrot.slane %v1265_v42, 5  ;;  %v822_v56 = vsel %vm10630_vm8, %v544_v35, %v821_v47  ;;  %v307_v57 = vsel %vm10649_vm9, 0, %v306_v31  ;;  %v229_v8 = vld [vmem:[#allocation2 + $0x48] sm:$0x1] }
  0x76   : > { %v554_v54 = vrot.slane %v549_v46, 4  ;;  %v931_v58 = vld [vmem:[#allocation2 + $0x9c] sm:$0xf]  ;;  %v254_v59 = vsel %vm10589_vm4, 0, %v253_v38  ;;  %v1061_v60 = vrot.slane %v1060_v48, 4  ;;  %v552_v63 = vor.u32 %v550_v52, %v549_v46 }
  0x77   : > { %v1076_v61 = vsel %vm10695_vm13, %v1071_v50, %v1075_v43  ;;  %v1268_v62 = vsel %vm10695_vm13, %v1263_v23, %v1267_v51  ;;  %823 = vst [vmem:[#allocation2 + $0x3c] sm:$0xf] %v822_v56  ;;  %v1270_v5 = vshrl.u32 %v931_v58, 16  ;;  %v1273_v49 = vshll.u32 %v931_v58, 16  ;;  %v285_v27 = vld [vmem:[#allocation2 + $0x50] sm:$0x1] }
  0x78   : > { %v1352_v1 = vunpack.c.l.b16 %v1076_v61  ;;  %v1368_v2 = vunpack.c.l.b16 %v1268_v62  ;;  %v826_v4 = vsel %vm10589_vm4, %v554_v54, %v825_v53  ;;  %308 = vst [vmem:[#allocation2 + $0xa4] sm:$0x1] %v307_v57  ;;  %v1066_v6 = vsel %vm10695_vm13, %v1061_v60, %v1065_v29  ;;  %v446_v29 = vld [vmem:[%s10607_s24 + $0x28] sm:$0xf]  ;;  %v447_v46 = vld [vmem:[%s10607_s24 + $0x2c] sm:$0xf] }
  0x79   : > { %v553_v36 = vsel %vm10620_vm7, %v545_v45, %v552_v63  ;;  %827 = vst [vmem:[#allocation2 + $0x44] sm:$0x1] %v826_v4  ;;  %v692_v55 = vshrl.u32 %v462_v37, 16  ;;  %v1351_v9 = vunpack.c.l.b16 %v1066_v6  ;;  %v10407_v11 = vld [vmem:[#allocation2 + $0x9c] sm:$0xff]  ;;  %v1272_v18 = vrot.slane %v1270_v5, 4 }
  0x7a   : > { %v1387_v10 = vpack.c.b16 %v1368_v2, %v1367_v20  ;;  %824 = vst.msk [vmem:[#allocation2 + $0x40] sm:$0xf] %vm199_vm1, %v553_v36  ;;  %v932_v15 = vld [vmem:[#allocation2 + $0xa0] sm:$0xf]  ;;  %v1275_v19 = vrot.slane %v1273_v49, 5  ;;  %9700 = vmatmul.msk.bf16.gmra.mxu3 %vm1391_vm10, %v10407_v11  ;;  %v695_v12 = vshll.u32 %v462_v37, 16 }
  0x7b   : > { %v1279_v21 = vshll.u32 %v932_v15, 16  ;;  %v1283_v22 = vshrl.u32 %v932_v15, 16  ;;  %255 = vst [vmem:[#allocation2 + $0xa8] sm:$0x1] %v254_v59  ;;  %v694_v23 = vrot.slane %v692_v55, 7  ;;  %v1379_v24 = vpack.c.b16 %v1352_v1, %v1351_v9 }
  0x7c   : > { %9619 = vmatmul.msk.bf16.gmra.mxu2 %vm1391_vm10, %v1387_v10  ;;  %v700_v25 = vshrl.u32 %v463_v0, 16  ;;  %v703_v26 = vshll.u32 %v463_v0, 16  ;;  %v1276_v16 = vor.u32 %v1275_v19, %v1272_v18  ;;  %v230_v20 = vsel %vm10589_vm4, 0, %v229_v8  ;;  %v309_v52 = vld [vmem:[#allocation2 + $0xb0] sm:$0x1] }
  0x7d   : > { %9611 = vmatmul.msk.bf16.gmra.mxu0 %vm1391_vm10, %v1379_v24  ;;  %v10925_v31 = vrot.slane %v1279_v21, 5  ;;  %v1285_v32 = vrot.slane %v1283_v22, 4  ;;  %v697_v39 = vor.u32 %v695_v12, %v694_v23  ;;  %v698_v40 = vrot.slane %v694_v23, 4  ;;  %231 = vst [vmem:[#allocation2 + $0x48] sm:$0x1] %v230_v20 }
  0x7e   : > { %v915_v30 = vld [vmem:[#allocation2 + $0x3c] sm:$0xf]  ;;  %v10927_v33 = vrot.slane %v700_v25, 7  ;;  %v286_v45 = vsel %vm10649_vm9, 0, %v285_v27  ;;  %v556_v47 = vshrl.u32 %v446_v29, 16  ;;  %v1277_v7 = vrot.slane %v1276_v16, 4 }
  0x7f   : > { %v1078_v34 = vshrl.u32 %v915_v30, 16  ;;  %v1081_v35 = vshll.u32 %v915_v30, 16  ;;  %v881_v38 = vld [vmem:[#allocation2 + $0xa4] sm:$0x1]  ;;  %v1286_v56 = vor.u32 %v1285_v32, %v10925_v31  ;;  %287 = vst [vmem:[#allocation2 + $0x50] sm:$0x1] %v286_v45 }
  0x80   : > { %v943_v41 = vld [vmem:[#allocation2 + $0x44] sm:$0x1]  ;;  %v882_v42 = vsel %vm10589_vm4, %v690_v44, %v881_v38  ;;  %v705_v43 = vor.u32 %v703_v26, %v10927_v33  ;;  %v707_v60 = vrot.slane %v10927_v33, 4  ;;  %v558_v2 = vrot.slane %v556_v47, 7  ;;  %v256_v8 = vld [vmem:[#allocation2 + $0xb4] sm:$0x1] }
  0x81   : > { %v916_v37 = vld [vmem:[#allocation2 + $0x40] sm:$0xf]  ;;  %v1080_v48 = vrot.slane %v1078_v34, 4  ;;  %v1083_v50 = vrot.slane %v1081_v35, 5  ;;  %v1097_v51 = vshll.u32 %v943_v41, 16  ;;  %v559_v5 = vshll.u32 %v446_v29, 16 }
  0x82   : > { %v1087_v53 = vshll.u32 %v916_v37, 16  ;;  %v1091_v54 = vshrl.u32 %v916_v37, 16  ;;  %883 = vst [vmem:[#allocation2 + $0xa4] sm:$0x1] %v882_v42  ;;  %v10399_v44 = vld [vmem:[#allocation2 + $0x3c] sm:$0xff]  ;;  %v706_v59 = vsel %vm10620_vm7, %v698_v40, %v705_v43  ;;  %v564_v0 = vshrl.u32 %v447_v46, 16 }
  0x83   : > { %v1084_v57 = vor.u32 %v1083_v50, %v1080_v48  ;;  %v1099_v58 = vrot.slane %v1097_v51, 5  ;;  %v884_v61 = vld [vmem:[#allocation2 + $0xa8] sm:$0xf]  ;;  %9692 = vmatmul.msk.bf16.gmra.mxu1 %vm1391_vm10, %v10399_v44  ;;  %887 = vst.msk [vmem:[#allocation2 + $0xac] sm:$0xf] %vm199_vm1, %v706_v59  ;;  %v567_v6 = vshll.u32 %v447_v46, 16  ;;  %v561_v11 = vor.u32 %v559_v5, %v558_v2 }
  0x84   : > { %v1089_v62 = vrot.slane %v1087_v53, 5  ;;  %v1093_v63 = vrot.slane %v1091_v54, 4  ;;  %v885_v1 = vsel %vm10630_vm8, %v697_v39, %v884_v61  ;;  %v562_v49 = vrot.slane %v558_v2, 4  ;;  %v464_v9 = vld [vmem:[%s10607_s24 + $0x70] sm:$0xf] }
  0x85   : > { %v1085_v4 = vrot.slane %v1084_v57, 4  ;;  %886 = vst [vmem:[#allocation2 + $0xa8] sm:$0xf] %v885_v1  ;;  %v310_v55 = vsel %vm10649_vm9, 0, %v309_v52  ;;  %v566_v15 = vrot.slane %v564_v0, 7  ;;  %v257_v19 = vsel %vm10589_vm4, 0, %v256_v8 }
  0x86   : > { %v1094_v36 = vor.u32 %v1093_v63, %v1089_v62  ;;  %v828_v18 = vld [vmem:[#allocation2 + $0x48] sm:$0xf]  ;;  %311 = vst [vmem:[#allocation2 + $0xb0] sm:$0x1] %v310_v55  ;;  %v1282_v22 = vsel %vm10695_vm13, %v1277_v7, %v10925_v31  ;;  %v1287_v23 = vrot.slane %v1286_v56, 4  ;;  %v709_v24 = vshrl.u32 %v464_v9, 16 }
  0x87   : > { %v1090_v10 = vsel %vm10695_vm13, %v1085_v4, %v1089_v62  ;;  %258 = vst [vmem:[#allocation2 + $0xb4] sm:$0x1] %v257_v19  ;;  %v569_v26 = vor.u32 %v567_v6, %v566_v15  ;;  %v571_v16 = vrot.slane %v566_v15, 4  ;;  %v829_v27 = vsel %vm10630_vm8, %v561_v11, %v828_v18  ;;  %v832_v32 = vld [vmem:[#allocation2 + $0x50] sm:$0x1] }
  0x88   : > { %v1095_v21 = vrot.slane %v1094_v36, 4  ;;  %v1353_v12 = vunpack.c.l.b16 %v1090_v10  ;;  %830 = vst [vmem:[#allocation2 + $0x48] sm:$0xf] %v829_v27  ;;  %v712_v20 = vshll.u32 %v464_v9, 16  ;;  %v10966_v39 = vld [vmem:[%s10607_s24 + $0x74] sm:$0xf]  ;;  %v1369_v42 = vunpack.c.l.b16 %v1282_v22 }
  0x89   : > { %v951_v25 = vld [vmem:[#allocation2 + $0xa4] sm:$0x1]  ;;  %v570_v31 = vsel %vm10620_vm7, %v562_v49, %v569_v26  ;;  %v833_v35 = vsel %vm10589_vm4, %v571_v16, %v832_v32  ;;  %v10968_v40 = vrot.slane %v709_v24, 7  ;;  %v232_v54 = vld [vmem:[#allocation2 + $0x54] sm:$0x1]  ;;  %v717_v62 = vshrl.u32 %v10966_v39, 16 }
  0x8a   : > { %v1100_v29 = vsel %vm10695_vm13, %v1095_v21, %v1099_v58  ;;  %v1289_v30 = vshll.u32 %v951_v25, 16  ;;  %v934_v38 = vld [vmem:[#allocation2 + $0xac] sm:$0xf]  ;;  %831 = vst.msk [vmem:[#allocation2 + $0x4c] sm:$0xf] %vm199_vm1, %v570_v31  ;;  %v233_v33 = vsel %vm10589_vm4, 0, %v232_v54 }
  0x8b   : > { %v1354_v34 = vunpack.c.l.b16 %v1100_v29  ;;  %834 = vst [vmem:[#allocation2 + $0x50] sm:$0x1] %v833_v35  ;;  %v1303_v48 = vshll.u32 %v934_v38, 16  ;;  %v1307_v52 = vshrl.u32 %v934_v38, 16  ;;  %v714_v53 = vor.u32 %v712_v20, %v10968_v40  ;;  %v288_v36 = vld [vmem:[#allocation2 + $0x5c] sm:$0x1] }
  0x8c   : > { %v1291_v41 = vrot.slane %v1289_v30, 5  ;;  %v10408_v43 = vld [vmem:[#allocation2 + $0xa8] sm:$0xff]  ;;  %v720_v6 = vshll.u32 %v10966_v39, 16  ;;  %234 = vst [vmem:[#allocation2 + $0x54] sm:$0x1] %v233_v33  ;;  %v289_v20 = vsel %vm10649_vm9, 0, %v288_v36 }
  0x8d   : > { %v933_v45 = vld [vmem:[#allocation2 + $0xa8] sm:$0xf]  ;;  %v1380_v46 = vpack.c.b16 %v1354_v34, %v1353_v12  ;;  %9701 = vmatmul.msk.bf16.gmra.mxu3 %vm1391_vm10, %v10408_v43  ;;  %v888_v51 = vld [vmem:[#allocation2 + $0xb0] sm:$0x1]  ;;  %v1305_v59 = vrot.slane %v1303_v48, 5  ;;  %v1309_v61 = vrot.slane %v1307_v52, 4 }
  0x8e   : > { %v1294_v47 = vshrl.u32 %v933_v45, 16  ;;  %v1297_v37 = vshll.u32 %v933_v45, 16  ;;  %v1292_v50 = vsel %vm10695_vm13, %v1287_v23, %v1291_v41  ;;  %v889_v56 = vsel %vm10589_vm4, %v707_v60, %v888_v51  ;;  %v891_v58 = vld [vmem:[#allocation2 + $0xb4] sm:$0xf]  ;;  %v448_v26 = vld [vmem:[%s10607_s24 + $0x30] sm:$0xf] }
  0x8f   : > { %9612 = vmatmul.msk.bf16.gmra.mxu0 %vm1391_vm10, %v1380_v46  ;;  %v1370_v7 = vunpack.c.l.b16 %v1292_v50  ;;  %890 = vst [vmem:[#allocation2 + $0xb0] sm:$0x1] %v889_v56  ;;  %v917_v1 = vld [vmem:[#allocation2 + $0x48] sm:$0xf]  ;;  %v892_v4 = vsel %vm10630_vm8, %v714_v53, %v891_v58  ;;  %v10985_v60 = vrot.slane %v717_v62, 7  ;;  %v1310_v8 = vor.u32 %v1309_v61, %v1305_v59 }
  0x90   : > { %v1296_v44 = vrot.slane %v1294_v47, 4  ;;  %v1299_v57 = vrot.slane %v1297_v37, 5  ;;  %v1102_v5 = vshrl.u32 %v917_v1, 16  ;;  %v1105_v0 = vshll.u32 %v917_v1, 16  ;;  %893 = vst [vmem:[#allocation2 + $0xb4] sm:$0xf] %v892_v4 }
  0x91   : > { %v1388_v63 = vpack.c.b16 %v1370_v7, %v1369_v42  ;;  %v10989_v49 = vld [vmem:[#allocation2 + $0x4c] sm:$0xf]  ;;  %v715_v23 = vrot.slane %v10968_v40, 4  ;;  %v449_v16 = vld [vmem:[%s10607_s24 + $0x34] sm:$0xf]  ;;  %v1311_v29 = vrot.slane %v1310_v8, 4  ;;  %v722_v32 = vor.u32 %v720_v6, %v10985_v60 }
  0x92   : > { %v1300_v2 = vor.u32 %v1299_v57, %v1296_v44  ;;  %v10400_v9 = vld [vmem:[#allocation2 + $0x48] sm:$0xff]  ;;  %v10991_v10 = vld [vmem:[#allocation2 + $0x50] sm:$0x1]  ;;  %v1104_v11 = vrot.slane %v1102_v5, 4  ;;  %v1107_v15 = vrot.slane %v1105_v0, 5  ;;  %v1111_v18 = vshll.u32 %v10989_v49, 16 }
  0x93   : > { %9620 = vmatmul.msk.bf16.gmra.mxu2 %vm1391_vm10, %v1388_v63  ;;  %v1115_v19 = vshrl.u32 %v10989_v49, 16  ;;  %v1121_v21 = vshll.u32 %v10991_v10, 16  ;;  %9693 = vmatmul.msk.bf16.gmra.mxu1 %vm1391_vm10, %v10400_v9  ;;  %v312_v34 = vld [vmem:[#allocation2 + $0xbc] sm:$0x1]  ;;  %290 = vst [vmem:[#allocation2 + $0x5c] sm:$0x1] %v289_v20  ;;  %v723_v40 = vsel %vm10620_vm7, %v715_v23, %v722_v32 }
  0x94   : > { %v1301_v55 = vrot.slane %v1300_v2, 4  ;;  %v1108_v24 = vor.u32 %v1107_v15, %v1104_v11  ;;  %v1113_v12 = vrot.slane %v1111_v18, 5  ;;  %v573_v41 = vshrl.u32 %v448_v26, 16  ;;  %894 = vst.msk [vmem:[#allocation2 + $0xb8] sm:$0xf] %vm199_vm1, %v723_v40 }
  0x95   : > { %v1117_v25 = vrot.slane %v1115_v19, 4  ;;  %v1123_v38 = vrot.slane %v1121_v21, 5  ;;  %v576_v42 = vshll.u32 %v448_v26, 16  ;;  %v581_v43 = vshrl.u32 %v449_v16, 16  ;;  %v835_v56 = vld [vmem:[#allocation2 + $0x54] sm:$0xf] }
  0x96   : > { %v1306_v22 = vsel %vm10695_vm13, %v1301_v55, %v1305_v59  ;;  %v952_v27 = vld [vmem:[#allocation2 + $0xb0] sm:$0x1]  ;;  %v1109_v31 = vrot.slane %v1108_v24, 4  ;;  %v584_v48 = vshll.u32 %v449_v16, 16  ;;  %v575_v51 = vrot.slane %v573_v41, 7 }
  0x97   : > { %v1371_v30 = vunpack.c.l.b16 %v1306_v22  ;;  %v1118_v35 = vor.u32 %v1117_v25, %v1113_v12  ;;  %v1313_v39 = vshll.u32 %v952_v27, 16  ;;  %v935_v45 = vld [vmem:[#allocation2 + $0xb4] sm:$0xf]  ;;  %v583_v52 = vrot.slane %v581_v43, 7  ;;  %v2424_v21 = vld [vmem:[#allocation2 + $0xc] sm:$0xf] }
  0x98   : > { %v1114_v46 = vsel %vm10695_vm13, %v1109_v31, %v1113_v12  ;;  %v313_v53 = vsel %vm10649_vm9, 0, %v312_v34  ;;  %v1318_v44 = vshrl.u32 %v935_v45, 16  ;;  %v1321_v57 = vshll.u32 %v935_v45, 16  ;;  %v11029_v23 = vld [vmem:[#allocation2 + $0x10] sm:$0xf] }
  0x99   : > { %v1119_v47 = vrot.slane %v1118_v35, 4  ;;  %v1315_v37 = vrot.slane %v1313_v39, 5  ;;  %v1355_v50 = vunpack.c.l.b16 %v1114_v46  ;;  %314 = vst [vmem:[#allocation2 + $0xbc] sm:$0x1] %v313_v53  ;;  %v578_v61 = vor.u32 %v576_v42, %v575_v51  ;;  %v9867_v27 = vld [vmem:[%s14737_s1 + $0xc] sm:$0x3] }
  0x9a   : > { %v579_v62 = vrot.slane %v575_v51, 4  ;;  %v586_v63 = vor.u32 %v584_v48, %v583_v52  ;;  %v588_v1 = vrot.slane %v583_v52, 4  ;;  %v1320_v2 = vrot.slane %v1318_v44, 4  ;;  %v839_v0 = vld [vmem:[#allocation2 + $0x5c] sm:$0x1] }
  0x9b   : > { %v1124_v54 = vsel %vm10695_vm13, %v1119_v47, %v1123_v38  ;;  %v1316_v7 = vsel %vm10695_vm13, %v1311_v29, %v1315_v37  ;;  %v836_v5 = vsel %vm10630_vm8, %v578_v61, %v835_v56  ;;  %v1323_v6 = vrot.slane %v1321_v57, 5  ;;  %v10409_v9 = vld [vmem:[#allocation2 + $0xb4] sm:$0xff]  ;;  %v9948_v56 = vld [vmem:[%s14737_s1 + $0xe] sm:$0x3] }
  0x9c   : > { %v1356_v58 = vunpack.c.l.b16 %v1124_v54  ;;  %v1372_v59 = vunpack.c.l.b16 %v1316_v7  ;;  %v724_v36 = vrot.slane %v10985_v60, 4  ;;  %v587_v55 = vsel %vm10620_vm7, %v579_v62, %v586_v63  ;;  %837 = vst [vmem:[#allocation2 + $0x54] sm:$0xf] %v836_v5  ;;  %v936_v11 = vld [vmem:[#allocation2 + $0xb8] sm:$0xf] }
  0x9d   : > { %v840_v8 = vsel %vm10589_vm4, %v588_v1, %v839_v0  ;;  %838 = vst.msk [vmem:[#allocation2 + $0x58] sm:$0xf] %vm199_vm1, %v587_v55  ;;  %v1327_v15 = vshll.u32 %v936_v11, 16  ;;  %v1331_v18 = vshrl.u32 %v936_v11, 16  ;;  %9702 = vmatmul.msk.bf16.gmra.mxu3 %vm1391_vm10, %v10409_v9  ;;  %v1324_v19 = vor.u32 %v1323_v6, %v1320_v2  ;;  %v9850_v62 = vld [vmem:[%s14737_s1 + $0xa] sm:$0x3] }
  0x9e   : > { %v1381_v4 = vpack.c.b16 %v1356_v58, %v1355_v50  ;;  %v1389_v33 = vpack.c.b16 %v1372_v59, %v1371_v30  ;;  %841 = vst [vmem:[#allocation2 + $0x5c] sm:$0x1] %v840_v8  ;;  %v2473_v26 = vshrl.u32 %v2424_v21, 16  ;;  %v2476_v32 = vshll.u32 %v2424_v21, 16  ;;  %v11047_v50 = vld [vmem:[#allocation2 + $0x14] sm:$0x1] }
  0x9f   : > { %v1329_v24 = vrot.slane %v1327_v15, 5  ;;  %v1333_v12 = vrot.slane %v1331_v18, 4  ;;  %v1325_v30 = vrot.slane %v1324_v19, 4  ;;  %v2482_v20 = vshll.u32 %v11029_v23, 16  ;;  %v10410_v9 = vld [vmem:[#allocation2 + $0xc] sm:$0xff] }
  0xa0   : > { %9613 = vmatmul.msk.bf16.gmra.mxu0 %vm1391_vm10, %v1381_v4  ;;  %v895_v60 = vld [vmem:[#allocation2 + $0xbc] sm:$0x1]  ;;  %v1673_v16 = vpop.f32.mrf.mxu1  ;;  %v3672_v34 = vsel %vm1440_vm0, %v9867_v27, 0  ;;  %v2486_v40 = vshrl.u32 %v11029_v23, 16  ;;  %v2475_v51 = vrot.slane %v2473_v26, 4  ;;  %v2478_v54 = vrot.slane %v2476_v32, 5 }
  0xa1   : > { %v896_v22 = vsel %vm10589_vm4, %v724_v36, %v895_v60  ;;  %3681 = vmatpush.bf16.msra.mxu2 %v3672_v34  ;;  %v1334_v45 = vor.u32 %v1333_v12, %v1329_v24  ;;  %v1330_v58 = vsel %vm10695_vm13, %v1325_v30, %v1329_v24  ;;  %v2484_v59 = vrot.slane %v2482_v20, 5  ;;  %v1753_v30 = vld [vmem:[#allocation2] sm:$0xe]  ;;  %v10505_v32 = vld [vmem:[#allocation2 + $0x4] sm:$0xf] }
  0xa2   : > { %897 = vst [vmem:[#allocation2 + $0xbc] sm:$0x1] %v896_v22  ;;  %v2488_v61 = vrot.slane %v2486_v40, 4  ;;  %v4326_v6 = vsel %vm1440_vm0, %v9948_v56, 0  ;;  %v2492_v11 = vshll.u32 %v11047_v50, 16  ;;  %v3385_v15 = vsel %vm1440_vm0, %v9850_v62, 0 }
  0xa3   : > { %9621 = vmatmul.msk.bf16.gmra.mxu2 %vm1391_vm10, %v1389_v33  ;;  %v919_v29 = vld [vmem:[#allocation2 + $0x54] sm:$0xf]  ;;  %v1335_v2 = vrot.slane %v1334_v45, 4  ;;  %v9981_v33 = vld [vmem:[%s14737_s1 + $0x10] sm:$0x3]  ;;  %4335 = vmatpush.bf16.msra.mxu3 %v4326_v6  ;;  %v1373_v60 = vunpack.c.l.b16 %v1330_v58  ;;  %v2479_v19 = vor.u32 %v2478_v54, %v2475_v51  ;;  %v1806_v20 = vrot.slane %v10505_v32, 5 }
  0xa4   : > { %v11038_v31 = vld [vmem:[#allocation2 + $0x58] sm:$0xf]  ;;  %v1126_v35 = vshrl.u32 %v919_v29, 16  ;;  %v1129_v38 = vshll.u32 %v919_v29, 16  ;;  %3394 = vmatpush.bf16.msrb.mxu1 %v3385_v15  ;;  %v4724_v21 = vsel %vm1440_vm0, %v9981_v33, 0  ;;  %v2489_v26 = vor.u32 %v2488_v61, %v2484_v59 }
  0xa5   : > { %v10401_v39 = vld [vmem:[#allocation2 + $0x54] sm:$0xff]  ;;  %v11041_v41 = vld [vmem:[#allocation2 + $0x5c] sm:$0x1]  ;;  %v1135_v42 = vshll.u32 %v11038_v31, 16  ;;  %v1139_v43 = vshrl.u32 %v11038_v31, 16  ;;  %4733 = vmatpush.bf16.msra.mxu0 %v4724_v21  ;;  %v2480_v40 = vrot.slane %v2479_v19, 4 }
  0xa6   : > { %v1128_v46 = vrot.slane %v1126_v35, 4  ;;  %v1131_v47 = vrot.slane %v1129_v38, 5  ;;  %v1145_v37 = vshll.u32 %v11041_v41, 16  ;;  %9694 = vmatmul.msk.bf16.gmra.mxu1 %vm1391_vm10, %v10401_v39  ;;  %v2494_v38 = vrot.slane %v2492_v11, 5  ;;  %v2427_v54 = vld [vmem:[#allocation2 + $0x18] sm:$0xf] }
  0xa7   : > { %v1137_v52 = vrot.slane %v1135_v42, 5  ;;  %v1141_v53 = vrot.slane %v1139_v43, 4  ;;  %v2490_v42 = vrot.slane %v2489_v26, 4  ;;  %v9703_v43 = vrot.slane %v1753_v30, 9  ;;  %v10411_v26 = vld [vmem:[#allocation2 + $0x18] sm:$0xff] }
  0xa8   : > { %v11031_v25 = vpop.f32.mrf.mxu3  ;;  %v1132_v44 = vor.u32 %v1131_v47, %v1128_v46  ;;  %v1147_v1 = vrot.slane %v1145_v37, 5  ;;  %v11065_v36 = vpop.f32.mrf.mxu1  ;;  %v3176_v45 = vrot.slane %v11029_v23, 5  ;;  %v10506_v46 = vld [vmem:[#allocation2 + $0x8] sm:$0x1]  ;;  %v3179_v51 = vrot.slane %v11047_v50, 5 }
  0xa9   : > { %v953_v57 = vld [vmem:[#allocation2 + $0xbc] sm:$0x1]  ;;  %v1142_v63 = vor.u32 %v1141_v53, %v1137_v52  ;;  %v1809_v47 = vrot.slane %v10506_v46, 5  ;;  %v1808_v53 = vrot.slane %v1806_v20, 4  ;;  %v11095_v61 = vsel %vm10695_vm13, %v2480_v40, %v2484_v59  ;;  %v1754_v40 = vld [vmem:[#allocation2 + $0xc] sm:$0xe] }
  0xaa   : > { %v1337_v4 = vshll.u32 %v953_v57, 16  ;;  %v1133_v5 = vrot.slane %v1132_v44, 4  ;;  %v2428_v23 = vld [vmem:[#allocation2 + $0x1c] sm:$0xf]  ;;  %v3178_v44 = vrot.slane %v3176_v45, 4  ;;  %14791 = vst [vmem:[#allocation7_spill] sm:$0xff] %v11095_v61  ;;  %v11099_v62 = vsel %vm10695_vm13, %v2490_v42, %v2494_v38 }
  0xab   : > { %v1143_v55 = vrot.slane %v1142_v63, 4  ;;  %14792 = vst [vmem:[#allocation8_spill] sm:$0xff] %v11099_v62  ;;  %v1807_v50 = vsel %vm11082_vm2, %v9703_v43, %v1806_v20  ;;  %v2510_v6 = vshrl.u32 %v2428_v23, 16  ;;  %v3183_v30 = vrot.slane %v2428_v23, 5  ;;  %v10507_v42 = vld [vmem:[#allocation2 + $0x10] sm:$0xf] }
  0xac   : > { %v1339_v8 = vrot.slane %v1337_v4, 5  ;;  %v1138_v18 = vsel %vm10695_vm13, %v1133_v5, %v1137_v52  ;;  %v3180_v63 = vsel %vm11082_vm2, %v3178_v44, %v3179_v51  ;;  %v2506_v4 = vshll.u32 %v2428_v23, 16  ;;  %v2430_v44 = vld [vmem:[#allocation2 + $0x24] sm:$0xf] }
  0xad   : > { %v1453_v48 = vpop.f32.mrf.mxu0  ;;  %v1148_v22 = vsel %vm10695_vm13, %v1143_v55, %v1147_v1  ;;  %v1357_v24 = vunpack.c.l.b16 %v1138_v18  ;;  %9801 = vmatmul.msk.bf16.vlgmr.msrb.gmra.mxu3 %vm1391_vm10, %v10410_v9  ;;  %v2497_v1 = vshrl.u32 %v2427_v54, 16  ;;  %v3289_v33 = vunpack.c.l.b16 %v3180_v63  ;;  %v2429_v18 = vld [vmem:[#allocation2 + $0x20] sm:$0x1] }
  0xae   : > { %v11049_v7 = vadd.f32 %v1673_v16, %v1453_v48  ;;  %v1340_v12 = vsel %vm10695_vm13, %v1335_v2, %v1339_v8  ;;  %v3110_v16 = vld [vmem:[#allocation2 + $0xc] sm:$0xe]  ;;  %v1358_v27 = vunpack.c.l.b16 %v1148_v22  ;;  %v2500_v2 = vshll.u32 %v2427_v54, 16 }
  0xaf   : > { %v1374_v29 = vunpack.c.l.b16 %v1340_v12  ;;  %v9834_v39 = vrot.slane %v3110_v16, 9  ;;  %v1810_v5 = vsel %vm11082_vm2, %v1808_v53, %v1809_v47  ;;  %v2890_v8 = vunpack.c.l.b16 %v11095_v61  ;;  %v3111_v12 = vld [vmem:[#allocation2 + $0x18] sm:$0xe]  ;;  %v10415_v61 = vld [vmem:[#allocation2 + $0x48] sm:$0xff] }
  0xb0   : > { %v11062_v0 = vpop.f32.mrf.mxu3  ;;  %v1382_v34 = vpack.c.b16 %v1358_v27, %v1357_v24  ;;  %v2891_v9 = vunpack.c.l.b16 %v11099_v62  ;;  %v1918_v11 = vunpack.c.l.b16 %v1807_v50  ;;  %v2499_v19 = vrot.slane %v2497_v1, 4 }
  0xb1   : > { %14788 = vst [vmem:[#allocation6_spill] sm:$0xff] %v11062_v0  ;;  %v1390_v35 = vpack.c.b16 %v1374_v29, %v1373_v60  ;;  %v3177_v56 = vsel %vm11082_vm2, %v9834_v39, %v3176_v45  ;;  %v1919_v60 = vunpack.c.l.b16 %v1810_v5  ;;  %v2502_v21 = vrot.slane %v2500_v2, 5  ;;  %v10508_v2 = vld [vmem:[#allocation2 + $0x14] sm:$0x1] }
  0xb2   : > { %9614 = vmatmul.msk.bf16.gmra.mxu0 %vm1391_vm10, %v1382_v34  ;;  %v3288_v58 = vunpack.c.l.b16 %v3177_v56  ;;  %v2508_v22 = vrot.slane %v2506_v4, 5  ;;  %v2512_v16 = vrot.slane %v2510_v6, 4  ;;  %v9835_v29 = vrot.slane %v3111_v12, 9 }
  0xb3   : > { %9622 = vmatmul.msk.bf16.gmra.mxu2 %vm1391_vm10, %v1390_v35  ;;  %v3186_v32 = vrot.slane %v2429_v18, 5  ;;  %v2922_v20 = vpack.c.b16 %v2891_v9, %v2890_v8  ;;  %v1950_v34 = vpack.c.b16 %v1919_v60, %v1918_v11  ;;  %v2503_v38 = vor.u32 %v2502_v21, %v2499_v19 }
  0xb4   : > { %v3320_v55 = vpack.c.b16 %v3289_v33, %v3288_v58  ;;  %v2516_v39 = vshll.u32 %v2429_v18, 16  ;;  %v1813_v43 = vrot.slane %v10507_v42, 5  ;;  %v2513_v45 = vor.u32 %v2512_v16, %v2508_v22  ;;  %v2431_v33 = vld [vmem:[#allocation2 + $0x28] sm:$0xf] }
  0xb5   : > { %v11091_v57 = vpop.f32.mrf.mxu0  ;;  %v3184_v47 = vsel %vm11082_vm2, %v9835_v29, %v3183_v30  ;;  %v9704_v54 = vrot.slane %v1754_v40, 9  ;;  %v2504_v50 = vrot.slane %v2503_v38, 4  ;;  %v1816_v4 = vrot.slane %v10508_v2, 5  ;;  %v3112_v38 = vld [vmem:[#allocation2 + $0x24] sm:$0xe] }
  0xb6   : > { %v1678_v52 = vpop.f32.mrf.mxu1  ;;  %9851 = vmatmul.msk.bf16.vlgmr.msrb.gmra.mxu1 %vm1391_vm10, %v3320_v55  ;;  %v2518_v23 = vrot.slane %v2516_v39, 5  ;;  %v3290_v58 = vunpack.c.l.b16 %v3184_v47  ;;  %v2514_v63 = vrot.slane %v2513_v45, 4  ;;  %v1815_v1 = vrot.slane %v1813_v43, 4  ;;  %v10412_v39 = vld [vmem:[#allocation2 + $0x24] sm:$0xff] }
  0xb7   : > { %v1814_v5 = vsel %vm11082_vm2, %v9704_v54, %v1813_v43  ;;  %v2521_v6 = vshrl.u32 %v2430_v44, 16  ;;  %v2530_v8 = vshll.u32 %v2431_v33, 16  ;;  %v11134_v11 = vsel %vm10695_vm13, %v2504_v50, %v2508_v22  ;;  %v10509_v50 = vld [vmem:[#allocation2 + $0x1c] sm:$0xf] }
  0xb8   : > { %v11086_v48 = vpop.f32.mrf.mxu3  ;;  %14794 = vst [vmem:[#allocation10_spill] sm:$0xff] %v11134_v11  ;;  %v11138_v18 = vsel %vm10695_vm13, %v2514_v63, %v2518_v23  ;;  %v1817_v60 = vsel %vm11082_vm2, %v1815_v1, %v1816_v4  ;;  %v2534_v21 = vshrl.u32 %v2431_v33, 16  ;;  %v1920_v12 = vunpack.c.l.b16 %v1814_v5 }
  0xb9   : > { %14795 = vst [vmem:[#allocation11_spill] sm:$0xff] %v11138_v18  ;;  %v2523_v29 = vrot.slane %v2521_v6, 4  ;;  %v2892_v22 = vunpack.c.l.b16 %v11134_v11  ;;  %v9836_v42 = vrot.slane %v3112_v38, 9  ;;  %v1820_v63 = vrot.slane %v10509_v50, 5  ;;  %v10514_v11 = vld [vmem:[#allocation2 + $0x38] sm:$0x1] }
  0xba   : > { %v2536_v40 = vrot.slane %v2534_v21, 4 }
  0xbd   : > { %9802 = vmatmul.msk.bf16.gmra.mxu3 %vm1391_vm10, %v10411_v26 }
  0xbe   : > { %v1493_v59 = vpop.f32.mrf.mxu2  ;;  %v11115_v27 = vpop.f32.mrf.mxu1 }
  0xbf   : > { %v11110_v15 = vadd.f32 %v11031_v25, %v1493_v59  ;;  %v3185_v25 = vrot.slane %v3183_v30, 4  ;;  %v2524_v59 = vshll.u32 %v2430_v44, 16  ;;  %v1755_v44 = vld [vmem:[#allocation2 + $0x18] sm:$0xe] }
  0xc0   : > { %v11113_v24 = vpop.f32.mrf.mxu3  ;;  %v9705_v6 = vrot.slane %v1755_v44, 9 }
  0xc1   : > { %14793 = vst [vmem:[#allocation9_spill] sm:$0xff] %v11113_v24  ;;  %v3187_v51 = vsel %vm11082_vm2, %v3185_v25, %v3186_v32  ;;  %v2526_v30 = vrot.slane %v2524_v59, 5  ;;  %v3190_v32 = vrot.slane %v2431_v33, 5  ;;  %v1921_v25 = vunpack.c.l.b16 %v1817_v60 }
  0xc2   : > { %v1458_v35 = vpop.f32.mrf.mxu0  ;;  %9818 = vmatmul.msk.bf16.vlgmr.msrb.gmra.mxu0 %vm1391_vm10, %v2922_v20  ;;  %v2893_v20 = vunpack.c.l.b16 %v11138_v18 }
  0xc3   : > { %v11118_v46 = vadd.f32 %v1678_v52, %v1458_v35  ;;  %9720 = vmatmul.msk.bf16.vlgmr.msrb.gmra.mxu2 %vm1391_vm10, %v1950_v34  ;;  %v3291_v52 = vunpack.c.l.b16 %v3187_v51  ;;  %v2432_v34 = vld [vmem:[#allocation2 + $0x2c] sm:$0x1]  ;;  %v2532_v35 = vrot.slane %v2530_v8, 5  ;;  %v3192_v43 = vrot.slane %v3190_v32, 4  ;;  %v2433_v8 = vld [vmem:[#allocation2 + $0x30] sm:$0xf] }
  0xc4   : > { %v3193_v45 = vrot.slane %v2432_v34, 5  ;;  %v2527_v47 = vor.u32 %v2526_v30, %v2523_v29  ;;  %v2923_v51 = vpack.c.b16 %v2893_v20, %v2892_v22  ;;  %v1951_v54 = vpack.c.b16 %v1921_v25, %v1920_v12  ;;  %v10510_v29 = vld [vmem:[#allocation2 + $0x20] sm:$0x1] }
  0xc5   : > { %v3321_v9 = vpack.c.b16 %v3291_v52, %v3290_v58  ;;  %v2540_v23 = vshll.u32 %v2432_v34, 16  ;;  %v2537_v52 = vor.u32 %v2536_v40, %v2532_v35  ;;  %v3191_v1 = vsel %vm11082_vm2, %v9836_v42, %v3190_v32  ;;  %v2434_v32 = vld [vmem:[#allocation2 + $0x34] sm:$0xf] }
  0xc6   : > { %v11124_v53 = vpop.f32.mrf.mxu2  ;;  %v3194_v2 = vsel %vm11082_vm2, %v3192_v43, %v3193_v45  ;;  %v2528_v5 = vrot.slane %v2527_v47, 4  ;;  %v1823_v30 = vrot.slane %v10510_v29, 5  ;;  %v1821_v20 = vsel %vm11082_vm2, %v9705_v6, %v1820_v63  ;;  %v3113_v6 = vld [vmem:[#allocation2 + $0x30] sm:$0xe] }
  0xc7   : > { %9852 = vmatmul.msk.bf16.gmra.mxu1 %vm1391_vm10, %v3321_v9  ;;  %v3292_v9 = vunpack.c.l.b16 %v3191_v1  ;;  %v3293_v60 = vunpack.c.l.b16 %v3194_v2  ;;  %v2538_v21 = vrot.slane %v2537_v52, 4  ;;  %v2542_v12 = vrot.slane %v2540_v23, 5  ;;  %v2435_v2 = vld [vmem:[#allocation2 + $0x38] sm:$0x1] }
  0xc8   : > { %v11128_v56 = vpop.f32.mrf.mxu3  ;;  %v11167_v22 = vsel %vm10695_vm13, %v2528_v5, %v2532_v35  ;;  %v2545_v25 = vshrl.u32 %v2433_v8, 16  ;;  %v2548_v34 = vshll.u32 %v2433_v8, 16  ;;  %v2554_v38 = vshll.u32 %v2434_v32, 16  ;;  %v10413_v8 = vld [vmem:[#allocation2 + $0x30] sm:$0xff] }
  0xc9   : > { %v1683_v55 = vpop.f32.mrf.mxu1  ;;  %14799 = vst [vmem:[#allocation15_spill] sm:$0xff] %v11167_v22  ;;  %v3322_v40 = vpack.c.b16 %v3293_v60, %v3292_v9  ;;  %v11175_v42 = vsel %vm10695_vm13, %v2538_v21, %v2542_v12  ;;  %v2894_v35 = vunpack.c.l.b16 %v11167_v22  ;;  %v1922_v45 = vunpack.c.l.b16 %v1821_v20  ;;  %v10513_v22 = vld [vmem:[#allocation2 + $0x34] sm:$0xf] }
  0xca   : > { %v11142_v19 = vpop.f32.mrf.mxu0  ;;  %14800 = vst [vmem:[#allocation16_spill] sm:$0xff] %v11175_v42  ;;  %v2547_v44 = vrot.slane %v2545_v25, 4  ;;  %v2550_v52 = vrot.slane %v2548_v34, 5  ;;  %v3197_v50 = vrot.slane %v2434_v32, 5  ;;  %v9837_v9 = vrot.slane %v3113_v6, 9 }
  0xcb   : > { %v3200_v21 = vrot.slane %v2435_v2, 5  ;;  %v2436_v6 = vld [vmem:[#allocation2 + $0x3c] sm:$0xf]  ;;  %v1834_v18 = vrot.slane %v10513_v22, 5 }
  0xcc   : > { %v3199_v60 = vrot.slane %v3197_v50, 4  ;;  %v2551_v12 = vor.u32 %v2550_v52, %v2547_v44  ;;  %v3198_v34 = vsel %vm11082_vm2, %v9837_v9, %v3197_v50  ;;  %v2437_v9 = vld [vmem:[#allocation2 + $0x40] sm:$0xf] }
  0xcd   : > { %9803 = vmatmul.msk.bf16.gmra.mxu3 %vm1391_vm10, %v10412_v39  ;;  %v2558_v39 = vshrl.u32 %v2434_v32, 16  ;;  %v10511_v32 = vld [vmem:[#allocation2 + $0x28] sm:$0xf]  ;;  %v3294_v44 = vunpack.c.l.b16 %v3198_v34  ;;  %v2582_v34 = vshrl.u32 %v2437_v9, 16 }
  0xce   : > { %v1498_v26 = vpop.f32.mrf.mxu2  ;;  %v1827_v25 = vrot.slane %v10511_v32, 5  ;;  %v2578_v32 = vshll.u32 %v2437_v9, 16 }
  0xcf   : > { %v11145_v16 = vadd.f32 %v11086_v48, %v1498_v26  ;;  %v1822_v26 = vrot.slane %v1820_v63, 4  ;;  %v2895_v63 = vunpack.c.l.b16 %v11175_v42  ;;  %v2560_v5 = vrot.slane %v2558_v39, 4  ;;  %v1756_v39 = vld [vmem:[#allocation2 + $0x24] sm:$0xe] }
  0xd0   : > { %v11150_v48 = vpop.f32.mrf.mxu3  ;;  %v1829_v50 = vrot.slane %v1827_v25, 4 }
  0xd1   : > { %14796 = vst [vmem:[#allocation12_spill] sm:$0xff] %v11145_v16  ;;  %v11152_v58 = vpop.f32.mrf.mxu1  ;;  %v1824_v43 = vsel %vm11082_vm2, %v1822_v26, %v1823_v30  ;;  %v2924_v26 = vpack.c.b16 %v2895_v63, %v2894_v35  ;;  %v2564_v30 = vshll.u32 %v2435_v2, 16  ;;  %v10512_v2 = vld [vmem:[#allocation2 + $0x2c] sm:$0x1] }
  0xd2   : > { %14797 = vst [vmem:[#allocation13_spill] sm:$0xff] %v11150_v48  ;;  %9819 = vmatmul.msk.bf16.gmra.mxu0 %vm1391_vm10, %v2923_v51  ;;  %v1923_v1 = vunpack.c.l.b16 %v1824_v43  ;;  %v2552_v43 = vrot.slane %v2551_v12, 4  ;;  %v2569_v12 = vshrl.u32 %v2436_v6, 16 }
  0xd3   : > { %9721 = vmatmul.msk.bf16.gmra.mxu2 %vm1391_vm10, %v1951_v54 }
  0xd5   : > { %v1463_v33 = vpop.f32.mrf.mxu0 }
  0xd6   : > { %v11159_v4 = vpop.f32.mrf.mxu2  ;;  %v11163_v59 = vadd.f32 %v1683_v55, %v1463_v33  ;;  %v2556_v33 = vrot.slane %v2554_v38, 5  ;;  %v3201_v38 = vsel %vm11082_vm2, %v3199_v60, %v3200_v21 }
  0xd7   : > { %14798 = vst [vmem:[#allocation14_spill] sm:$0xff] %v11159_v4  ;;  %9853 = vmatmul.msk.bf16.gmra.mxu1 %vm1391_vm10, %v3322_v40  ;;  %v3295_v52 = vunpack.c.l.b16 %v3201_v38 }
  0xd8   : > { %v2561_v29 = vor.u32 %v2560_v5, %v2556_v33  ;;  %v1830_v5 = vrot.slane %v10512_v2, 5  ;;  %v11204_v60 = vsel %vm10695_vm13, %v2552_v43, %v2556_v33  ;;  %v2584_v2 = vrot.slane %v2582_v34, 4  ;;  %v1757_v34 = vld [vmem:[#allocation2 + $0x30] sm:$0xe] }
  0xd9   : > { %v11171_v55 = vpop.f32.mrf.mxu3  ;;  %14803 = vst [vmem:[#allocation19_spill] sm:$0xff] %v11204_v60  ;;  %v2896_v33 = vunpack.c.l.b16 %v11204_v60 }
  0xda   : > { %v2562_v35 = vrot.slane %v2561_v29, 4 }
  0xdb   : > { %v1688_v51 = vpop.f32.mrf.mxu1 }
  0xdd   : > { %v11180_v54 = vpop.f32.mrf.mxu0  ;;  %9804 = vmatmul.msk.bf16.gmra.mxu3 %vm1391_vm10, %v10413_v8 }
  0xde   : > { %v1503_v47 = vpop.f32.mrf.mxu2 }
  0xdf   : > { %v11183_v23 = vadd.f32 %v11128_v56, %v1503_v47  ;;  %v1952_v56 = vpack.c.b16 %v1923_v1, %v1922_v45  ;;  %v2566_v45 = vrot.slane %v2564_v30, 5  ;;  %v9706_v1 = vrot.slane %v1756_v39, 9 }
  0xe0   : > { %v1831_v30 = vsel %vm11082_vm2, %v1829_v50, %v1830_v5  ;;  %v3204_v39 = vrot.slane %v2437_v9, 5  ;;  %v2580_v50 = vrot.slane %v2578_v32, 5 }
  0xe1   : > { %14801 = vst [vmem:[#allocation17_spill] sm:$0xff] %v11183_v23  ;;  %v11187_v20 = vpop.f32.mrf.mxu3  ;;  %v11208_v21 = vsel %vm10695_vm13, %v2562_v35, %v2566_v45  ;;  %v1828_v29 = vsel %vm11082_vm2, %v9706_v1, %v1827_v25  ;;  %v1925_v35 = vunpack.c.l.b16 %v1831_v30  ;;  %v2571_v45 = vrot.slane %v2569_v12, 4  ;;  %v2438_v1 = vld [vmem:[#allocation2 + $0x44] sm:$0x1]  ;;  %v1760_v23 = vld [vmem:[#allocation2 + $0x54] sm:$0xe] }
  0xe2   : > { %9820 = vmatmul.msk.bf16.gmra.mxu0 %vm1391_vm10, %v2924_v26  ;;  %14804 = vst [vmem:[#allocation20_spill] sm:$0xff] %v11208_v21  ;;  %v2572_v26 = vshll.u32 %v2436_v6, 16  ;;  %v2897_v38 = vunpack.c.l.b16 %v11208_v21  ;;  %v1924_v43 = vunpack.c.l.b16 %v1828_v29  ;;  %v3206_v42 = vrot.slane %v3204_v39, 4 }
  0xe3   : > { %9722 = vmatmul.msk.bf16.gmra.mxu2 %vm1391_vm10, %v1952_v56  ;;  %v11198_v47 = vpop.f32.mrf.mxu1  ;;  %v3323_v56 = vpack.c.b16 %v3295_v52, %v3294_v44  ;;  %v3114_v44 = vld [vmem:[#allocation2 + $0x3c] sm:$0xe]  ;;  %v3207_v21 = vrot.slane %v2438_v1, 5  ;;  %v2588_v30 = vshll.u32 %v2438_v1, 16  ;;  %v1836_v1 = vrot.slane %v1834_v18, 4 }
  0xe4   : > { %v10414_v52 = vld [vmem:[#allocation2 + $0x3c] sm:$0xff]  ;;  %v9838_v5 = vrot.slane %v3114_v44, 9  ;;  %v2925_v29 = vpack.c.b16 %v2897_v38, %v2896_v33  ;;  %v1953_v12 = vpack.c.b16 %v1925_v35, %v1924_v43  ;;  %v1837_v33 = vrot.slane %v10514_v11, 5  ;;  %v2440_v43 = vld [vmem:[#allocation2 + $0x4c] sm:$0xf] }
  0xe5   : > { %v2590_v38 = vrot.slane %v2588_v30, 5 }
  0xe6   : > { %v11194_v40 = vpop.f32.mrf.mxu2  ;;  %v3205_v32 = vsel %vm11082_vm2, %v9838_v5, %v3204_v39  ;;  %v2602_v5 = vshll.u32 %v2440_v43, 16 }
  0xe7   : > { %14802 = vst [vmem:[#allocation18_spill] sm:$0xff] %v11194_v40  ;;  %v1468_v63 = vpop.f32.mrf.mxu0  ;;  %9854 = vmatmul.msk.bf16.gmra.mxu1 %vm1391_vm10, %v3323_v56  ;;  %v2585_v56 = vor.u32 %v2584_v2, %v2580_v50  ;;  %v3296_v35 = vunpack.c.l.b16 %v3205_v32 }
  0xe8   : > { %v11200_v8 = vadd.f32 %v1688_v51, %v1468_v63  ;;  %v2574_v63 = vrot.slane %v2572_v26, 5 }
  0xe9   : > { %v11214_v51 = vpop.f32.mrf.mxu3  ;;  %v2586_v39 = vrot.slane %v2585_v56, 4  ;;  %v1838_v56 = vsel %vm11082_vm2, %v1836_v1, %v1837_v33 }
  0xea   : > { %v2575_v26 = vor.u32 %v2574_v63, %v2571_v45 }
  0xec   : > { %v2576_v63 = vrot.slane %v2575_v26, 4  ;;  %v11244_v26 = vsel %vm10695_vm13, %v2586_v39, %v2590_v38  ;;  %v1927_v38 = vunpack.c.l.b16 %v1838_v56  ;;  %v2441_v39 = vld [vmem:[#allocation2 + $0x50] sm:$0x1] }
  0xed   : > { %9805 = vmatmul.msk.bf16.gmra.mxu3 %vm1391_vm10, %v10414_v52  ;;  %v9707_v52 = vrot.slane %v1757_v34, 9  ;;  %14808 = vst [vmem:[#allocation24_spill] sm:$0xff] %v11244_v26 }
  0xee   : > { %v1508_v25 = vpop.f32.mrf.mxu2  ;;  %v1693_v60 = vpop.f32.mrf.mxu1  ;;  %v11240_v30 = vsel %vm10695_vm13, %v2576_v63, %v2580_v50 }
  0xef   : > { %v11220_v6 = vadd.f32 %v11171_v55, %v1508_v25  ;;  %v11222_v9 = vpop.f32.mrf.mxu0  ;;  %v3208_v55 = vsel %vm11082_vm2, %v3206_v42, %v3207_v21  ;;  %v2439_v25 = vld [vmem:[#allocation2 + $0x48] sm:$0xf]  ;;  %14807 = vst [vmem:[#allocation23_spill] sm:$0xff] %v11240_v30  ;;  %v2898_v50 = vunpack.c.l.b16 %v11240_v30 }
  0xf0   : > { %v3297_v22 = vunpack.c.l.b16 %v3208_v55  ;;  %v2593_v2 = vshrl.u32 %v2439_v25, 16  ;;  %v2596_v11 = vshll.u32 %v2439_v25, 16  ;;  %v2604_v25 = vrot.slane %v2602_v5, 5 }
  0xf1   : > { %14805 = vst [vmem:[#allocation21_spill] sm:$0xff] %v11220_v6  ;;  %v11229_v44 = vpop.f32.mrf.mxu3 }
  0xf2   : > { %9821 = vmatmul.msk.bf16.gmra.mxu0 %vm1391_vm10, %v2925_v29  ;;  %v2606_v29 = vshrl.u32 %v2440_v43, 16  ;;  %v3324_v62 = vpack.c.b16 %v3297_v22, %v3296_v35  ;;  %v2595_v55 = vrot.slane %v2593_v2, 4  ;;  %v2598_v34 = vrot.slane %v2596_v11, 5 }
  0xf3   : > { %9723 = vmatmul.msk.bf16.gmra.mxu2 %vm1391_vm10, %v1953_v12  ;;  %v3211_v22 = vrot.slane %v2440_v43, 5  ;;  %v3214_v11 = vrot.slane %v2441_v39, 5 }
  0xf4   : > { %v2608_v35 = vrot.slane %v2606_v29, 4  ;;  %v2599_v2 = vor.u32 %v2598_v34, %v2595_v55  ;;  %v2612_v29 = vshll.u32 %v2441_v39, 16  ;;  %v10516_v55 = vld [vmem:[#allocation2 + $0x44] sm:$0x1] }
  0xf5   : > { %v3213_v43 = vrot.slane %v3211_v22, 4  ;;  %v1844_v34 = vrot.slane %v10516_v55, 5 }
  0xf6   : > { %v1510_v45 = vpop.f32.mrf.mxu2  ;;  %v11236_v21 = vpop.f32.mrf.mxu1  ;;  %v2609_v5 = vor.u32 %v2608_v35, %v2604_v25  ;;  %v2600_v35 = vrot.slane %v2599_v2, 4 }
  0xf7   : > { %v11234_v42 = vadd.f32 %v11187_v20, %v1510_v45  ;;  %v1835_v20 = vsel %vm11082_vm2, %v9707_v52, %v1834_v18  ;;  %v2899_v45 = vunpack.c.l.b16 %v11244_v26  ;;  %9855 = vmatmul.msk.bf16.gmra.mxu1 %vm1391_vm10, %v3324_v62  ;;  %v3115_v18 = vld [vmem:[#allocation2 + $0x48] sm:$0xe]  ;;  %v1758_v62 = vld [vmem:[#allocation2 + $0x3c] sm:$0xe] }
  0xf8   : > { %v1926_v63 = vunpack.c.l.b16 %v1835_v20  ;;  %v10515_v20 = vld [vmem:[#allocation2 + $0x40] sm:$0xf]  ;;  %v2610_v39 = vrot.slane %v2609_v5, 4 }
  0xf9   : > { %14806 = vst [vmem:[#allocation22_spill] sm:$0xff] %v11234_v42  ;;  %v1841_v56 = vrot.slane %v10515_v20, 5  ;;  %v2926_v26 = vpack.c.b16 %v2899_v45, %v2898_v50  ;;  %v2442_v50 = vld [vmem:[#allocation2 + $0x54] sm:$0xf] }
  0xfa   : > { %v1473_v12 = vpop.f32.mrf.mxu0  ;;  %v1954_v30 = vpack.c.b16 %v1927_v38, %v1926_v63  ;;  %v2443_v38 = vld [vmem:[#allocation2 + $0x58] sm:$0xf]  ;;  %v2620_v5 = vshll.u32 %v2442_v50, 16 }
  0xfb   : > { %v11250_v32 = vadd.f32 %v1693_v60, %v1473_v12  ;;  %v9839_v60 = vrot.slane %v3115_v18, 9  ;;  %v1843_v20 = vrot.slane %v1841_v56, 4 }
  0xfd   : > { %v11255_v33 = vpop.f32.mrf.mxu3  ;;  %9806 = vmatmul.msk.bf16.gmra.mxu3 %vm1391_vm10, %v10415_v61  ;;  %v3212_v18 = vsel %vm11082_vm2, %v9839_v60, %v3211_v22  ;;  %v11274_v60 = vsel %vm10695_vm13, %v2600_v35, %v2604_v25 }
  0xfe   : > { %v3298_v45 = vunpack.c.l.b16 %v3212_v18  ;;  %14811 = vst [vmem:[#allocation27_spill] sm:$0xff] %v11274_v60 }
  0xff   : > { %v1513_v52 = vpop.f32.mrf.mxu2 }
 0x100   : > { %v11258_v1 = vadd.f32 %v11214_v51, %v1513_v52  ;;  %v1698_v12 = vpop.f32.mrf.mxu1  ;;  %v3215_v51 = vsel %vm11082_vm2, %v3213_v43, %v3214_v11  ;;  %v2614_v52 = vrot.slane %v2612_v29, 5  ;;  %v2617_v11 = vshrl.u32 %v2442_v50, 16 }
 0x101   : > { %v3299_v61 = vunpack.c.l.b16 %v3215_v51  ;;  %v2630_v29 = vshrl.u32 %v2443_v38, 16  ;;  %v2900_v51 = vunpack.c.l.b16 %v11274_v60  ;;  %v3218_v50 = vrot.slane %v2443_v38, 5 }
 0x102   : > { %14809 = vst [vmem:[#allocation25_spill] sm:$0xff] %v11258_v1  ;;  %v11260_v42 = vpop.f32.mrf.mxu0  ;;  %v9708_v1 = vrot.slane %v1758_v62, 9  ;;  %9822 = vmatmul.msk.bf16.gmra.mxu0 %vm1391_vm10, %v2926_v26  ;;  %v11278_v2 = vsel %vm10695_vm13, %v2610_v39, %v2614_v52  ;;  %v1845_v26 = vsel %vm11082_vm2, %v1843_v20, %v1844_v34  ;;  %v3116_v20 = vld [vmem:[#allocation2 + $0x54] sm:$0xe] }
 0x103   : > { %9724 = vmatmul.msk.bf16.gmra.mxu2 %vm1391_vm10, %v1954_v30  ;;  %14812 = vst [vmem:[#allocation28_spill] sm:$0xff] %v11278_v2  ;;  %v3325_v62 = vpack.c.b16 %v3299_v61, %v3298_v45  ;;  %v2901_v55 = vunpack.c.l.b16 %v11278_v2  ;;  %v1929_v52 = vunpack.c.l.b16 %v1845_v26  ;;  %v2632_v34 = vrot.slane %v2630_v29, 4  ;;  %v10416_v45 = vld [vmem:[#allocation2 + $0x54] sm:$0xff]  ;;  %v2444_v61 = vld [vmem:[#allocation2 + $0x5c] sm:$0x1] }
 0x104   : > { %v1842_v30 = vsel %vm11082_vm2, %v9708_v1, %v1841_v56  ;;  %v2619_v1 = vrot.slane %v2617_v11, 4  ;;  %v2622_v56 = vrot.slane %v2620_v5, 5  ;;  %v3220_v6 = vrot.slane %v3218_v50, 4  ;;  %v1759_v29 = vld [vmem:[#allocation2 + $0x48] sm:$0xe] }
 0x105   : > { %v11280_v43 = vpop.f32.mrf.mxu3  ;;  %v1928_v39 = vunpack.c.l.b16 %v1842_v30  ;;  %v3221_v48 = vrot.slane %v2444_v61, 5  ;;  %v2927_v60 = vpack.c.b16 %v2901_v55, %v2900_v51  ;;  %v2636_v26 = vshll.u32 %v2444_v61, 16  ;;  %v2445_v51 = vld [vmem:[#allocation2 + $0x60] sm:$0xf] }
 0x106   : > { %v2623_v2 = vor.u32 %v2622_v56, %v2619_v1  ;;  %v1848_v11 = vrot.slane %v10989_v49, 5 }
 0x107   : > { %v1515_v63 = vpop.f32.mrf.mxu2  ;;  %9856 = vmatmul.msk.bf16.gmra.mxu1 %vm1391_vm10, %v3325_v62  ;;  %v1955_v40 = vpack.c.b16 %v1929_v52, %v1928_v39  ;;  %v1851_v62 = vrot.slane %v10991_v10, 5  ;;  %v2446_v52 = vld [vmem:[#allocation2 + $0x64] sm:$0xf]  ;;  %v2644_v10 = vshll.u32 %v2445_v51, 16 }
 0x108   : > { %v11270_v22 = vadd.f32 %v11229_v44, %v1515_v63  ;;  %v2626_v44 = vshll.u32 %v2443_v38, 16  ;;  %v11286_v18 = vpop.f32.mrf.mxu1  ;;  %v3222_v38 = vsel %vm11082_vm2, %v3220_v6, %v3221_v48  ;;  %v2624_v39 = vrot.slane %v2623_v2, 4 }
 0x109   : > { %v2638_v48 = vrot.slane %v2636_v26, 5  ;;  %v9709_v6 = vrot.slane %v1759_v29, 9  ;;  %v2646_v26 = vrot.slane %v2644_v10, 5 }
 0x10a   : > { %14810 = vst [vmem:[#allocation26_spill] sm:$0xff] %v11270_v22  ;;  %v2628_v63 = vrot.slane %v2626_v44, 5  ;;  %v9840_v22 = vrot.slane %v3116_v20, 9  ;;  %v2641_v20 = vshrl.u32 %v2445_v51, 16  ;;  %v3225_v51 = vrot.slane %v2446_v52, 5 }
 0x10c   : > { %v1478_v25 = vpop.f32.mrf.mxu0  ;;  %v3219_v5 = vsel %vm11082_vm2, %v9840_v22, %v3218_v50  ;;  %v3301_v22 = vunpack.c.l.b16 %v3222_v38  ;;  %v2650_v50 = vshll.u32 %v2446_v52, 16 }
 0x10d   : > { %v11290_v35 = vadd.f32 %v1698_v12, %v1478_v25  ;;  %v2633_v12 = vor.u32 %v2632_v34, %v2628_v63  ;;  %9807 = vmatmul.msk.bf16.gmra.mxu3 %vm1391_vm10, %v10416_v45  ;;  %v3300_v1 = vunpack.c.l.b16 %v3219_v5  ;;  %v1850_v34 = vrot.slane %v1848_v11, 4 }
 0x10e   : > { %v2654_v45 = vshrl.u32 %v2446_v52, 16  ;;  %v2652_v38 = vrot.slane %v2650_v50, 5  ;;  %v3227_v50 = vrot.slane %v3225_v51, 4 }
 0x10f   : > { %v2634_v49 = vrot.slane %v2633_v12, 4  ;;  %v3326_v61 = vpack.c.b16 %v3301_v22, %v3300_v1  ;;  %v1852_v2 = vsel %vm11082_vm2, %v1850_v34, %v1851_v62  ;;  %v2643_v12 = vrot.slane %v2641_v20, 4  ;;  %v10417_v34 = vld [vmem:[#allocation2 + $0x60] sm:$0xff] }
 0x110   : > { %v11294_v30 = vpop.f32.mrf.mxu3  ;;  %v1703_v25 = vpop.f32.mrf.mxu1  ;;  %v2656_v29 = vrot.slane %v2654_v45, 4  ;;  %v1931_v22 = vunpack.c.l.b16 %v1852_v2 }
 0x111   : > { %v2647_v52 = vor.u32 %v2646_v26, %v2643_v12 }
 0x112   : > { %9823 = vmatmul.msk.bf16.gmra.mxu0 %vm1391_vm10, %v2927_v60  ;;  %v11315_v60 = vsel %vm10695_vm13, %v2634_v49, %v2638_v48  ;;  %v2447_v48 = vld [vmem:[#allocation2 + $0x68] sm:$0x1] }
 0x113   : > { %9725 = vmatmul.msk.bf16.gmra.mxu2 %vm1391_vm10, %v1955_v40  ;;  %v11311_v40 = vsel %vm10695_vm13, %v2624_v39, %v2628_v63  ;;  %14815 = vst [vmem:[#allocation31_spill] sm:$0xff] %v11315_v60  ;;  %v2903_v49 = vunpack.c.l.b16 %v11315_v60  ;;  %v3228_v45 = vrot.slane %v2447_v48, 5  ;;  %v2648_v12 = vrot.slane %v2647_v52, 4 }
 0x114   : > { %v11301_v44 = vpop.f32.mrf.mxu0  ;;  %14814 = vst [vmem:[#allocation30_spill] sm:$0xff] %v11311_v40  ;;  %v2902_v39 = vunpack.c.l.b16 %v11311_v40  ;;  %v2657_v40 = vor.u32 %v2656_v29, %v2652_v38  ;;  %v9710_v29 = vrot.slane %v1760_v23, 9 }
 0x115   : > { %v11349_v23 = vsel %vm10695_vm13, %v2648_v12, %v2652_v38 }
 0x116   : > { %v1518_v55 = vpop.f32.mrf.mxu2  ;;  %v2928_v2 = vpack.c.b16 %v2903_v49, %v2902_v39  ;;  %v2658_v26 = vrot.slane %v2657_v40, 4  ;;  %v2448_v49 = vld [vmem:[#allocation2 + $0x6c] sm:$0xf]  ;;  %v2449_v40 = vld [vmem:[#allocation2 + $0x70] sm:$0xf]  ;;  %14818 = vst [vmem:[#allocation34_spill] sm:$0xff] %v11349_v23 }
 0x117   : > { %v11307_v56 = vadd.f32 %v11255_v33, %v1518_v55  ;;  %v1849_v33 = vsel %vm11082_vm2, %v9709_v6, %v1848_v11  ;;  %9857 = vmatmul.msk.bf16.gmra.mxu1 %vm1391_vm10, %v3326_v61  ;;  %v3117_v11 = vld [vmem:[#allocation2 + $0x60] sm:$0xe]  ;;  %v1858_v61 = vrot.slane %v11041_v41, 5  ;;  %v2674_v52 = vshll.u32 %v2449_v40, 16 }
 0x118   : > { %v11321_v5 = vpop.f32.mrf.mxu3  ;;  %v1930_v1 = vunpack.c.l.b16 %v1849_v33  ;;  %v1705_v20 = vpop.f32.mrf.mxu1  ;;  %v9841_v10 = vrot.slane %v3117_v11, 9  ;;  %v1855_v33 = vrot.slane %v11038_v31, 5 }
 0x119   : > { %14813 = vst [vmem:[#allocation29_spill] sm:$0xff] %v11307_v56  ;;  %v2660_v56 = vshll.u32 %v2447_v48, 16 }
 0x11a   : > { %v1956_v60 = vpack.c.b16 %v1931_v22, %v1930_v1  ;;  %v1856_v11 = vsel %vm11082_vm2, %v9710_v29, %v1855_v33 }
 0x11d   : > { %v1483_v55 = vpop.f32.mrf.mxu0  ;;  %9808 = vmatmul.msk.bf16.gmra.mxu3 %vm1391_vm10, %v10417_v34  ;;  %v2665_v34 = vshrl.u32 %v2448_v49, 16 }
 0x11e   : > { %v1520_v63 = vpop.f32.mrf.mxu2  ;;  %v11329_v6 = vadd.f32 %v1703_v25, %v1483_v55  ;;  %v3229_v25 = vsel %vm11082_vm2, %v3227_v50, %v3228_v45  ;;  %v2662_v55 = vrot.slane %v2660_v56, 5  ;;  %v2904_v45 = vunpack.c.l.b16 %v11349_v23 }
 0x11f   : > { %v11327_v62 = vadd.f32 %v11280_v43, %v1520_v63  ;;  %v3226_v43 = vsel %vm11082_vm2, %v9841_v10, %v3225_v51  ;;  %v1857_v63 = vrot.slane %v1855_v33, 4  ;;  %v3303_v22 = vunpack.c.l.b16 %v3229_v25 }
 0x120   : > { %v3302_v1 = vunpack.c.l.b16 %v3226_v43  ;;  %v11345_v41 = vpop.f32.mrf.mxu3  ;;  %v11353_v56 = vsel %vm10695_vm13, %v2658_v26, %v2662_v55  ;;  %v2678_v10 = vshrl.u32 %v2449_v40, 16  ;;  %v3232_v25 = vrot.slane %v2449_v40, 5 }
 0x121   : > { %14816 = vst [vmem:[#allocation32_spill] sm:$0xff] %v11327_v62  ;;  %v2905_v38 = vunpack.c.l.b16 %v11353_v56  ;;  %v2667_v26 = vrot.slane %v2665_v34, 4 }
 0x122   : > { %9824 = vmatmul.msk.bf16.gmra.mxu0 %vm1391_vm10, %v2928_v2  ;;  %14819 = vst [vmem:[#allocation35_spill] sm:$0xff] %v11353_v56  ;;  %v3327_v50 = vpack.c.b16 %v3303_v22, %v3302_v1  ;;  %v1932_v2 = vunpack.c.l.b16 %v1856_v11  ;;  %v2680_v33 = vrot.slane %v2678_v10, 4  ;;  %v3234_v22 = vrot.slane %v3232_v25, 4 }
 0x123   : > { %9726 = vmatmul.msk.bf16.gmra.mxu2 %vm1391_vm10, %v1956_v60  ;;  %v1708_v60 = vpop.f32.mrf.mxu1 }
 0x125   : > { %v1485_v31 = vpop.f32.mrf.mxu0 }
 0x126   : > { %v1523_v39 = vpop.f32.mrf.mxu2  ;;  %v11343_v48 = vadd.f32 %v1705_v20, %v1485_v31  ;;  %v2668_v20 = vshll.u32 %v2448_v49, 16  ;;  %v2676_v31 = vrot.slane %v2674_v52, 5  ;;  %v2450_v49 = vld [vmem:[#allocation2 + $0x74] sm:$0x1] }
 0x127   : > { %v11341_v51 = vadd.f32 %v11294_v30, %v1523_v39  ;;  %v1859_v30 = vsel %vm11082_vm2, %v1857_v63, %v1858_v61  ;;  %9858 = vmatmul.msk.bf16.gmra.mxu1 %vm1391_vm10, %v3327_v50  ;;  %v3118_v61 = vld [vmem:[#allocation2 + $0x6c] sm:$0xe]  ;;  %v3235_v11 = vrot.slane %v2450_v49, 5  ;;  %v2684_v10 = vshll.u32 %v2450_v49, 16  ;;  %v10517_v50 = vld [vmem:[#allocation2 + $0x64] sm:$0xf] }
 0x128   : > { %v1933_v43 = vunpack.c.l.b16 %v1859_v30  ;;  %v2670_v55 = vrot.slane %v2668_v20, 5  ;;  %v11365_v63 = vpop.f32.mrf.mxu3  ;;  %v10418_v39 = vld [vmem:[#allocation2 + $0x6c] sm:$0xff]  ;;  %v9842_v1 = vrot.slane %v3118_v61, 9  ;;  %v2929_v30 = vpack.c.b16 %v2905_v38, %v2904_v45  ;;  %v2451_v45 = vld [vmem:[#allocation2 + $0x78] sm:$0xf] }
 0x129   : > { %14817 = vst [vmem:[#allocation33_spill] sm:$0xff] %v11341_v51  ;;  %v2681_v34 = vor.u32 %v2680_v33, %v2676_v31  ;;  %v1862_v23 = vrot.slane %v10517_v50, 5  ;;  %v10518_v38 = vld [vmem:[#allocation2 + $0x68] sm:$0x1]  ;;  %v2686_v49 = vrot.slane %v2684_v10, 5 }
 0x12a   : > { %v1957_v40 = vpack.c.b16 %v1933_v43, %v1932_v2  ;;  %v2671_v56 = vor.u32 %v2670_v55, %v2667_v26  ;;  %v1865_v2 = vrot.slane %v10518_v38, 5  ;;  %v2452_v26 = vld [vmem:[#allocation2 + $0x7c] sm:$0xf] }
 0x12b   : > { %v1710_v52 = vpop.f32.mrf.mxu1  ;;  %v2698_v50 = vshll.u32 %v2452_v26, 16  ;;  %v2702_v51 = vshrl.u32 %v2452_v26, 16 }
 0x12c   : > { %v2672_v43 = vrot.slane %v2671_v56, 4 }
 0x12d   : > { %9809 = vmatmul.msk.bf16.gmra.mxu3 %vm1391_vm10, %v10418_v39 }
 0x12e   : > { %v1525_v12 = vpop.f32.mrf.mxu2  ;;  %v11383_v56 = vsel %vm10695_vm13, %v2672_v43, %v2676_v31  ;;  %v3239_v31 = vrot.slane %v2452_v26, 5 }
 0x12f   : > { %v11363_v29 = vadd.f32 %v11321_v5, %v1525_v12  ;;  %v1488_v20 = vpop.f32.mrf.mxu0  ;;  %v3233_v5 = vsel %vm11082_vm2, %v9842_v1, %v3232_v25  ;;  %v3236_v12 = vsel %vm11082_vm2, %v3234_v22, %v3235_v11  ;;  %v2682_v25 = vrot.slane %v2681_v34, 4  ;;  %14822 = vst [vmem:[#allocation38_spill] sm:$0xff] %v11383_v56 }
 0x130   : > { %v11372_v61 = vadd.f32 %v1708_v60, %v1488_v20  ;;  %v3304_v55 = vunpack.c.l.b16 %v3233_v5  ;;  %v3305_v33 = vunpack.c.l.b16 %v3236_v12  ;;  %v11376_v39 = vpop.f32.mrf.mxu3  ;;  %v1864_v22 = vrot.slane %v1862_v23, 4 }
 0x131   : > { %14820 = vst [vmem:[#allocation36_spill] sm:$0xff] %v11363_v29  ;;  %v1761_v29 = vld [vmem:[#allocation2 + $0x60] sm:$0xe]  ;;  %v2689_v60 = vshrl.u32 %v2451_v45, 16  ;;  %v2692_v20 = vshll.u32 %v2451_v45, 16  ;;  %v11387_v34 = vsel %vm10695_vm13, %v2682_v25, %v2686_v49  ;;  %v2906_v43 = vunpack.c.l.b16 %v11383_v56 }
 0x132   : > { %9825 = vmatmul.msk.bf16.gmra.mxu0 %vm1391_vm10, %v2929_v30  ;;  %v9711_v1 = vrot.slane %v1761_v29, 9  ;;  %v3328_v30 = vpack.c.b16 %v3305_v33, %v3304_v55  ;;  %14823 = vst [vmem:[#allocation39_spill] sm:$0xff] %v11387_v34  ;;  %v1866_v10 = vsel %vm11082_vm2, %v1864_v22, %v1865_v2  ;;  %v2700_v55 = vrot.slane %v2698_v50, 5 }
 0x133   : > { %9727 = vmatmul.msk.bf16.gmra.mxu2 %vm1391_vm10, %v1957_v40  ;;  %v11393_v5 = vpop.f32.mrf.mxu1  ;;  %v2691_v12 = vrot.slane %v2689_v60, 4  ;;  %v2694_v45 = vrot.slane %v2692_v20, 5  ;;  %v2704_v33 = vrot.slane %v2702_v51, 4  ;;  %v2907_v25 = vunpack.c.l.b16 %v11387_v34 }
 0x134   : > { %v1863_v29 = vsel %vm11082_vm2, %v9711_v1, %v1862_v23  ;;  %v3119_v23 = vld [vmem:[#allocation2 + $0x78] sm:$0xe]  ;;  %v3241_v22 = vrot.slane %v3239_v31, 4 }
 0x135   : > { %v1934_v49 = vunpack.c.l.b16 %v1863_v29  ;;  %v10419_v1 = vld [vmem:[#allocation2 + $0x78] sm:$0xff]  ;;  %v2695_v50 = vor.u32 %v2694_v45, %v2691_v12  ;;  %v2705_v51 = vor.u32 %v2704_v33, %v2700_v55  ;;  %v2930_v34 = vpack.c.b16 %v2907_v25, %v2906_v43  ;;  %v11412_v45 = vld [vmem:[#allocation2 + $0x88] sm:$0xf] }
 0x136   : > { %v1528_v11 = vpop.f32.mrf.mxu2 }
 0x137   : > { %v11379_v38 = vadd.f32 %v11345_v41, %v1528_v11  ;;  %v1490_v40 = vpop.f32.mrf.mxu0  ;;  %v1935_v11 = vunpack.c.l.b16 %v1866_v10  ;;  %9859 = vmatmul.msk.bf16.gmra.mxu1 %vm1391_vm10, %v3328_v30  ;;  %v10519_v10 = vld [vmem:[#allocation2 + $0x70] sm:$0xf]  ;;  %v1762_v30 = vld [vmem:[#allocation2 + $0x6c] sm:$0xe]  ;;  %v2696_v43 = vrot.slane %v2695_v50, 4  ;;  %v2706_v25 = vrot.slane %v2705_v51, 4 }
 0x138   : > { %v11395_v41 = vadd.f32 %v1710_v52, %v1490_v40  ;;  %v11400_v2 = vpop.f32.mrf.mxu3  ;;  %v9843_v52 = vrot.slane %v3119_v23, 9  ;;  %v1869_v56 = vrot.slane %v10519_v10, 5 }
 0x139   : > { %14821 = vst [vmem:[#allocation37_spill] sm:$0xff] %v11379_v38  ;;  %v2453_v38 = vld [vmem:[#allocation2 + $0x80] sm:$0x1]  ;;  %v1958_v29 = vpack.c.b16 %v1935_v11, %v1934_v49  ;;  %v9712_v11 = vrot.slane %v1762_v30, 9  ;;  %v11422_v50 = vsel %vm10695_vm13, %v2696_v43, %v2700_v55 }
 0x13a   : > { %v3242_v60 = vrot.slane %v2453_v38, 5  ;;  %v2708_v26 = vshll.u32 %v2453_v38, 16  ;;  %v3240_v23 = vsel %vm11082_vm2, %v9843_v52, %v3239_v31  ;;  %v2454_v38 = vld [vmem:[#allocation2 + $0x84] sm:$0xf]  ;;  %14825 = vst [vmem:[#allocation41_spill] sm:$0xff] %v11422_v50 }
 0x13b   : > { %v11406_v24 = vpop.f32.mrf.mxu1  ;;  %v2713_v52 = vshrl.u32 %v2454_v38, 16 }
 0x13c   : > { %v3243_v12 = vsel %vm11082_vm2, %v3241_v22, %v3242_v60  ;;  %v2710_v49 = vrot.slane %v2708_v26, 5  ;;  %v2716_v22 = vshll.u32 %v2454_v38, 16  ;;  %v2722_v60 = vshll.u32 %v11412_v45, 16 }
 0x13d   : > { %9810 = vmatmul.msk.bf16.gmra.mxu3 %vm1391_vm10, %v10419_v1  ;;  %v1871_v1 = vrot.slane %v1869_v56, 4  ;;  %v3307_v10 = vunpack.c.l.b16 %v3243_v12  ;;  %v1870_v26 = vsel %vm11082_vm2, %v9712_v11, %v1869_v56  ;;  %v2715_v38 = vrot.slane %v2713_v52, 4 }
 0x13e   : > { %v1530_v20 = vpop.f32.mrf.mxu2  ;;  %v2718_v4 = vrot.slane %v2716_v22, 5  ;;  %v2724_v55 = vrot.slane %v2722_v60, 5  ;;  %v10420_v22 = vld [vmem:[#allocation2 + $0x84] sm:$0xff] }
 0x13f   : > { %v11403_v40 = vadd.f32 %v11365_v63, %v1530_v20  ;;  %v2998_v62 = vpop.f32.mrf.mxu0  ;;  %v10520_v63 = vld [vmem:[#allocation2 + $0x74] sm:$0x1]  ;;  %v3306_v20 = vunpack.c.l.b16 %v3240_v23 }
 0x140   : > { %v1872_v33 = vrot.slane %v10520_v63, 5  ;;  %v11416_v31 = vpop.f32.mrf.mxu3  ;;  %v2719_v60 = vor.u32 %v2718_v4, %v2715_v38 }
 0x141   : > { %14824 = vst [vmem:[#allocation40_spill] sm:$0xff] %v11403_v40  ;;  %v2726_v40 = vshrl.u32 %v11412_v45, 16  ;;  %v3329_v30 = vpack.c.b16 %v3307_v10, %v3306_v20  ;;  %v3120_v10 = vld [vmem:[#allocation2 + $0x84] sm:$0xe] }
 0x142   : > { %9826 = vmatmul.msk.bf16.gmra.mxu0 %vm1391_vm10, %v2930_v34  ;;  %v11426_v34 = vsel %vm10695_vm13, %v2706_v25, %v2710_v49  ;;  %v2908_v25 = vunpack.c.l.b16 %v11422_v50  ;;  %v2456_v49 = vld [vmem:[#allocation2 + $0x8c] sm:$0x1] }
 0x143   : > { %9728 = vmatmul.msk.bf16.gmra.mxu2 %vm1391_vm10, %v1958_v29  ;;  %14826 = vst [vmem:[#allocation42_spill] sm:$0xff] %v11426_v34  ;;  %v1873_v29 = vsel %vm11082_vm2, %v1871_v1, %v1872_v33  ;;  %v2728_v43 = vrot.slane %v2726_v40, 4  ;;  %v2909_v56 = vunpack.c.l.b16 %v11426_v34  ;;  %v1936_v1 = vunpack.c.l.b16 %v1870_v26 }
 0x144   : > { %v11433_v12 = vpop.f32.mrf.mxu1  ;;  %v1937_v20 = vunpack.c.l.b16 %v1873_v29  ;;  %v3246_v40 = vrot.slane %v11412_v45, 5  ;;  %v3249_v26 = vrot.slane %v2456_v49, 5 }
 0x145   : > { %v2931_v50 = vpack.c.b16 %v2909_v56, %v2908_v25 }
 0x146   : > { %v2026_v63 = vpop.f32.mrf.mxu2  ;;  %v1959_v0 = vpack.c.b16 %v1937_v20, %v1936_v1 }
 0x147   : > { %v2106_v51 = vadd.f32 %v2026_v63, %v11049_v7  ;;  %v3000_v23 = vpop.f32.mrf.mxu0  ;;  %v9998_v7 = vld [vmem:[%s14738_s2 + $0x2] sm:$0x3]  ;;  %9860 = vmatmul.msk.bf16.gmra.mxu1 %vm1391_vm10, %v3329_v30  ;;  %v2729_v63 = vor.u32 %v2728_v43, %v2724_v55  ;;  %v10521_v30 = vld [vmem:[#allocation2 + $0x7c] sm:$0xf] }
 0x148   : > { %v5944_v33 = vsel %vm1440_vm0, %v9998_v7, 0  ;;  %v11446_v52 = vpop.f32.mrf.mxu3  ;;  %v1876_v34 = vrot.slane %v10521_v30, 5 }
 0x149   : > { %v2392_v16 = vadd.f32 %v11376_v39, %v2106_v51  ;;  %v1676_v39 = vadd.f32 %v11065_v36, %v11091_v57  ;;  %5953 = vmatpush.bf16.msra.mxu1 %v5944_v33  ;;  %v9844_v51 = vrot.slane %v3120_v10, 9  ;;  %v1763_v36 = vld [vmem:[#allocation2 + $0x78] sm:$0xe]  ;;  %v2730_v33 = vrot.slane %v2729_v63, 4  ;;  %v10522_v10 = vld [vmem:[#allocation2 + $0x80] sm:$0x1] }
 0x14a   : > { %v1879_v25 = vrot.slane %v10522_v10, 5  ;;  %v9713_v56 = vrot.slane %v1763_v36, 9  ;;  %v1878_v1 = vrot.slane %v1876_v34, 4 }
 0x14b   : > { %v3078_v11 = vadd.f32 %v2998_v62, %v2392_v16  ;;  %v2732_v16 = vshll.u32 %v2456_v49, 16  ;;  %v3248_v62 = vrot.slane %v3246_v40, 4  ;;  %v3247_v38 = vsel %vm11082_vm2, %v9844_v51, %v3246_v40 }
 0x14c   : > { %v11452_v4 = vpop.f32.mrf.mxu1  ;;  %v2720_v49 = vrot.slane %v2719_v60, 4 }
 0x14d   : > { %v11449_v7 = vadd.f32 %v11393_v5, %v3078_v11  ;;  %9811 = vmatmul.msk.bf16.gmra.mxu3 %vm1391_vm10, %v10420_v22  ;;  %v3250_v5 = vsel %vm11082_vm2, %v3248_v62, %v3249_v26  ;;  %v2734_v11 = vrot.slane %v2732_v16, 5  ;;  %v3308_v22 = vunpack.c.l.b16 %v3247_v38  ;;  %v2458_v62 = vld [vmem:[#allocation2 + $0x94] sm:$0xf] }
 0x14e   : > { %v2028_v29 = vpop.f32.mrf.mxu2  ;;  %v3309_v40 = vunpack.c.l.b16 %v3250_v5  ;;  %v11468_v60 = vsel %vm10695_vm13, %v2720_v49, %v2724_v55  ;;  %v2750_v30 = vshrl.u32 %v2458_v62, 16 }
 0x14f   : > { %v2107_v45 = vadd.f32 %v2028_v29, %v1676_v39  ;;  %v3003_v57 = vpop.f32.mrf.mxu0  ;;  %v2457_v39 = vld [vmem:[#allocation2 + $0x90] sm:$0xf]  ;;  %14827 = vst [vmem:[#allocation43_spill] sm:$0xff] %v11468_v60  ;;  %v11472_v63 = vsel %vm10695_vm13, %v2730_v33, %v2734_v11  ;;  %v2746_v29 = vshll.u32 %v2458_v62, 16  ;;  %v2910_v5 = vunpack.c.l.b16 %v11468_v60  ;;  %v2466_v60 = vld [vmem:[#allocation2 + $0xb4] sm:$0xf] }
 0x150   : > { %v11461_v51 = vpop.f32.mrf.mxu3  ;;  %14828 = vst [vmem:[#allocation44_spill] sm:$0xff] %v11472_v63  ;;  %v2737_v16 = vshrl.u32 %v2457_v39, 16  ;;  %v2740_v26 = vshll.u32 %v2457_v39, 16  ;;  %v3253_v11 = vrot.slane %v2458_v62, 5  ;;  %v10421_v39 = vld [vmem:[#allocation2 + $0x90] sm:$0xff] }
 0x151   : > { %v2393_v43 = vadd.f32 %v11400_v2, %v2107_v45  ;;  %v3330_v45 = vpack.c.b16 %v3309_v40, %v3308_v22  ;;  %v2459_v22 = vld [vmem:[#allocation2 + $0x98] sm:$0x1]  ;;  %v1681_v40 = vadd.f32 %v11115_v27, %v11142_v19 }
 0x152   : > { %9827 = vmatmul.msk.bf16.gmra.mxu0 %vm1391_vm10, %v2931_v50  ;;  %v2739_v33 = vrot.slane %v2737_v16, 4  ;;  %v3256_v62 = vrot.slane %v2459_v22, 5 }
 0x153   : > { %9729 = vmatmul.msk.bf16.gmra.mxu2 %vm1391_vm10, %v1959_v0  ;;  %v3079_v20 = vadd.f32 %v3000_v23, %v2393_v43  ;;  %v1877_v0 = vsel %vm11082_vm2, %v9713_v56, %v1876_v34  ;;  %v1880_v23 = vsel %vm11082_vm2, %v1878_v1, %v1879_v25  ;;  %v2911_v43 = vunpack.c.l.b16 %v11472_v63  ;;  %v3121_v1 = vld [vmem:[#allocation2 + $0x90] sm:$0xe] }
 0x154   : > { %v11479_v36 = vpop.f32.mrf.mxu1  ;;  %v1938_v34 = vunpack.c.l.b16 %v1877_v0  ;;  %v1939_v49 = vunpack.c.l.b16 %v1880_v23  ;;  %v2742_v25 = vrot.slane %v2740_v26, 5  ;;  %v2748_v56 = vrot.slane %v2746_v29, 5 }
 0x155   : > { %v11464_v2 = vadd.f32 %v11406_v24, %v3079_v20  ;;  %v3255_v0 = vrot.slane %v3253_v11, 4  ;;  %v2932_v23 = vpack.c.b16 %v2911_v43, %v2910_v5  ;;  %v1764_v5 = vld [vmem:[#allocation2 + $0x84] sm:$0xe]  ;;  %v10524_v43 = vld [vmem:[#allocation2 + $0x8c] sm:$0x1] }
 0x156   : > { %v2031_v50 = vpop.f32.mrf.mxu2  ;;  %v1960_v26 = vpack.c.b16 %v1939_v49, %v1938_v34  ;;  %v1886_v34 = vrot.slane %v10524_v43, 5  ;;  %v2460_v49 = vld [vmem:[#allocation2 + $0x9c] sm:$0xf] }
 0x157   : > { %v2108_v24 = vadd.f32 %v2031_v50, %v11118_v46  ;;  %v3005_v55 = vpop.f32.mrf.mxu0  ;;  %v2752_v46 = vrot.slane %v2750_v30, 4  ;;  %9861 = vmatmul.msk.bf16.gmra.mxu1 %vm1391_vm10, %v3330_v45  ;;  %v2756_v45 = vshll.u32 %v2459_v22, 16  ;;  %v3257_v19 = vsel %vm11082_vm2, %v3255_v0, %v3256_v62 }
 0x158   : > { %v11485_v20 = vpop.f32.mrf.mxu3  ;;  %v2761_v62 = vshrl.u32 %v2460_v49, 16 }
 0x159   : > { %v2394_v38 = vadd.f32 %v11416_v31, %v2108_v24  ;;  %v9845_v31 = vrot.slane %v3121_v1, 9  ;;  %v2743_v24 = vor.u32 %v2742_v25, %v2739_v33  ;;  %v2753_v29 = vor.u32 %v2752_v46, %v2748_v56  ;;  %v2461_v25 = vld [vmem:[#allocation2 + $0xa0] sm:$0xf] }
 0x15b   : > { %v3080_v10 = vadd.f32 %v3003_v57, %v2394_v38  ;;  %v10523_v38 = vld [vmem:[#allocation2 + $0x88] sm:$0xf]  ;;  %v3254_v27 = vsel %vm11082_vm2, %v9845_v31, %v3253_v11  ;;  %v2754_v11 = vrot.slane %v2753_v29, 4  ;;  %v2758_v31 = vrot.slane %v2756_v45, 5 }
 0x15c   : > { %v1883_v1 = vrot.slane %v10523_v38, 5  ;;  %v11493_v63 = vpop.f32.mrf.mxu1  ;;  %v3310_v46 = vunpack.c.l.b16 %v3254_v27  ;;  %v2774_v38 = vshrl.u32 %v2461_v25, 16 }
 0x15d   : > { %v11490_v50 = vadd.f32 %v11433_v12, %v3080_v10  ;;  %9812 = vmatmul.msk.bf16.gmra.mxu3 %vm1391_vm10, %v10421_v39  ;;  %v2744_v10 = vrot.slane %v2743_v24, 4  ;;  %v3311_v39 = vunpack.c.l.b16 %v3257_v19  ;;  %v11514_v29 = vsel %vm10695_vm13, %v2754_v11, %v2758_v31 }
 0x15e   : > { %v2033_v57 = vpop.f32.mrf.mxu2  ;;  %v1885_v0 = vrot.slane %v1883_v1, 4  ;;  %14830 = vst [vmem:[#allocation46_spill] sm:$0xff] %v11514_v29  ;;  %v1686_v31 = vadd.f32 %v11152_v58, %v11180_v54 }
 0x15f   : > { %v2109_v16 = vadd.f32 %v2033_v57, %v1681_v40  ;;  %v3008_v30 = vpop.f32.mrf.mxu0  ;;  %v9714_v40 = vrot.slane %v1764_v5, 9  ;;  %v2764_v57 = vshll.u32 %v2460_v49, 16  ;;  %v3331_v24 = vpack.c.b16 %v3311_v39, %v3310_v46 }
 0x160   : > { %v11502_v22 = vpop.f32.mrf.mxu3  ;;  %v1887_v45 = vsel %vm11082_vm2, %v1885_v0, %v1886_v34  ;;  %v2776_v49 = vrot.slane %v2774_v38, 4  ;;  %v2913_v46 = vunpack.c.l.b16 %v11514_v29  ;;  %v3122_v34 = vld [vmem:[#allocation2 + $0x9c] sm:$0xe]  ;;  %v1765_v29 = vld [vmem:[#allocation2 + $0x90] sm:$0xe] }
 0x161   : > { %v2395_v12 = vadd.f32 %v11446_v52, %v2109_v16  ;;  %v2766_v5 = vrot.slane %v2764_v57, 5  ;;  %v1941_v11 = vunpack.c.l.b16 %v1887_v45  ;;  %v9846_v0 = vrot.slane %v3122_v34, 9  ;;  %v2463_v34 = vld [vmem:[#allocation2 + $0xa8] sm:$0xf] }
 0x162   : > { %9828 = vmatmul.msk.bf16.gmra.mxu0 %vm1391_vm10, %v2932_v23  ;;  %v2770_v23 = vshll.u32 %v2461_v25, 16 }
 0x163   : > { %9730 = vmatmul.msk.bf16.gmra.mxu2 %vm1391_vm10, %v1960_v26  ;;  %v3081_v33 = vadd.f32 %v3005_v55, %v2395_v12  ;;  %v11510_v26 = vsel %vm10695_vm13, %v2744_v10, %v2748_v56  ;;  %v2763_v12 = vrot.slane %v2761_v62, 4 }
 0x164   : > { %14829 = vst [vmem:[#allocation45_spill] sm:$0xff] %v11510_v26  ;;  %v11520_v19 = vpop.f32.mrf.mxu1  ;;  %v2912_v56 = vunpack.c.l.b16 %v11510_v26  ;;  %v2772_v43 = vrot.slane %v2770_v23, 5 }
 0x165   : > { %v11505_v52 = vadd.f32 %v11452_v4, %v3081_v33  ;;  %v1884_v4 = vsel %vm11082_vm2, %v9714_v40, %v1883_v1  ;;  %v3260_v33 = vrot.slane %v2461_v25, 5  ;;  %v2462_v1 = vld [vmem:[#allocation2 + $0xa4] sm:$0x1]  ;;  %v10422_v40 = vld [vmem:[#allocation2 + $0x9c] sm:$0xff]  ;;  %v2767_v25 = vor.u32 %v2766_v5, %v2763_v12  ;;  %v10526_v5 = vld [vmem:[#allocation2 + $0x98] sm:$0x1] }
 0x166   : > { %v2036_v16 = vpop.f32.mrf.mxu2  ;;  %v1940_v39 = vunpack.c.l.b16 %v1884_v4  ;;  %v3263_v57 = vrot.slane %v2462_v1, 5  ;;  %v2777_v23 = vor.u32 %v2776_v49, %v2772_v43  ;;  %v2780_v38 = vshll.u32 %v2462_v1, 16 }
 0x167   : > { %v2110_v55 = vadd.f32 %v2036_v16, %v11163_v59  ;;  %v3010_v27 = vpop.f32.mrf.mxu0  ;;  %9862 = vmatmul.msk.bf16.gmra.mxu1 %vm1391_vm10, %v3331_v24  ;;  %v2933_v45 = vpack.c.b16 %v2913_v46, %v2912_v56  ;;  %v1893_v49 = vrot.slane %v10526_v5, 5  ;;  %v2768_v1 = vrot.slane %v2767_v25, 4  ;;  %v11541_v56 = vld [vmem:[#allocation2 + $0xac] sm:$0xf] }
 0x168   : > { %v2778_v46 = vrot.slane %v2777_v23, 4  ;;  %v2794_v25 = vshll.u32 %v11541_v56, 16  ;;  %v2798_v23 = vshrl.u32 %v11541_v56, 16 }
 0x169   : > { %v2396_v59 = vadd.f32 %v11461_v51, %v2110_v55  ;;  %v11528_v51 = vpop.f32.mrf.mxu3  ;;  %v10525_v55 = vld [vmem:[#allocation2 + $0x94] sm:$0xf] }
 0x16a   : > { %v1890_v4 = vrot.slane %v10525_v55, 5  ;;  %v11556_v55 = vsel %vm10695_vm13, %v2768_v1, %v2772_v43 }
 0x16b   : > { %v3082_v10 = vadd.f32 %v3008_v30, %v2396_v59  ;;  %v3262_v30 = vrot.slane %v3260_v33, 4  ;;  %v1961_v59 = vpack.c.b16 %v1941_v11, %v1940_v39  ;;  %v2782_v39 = vrot.slane %v2780_v38, 5  ;;  %14832 = vst [vmem:[#allocation48_spill] sm:$0xff] %v11556_v55 }
 0x16c   : > { %v11534_v54 = vpop.f32.mrf.mxu1  ;;  %v9715_v11 = vrot.slane %v1765_v29, 9 }
 0x16d   : > { %v11531_v62 = vadd.f32 %v11479_v36, %v3082_v10  ;;  %9813 = vmatmul.msk.bf16.gmra.mxu3 %vm1391_vm10, %v10422_v40  ;;  %v3261_v36 = vsel %vm11082_vm2, %v9846_v0, %v3260_v33  ;;  %v3264_v12 = vsel %vm11082_vm2, %v3262_v30, %v3263_v57  ;;  %v2785_v33 = vshrl.u32 %v2463_v34, 16  ;;  %v259_v57 = vld [vmem:[#allocation2 + $0xc0] sm:$0x1] }
 0x16e   : > { %v2038_v16 = vpop.f32.mrf.mxu2  ;;  %v3312_v0 = vunpack.c.l.b16 %v3261_v36  ;;  %v3313_v30 = vunpack.c.l.b16 %v3264_v12  ;;  %v260_v29 = vsel %vm10589_vm4, 0, %v259_v57  ;;  %v467_v12 = vld [vmem:[%s10607_s24 + $0x7c] sm:$0xf]  ;;  %v11571_v57 = vrot.slane %v2794_v25, 5  ;;  %v2465_v25 = vld [vmem:[#allocation2 + $0xb0] sm:$0x1] }
 0x16f   : > { %v2111_v24 = vadd.f32 %v2038_v16, %v1686_v31  ;;  %v3013_v58 = vpop.f32.mrf.mxu0  ;;  %v1892_v31 = vrot.slane %v1890_v4, 4  ;;  %261 = vst [vmem:[#allocation2 + $0xc0] sm:$0x1] %v260_v29  ;;  %v2787_v43 = vrot.slane %v2785_v33, 4 }
 0x170   : > { %v3332_v36 = vpack.c.b16 %v3313_v30, %v3312_v0 }
 0x171   : > { %v2397_v10 = vadd.f32 %v11485_v20, %v2111_v24  ;;  %v11545_v16 = vpop.f32.mrf.mxu3  ;;  %v2788_v20 = vshll.u32 %v2463_v34, 16  ;;  %v11560_v24 = vsel %vm10695_vm13, %v2778_v46, %v2782_v39  ;;  %v2800_v46 = vrot.slane %v2798_v23, 4  ;;  %v3123_v23 = vld [vmem:[#allocation2 + $0xa8] sm:$0xe] }
 0x172   : > { %9829 = vmatmul.msk.bf16.gmra.mxu0 %vm1391_vm10, %v2933_v45  ;;  %14833 = vst [vmem:[#allocation49_spill] sm:$0xff] %v11560_v24  ;;  %v1891_v45 = vsel %vm11082_vm2, %v9715_v11, %v1890_v4  ;;  %v1691_v4 = vadd.f32 %v11198_v47, %v11222_v9  ;;  %v2914_v11 = vunpack.c.l.b16 %v11556_v55  ;;  %v2915_v29 = vunpack.c.l.b16 %v11560_v24  ;;  %v10423_v47 = vld [vmem:[#allocation2 + $0xa8] sm:$0xff] }
 0x173   : > { %9731 = vmatmul.msk.bf16.gmra.mxu2 %vm1391_vm10, %v1961_v59  ;;  %v3083_v40 = vadd.f32 %v3010_v27, %v2397_v10  ;;  %v466_v59 = vld [vmem:[%s10607_s24 + $0x78] sm:$0xf]  ;;  %v2790_v1 = vrot.slane %v2788_v20, 5  ;;  %v1942_v33 = vunpack.c.l.b16 %v1891_v45  ;;  %v737_v45 = vshll.u32 %v467_v12, 16 }
 0x174   : > { %v726_v5 = vshrl.u32 %v466_v59, 16  ;;  %v729_v0 = vshll.u32 %v466_v59, 16  ;;  %v3270_v59 = vrot.slane %v2465_v25, 5  ;;  %v2934_v24 = vpack.c.b16 %v2915_v29, %v2914_v11  ;;  %v315_v29 = vld [vmem:[#allocation2 + $0xc8] sm:$0x1] }
 0x175   : > { %v11552_v38 = vadd.f32 %v11493_v63, %v3083_v40  ;;  %v1894_v63 = vsel %vm11082_vm2, %v1892_v31, %v1893_v49  ;;  %v11569_v40 = vpop.f32.mrf.mxu1  ;;  %v3267_v49 = vrot.slane %v11541_v56, 5  ;;  %v2791_v9 = vor.u32 %v2790_v1, %v2787_v43 }
 0x176   : > { %v2041_v27 = vpop.f32.mrf.mxu2  ;;  %v728_v31 = vrot.slane %v726_v5, 7  ;;  %v1943_v20 = vunpack.c.l.b16 %v1894_v63  ;;  %v2804_v5 = vshll.u32 %v2465_v25, 16  ;;  %v898_v43 = vld [vmem:[#allocation2 + $0xc0] sm:$0xf]  ;;  %v2812_v25 = vshll.u32 %v2466_v60, 16 }
 0x177   : > { %14831 = vst [vmem:[#allocation47_spill] sm:$0xff] %v11552_v38  ;;  %v2112_v34 = vadd.f32 %v2041_v27, %v11200_v8  ;;  %v3015_v10 = vpop.f32.mrf.mxu0  ;;  %v734_v8 = vshrl.u32 %v467_v12, 16  ;;  %9863 = vmatmul.msk.bf16.gmra.mxu1 %vm1391_vm10, %v3332_v36  ;;  %v2792_v11 = vrot.slane %v2791_v9, 4 }
 0x178   : > { %v1962_v26 = vpack.c.b16 %v1943_v20, %v1942_v33  ;;  %v732_v38 = vrot.slane %v728_v31, 4  ;;  %v2806_v33 = vrot.slane %v2804_v5, 5  ;;  %v2809_v20 = vshrl.u32 %v2466_v60, 16 }
 0x179   : > { %v2398_v39 = vadd.f32 %v11502_v22, %v2112_v34  ;;  %v11580_v27 = vpop.f32.mrf.mxu3  ;;  %v2801_v22 = vor.u32 %v2800_v46, %v11571_v57  ;;  %v9847_v34 = vrot.slane %v3123_v23, 9  ;;  %v11583_v55 = vrot.slane %v734_v8, 7  ;;  %v10527_v46 = vld [vmem:[#allocation2 + $0xa0] sm:$0xf] }
 0x17a   : > { %v1897_v8 = vrot.slane %v10527_v46, 5  ;;  %v2811_v46 = vrot.slane %v2809_v20, 4 }
 0x17b   : > { %v3084_v30 = vadd.f32 %v3013_v58, %v2398_v39  ;;  %v3269_v58 = vrot.slane %v3267_v49, 4  ;;  %v731_v39 = vor.u32 %v729_v0, %v728_v31  ;;  %v2802_v0 = vrot.slane %v2801_v22, 4 }
 0x17c   : > { %v739_v31 = vor.u32 %v737_v45, %v11583_v55 }
 0x17d   : > { %v11586_v56 = vadd.f32 %v11520_v19, %v3084_v30  ;;  %9814 = vmatmul.msk.bf16.gmra.mxu3 %vm1391_vm10, %v10423_v47  ;;  %v11589_v23 = vpop.f32.mrf.mxu1  ;;  %v3268_v19 = vsel %vm11082_vm2, %v9847_v34, %v3267_v49  ;;  %v3271_v12 = vsel %vm11082_vm2, %v3269_v58, %v3270_v59  ;;  %v1766_v30 = vld [vmem:[#allocation2 + $0x9c] sm:$0xe]  ;;  %v899_v47 = vsel %vm10630_vm8, %v731_v39, %v898_v43  ;;  %v11601_v34 = vld [vmem:[#allocation2 + $0xb8] sm:$0xf]  ;;  %v10528_v58 = vld [vmem:[#allocation2 + $0xa4] sm:$0x1] }
 0x17e   : > { %v2043_v63 = vpop.f32.mrf.mxu2  ;;  %14834 = vst [vmem:[#allocation50_spill] sm:$0xff] %v11589_v23  ;;  %v3315_v9 = vunpack.c.l.b16 %v3271_v12  ;;  %v740_v22 = vsel %vm10620_vm7, %v732_v38, %v739_v31  ;;  %v1900_v59 = vrot.slane %v10528_v58, 5  ;;  %v9716_v60 = vrot.slane %v1766_v30, 9  ;;  %v3124_v58 = vld [vmem:[#allocation2 + $0xb4] sm:$0xe] }
 0x17f   : > { %v2113_v36 = vadd.f32 %v2043_v63, %v1691_v4  ;;  %v3018_v1 = vpop.f32.mrf.mxu0  ;;  %900 = vst [vmem:[#allocation2 + $0xc0] sm:$0xf] %v899_v47  ;;  %v1899_v63 = vrot.slane %v1897_v8, 4  ;;  %v11616_v38 = vsel %vm10695_vm13, %v2792_v11, %v11571_v57  ;;  %v11620_v5 = vsel %vm10695_vm13, %v2802_v0, %v2806_v33  ;;  %v10532_v23 = vld [vmem:[#allocation2 + $0xbc] sm:$0x1] }
 0x180   : > { %901 = vst.msk [vmem:[#allocation2 + $0xc4] sm:$0xf] %vm199_vm1, %v740_v22  ;;  %v2818_v39 = vshll.u32 %v11601_v34, 16  ;;  %v2916_v30 = vunpack.c.l.b16 %v11616_v38  ;;  %v2917_v31 = vunpack.c.l.b16 %v11620_v5  ;;  %v3274_v20 = vrot.slane %v11601_v34, 5 }
 0x181   : > { %v2399_v4 = vadd.f32 %v11528_v51, %v2113_v36  ;;  %v3314_v51 = vunpack.c.l.b16 %v3268_v19  ;;  %v11605_v45 = vpop.f32.mrf.mxu3  ;;  %14835 = vst [vmem:[#allocation51_spill] sm:$0xff] %v11616_v38  ;;  %v2822_v36 = vshrl.u32 %v11601_v34, 16  ;;  %v1901_v57 = vsel %vm11082_vm2, %v1899_v63, %v1900_v59 }
 0x182   : > { %9830 = vmatmul.msk.bf16.gmra.mxu0 %vm1391_vm10, %v2934_v24  ;;  %14836 = vst [vmem:[#allocation52_spill] sm:$0xff] %v11620_v5  ;;  %v1696_v59 = vadd.f32 %v11236_v21, %v11260_v42  ;;  %v10529_v42 = vld [vmem:[#allocation2 + $0xac] sm:$0xf] }
 0x183   : > { %9732 = vmatmul.msk.bf16.gmra.mxu2 %vm1391_vm10, %v1962_v26  ;;  %v3085_v49 = vadd.f32 %v3015_v10, %v2399_v4  ;;  %v316_v26 = vsel %vm10649_vm9, 0, %v315_v29  ;;  %v3333_v19 = vpack.c.b16 %v3315_v9, %v3314_v51  ;;  %v1898_v4 = vsel %vm11082_vm2, %v9716_v60, %v1897_v8 }
 0x184   : > { %317 = vst [vmem:[#allocation2 + $0xc8] sm:$0x1] %v316_v26  ;;  %v2820_v29 = vrot.slane %v2818_v39, 5  ;;  %v2824_v33 = vrot.slane %v2822_v36, 4  ;;  %v1944_v47 = vunpack.c.l.b16 %v1898_v4  ;;  %v1945_v8 = vunpack.c.l.b16 %v1901_v57 }
 0x185   : > { %v11611_v24 = vadd.f32 %v11534_v54, %v3085_v49  ;;  %v2814_v54 = vrot.slane %v2812_v25, 5  ;;  %v11629_v11 = vpop.f32.mrf.mxu1  ;;  %v2468_v49 = vld [vmem:[#allocation2 + $0xbc] sm:$0x1]  ;;  %v2935_v60 = vpack.c.b16 %v2917_v31, %v2916_v30  ;;  %v3276_v39 = vrot.slane %v3274_v20, 4 }
 0x186   : > { %v2046_v10 = vpop.f32.mrf.mxu2  ;;  %v2825_v63 = vor.u32 %v2824_v33, %v2820_v29  ;;  %v2828_v26 = vshll.u32 %v2468_v49, 16  ;;  %v1904_v21 = vrot.slane %v10529_v42, 5  ;;  %v2469_v30 = vld [vmem:[#allocation2 + $0xc0] sm:$0xf]  ;;  %v10530_v33 = vld [vmem:[#allocation2 + $0xb0] sm:$0x1] }
 0x187   : > { %v2114_v43 = vadd.f32 %v2046_v10, %v11250_v32  ;;  %v3020_v12 = vpop.f32.mrf.mxu0  ;;  %v741_v32 = vrot.slane %v11583_v55, 4  ;;  %v2815_v51 = vor.u32 %v2814_v54, %v2811_v46  ;;  %9864 = vmatmul.msk.bf16.gmra.mxu1 %vm1391_vm10, %v3333_v19  ;;  %v9848_v10 = vrot.slane %v3124_v58, 9 }
 0x188   : > { %v3277_v54 = vrot.slane %v2468_v49, 5  ;;  %v11654_v49 = vld [vmem:[#allocation2 + $0x1c] sm:$0xf] }
 0x189   : > { %v2400_v0 = vadd.f32 %v11545_v16, %v2114_v43  ;;  %v11637_v9 = vpop.f32.mrf.mxu3  ;;  %v10424_v16 = vld [vmem:[#allocation2 + $0xb4] sm:$0xff]  ;;  %v1963_v43 = vpack.c.b16 %v1945_v8, %v1944_v47  ;;  %v2816_v46 = vrot.slane %v2815_v51, 4  ;;  %v3275_v4 = vsel %vm11082_vm2, %v9848_v10, %v3274_v20  ;;  %v11664_v20 = vld [vmem:[#allocation2 + $0xc4] sm:$0xf] }
 0x18a   : > { %v3278_v31 = vsel %vm11082_vm2, %v3276_v39, %v3277_v54  ;;  %v2826_v47 = vrot.slane %v2825_v63, 4  ;;  %v2830_v8 = vrot.slane %v2828_v26, 5  ;;  %v2836_v39 = vshll.u32 %v2469_v30, 16 }
 0x18b   : > { %v3086_v25 = vadd.f32 %v3018_v1, %v2400_v0  ;;  %v902_v22 = vld [vmem:[#allocation2 + $0xc8] sm:$0x1]  ;;  %v1767_v0 = vld [vmem:[#allocation2 + $0xa8] sm:$0xe] }
 0x18c   : > { %v903_v1 = vsel %vm10589_vm4, %v741_v32, %v902_v22  ;;  %v3795_v32 = vld [vmem:[#allocation2 + $0x18] sm:$0xf]  ;;  %v3317_v22 = vunpack.c.l.b16 %v3278_v31 }
 0x18d   : > { %v11642_v55 = vadd.f32 %v11569_v40, %v3086_v25  ;;  %904 = vst [vmem:[#allocation2 + $0xc8] sm:$0x1] %v903_v1  ;;  %9815 = vmatmul.msk.bf16.gmra.mxu3 %vm1391_vm10, %v10424_v16  ;;  %v11647_v40 = vpop.f32.mrf.mxu1  ;;  %v1907_v25 = vrot.slane %v10530_v33, 5  ;;  %v3316_v16 = vunpack.c.l.b16 %v3275_v4  ;;  %v1906_v1 = vrot.slane %v1904_v21, 4 }
 0x18e   : > { %v2048_v34 = vpop.f32.mrf.mxu2  ;;  %14837 = vst [vmem:[#allocation53_spill] sm:$0xff] %v11647_v40  ;;  %v3844_v63 = vshrl.u32 %v3795_v32, 16  ;;  %v3847_v26 = vshll.u32 %v3795_v32, 16  ;;  %v1768_v40 = vld [vmem:[#allocation2 + $0xb4] sm:$0xe] }
 0x18f   : > { %v2115_v36 = vadd.f32 %v2048_v34, %v1696_v59  ;;  %v3023_v19 = vpop.f32.mrf.mxu0  ;;  %v9717_v59 = vrot.slane %v1767_v0, 9  ;;  %v2833_v34 = vshrl.u32 %v2469_v30, 16  ;;  %v3334_v42 = vpack.c.b16 %v3317_v22, %v3316_v16  ;;  %v11689_v22 = vld [vmem:[#allocation2 + $0x20] sm:$0x1] }
 0x190   : > { %v1908_v0 = vsel %vm11082_vm2, %v1906_v1, %v1907_v25  ;;  %v3846_v32 = vrot.slane %v3844_v63, 4  ;;  %v3849_v33 = vrot.slane %v3847_v26, 5  ;;  %v1701_v26 = vadd.f32 %v11286_v18, %v11301_v44 }
 0x191   : > { %v2401_v57 = vadd.f32 %v11580_v27, %v2115_v36  ;;  %v11662_v27 = vsel %vm10695_vm13, %v2816_v46, %v2820_v29  ;;  %v11666_v58 = vpop.f32.mrf.mxu3  ;;  %v2842_v29 = vshll.u32 %v11664_v20, 16  ;;  %v2846_v36 = vshrl.u32 %v11664_v20, 16 }
 0x192   : > { %9831 = vmatmul.msk.bf16.gmra.mxu0 %vm1391_vm10, %v2935_v60  ;;  %14839 = vst [vmem:[#allocation55_spill] sm:$0xff] %v11662_v27  ;;  %v3853_v60 = vshll.u32 %v11654_v49, 16  ;;  %v11675_v46 = vsel %vm10695_vm13, %v2826_v47, %v2830_v8  ;;  %v2918_v54 = vunpack.c.l.b16 %v11662_v27  ;;  %v2835_v31 = vrot.slane %v2833_v34, 4 }
 0x193   : > { %9733 = vmatmul.msk.bf16.gmra.mxu2 %vm1391_vm10, %v1963_v43  ;;  %v11658_v51 = vadd.f32 %v3020_v12, %v2401_v57  ;;  %v3857_v12 = vshrl.u32 %v11654_v49, 16  ;;  %14840 = vst [vmem:[#allocation56_spill] sm:$0xff] %v11675_v46  ;;  %v1905_v57 = vsel %vm11082_vm2, %v9717_v59, %v1904_v21  ;;  %v2838_v8 = vrot.slane %v2836_v39, 5 }
 0x194   : > { %v11687_v27 = vrot.slane %v2842_v29, 5  ;;  %v2848_v16 = vrot.slane %v2846_v36, 4  ;;  %v3281_v21 = vrot.slane %v11664_v20, 5  ;;  %v2919_v25 = vunpack.c.l.b16 %v11675_v46  ;;  %v2471_v63 = vld [vmem:[#allocation2 + $0xc8] sm:$0x1] }
 0x195   : > { %14838 = vst [vmem:[#allocation54_spill] sm:$0xff] %v11658_v51  ;;  %v11682_v30 = vpop.f32.mrf.mxu1  ;;  %v3859_v47 = vrot.slane %v3857_v12, 4  ;;  %v1946_v1 = vunpack.c.l.b16 %v1905_v57  ;;  %v1947_v34 = vunpack.c.l.b16 %v1908_v0  ;;  %v10425_v12 = vld [vmem:[#allocation2 + $0xc0] sm:$0xff]  ;;  %v3284_v36 = vrot.slane %v2471_v63, 5  ;;  %v10531_v46 = vld [vmem:[#allocation2 + $0xb8] sm:$0xf] }
 0x196   : > { %v2051_v10 = vpop.f32.mrf.mxu2  ;;  %v3283_v29 = vrot.slane %v3281_v21, 4  ;;  %v3863_v57 = vshll.u32 %v11689_v22, 16  ;;  %v1911_v18 = vrot.slane %v10531_v46, 5  ;;  %v2936_v5 = vpack.c.b16 %v2919_v25, %v2918_v54 }
 0x197   : > { %v2116_v43 = vadd.f32 %v2051_v10, %v11290_v35  ;;  %v3025_v4 = vpop.f32.mrf.mxu0  ;;  %v11685_v10 = vrot.slane %v3853_v60, 5  ;;  %9865 = vmatmul.msk.bf16.gmra.mxu1 %vm1391_vm10, %v3334_v42  ;;  %v2839_v42 = vor.u32 %v2838_v8, %v2835_v31  ;;  %v1964_v38 = vpack.c.b16 %v1947_v34, %v1946_v1  ;;  %v11712_v34 = vld [vmem:[#allocation2 + $0x28] sm:$0xf] }
 0x198   : > { %v1914_v51 = vrot.slane %v10532_v23, 5  ;;  %v3285_v31 = vsel %vm11082_vm2, %v3283_v29, %v3284_v36  ;;  %v3865_v8 = vrot.slane %v3863_v57, 5  ;;  %v9718_v23 = vrot.slane %v1768_v40, 9 }
 0x199   : > { %v2402_v35 = vadd.f32 %v11605_v45, %v2116_v43  ;;  %v3125_v45 = vld [vmem:[#allocation2 + $0xc0] sm:$0xe]  ;;  %v11696_v60 = vpop.f32.mrf.mxu3  ;;  %v3860_v43 = vor.u32 %v3859_v47, %v11685_v10  ;;  %v1913_v1 = vrot.slane %v1911_v18, 4 }
 0x19a   : > { %v9849_v39 = vrot.slane %v3125_v45, 9  ;;  %v2852_v45 = vshll.u32 %v2471_v63, 16 }
 0x19b   : > { %v3088_v59 = vadd.f32 %v3023_v19, %v2402_v35  ;;  %v3850_v19 = vor.u32 %v3849_v33, %v3846_v32  ;;  %v2849_v35 = vor.u32 %v2848_v16, %v11687_v27  ;;  %v3861_v54 = vrot.slane %v3860_v43, 4  ;;  %v3798_v16 = vld [vmem:[#allocation2 + $0x24] sm:$0xf] }
 0x19c   : > { %v3282_v33 = vsel %vm11082_vm2, %v9849_v39, %v3281_v21  ;;  %v2854_v63 = vrot.slane %v2852_v45, 5  ;;  %v3868_v39 = vshrl.u32 %v3798_v16, 16  ;;  %v3871_v29 = vshll.u32 %v3798_v16, 16 }
 0x19d   : > { %v11699_v20 = vadd.f32 %v11629_v11, %v3088_v59  ;;  %9816 = vmatmul.msk.bf16.gmra.mxu3 %vm1391_vm10, %v10425_v12  ;;  %v11705_v32 = vpop.f32.mrf.mxu1  ;;  %v3851_v47 = vrot.slane %v3850_v19, 4  ;;  %v2840_v59 = vrot.slane %v2839_v42, 4  ;;  %v2850_v25 = vrot.slane %v2849_v35, 4 }
 0x19e   : > { %v2053_v0 = vpop.f32.mrf.mxu2  ;;  %v3319_v12 = vunpack.c.l.b16 %v3285_v31  ;;  %v3866_v36 = vsel %vm10695_vm13, %v3861_v54, %v3865_v8  ;;  %v1912_v43 = vsel %vm11082_vm2, %v9718_v23, %v1911_v18  ;;  %v3873_v31 = vrot.slane %v3871_v29, 5  ;;  %v11744_v54 = vld [vmem:[#allocation2 + $0x2c] sm:$0x1] }
 0x19f   : > { %v2117_v44 = vadd.f32 %v2053_v0, %v1701_v26  ;;  %v3028_v11 = vpop.f32.mrf.mxu0  ;;  %v3318_v26 = vunpack.c.l.b16 %v3282_v33  ;;  %v3856_v40 = vsel %vm10695_vm13, %v3851_v47, %v11685_v10  ;;  %v11730_v19 = vsel %vm10695_vm13, %v2840_v59, %v11687_v27 }
 0x1a0   : > { %14841 = vst [vmem:[#allocation57_spill] sm:$0xff] %v11730_v19  ;;  %v11737_v10 = vsel %vm10695_vm13, %v2850_v25, %v2854_v63  ;;  %v1915_v0 = vsel %vm11082_vm2, %v1913_v1, %v1914_v51  ;;  %v4230_v45 = vunpack.c.l.b16 %v3866_v36  ;;  %v3870_v27 = vrot.slane %v3868_v39, 4  ;;  %v4449_v36 = vld [vmem:[#allocation2 + $0x18] sm:$0xe] }
 0x1a1   : > { %v2403_v46 = vadd.f32 %v11637_v9, %v2117_v44  ;;  %v11718_v9 = vpop.f32.mrf.mxu3  ;;  %14842 = vst [vmem:[#allocation58_spill] sm:$0xff] %v11737_v10  ;;  %v3335_v42 = vpack.c.b16 %v3319_v12, %v3318_v26  ;;  %v4229_v44 = vunpack.c.l.b16 %v3856_v40  ;;  %v2920_v16 = vunpack.c.l.b16 %v11730_v19 }
 0x1a2   : > { %9832 = vmatmul.msk.bf16.gmra.mxu0 %vm1391_vm10, %v2936_v5  ;;  %v3877_v5 = vshll.u32 %v11712_v34, 16  ;;  %v2921_v51 = vunpack.c.l.b16 %v11737_v10  ;;  %v1949_v59 = vunpack.c.l.b16 %v1915_v0  ;;  %v3874_v1 = vor.u32 %v3873_v31, %v3870_v27  ;;  %v3801_v0 = vld [vmem:[#allocation2 + $0x30] sm:$0xf] }
 0x1a3   : > { %9734 = vmatmul.msk.bf16.gmra.mxu2 %vm1391_vm10, %v1964_v38  ;;  %v11716_v21 = vadd.f32 %v3025_v4, %v2403_v46  ;;  %v3881_v38 = vshrl.u32 %v11712_v34, 16  ;;  %v4261_v23 = vpack.c.b16 %v4230_v45, %v4229_v44  ;;  %v3887_v26 = vshll.u32 %v11744_v54, 16 }
 0x1a4   : > { %v3879_v18 = vrot.slane %v3877_v5, 5  ;;  %v2937_v39 = vpack.c.b16 %v2921_v51, %v2920_v16  ;;  %v4515_v5 = vrot.slane %v11654_v49, 5  ;;  %v9965_v44 = vrot.slane %v4449_v36, 9 }
 0x1a5   : > { %v11741_v33 = vpop.f32.mrf.mxu1  ;;  %v3883_v47 = vrot.slane %v3881_v38, 4  ;;  %v4518_v27 = vrot.slane %v11689_v22, 5  ;;  %v3892_v31 = vshrl.u32 %v3801_v0, 16 }
 0x1a6   : > { %v2056_v4 = vpop.f32.mrf.mxu2  ;;  %v4517_v49 = vrot.slane %v4515_v5, 4  ;;  %v4516_v51 = vsel %vm11082_vm2, %v9965_v44, %v4515_v5 }
 0x1a7   : > { %v2118_v57 = vadd.f32 %v2056_v4, %v11329_v6  ;;  %v3030_v35 = vpop.f32.mrf.mxu0  ;;  %v1948_v6 = vunpack.c.l.b16 %v1912_v43  ;;  %9866 = vmatmul.msk.bf16.gmra.mxu1 %vm1391_vm10, %v3335_v42  ;;  %v3875_v4 = vrot.slane %v3874_v1, 4  ;;  %v11761_v42 = vld [vmem:[#allocation2 + $0x34] sm:$0xf]  ;;  %v4627_v36 = vunpack.c.l.b16 %v4516_v51  ;;  %v11798_v51 = vld [vmem:[#allocation2 + $0x40] sm:$0xf] }
 0x1a8   : > { %v4519_v22 = vsel %vm11082_vm2, %v4517_v49, %v4518_v27 }
 0x1a9   : > { %v2404_v46 = vadd.f32 %v11666_v58, %v2118_v57  ;;  %v11749_v25 = vpop.f32.mrf.mxu3  ;;  %v3884_v58 = vor.u32 %v3883_v47, %v3879_v18  ;;  %v1965_v29 = vpack.c.b16 %v1949_v59, %v1948_v6  ;;  %v3889_v57 = vrot.slane %v3887_v26, 5 }
 0x1aa   : > { %v3895_v47 = vshll.u32 %v3801_v0, 16  ;;  %v3901_v6 = vshll.u32 %v11761_v42, 16 }
 0x1ab   : > { %v3090_v8 = vadd.f32 %v3028_v11, %v2404_v46  ;;  %v3885_v43 = vrot.slane %v3884_v58, 4  ;;  %v3894_v58 = vrot.slane %v3892_v31, 4  ;;  %v4522_v31 = vrot.slane %v11712_v34, 5 }
 0x1ad   : > { %v11752_v63 = vadd.f32 %v11682_v30, %v3090_v8  ;;  %9949 = vmatmul.msk.bf16.vlgmr.msra.gmra.mxu3 %vm1391_vm10, %v4261_v23  ;;  %v11758_v38 = vpop.f32.mrf.mxu1  ;;  %v3890_v46 = vsel %vm10695_vm13, %v3885_v43, %v3889_v57  ;;  %v3905_v8 = vshrl.u32 %v11761_v42, 16 }
 0x1ae   : > { %v2058_v12 = vpop.f32.mrf.mxu2  ;;  %v4232_v23 = vunpack.c.l.b16 %v3890_v46  ;;  %v4450_v46 = vld [vmem:[#allocation2 + $0x24] sm:$0xe] }
 0x1af   : > { %v2119_v11 = vadd.f32 %v2058_v12, %v11343_v48  ;;  %v3033_v40 = vpop.f32.mrf.mxu0  ;;  %v3897_v12 = vrot.slane %v3895_v47, 5  ;;  %v9966_v34 = vrot.slane %v4450_v46, 9  ;;  %v11821_v46 = vld [vmem:[#allocation2 + $0x44] sm:$0x1] }
 0x1b1   : > { %v2405_v30 = vadd.f32 %v11696_v60, %v2119_v11  ;;  %v11767_v45 = vpop.f32.mrf.mxu3  ;;  %v3880_v60 = vsel %vm10695_vm13, %v3875_v4, %v3879_v18  ;;  %v3903_v11 = vrot.slane %v3901_v6, 5  ;;  %v4628_v4 = vunpack.c.l.b16 %v4519_v22 }
 0x1b2   : > { %9833 = vmatmul.msk.bf16.gmra.mxu0 %vm1391_vm10, %v2937_v39  ;;  %v4231_v18 = vunpack.c.l.b16 %v3880_v60  ;;  %v3907_v39 = vrot.slane %v3905_v8, 4  ;;  %v3898_v57 = vor.u32 %v3897_v12, %v3894_v58  ;;  %v10426_v60 = vld [vmem:[#allocation2 + $0x18] sm:$0xff]  ;;  %v4524_v22 = vrot.slane %v4522_v31, 4 }
 0x1b3   : > { %9735 = vmatmul.msk.bf16.gmra.mxu2 %vm1391_vm10, %v1965_v29  ;;  %v11765_v48 = vadd.f32 %v3030_v35, %v2405_v30  ;;  %v11784_v29 = vld [vmem:[#allocation2 + $0x38] sm:$0x1]  ;;  %v4659_v27 = vpack.c.b16 %v4628_v4, %v4627_v36 }
 0x1b4   : > { %v4262_v30 = vpack.c.b16 %v4232_v23, %v4231_v18  ;;  %v3908_v0 = vor.u32 %v3907_v39, %v3903_v11  ;;  %v3911_v44 = vshll.u32 %v11784_v29, 16  ;;  %v3899_v6 = vrot.slane %v3898_v57, 4 }
 0x1b5   : > { %v11781_v1 = vpop.f32.mrf.mxu1  ;;  %v4525_v18 = vrot.slane %v11744_v54, 5  ;;  %v3925_v39 = vshll.u32 %v11798_v51, 16  ;;  %v4523_v54 = vsel %vm11082_vm2, %v9966_v34, %v4522_v31 }
 0x1b6   : > { %v2061_v35 = vpop.f32.mrf.mxu2  ;;  %v3909_v8 = vrot.slane %v3908_v0, 4 }
 0x1b7   : > { %v2120_v16 = vadd.f32 %v2061_v35, %v11372_v61  ;;  %v3035_v59 = vpop.f32.mrf.mxu0  ;;  %v3913_v35 = vrot.slane %v3911_v44, 5  ;;  %v4526_v4 = vsel %vm11082_vm2, %v4524_v22, %v4525_v18 }
 0x1b9   : > { %v2406_v26 = vadd.f32 %v11718_v9, %v2120_v16  ;;  %v11786_v5 = vpop.f32.mrf.mxu3  ;;  %v3804_v16 = vld [vmem:[#allocation2 + $0x3c] sm:$0xf]  ;;  %v3914_v12 = vsel %vm10695_vm13, %v3909_v8, %v3913_v35 }
 0x1ba   : > { %v3916_v58 = vshrl.u32 %v3804_v16, 16  ;;  %v4234_v0 = vunpack.c.l.b16 %v3914_v12  ;;  %v10427_v12 = vld [vmem:[#allocation2 + $0x24] sm:$0xff] }
 0x1bb   : > { %v3092_v61 = vadd.f32 %v3033_v40, %v2406_v26  ;;  %v3904_v26 = vsel %vm10695_vm13, %v3899_v6, %v3903_v11  ;;  %v4630_v6 = vunpack.c.l.b16 %v4526_v4  ;;  %v3807_v4 = vld [vmem:[#allocation2 + $0x48] sm:$0xf] }
 0x1bc   : > { %v4233_v57 = vunpack.c.l.b16 %v3904_v26  ;;  %v3918_v44 = vrot.slane %v3916_v58, 4 }
 0x1bd   : > { %v11789_v43 = vadd.f32 %v11741_v33, %v3092_v61  ;;  %9950 = vmatmul.msk.bf16.gmra.mxu3 %vm1391_vm10, %v4262_v30  ;;  %v11795_v47 = vpop.f32.mrf.mxu1  ;;  %v3929_v61 = vshrl.u32 %v11798_v51, 16 }
 0x1be   : > { %v2063_v49 = vpop.f32.mrf.mxu2  ;;  %14843 = vst [vmem:[#allocation59_spill] sm:$0xff] %v11795_v47  ;;  %v4263_v8 = vpack.c.b16 %v4234_v0, %v4233_v57  ;;  %v11836_v57 = vld [vmem:[#allocation2 + $0x4c] sm:$0xf]  ;;  %v12085_v47 = vld [vmem:[#allocation2 + $0xa0] sm:$0xf] }
 0x1bf   : > { %v2121_v9 = vadd.f32 %v2063_v49, %v11395_v41  ;;  %v3038_v40 = vpop.f32.mrf.mxu0 }
 0x1c1   : > { %v2407_v33 = vadd.f32 %v11749_v25, %v2121_v9  ;;  %v11805_v23 = vpop.f32.mrf.mxu3  ;;  %v3919_v25 = vshll.u32 %v3804_v16, 16  ;;  %v14844_v16 = vld [vmem:[#allocation6_spill] sm:$0xff] }
 0x1c2   : > { %9982 = vmatmul.msk.bf16.vlgmr.msra.gmra.mxu0 %vm1391_vm10, %v4659_v27  ;;  %v3927_v27 = vrot.slane %v3925_v39, 5  ;;  %v1716_v34 = vadd.f32 %v14844_v16, %v11124_v53  ;;  %v4451_v39 = vld [vmem:[#allocation2 + $0x30] sm:$0xe] }
 0x1c3   : > { %9932 = vmatmul.msk.bf16.vlgmr.msra.gmra.mxu2 %vm1391_vm10, %v10426_v60  ;;  %v11802_v41 = vadd.f32 %v3035_v59, %v2407_v33  ;;  %v3921_v49 = vrot.slane %v3919_v25, 5  ;;  %v3931_v60 = vrot.slane %v3929_v61, 4  ;;  %v4629_v33 = vunpack.c.l.b16 %v4523_v54 }
 0x1c4   : > { %v4529_v61 = vrot.slane %v11761_v42, 5 }
 0x1c5   : > { %v11818_v11 = vpop.f32.mrf.mxu1  ;;  %v3922_v35 = vor.u32 %v3921_v49, %v3918_v44  ;;  %v3932_v18 = vor.u32 %v3931_v60, %v3927_v27  ;;  %v4660_v26 = vpack.c.b16 %v4630_v6, %v4629_v33  ;;  %v9967_v44 = vrot.slane %v4451_v39, 9 }
 0x1c6   : > { %v2066_v59 = vpop.f32.mrf.mxu2  ;;  %v4531_v42 = vrot.slane %v4529_v61, 4  ;;  %v3940_v60 = vshrl.u32 %v3807_v4, 16  ;;  %v3943_v33 = vshll.u32 %v3807_v4, 16  ;;  %v3949_v6 = vshll.u32 %v11836_v57, 16 }
 0x1c7   : > { %v2122_v36 = vadd.f32 %v2066_v59, %v11110_v15  ;;  %v3040_v30 = vpop.f32.mrf.mxu0 }
 0x1c8   : > { %v3951_v39 = vrot.slane %v3949_v6, 5 }
 0x1c9   : > { %v2408_v9 = vadd.f32 %v11767_v45, %v2122_v36  ;;  %v11823_v31 = vpop.f32.mrf.mxu3  ;;  %v3935_v45 = vshll.u32 %v11821_v46, 16  ;;  %v3923_v36 = vrot.slane %v3922_v35, 4  ;;  %v14846_v35 = vld [vmem:[#allocation12_spill] sm:$0xff] }
 0x1cb   : > { %v3094_v15 = vadd.f32 %v3038_v40, %v2408_v9  ;;  %v3937_v54 = vrot.slane %v3935_v45, 5  ;;  %v4532_v9 = vrot.slane %v11784_v29, 5 }
 0x1cd   : > { %v11828_v22 = vadd.f32 %v11781_v1, %v3094_v15  ;;  %9951 = vmatmul.msk.bf16.gmra.mxu3 %vm1391_vm10, %v4263_v8  ;;  %v11833_v59 = vpop.f32.mrf.mxu1  ;;  %v3933_v1 = vrot.slane %v3932_v18, 4  ;;  %v3953_v8 = vshrl.u32 %v11836_v57, 16  ;;  %v4533_v29 = vsel %vm11082_vm2, %v4531_v42, %v4532_v9 }
 0x1ce   : > { %v2068_v58 = vpop.f32.mrf.mxu2  ;;  %14845 = vst [vmem:[#allocation6_spill] sm:$0xff] %v11833_v59  ;;  %v4632_v4 = vunpack.c.l.b16 %v4533_v29 }
 0x1cf   : > { %v2123_v25 = vadd.f32 %v2068_v58, %v1716_v34  ;;  %v3043_v40 = vpop.f32.mrf.mxu0  ;;  %v3938_v15 = vsel %vm10695_vm13, %v3933_v1, %v3937_v54  ;;  %v4530_v34 = vsel %vm11082_vm2, %v9967_v44, %v4529_v61  ;;  %v14847_v61 = vld [vmem:[#allocation14_spill] sm:$0xff]  ;;  %v14848_v44 = vld [vmem:[#allocation9_spill] sm:$0xff] }
 0x1d0   : > { %v4236_v45 = vunpack.c.l.b16 %v3938_v15  ;;  %v4631_v54 = vunpack.c.l.b16 %v4530_v34  ;;  %v4452_v34 = vld [vmem:[#allocation2 + $0x3c] sm:$0xe] }
 0x1d1   : > { %v2409_v53 = vadd.f32 %v11786_v5, %v2123_v25  ;;  %v11842_v49 = vpop.f32.mrf.mxu3  ;;  %v3928_v5 = vsel %vm10695_vm13, %v3923_v36, %v3927_v27  ;;  %v3942_v25 = vrot.slane %v3940_v60, 4  ;;  %v3955_v36 = vrot.slane %v3953_v8, 4  ;;  %v10428_v8 = vld [vmem:[#allocation2 + $0x30] sm:$0xff] }
 0x1d2   : > { %9983 = vmatmul.msk.bf16.gmra.mxu0 %vm1391_vm10, %v4660_v26  ;;  %v4235_v27 = vunpack.c.l.b16 %v3928_v5  ;;  %v4661_v6 = vpack.c.b16 %v4632_v4, %v4631_v54  ;;  %v4539_v54 = vrot.slane %v11821_v46, 5 }
 0x1d3   : > { %9933 = vmatmul.msk.bf16.gmra.mxu2 %vm1391_vm10, %v10427_v12  ;;  %v11840_v0 = vadd.f32 %v3040_v30, %v2409_v53  ;;  %v3945_v12 = vrot.slane %v3943_v33, 5  ;;  %v11859_v53 = vld [vmem:[#allocation2 + $0x50] sm:$0x1]  ;;  %v3956_v60 = vor.u32 %v3955_v36, %v3951_v39 }
 0x1d4   : > { %v4264_v42 = vpack.c.b16 %v4236_v45, %v4235_v27 }
 0x1d5   : > { %v11856_v58 = vpop.f32.mrf.mxu1  ;;  %v3946_v5 = vor.u32 %v3945_v12, %v3942_v25  ;;  %v3957_v45 = vrot.slane %v3956_v60, 4  ;;  %v11874_v12 = vld [vmem:[#allocation2 + $0x58] sm:$0xf] }
 0x1d6   : > { %v2071_v30 = vpop.f32.mrf.mxu2  ;;  %v14852_v60 = vld [vmem:[#allocation17_spill] sm:$0xff] }
 0x1d7   : > { %v2124_v16 = vadd.f32 %v2071_v30, %v14846_v35  ;;  %v3045_v18 = vpop.f32.mrf.mxu0  ;;  %v1721_v30 = vadd.f32 %v14848_v44, %v14847_v61 }
 0x1d9   : > { %v2410_v26 = vadd.f32 %v11805_v23, %v2124_v16  ;;  %v11863_v35 = vpop.f32.mrf.mxu3  ;;  %v3959_v23 = vshll.u32 %v11859_v53, 16 }
 0x1db   : > { %v3096_v1 = vadd.f32 %v3043_v40, %v2410_v26  ;;  %v4536_v40 = vrot.slane %v11798_v51, 5  ;;  %v3961_v25 = vrot.slane %v3959_v23, 5  ;;  %v3810_v26 = vld [vmem:[#allocation2 + $0x54] sm:$0xf]  ;;  %v9968_v51 = vrot.slane %v4452_v34, 9 }
 0x1dc   : > { %v3964_v61 = vshrl.u32 %v3810_v26, 16 }
 0x1dd   : > { %v11866_v9 = vadd.f32 %v11818_v11, %v3096_v1  ;;  %9952 = vmatmul.msk.bf16.gmra.mxu3 %vm1391_vm10, %v4264_v42  ;;  %v11871_v29 = vpop.f32.mrf.mxu1  ;;  %v3947_v11 = vrot.slane %v3946_v5, 4  ;;  %v4538_v1 = vrot.slane %v4536_v40, 4  ;;  %v3973_v42 = vshll.u32 %v11874_v12, 16 }
 0x1de   : > { %v2073_v15 = vpop.f32.mrf.mxu2  ;;  %14850 = vst [vmem:[#allocation14_spill] sm:$0xff] %v11871_v29  ;;  %v3977_v5 = vshrl.u32 %v11874_v12, 16  ;;  %v4537_v46 = vsel %vm11082_vm2, %v9968_v51, %v4536_v40 }
 0x1df   : > { %14849 = vst [vmem:[#allocation12_spill] sm:$0xff] %v11866_v9  ;;  %v2125_v33 = vadd.f32 %v2073_v15, %v1721_v30  ;;  %v3048_v16 = vpop.f32.mrf.mxu0  ;;  %v3952_v44 = vsel %vm10695_vm13, %v3947_v11, %v3951_v39  ;;  %v3962_v30 = vsel %vm10695_vm13, %v3957_v45, %v3961_v25  ;;  %v4540_v15 = vsel %vm11082_vm2, %v4538_v1, %v4539_v54  ;;  %v14853_v1 = vld [vmem:[#allocation18_spill] sm:$0xff]  ;;  %v14854_v54 = vld [vmem:[#allocation13_spill] sm:$0xff] }
 0x1e0   : > { %v3966_v39 = vrot.slane %v3964_v61, 4  ;;  %v3975_v11 = vrot.slane %v3973_v42, 5  ;;  %v3979_v45 = vrot.slane %v3977_v5, 4 }
 0x1e1   : > { %v2411_v27 = vadd.f32 %v11823_v31, %v2125_v33  ;;  %v11881_v4 = vpop.f32.mrf.mxu3  ;;  %v3967_v31 = vshll.u32 %v3810_v26, 16  ;;  %v11895_v26 = vld [vmem:[#allocation2 + $0x5c] sm:$0x1] }
 0x1e2   : > { %9984 = vmatmul.msk.bf16.gmra.mxu0 %vm1391_vm10, %v4661_v6  ;;  %v4237_v6 = vunpack.c.l.b16 %v3952_v44  ;;  %v1726_v44 = vadd.f32 %v14854_v54, %v14853_v1 }
 0x1e3   : > { %9934 = vmatmul.msk.bf16.gmra.mxu2 %vm1391_vm10, %v10428_v8  ;;  %v11878_v36 = vadd.f32 %v3045_v18, %v2411_v27  ;;  %v4238_v8 = vunpack.c.l.b16 %v3962_v30  ;;  %v3969_v34 = vrot.slane %v3967_v31, 5  ;;  %v3980_v31 = vor.u32 %v3979_v45, %v3975_v11 }
 0x1e5   : > { %14851 = vst [vmem:[#allocation9_spill] sm:$0xff] %v11878_v36  ;;  %v3451_v25 = vpop.f32.mrf.mxu1  ;;  %v4265_v40 = vpack.c.b16 %v4238_v8, %v4237_v6  ;;  %v3970_v51 = vor.u32 %v3969_v34, %v3966_v39  ;;  %v3981_v39 = vrot.slane %v3980_v31, 4 }
 0x1e6   : > { %v2076_v18 = vpop.f32.mrf.mxu2 }
 0x1e7   : > { %v2126_v23 = vadd.f32 %v2076_v18, %v14852_v60  ;;  %v3050_v33 = vpop.f32.mrf.mxu0  ;;  %v4633_v18 = vunpack.c.l.b16 %v4537_v46  ;;  %v4634_v60 = vunpack.c.l.b16 %v4540_v15  ;;  %v4453_v46 = vld [vmem:[#allocation2 + $0x48] sm:$0xe]  ;;  %v4543_v15 = vrot.slane %v11836_v57, 5 }
 0x1e8   : > { %v3971_v6 = vrot.slane %v3970_v51, 4  ;;  %v9969_v45 = vrot.slane %v4453_v46, 9  ;;  %v4546_v57 = vrot.slane %v11859_v53, 5 }
 0x1e9   : > { %v2412_v27 = vadd.f32 %v11842_v49, %v2126_v23  ;;  %v11897_v19 = vpop.f32.mrf.mxu3  ;;  %v3983_v49 = vshll.u32 %v11895_v26, 16  ;;  %v4662_v5 = vpack.c.b16 %v4634_v60, %v4633_v18  ;;  %v10429_v23 = vld [vmem:[#allocation2 + $0x3c] sm:$0xff]  ;;  %v4545_v60 = vrot.slane %v4543_v15, 4 }
 0x1ea   : > { %v4544_v53 = vsel %vm11082_vm2, %v9969_v45, %v4543_v15 }
 0x1eb   : > { %v3098_v10 = vadd.f32 %v3048_v16, %v2412_v27  ;;  %v3985_v34 = vrot.slane %v3983_v49, 5  ;;  %v14858_v49 = vld [vmem:[#allocation21_spill] sm:$0xff]  ;;  %v4635_v29 = vunpack.c.l.b16 %v4544_v53 }
 0x1ed   : > { %v11902_v61 = vadd.f32 %v11856_v58, %v3098_v10  ;;  %9953 = vmatmul.msk.bf16.gmra.mxu3 %vm1391_vm10, %v4265_v40  ;;  %v3813_v10 = vld [vmem:[#allocation2 + $0x60] sm:$0xf]  ;;  %v11908_v58 = vld [vmem:[#allocation2 + $0x64] sm:$0xf]  ;;  %v11917_v40 = vpop.f32.mrf.mxu1  ;;  %v3986_v1 = vsel %vm10695_vm13, %v3981_v39, %v3985_v34 }
 0x1ee   : > { %v2078_v30 = vpop.f32.mrf.mxu2  ;;  %14857 = vst [vmem:[#allocation13_spill] sm:$0xff] %v11917_v40  ;;  %v3988_v51 = vshrl.u32 %v3813_v10, 16  ;;  %v3991_v54 = vshll.u32 %v3813_v10, 16  ;;  %v11931_v10 = vld [vmem:[#allocation2 + $0x68] sm:$0x1] }
 0x1ef   : > { %14855 = vst [vmem:[#allocation17_spill] sm:$0xff] %v11902_v61  ;;  %v2127_v42 = vadd.f32 %v2078_v30, %v1726_v44  ;;  %v3053_v16 = vpop.f32.mrf.mxu0  ;;  %v3997_v44 = vshll.u32 %v11908_v58, 16 }
 0x1f0   : > { %v3990_v46 = vrot.slane %v3988_v51, 4 }
 0x1f1   : > { %v2413_v8 = vadd.f32 %v11863_v35, %v2127_v42  ;;  %v11914_v18 = vpop.f32.mrf.mxu3  ;;  %v3976_v35 = vsel %vm10695_vm13, %v3971_v6, %v3975_v11  ;;  %v3999_v39 = vrot.slane %v3997_v44, 5  ;;  %v10430_v44 = vld [vmem:[#allocation2 + $0x48] sm:$0xff] }
 0x1f2   : > { %9985 = vmatmul.msk.bf16.gmra.mxu0 %vm1391_vm10, %v4662_v5  ;;  %v4547_v5 = vsel %vm11082_vm2, %v4545_v60, %v4546_v57  ;;  %v4239_v11 = vunpack.c.l.b16 %v3976_v35  ;;  %v4007_v57 = vshll.u32 %v11931_v10, 16 }
 0x1f3   : > { %9935 = vmatmul.msk.bf16.gmra.mxu2 %vm1391_vm10, %v10429_v23  ;;  %v11912_v27 = vadd.f32 %v3050_v33, %v2413_v8  ;;  %v4001_v33 = vshrl.u32 %v11908_v58, 16  ;;  %v4240_v23 = vunpack.c.l.b16 %v3986_v1  ;;  %v3993_v8 = vrot.slane %v3991_v54, 5 }
 0x1f5   : > { %14856 = vst [vmem:[#allocation18_spill] sm:$0xff] %v11912_v27  ;;  %v4003_v34 = vrot.slane %v4001_v33, 4  ;;  %v4266_v15 = vpack.c.b16 %v4240_v23, %v4239_v11  ;;  %v3994_v27 = vor.u32 %v3993_v8, %v3990_v46  ;;  %v3456_v51 = vpop.f32.mrf.mxu1  ;;  %v4550_v33 = vrot.slane %v11874_v12, 5  ;;  %v3816_v11 = vld [vmem:[#allocation2 + $0x6c] sm:$0xf] }
 0x1f6   : > { %v2081_v31 = vpop.f32.mrf.mxu2  ;;  %v11942_v23 = vld [vmem:[#allocation2 + $0x70] sm:$0xf] }
 0x1f7   : > { %v2128_v30 = vadd.f32 %v2081_v31, %v14858_v49  ;;  %v3055_v42 = vpop.f32.mrf.mxu0  ;;  %v4636_v31 = vunpack.c.l.b16 %v4547_v5  ;;  %v4004_v60 = vor.u32 %v4003_v34, %v3999_v39  ;;  %v4009_v5 = vrot.slane %v4007_v57, 5  ;;  %v14862_v57 = vld [vmem:[#allocation25_spill] sm:$0xff] }
 0x1f8   : > { %v4552_v12 = vrot.slane %v4550_v33, 4  ;;  %v4012_v34 = vshrl.u32 %v3816_v11, 16 }
 0x1f9   : > { %v2414_v6 = vadd.f32 %v11881_v4, %v2128_v30  ;;  %v11933_v49 = vpop.f32.mrf.mxu3  ;;  %v14860_v4 = vld [vmem:[#allocation22_spill] sm:$0xff]  ;;  %v4663_v54 = vpack.c.b16 %v4636_v31, %v4635_v29  ;;  %v4454_v30 = vld [vmem:[#allocation2 + $0x54] sm:$0xe] }
 0x1fa   : > { %v9970_v46 = vrot.slane %v4454_v30, 9  ;;  %v4014_v30 = vrot.slane %v4012_v34, 4 }
 0x1fb   : > { %v3100_v40 = vadd.f32 %v3053_v16, %v2414_v6  ;;  %v4553_v6 = vrot.slane %v11895_v26, 5 }
 0x1fc   : > { %v4551_v26 = vsel %vm11082_vm2, %v9970_v46, %v4550_v33 }
 0x1fd   : > { %v11935_v45 = vadd.f32 %v3451_v25, %v3100_v40  ;;  %9954 = vmatmul.msk.bf16.gmra.mxu3 %vm1391_vm10, %v4266_v15  ;;  %v3995_v25 = vrot.slane %v3994_v27, 4  ;;  %v4005_v40 = vrot.slane %v4004_v60, 4  ;;  %v4021_v15 = vshll.u32 %v11942_v23, 16 }
 0x1fe   : > { %v2083_v35 = vpop.f32.mrf.mxu2  ;;  %v4025_v60 = vshrl.u32 %v11942_v23, 16 }
 0x1ff   : > { %14859 = vst [vmem:[#allocation21_spill] sm:$0xff] %v11935_v45  ;;  %v2129_v1 = vadd.f32 %v2083_v35, %v14860_v4  ;;  %v3058_v16 = vpop.f32.mrf.mxu0  ;;  %v4000_v27 = vsel %vm10695_vm13, %v3995_v25, %v3999_v39  ;;  %v4010_v31 = vsel %vm10695_vm13, %v4005_v40, %v4009_v5  ;;  %v4554_v4 = vsel %vm11082_vm2, %v4552_v12, %v4553_v6 }
 0x200   : > { %v4241_v39 = vunpack.c.l.b16 %v4000_v27  ;;  %v4023_v40 = vrot.slane %v4021_v15, 5  ;;  %v4027_v5 = vrot.slane %v4025_v60, 4  ;;  %v10431_v15 = vld [vmem:[#allocation2 + $0x54] sm:$0xff] }
 0x201   : > { %v2415_v53 = vadd.f32 %v11897_v19, %v2129_v1  ;;  %v11949_v8 = vpop.f32.mrf.mxu3  ;;  %v4015_v19 = vshll.u32 %v3816_v11, 16  ;;  %v11965_v11 = vld [vmem:[#allocation2 + $0x74] sm:$0x1] }
 0x202   : > { %9986 = vmatmul.msk.bf16.gmra.mxu0 %vm1391_vm10, %v4663_v54  ;;  %v11962_v54 = vpop.f32.mrf.mxu1  ;;  %v4031_v27 = vshll.u32 %v11965_v11, 16 }
 0x203   : > { %9936 = vmatmul.msk.bf16.gmra.mxu2 %vm1391_vm10, %v10430_v44  ;;  %v11946_v29 = vadd.f32 %v3055_v42, %v2415_v53  ;;  %14863 = vst [vmem:[#allocation25_spill] sm:$0xff] %v11962_v54  ;;  %v4242_v44 = vunpack.c.l.b16 %v4010_v31  ;;  %v4017_v53 = vrot.slane %v4015_v19, 5  ;;  %v4028_v54 = vor.u32 %v4027_v5, %v4023_v40  ;;  %v14865_v19 = vld [vmem:[#allocation26_spill] sm:$0xff] }
 0x205   : > { %14861 = vst [vmem:[#allocation22_spill] sm:$0xff] %v11946_v29  ;;  %v4638_v29 = vunpack.c.l.b16 %v4554_v4  ;;  %v4267_v46 = vpack.c.b16 %v4242_v44, %v4241_v39  ;;  %v4018_v12 = vor.u32 %v4017_v53, %v4014_v30  ;;  %v4029_v39 = vrot.slane %v4028_v54, 4  ;;  %v3819_v44 = vld [vmem:[#allocation2 + $0x78] sm:$0xf]  ;;  %v11976_v53 = vld [vmem:[#allocation2 + $0x7c] sm:$0xf] }
 0x206   : > { %v2086_v42 = vpop.f32.mrf.mxu2  ;;  %v4036_v54 = vshrl.u32 %v3819_v44, 16 }
 0x207   : > { %v2130_v35 = vadd.f32 %v2086_v42, %v14862_v57  ;;  %v3060_v1 = vpop.f32.mrf.mxu0  ;;  %v4637_v57 = vunpack.c.l.b16 %v4551_v26  ;;  %v4019_v26 = vrot.slane %v4018_v12, 4  ;;  %v4045_v12 = vshll.u32 %v11976_v53, 16 }
 0x209   : > { %v2416_v25 = vadd.f32 %v11914_v18, %v2130_v35  ;;  %v11967_v33 = vpop.f32.mrf.mxu3  ;;  %v4664_v18 = vpack.c.b16 %v4638_v29, %v4637_v57  ;;  %v4557_v35 = vrot.slane %v11908_v58, 5  ;;  %v4560_v58 = vrot.slane %v11931_v10, 5 }
 0x20a   : > { %v3461_v30 = vpop.f32.mrf.mxu1 }
 0x20b   : > { %v3102_v42 = vadd.f32 %v3058_v16, %v2416_v25  ;;  %v4455_v16 = vld [vmem:[#allocation2 + $0x60] sm:$0xe] }
 0x20c   : > { %v9971_v25 = vrot.slane %v4455_v16, 9  ;;  %v4038_v16 = vrot.slane %v4036_v54, 4  ;;  %v14870_v54 = vld [vmem:[#allocation32_spill] sm:$0xff] }
 0x20d   : > { %v11969_v6 = vadd.f32 %v3456_v51, %v3102_v42  ;;  %9955 = vmatmul.msk.bf16.gmra.mxu3 %vm1391_vm10, %v4267_v46  ;;  %v4033_v51 = vrot.slane %v4031_v27, 5  ;;  %v4559_v42 = vrot.slane %v4557_v35, 4  ;;  %v4039_v46 = vshll.u32 %v3819_v44, 16  ;;  %v11997_v44 = vld [vmem:[#allocation2 + $0x80] sm:$0x1] }
 0x20e   : > { %v2088_v34 = vpop.f32.mrf.mxu2  ;;  %v4049_v27 = vshrl.u32 %v11976_v53, 16 }
 0x20f   : > { %14864 = vst [vmem:[#allocation60_spill] sm:$0xff] %v11969_v6  ;;  %v2131_v31 = vadd.f32 %v2088_v34, %v14865_v19  ;;  %v3063_v60 = vpop.f32.mrf.mxu0  ;;  %v4034_v57 = vsel %vm10695_vm13, %v4029_v39, %v4033_v51  ;;  %v14867_v34 = vld [vmem:[#allocation29_spill] sm:$0xff]  ;;  %v4561_v10 = vsel %vm11082_vm2, %v4559_v42, %v4560_v58  ;;  %v4047_v39 = vrot.slane %v4045_v12, 5  ;;  %v10432_v12 = vld [vmem:[#allocation2 + $0x60] sm:$0xff] }
 0x210   : > { %v4051_v51 = vrot.slane %v4049_v27, 4  ;;  %v3822_v27 = vld [vmem:[#allocation2 + $0x84] sm:$0xf] }
 0x211   : > { %v2417_v4 = vadd.f32 %v11933_v49, %v2131_v31  ;;  %v11982_v5 = vpop.f32.mrf.mxu3  ;;  %v4024_v49 = vsel %vm10695_vm13, %v4019_v26, %v4023_v40  ;;  %v4558_v31 = vsel %vm11082_vm2, %v9971_v25, %v4557_v35 }
 0x212   : > { %9987 = vmatmul.msk.bf16.gmra.mxu0 %vm1391_vm10, %v4664_v18  ;;  %v4243_v40 = vunpack.c.l.b16 %v4024_v49  ;;  %v4639_v6 = vunpack.c.l.b16 %v4558_v31  ;;  %v12001_v35 = vpop.f32.mrf.mxu1  ;;  %v4052_v58 = vor.u32 %v4051_v51, %v4047_v39  ;;  %v4055_v49 = vshll.u32 %v11997_v44, 16  ;;  %v4456_v31 = vld [vmem:[#allocation2 + $0x6c] sm:$0xe] }
 0x213   : > { %9937 = vmatmul.msk.bf16.gmra.mxu2 %vm1391_vm10, %v10431_v15  ;;  %v11980_v29 = vadd.f32 %v3060_v1, %v2417_v4  ;;  %v4244_v15 = vunpack.c.l.b16 %v4034_v57  ;;  %v4041_v4 = vrot.slane %v4039_v46, 5  ;;  %14868 = vst [vmem:[#allocation29_spill] sm:$0xff] %v12001_v35  ;;  %v4567_v51 = vrot.slane %v11965_v11, 5  ;;  %v331_v35 = vld [vmem:[#allocation3 + $0xc] sm:$0x1] }
 0x215   : > { %14866 = vst [vmem:[#allocation26_spill] sm:$0xff] %v11980_v29  ;;  %v4268_v25 = vpack.c.b16 %v4244_v15, %v4243_v40  ;;  %v4042_v42 = vor.u32 %v4041_v4, %v4038_v16  ;;  %v4057_v40 = vrot.slane %v4055_v49, 5  ;;  %v12010_v15 = vld [vmem:[#allocation2 + $0x88] sm:$0xf]  ;;  %v4060_v16 = vshrl.u32 %v3822_v27, 16 }
 0x216   : > { %v2091_v1 = vpop.f32.mrf.mxu2 }
 0x217   : > { %v2132_v19 = vadd.f32 %v2091_v1, %v14867_v34  ;;  %v3065_v18 = vpop.f32.mrf.mxu0  ;;  %v4640_v1 = vunpack.c.l.b16 %v4561_v10 }
 0x219   : > { %v2418_v26 = vadd.f32 %v11949_v8, %v2132_v19  ;;  %v11999_v34 = vpop.f32.mrf.mxu3  ;;  %v4665_v46 = vpack.c.b16 %v4640_v1, %v4639_v6 }
 0x21b   : > { %v3104_v29 = vadd.f32 %v3063_v60, %v2418_v26  ;;  %v4564_v60 = vrot.slane %v11942_v23, 5  ;;  %v4063_v26 = vshll.u32 %v3822_v27, 16  ;;  %v9972_v23 = vrot.slane %v4456_v31, 9 }
 0x21d   : > { %v12003_v45 = vadd.f32 %v3461_v30, %v3104_v29  ;;  %9956 = vmatmul.msk.bf16.gmra.mxu3 %vm1391_vm10, %v4268_v25  ;;  %v4043_v30 = vrot.slane %v4042_v42, 4  ;;  %v4053_v29 = vrot.slane %v4052_v58, 4  ;;  %v4566_v4 = vrot.slane %v4564_v60, 4 }
 0x21e   : > { %v2093_v8 = vpop.f32.mrf.mxu2  ;;  %v4073_v25 = vshrl.u32 %v12010_v15, 16  ;;  %v4565_v11 = vsel %vm11082_vm2, %v9972_v23, %v4564_v60 }
 0x21f   : > { %14869 = vst [vmem:[#allocation61_spill] sm:$0xff] %v12003_v45  ;;  %v2133_v57 = vadd.f32 %v2093_v8, %v14870_v54  ;;  %v3068_v19 = vpop.f32.mrf.mxu0  ;;  %v4048_v42 = vsel %vm10695_vm13, %v4043_v30, %v4047_v39  ;;  %v4058_v58 = vsel %vm10695_vm13, %v4053_v29, %v4057_v40  ;;  %v3466_v8 = vpop.f32.mrf.mxu1  ;;  %v4065_v54 = vrot.slane %v4063_v26, 5  ;;  %v4458_v45 = vld [vmem:[#allocation2 + $0x84] sm:$0xe] }
 0x220   : > { %v4245_v31 = vunpack.c.l.b16 %v4048_v42  ;;  %v4075_v30 = vrot.slane %v4073_v25, 4  ;;  %v332_v40 = vsel %vm10589_vm4, 0, %v331_v35  ;;  %v4641_v60 = vunpack.c.l.b16 %v4565_v11  ;;  %v328_v35 = vld [vmem:[#allocation3] sm:$0x1] }
 0x221   : > { %v2419_v10 = vadd.f32 %v11967_v33, %v2133_v57  ;;  %v12017_v1 = vpop.f32.mrf.mxu3  ;;  %v4069_v33 = vshll.u32 %v12010_v15, 16  ;;  %v14872_v57 = vld [vmem:[#allocation33_spill] sm:$0xff]  ;;  %333 = vst [vmem:[#allocation3 + $0xc] sm:$0x1] %v332_v40 }
 0x222   : > { %9988 = vmatmul.msk.bf16.gmra.mxu0 %vm1391_vm10, %v4665_v46 }
 0x223   : > { %9938 = vmatmul.msk.bf16.gmra.mxu2 %vm1391_vm10, %v10432_v12  ;;  %v12014_v6 = vadd.f32 %v3065_v18, %v2419_v10  ;;  %v4062_v18 = vrot.slane %v4060_v16, 4  ;;  %v4568_v12 = vsel %vm11082_vm2, %v4566_v4, %v4567_v51  ;;  %v4246_v10 = vunpack.c.l.b16 %v4058_v58  ;;  %v12033_v16 = vld [vmem:[#allocation2 + $0x8c] sm:$0x1] }
 0x224   : > { %v4071_v39 = vrot.slane %v4069_v33, 5  ;;  %v4642_v23 = vunpack.c.l.b16 %v4568_v12  ;;  %v4079_v42 = vshll.u32 %v12033_v16, 16 }
 0x225   : > { %14871 = vst [vmem:[#allocation32_spill] sm:$0xff] %v12014_v6  ;;  %v4066_v26 = vor.u32 %v4065_v54, %v4062_v18  ;;  %v4269_v4 = vpack.c.b16 %v4246_v10, %v4245_v31  ;;  %v10433_v18 = vld [vmem:[#allocation2 + $0x6c] sm:$0xff] }
 0x226   : > { %v2096_v49 = vpop.f32.mrf.mxu2  ;;  %v4076_v51 = vor.u32 %v4075_v30, %v4071_v39  ;;  %v4666_v40 = vpack.c.b16 %v4642_v23, %v4641_v60  ;;  %v4081_v31 = vrot.slane %v4079_v42, 5  ;;  %v3825_v10 = vld [vmem:[#allocation2 + $0x90] sm:$0xf]  ;;  %v12048_v30 = vld [vmem:[#allocation2 + $0x94] sm:$0xf] }
 0x227   : > { %v2134_v46 = vadd.f32 %v2096_v49, %v14872_v57  ;;  %v3070_v27 = vpop.f32.mrf.mxu0  ;;  %v4067_v58 = vrot.slane %v4066_v26, 4  ;;  %v12042_v11 = vpop.f32.mrf.mxu1  ;;  %v382_v23 = vld [vmem:[#allocation3 + $0x8] sm:$0x1]  ;;  %v4087_v42 = vshll.u32 %v3825_v10, 16 }
 0x228   : > { %v4077_v12 = vrot.slane %v4076_v51, 4  ;;  %v4084_v51 = vshrl.u32 %v3825_v10, 16 }
 0x229   : > { %v2420_v29 = vadd.f32 %v11982_v5, %v2134_v46  ;;  %v12035_v57 = vpop.f32.mrf.mxu3  ;;  %v4571_v5 = vrot.slane %v11976_v53, 5  ;;  %v14874_v46 = vld [vmem:[#allocation36_spill] sm:$0xff]  ;;  %v4072_v60 = vsel %vm10695_vm13, %v4067_v58, %v4071_v39  ;;  %v4097_v39 = vshrl.u32 %v12048_v30, 16 }
 0x22a   : > { %14875 = vst [vmem:[#allocation36_spill] sm:$0xff] %v12042_v11  ;;  %v4086_v10 = vrot.slane %v4084_v51, 4  ;;  %v4578_v51 = vrot.slane %v12010_v15, 5 }
 0x22b   : > { %v3106_v49 = vadd.f32 %v3068_v19, %v2420_v29  ;;  %v4457_v19 = vld [vmem:[#allocation2 + $0x78] sm:$0xe]  ;;  %v4573_v26 = vrot.slane %v4571_v5, 4 }
 0x22c   : > { %v9973_v29 = vrot.slane %v4457_v19, 9 }
 0x22d   : > { %v12038_v33 = vadd.f32 %v3466_v8, %v3106_v49  ;;  %9957 = vmatmul.msk.bf16.gmra.mxu3 %vm1391_vm10, %v4269_v4  ;;  %v329_v8 = vsel %vm10589_vm4, 0, %v328_v35  ;;  %v4574_v49 = vrot.slane %v11997_v44, 5  ;;  %v4082_v44 = vsel %vm10695_vm13, %v4077_v12, %v4081_v31 }
 0x22e   : > { %v2098_v25 = vpop.f32.mrf.mxu2  ;;  %330 = vst [vmem:[#allocation3] sm:$0x1] %v329_v8  ;;  %v4248_v19 = vunpack.c.l.b16 %v4082_v44  ;;  %v4089_v8 = vrot.slane %v4087_v42, 5 }
 0x22f   : > { %14873 = vst [vmem:[#allocation33_spill] sm:$0xff] %v12038_v33  ;;  %v2135_v6 = vadd.f32 %v2098_v25, %v14874_v46  ;;  %v3073_v54 = vpop.f32.mrf.mxu0  ;;  %v4093_v25 = vshll.u32 %v12048_v30, 16  ;;  %v4575_v35 = vsel %vm11082_vm2, %v4573_v26, %v4574_v49  ;;  %v4247_v46 = vunpack.c.l.b16 %v4072_v60  ;;  %v3471_v60 = vpop.f32.mrf.mxu1 }
 0x231   : > { %v2421_v53 = vadd.f32 %v11999_v34, %v2135_v6  ;;  %v383_v34 = vsel %vm10649_vm9, 0, %v382_v23  ;;  %v12059_v6 = vpop.f32.mrf.mxu3  ;;  %v12070_v31 = vrot.slane %v4093_v25, 5  ;;  %v4099_v23 = vrot.slane %v4097_v39, 4 }
 0x232   : > { %9989 = vmatmul.msk.bf16.gmra.mxu0 %vm1391_vm10, %v4666_v40  ;;  %384 = vst [vmem:[#allocation3 + $0x8] sm:$0x1] %v383_v34  ;;  %v14877_v40 = vld [vmem:[#allocation37_spill] sm:$0xff]  ;;  %v4270_v25 = vpack.c.b16 %v4248_v19, %v4247_v46 }
 0x233   : > { %9939 = vmatmul.msk.bf16.gmra.mxu2 %vm1391_vm10, %v10433_v18  ;;  %v12055_v4 = vadd.f32 %v3070_v27, %v2421_v53  ;;  %v4572_v27 = vsel %vm11082_vm2, %v9973_v29, %v4571_v5  ;;  %v5413_v53 = vld [vmem:[#allocation3 + $0x4] sm:$0xf]  ;;  %v12073_v29 = vld [vmem:[#allocation2 + $0x98] sm:$0x1] }
 0x234   : > { %v5471_v34 = vshll.u32 %v5413_v53, 16  ;;  %v4643_v5 = vunpack.c.l.b16 %v4572_v27  ;;  %v4090_v27 = vor.u32 %v4089_v8, %v4086_v10  ;;  %v10434_v8 = vld [vmem:[#allocation2 + $0x78] sm:$0xff] }
 0x235   : > { %14876 = vst [vmem:[#allocation62_spill] sm:$0xff] %v12055_v4  ;;  %v5412_v11 = vld [vmem:[#allocation3] sm:$0xf]  ;;  %v5475_v4 = vshrl.u32 %v5413_v53, 16 }
 0x236   : > { %v2101_v58 = vpop.f32.mrf.mxu2  ;;  %v5462_v26 = vshrl.u32 %v5412_v11, 16  ;;  %v5465_v49 = vshll.u32 %v5412_v11, 16  ;;  %v5473_v42 = vrot.slane %v5471_v34, 5  ;;  %v4103_v11 = vshll.u32 %v12073_v29, 16 }
 0x237   : > { %v2136_v18 = vadd.f32 %v2101_v58, %v14877_v40  ;;  %v3075_v12 = vpop.f32.mrf.mxu0  ;;  %v4644_v58 = vunpack.c.l.b16 %v4575_v35  ;;  %v5477_v44 = vrot.slane %v5475_v4, 4  ;;  %v3828_v4 = vld [vmem:[#allocation2 + $0x9c] sm:$0xf]  ;;  %v9974_v34 = vrot.slane %v4458_v45, 9 }
 0x238   : > { %v5464_v61 = vrot.slane %v5462_v26, 4  ;;  %v5467_v59 = vrot.slane %v5465_v49, 5  ;;  %v14878_v49 = vld [vmem:[#allocation40_spill] sm:$0xff] }
 0x239   : > { %v2422_v33 = vadd.f32 %v12017_v1, %v2136_v18  ;;  %v5445_v39 = vld [vmem:[#allocation3 + $0x8] sm:$0x1]  ;;  %v12076_v53 = vpop.f32.mrf.mxu3  ;;  %v385_v1 = vld [vmem:[#allocation3 + $0x14] sm:$0x1]  ;;  %v4100_v18 = vor.u32 %v4099_v23, %v12070_v31  ;;  %v5478_v36 = vor.u32 %v5477_v44, %v5473_v42  ;;  %v4667_v19 = vpack.c.b16 %v4644_v58, %v4643_v5 }
 0x23a   : > { %v386_v15 = vsel %vm10649_vm9, 0, %v385_v1  ;;  %v4580_v23 = vrot.slane %v4578_v51, 4 }
 0x23b   : > { %v3108_v40 = vadd.f32 %v3073_v54, %v2422_v33  ;;  %v5468_v33 = vor.u32 %v5467_v59, %v5464_v61  ;;  %v5481_v54 = vshll.u32 %v5445_v39, 16  ;;  %387 = vst [vmem:[#allocation3 + $0x14] sm:$0x1] %v386_v15  ;;  %v5479_v26 = vrot.slane %v5478_v36, 4 }
 0x23c   : > { %v4581_v59 = vrot.slane %v12033_v16, 5  ;;  %v4091_v61 = vrot.slane %v4090_v27, 4  ;;  %v4111_v39 = vshll.u32 %v3828_v4, 16  ;;  %v4101_v45 = vrot.slane %v4100_v18, 4 }
 0x23d   : > { %v12080_v35 = vadd.f32 %v3471_v60, %v3108_v40  ;;  %v5469_v9 = vrot.slane %v5468_v33, 4  ;;  %v4108_v60 = vshrl.u32 %v3828_v4, 16  ;;  %9958 = vmatmul.msk.bf16.gmra.mxu3 %vm1391_vm10, %v4270_v25  ;;  %v5483_v40 = vrot.slane %v5481_v54, 5  ;;  %v334_v54 = vld [vmem:[#allocation3 + $0x18] sm:$0x1] }
 0x23e   : > { %v2103_v46 = vpop.f32.mrf.mxu2  ;;  %v4105_v36 = vrot.slane %v4103_v11, 5  ;;  %v4117_v33 = vshll.u32 %v12085_v47, 16  ;;  %v4121_v25 = vshrl.u32 %v12085_v47, 16  ;;  %v4113_v18 = vrot.slane %v4111_v39, 5 }
 0x23f   : > { %v2137_v10 = vadd.f32 %v2103_v46, %v14878_v49  ;;  %v4735_v44 = vpop.f32.mrf.mxu0  ;;  %v5474_v58 = vsel %vm10695_vm13, %v5469_v9, %v5473_v42  ;;  %v5484_v1 = vsel %vm10695_vm13, %v5479_v26, %v5483_v40  ;;  %v4110_v27 = vrot.slane %v4108_v60, 4  ;;  %v4459_v49 = vld [vmem:[#allocation2 + $0x90] sm:$0xe] }
 0x240   : > { %v5847_v15 = vunpack.c.l.b16 %v5474_v58  ;;  %v4579_v9 = vsel %vm11082_vm2, %v9974_v34, %v4578_v51  ;;  %v4582_v42 = vsel %vm11082_vm2, %v4580_v23, %v4581_v59  ;;  %v4096_v4 = vsel %vm10695_vm13, %v4091_v61, %v12070_v31  ;;  %v12118_v31 = vld [vmem:[#allocation2 + $0xa4] sm:$0x1] }
 0x241   : > { %v2423_v5 = vadd.f32 %v12035_v57, %v2137_v10  ;;  %v5848_v57 = vunpack.c.l.b16 %v5484_v1  ;;  %v12100_v11 = vpop.f32.mrf.mxu3  ;;  %v335_v26 = vsel %vm10589_vm4, 0, %v334_v54  ;;  %v4585_v10 = vrot.slane %v12048_v30, 5  ;;  %v12124_v30 = vld [vmem:[%s14739_s3] ss:$0 sm:$0xff] }
 0x242   : > { %9990 = vmatmul.msk.bf16.gmra.mxu0 %vm1391_vm10, %v4667_v19  ;;  %v12114_v51 = vrot.slane %v4117_v33, 5  ;;  %v4123_v34 = vrot.slane %v4121_v25, 4  ;;  %336 = vst [vmem:[#allocation3 + $0x18] sm:$0x1] %v335_v26  ;;  %v4114_v23 = vor.u32 %v4113_v18, %v4110_v27  ;;  %v4249_v59 = vunpack.c.l.b16 %v4096_v4  ;;  %v388_v18 = vld [vmem:[#allocation3 + $0x20] sm:$0x1] }
 0x243   : > { %9940 = vmatmul.msk.bf16.gmra.mxu2 %vm1391_vm10, %v10434_v8  ;;  %v12098_v16 = vadd.f32 %v3075_v12, %v2423_v5  ;;  %v4106_v12 = vsel %vm10695_vm13, %v4101_v45, %v4105_v36  ;;  %v5879_v46 = vpack.c.b16 %v5848_v57, %v5847_v15  ;;  %v4645_v39 = vunpack.c.l.b16 %v4579_v9  ;;  %v4460_v9 = vld [vmem:[#allocation2 + $0x9c] sm:$0xe] }
 0x244   : > { %v4250_v61 = vunpack.c.l.b16 %v4106_v12  ;;  %v4646_v5 = vunpack.c.l.b16 %v4582_v42  ;;  %v9975_v45 = vrot.slane %v4459_v49, 9  ;;  %v4588_v36 = vrot.slane %v12073_v29, 5  ;;  %v5444_v29 = vld [vmem:[%s14738_s2] sm:$0x3]  ;;  %v3831_v12 = vld [vmem:[#allocation2 + $0xa8] sm:$0xf] }
 0x245   : > { %9999 = vmatmul.msk.bf16.vlgmr.msra.gmra.mxu1 %vm1391_vm10, %v5879_v46  ;;  %v4124_v58 = vor.u32 %v4123_v34, %v12114_v51  ;;  %v4127_v1 = vshll.u32 %v12118_v31, 16  ;;  %v4115_v33 = vrot.slane %v4114_v23, 4  ;;  %v4592_v25 = vrot.slane %v12085_v47, 5  ;;  %v12152_v34 = vld [vmem:[#allocation2 + $0xac] sm:$0xf] }
 0x246   : > { %v3683_v19 = vpop.f32.mrf.mxu2  ;;  %v4271_v27 = vpack.c.b16 %v4250_v61, %v4249_v59  ;;  %v6164_v54 = vsel %vm1440_vm0, %v5444_v29, 0  ;;  %v389_v4 = vsel %vm10649_vm9, 0, %v388_v18  ;;  %v12146_v47 = vsel %vm11082_vm2, %v9975_v45, %v4585_v10  ;;  %v10435_v59 = vld [vmem:[#allocation2 + $0x84] sm:$0xff] }
 0x247   : > { %v3763_v8 = vadd.f32 %v3683_v19, %v11449_v7  ;;  %v4737_v60 = vpop.f32.mrf.mxu0  ;;  %v4587_v7 = vrot.slane %v4585_v10, 4  ;;  %6173 = vmatpush.bf16.msrb.mxu2 %v6164_v54  ;;  %390 = vst [vmem:[#allocation3 + $0x20] sm:$0x1] %v389_v4  ;;  %v4125_v26 = vrot.slane %v4124_v58, 4  ;;  %v4129_v49 = vrot.slane %v4127_v1, 5 }
 0x248   : > { %v4120_v61 = vsel %vm10695_vm13, %v4115_v33, %v12114_v51  ;;  %v4135_v45 = vshll.u32 %v3831_v12, 16  ;;  %v4595_v1 = vrot.slane %v12118_v31, 5 }
 0x249   : > { %v4417_v40 = vadd.f32 %v12059_v6, %v3763_v8  ;;  %v12132_v6 = vld [vmem:[%s14739_s3 + $0x1] ss:$0 sm:$0xff]  ;;  %v12135_v57 = vpop.f32.mrf.mxu3  ;;  %v12150_v19 = vsel %vm11082_vm2, %v4587_v7, %v4588_v36  ;;  %v4141_v7 = vshll.u32 %v12152_v34, 16  ;;  %v4130_v54 = vsel %vm10695_vm13, %v4125_v26, %v4129_v49  ;;  %v337_v49 = vld [vmem:[#allocation3 + $0x24] sm:$0x1] }
 0x24a   : > { %v4137_v29 = vrot.slane %v4135_v45, 5  ;;  %v4648_v31 = vunpack.c.l.b16 %v12150_v19  ;;  %v12176_v4 = vunpack.c.l.b16 %v4120_v61 }
 0x24b   : > { %v4815_v15 = vadd.f32 %v4735_v44, %v4417_v40  ;;  %v4668_v44 = vpack.c.b16 %v4646_v5, %v4645_v39  ;;  %v9976_v40 = vrot.slane %v4460_v9, 9  ;;  %v4594_v39 = vrot.slane %v4592_v25, 4  ;;  %v12169_v9 = vld [vmem:[#allocation2 + $0xb0] sm:$0x1] }
 0x24c   : > { %v4132_v5 = vshrl.u32 %v3831_v12, 16  ;;  %v12164_v18 = vrot.slane %v4141_v7, 5  ;;  %v4151_v61 = vshll.u32 %v12169_v9, 16 }
 0x24d   : > { %v4849_v42 = vmul.f32 %v12124_v30, %v4815_v15  ;;  %9959 = vmatmul.msk.bf16.gmra.mxu3 %vm1391_vm10, %v4271_v27  ;;  %v4647_v27 = vunpack.c.l.b16 %v12146_v47  ;;  %v4593_v47 = vsel %vm11082_vm2, %v9976_v40, %v4592_v25  ;;  %v338_v25 = vsel %vm10589_vm4, 0, %v337_v49  ;;  %v5300_v40 = vld [vmem:[#allocation3 + $0xc] sm:$0xf] }
 0x24e   : > { %v3685_v46 = vpop.f32.mrf.mxu2  ;;  %v4134_v15 = vrot.slane %v4132_v5, 4  ;;  %339 = vst [vmem:[#allocation3 + $0x24] sm:$0x1] %v338_v25  ;;  %v391_v49 = vld [vmem:[#allocation3 + $0x2c] sm:$0x1] }
 0x24f   : > { %v4883_v8 = vadd.f32 %v12132_v6, %v4849_v42  ;;  %v3764_v23 = vadd.f32 %v3685_v46, %v11464_v2  ;;  %v4740_v10 = vpop.f32.mrf.mxu0  ;;  %v4145_v2 = vshrl.u32 %v12152_v34, 16  ;;  %v10111_v46 = vld [vmem:[%s14738_s2 + $0x4] sm:$0x3]  ;;  %v3834_v25 = vld [vmem:[#allocation2 + $0xb4] sm:$0xf] }
 0x250   : > { %v4138_v12 = vor.u32 %v4137_v29, %v4134_v15  ;;  %v6514_v26 = vsel %vm1440_vm0, %v10111_v46, 0  ;;  %v4461_v46 = vld [vmem:[#allocation2 + $0xa8] sm:$0xe] }
 0x251   : > { %v4915_v36 = vmax.f32 %v4883_v8, 0.0  ;;  %v4418_v58 = vadd.f32 %v12076_v53, %v3764_v23  ;;  %v4147_v42 = vrot.slane %v4145_v2, 4  ;;  %v12171_v53 = vpop.f32.mrf.mxu3  ;;  %v4596_v8 = vsel %vm11082_vm2, %v4594_v39, %v4595_v1  ;;  %6523 = vmatpush.bf16.msrb.mxu3 %v6514_v26 }
 0x252   : > { %9991 = vmatmul.msk.bf16.gmra.mxu0 %vm1391_vm10, %v4668_v44  ;;  %v4650_v1 = vunpack.c.l.b16 %v4596_v8  ;;  %v12195_v2 = vrot.slane %v4138_v12, 4  ;;  %v10128_v12 = vld [vmem:[%s14738_s2 + $0x6] sm:$0x3]  ;;  %v10209_v8 = vld [vmem:[%s14738_s2 + $0x8] sm:$0x3] }
 0x253   : > { %v4947_v51 = vpack.c.bf16 %v4915_v36, %v4915_v36  ;;  %v4816_v33 = vadd.f32 %v4737_v60, %v4418_v58  ;;  %9941 = vmatmul.msk.bf16.gmra.mxu2 %vm1391_vm10, %v10435_v59  ;;  %v4148_v59 = vor.u32 %v4147_v42, %v12164_v18  ;;  %v4252_v36 = vunpack.c.l.b16 %v4130_v54 }
 0x254   : > { %v4649_v58 = vunpack.c.l.b16 %v4593_v47  ;;  %v4153_v42 = vrot.slane %v4151_v61, 5  ;;  %v4669_v54 = vpack.c.b16 %v4648_v31, %v4647_v27  ;;  %v6800_v26 = vsel %vm1440_vm0, %v10128_v12, 0 }
 0x255   : > { %v4980_v60 = vshrl.u32 %v4947_v51, 16  ;;  %v4850_v44 = vmul.f32 %v12124_v30, %v4816_v33  ;;  %v4983_v19 = vshll.u32 %v4947_v51, 16  ;;  %v4149_v33 = vrot.slane %v4148_v59, 4  ;;  %6809 = vmatpush.bf16.msrb.mxu0 %v6800_v26 }
 0x256   : > { %v3688_v23 = vpop.f32.mrf.mxu2  ;;  %v7454_v61 = vsel %vm1440_vm0, %v10209_v8, 0 }
 0x257   : > { %v12189_v5 = vrot.slane %v4980_v60, 7  ;;  %v4884_v45 = vadd.f32 %v12132_v6, %v4850_v44  ;;  %v3765_v7 = vadd.f32 %v3688_v23, %v11490_v50  ;;  %v4742_v39 = vpop.f32.mrf.mxu0  ;;  %v4599_v23 = vrot.slane %v12152_v34, 5  ;;  %7463 = vmatpush.bf16.msrb.mxu1 %v7454_v61  ;;  %v12249_v61 = vld [vmem:[#allocation2 + $0xbc] sm:$0x1] }
 0x258   : > { %v4144_v34 = vsel %vm10695_vm13, %v12195_v2, %v12164_v18  ;;  %v10436_v2 = vld [vmem:[#allocation2 + $0x90] sm:$0xff] }
 0x259   : > { %v4985_v15 = vor.u32 %v4983_v19, %v12189_v5  ;;  %v4916_v29 = vmax.f32 %v4884_v45, 0.0  ;;  %v4419_v51 = vadd.f32 %v12100_v11, %v3765_v7  ;;  %v12202_v47 = vpop.f32.mrf.mxu3  ;;  %v4272_v11 = vpack.c.b16 %v4252_v36, %v12176_v4 }
 0x25a   : > { %v12211_v19 = vpack.c.b16 %v4650_v1, %v4649_v58  ;;  %v392_v45 = vsel %vm10649_vm9, 0, %v391_v49  ;;  %v9977_v7 = vrot.slane %v4461_v46, 9  ;;  %v4601_v36 = vrot.slane %v4599_v23, 4  ;;  %v5304_v58 = vld [vmem:[#allocation3 + $0x14] sm:$0x1] }
 0x25b   : > { %v5301_v50 = vsel %vm10630_vm8, %v4985_v15, %v5300_v40  ;;  %v4948_v60 = vpack.c.bf16 %v4916_v29, %v4916_v29  ;;  %v4817_v44 = vadd.f32 %v4740_v10, %v4419_v51  ;;  %v4986_v10 = vrot.slane %v12189_v5, 4  ;;  %393 = vst [vmem:[#allocation3 + $0x2c] sm:$0x1] %v392_v45  ;;  %v340_v45 = vld [vmem:[#allocation3 + $0x30] sm:$0x1] }
 0x25c   : > { %5302 = vst [vmem:[#allocation3 + $0xc] sm:$0xf] %v5301_v50  ;;  %v4154_v15 = vsel %vm10695_vm13, %v4149_v33, %v4153_v42  ;;  %v4602_v29 = vrot.slane %v12169_v9, 5  ;;  %v4156_v51 = vshrl.u32 %v3834_v25, 16  ;;  %v4159_v50 = vshll.u32 %v3834_v25, 16 }
 0x25d   : > { %v4988_v27 = vshrl.u32 %v4948_v60, 16  ;;  %v4851_v31 = vmul.f32 %v12124_v30, %v4817_v44  ;;  %v4991_v4 = vshll.u32 %v4948_v60, 16  ;;  %9960 = vmatmul.msk.bf16.gmra.mxu3 %vm1391_vm10, %v4272_v11  ;;  %v4600_v12 = vsel %vm11082_vm2, %v9977_v7, %v4599_v23 }
 0x25e   : > { %v3690_v59 = vpop.f32.mrf.mxu2  ;;  %v4603_v8 = vsel %vm11082_vm2, %v4601_v36, %v4602_v29  ;;  %v4161_v11 = vrot.slane %v4159_v50, 5  ;;  %v12245_v49 = vunpack.c.l.b16 %v4144_v34  ;;  %v4651_v7 = vunpack.c.l.b16 %v4600_v12 }
 0x25f   : > { %v4990_v40 = vrot.slane %v4988_v27, 7  ;;  %v4885_v18 = vadd.f32 %v12132_v6, %v4851_v31  ;;  %v3766_v5 = vadd.f32 %v3690_v59, %v11505_v52  ;;  %v4745_v1 = vpop.f32.mrf.mxu0  ;;  %v4158_v27 = vrot.slane %v4156_v51, 4  ;;  %v5307_v51 = vld [vmem:[#allocation3 + $0x18] sm:$0xf] }
 0x260   : > { %v4652_v36 = vunpack.c.l.b16 %v4603_v8 }
 0x261   : > { %v4993_v60 = vor.u32 %v4991_v4, %v4990_v40  ;;  %v4995_v44 = vrot.slane %v4990_v40, 4  ;;  %v4917_v46 = vmax.f32 %v4885_v18, 0.0  ;;  %v4420_v52 = vadd.f32 %v12135_v57, %v3766_v5  ;;  %v12239_v57 = vld [vmem:[#allocation2 + $0xb8] sm:$0xf]  ;;  %v12243_v23 = vpop.f32.mrf.mxu3 }
 0x262   : > { %9992 = vmatmul.msk.bf16.gmra.mxu0 %vm1391_vm10, %v4669_v54  ;;  %v12247_v4 = vunpack.c.l.b16 %v4154_v15  ;;  %v4162_v25 = vor.u32 %v4161_v11, %v4158_v27  ;;  %v341_v18 = vsel %vm10589_vm4, 0, %v340_v45 }
 0x263   : > { %v4994_v33 = vsel %vm10620_vm7, %v4986_v10, %v4993_v60  ;;  %v5305_v9 = vsel %vm10589_vm4, %v4995_v44, %v5304_v58  ;;  %v4949_v42 = vpack.c.bf16 %v4917_v46, %v4917_v46  ;;  %v4818_v31 = vadd.f32 %v4742_v39, %v4420_v52  ;;  %v5414_v26 = vld [vmem:[#allocation3 + $0xc] sm:$0xf]  ;;  %9942 = vmatmul.msk.bf16.gmra.mxu2 %vm1391_vm10, %v10436_v2 }
 0x264   : > { %5303 = vst.msk [vmem:[#allocation3 + $0x10] sm:$0xf] %vm199_vm1, %v4994_v33  ;;  %v5486_v10 = vshrl.u32 %v5414_v26, 16  ;;  %v5489_v59 = vshll.u32 %v5414_v26, 16  ;;  %v4165_v44 = vshll.u32 %v12239_v57, 16  ;;  %v4169_v46 = vshrl.u32 %v12239_v57, 16 }
 0x265   : > { %5306 = vst [vmem:[#allocation3 + $0x14] sm:$0x1] %v5305_v9  ;;  %v4997_v39 = vshrl.u32 %v4949_v42, 16  ;;  %v4852_v54 = vmul.f32 %v12124_v30, %v4818_v31  ;;  %v5000_v2 = vshll.u32 %v4949_v42, 16  ;;  %v4175_v52 = vshll.u32 %v12249_v61, 16 }
 0x266   : > { %v3693_v40 = vpop.f32.mrf.mxu2  ;;  %v5488_v5 = vrot.slane %v5486_v10, 4  ;;  %v5491_v34 = vrot.slane %v5489_v59, 5  ;;  %342 = vst [vmem:[#allocation3 + $0x30] sm:$0x1] %v341_v18  ;;  %v4163_v11 = vrot.slane %v4162_v25, 4  ;;  %v4273_v33 = vpack.c.b16 %v12247_v4, %v12245_v49 }
 0x267   : > { %v12254_v58 = vrot.slane %v4997_v39, 7  ;;  %v4886_v15 = vadd.f32 %v12132_v6, %v4852_v54  ;;  %v3767_v29 = vadd.f32 %v3693_v40, %v11531_v62  ;;  %v4747_v50 = vpop.f32.mrf.mxu0  ;;  %v4167_v9 = vrot.slane %v4165_v44, 5 }
 0x268   : > { %v5492_v60 = vor.u32 %v5491_v34, %v5488_v5  ;;  %v4171_v42 = vrot.slane %v4169_v46, 4  ;;  %v12269_v39 = vrot.slane %v4175_v52, 5  ;;  %v12277_v4 = vpack.c.b16 %v4652_v36, %v4651_v7  ;;  %v394_v5 = vld [vmem:[#allocation3 + $0x38] sm:$0x1]  ;;  %v14879_v46 = vld [vmem:[#allocation47_spill] sm:$0xff] }
 0x269   : > { %v5002_v12 = vor.u32 %v5000_v2, %v12254_v58  ;;  %v4918_v8 = vmax.f32 %v4886_v15, 0.0  ;;  %v4421_v27 = vadd.f32 %v12171_v53, %v3767_v29  ;;  %v12271_v54 = vpop.f32.mrf.mxu3  ;;  %v4168_v34 = vsel %vm10695_vm13, %v4163_v11, %v4167_v9 }
 0x26a   : > { %v5493_v62 = vrot.slane %v5492_v60, 4  ;;  %v4172_v25 = vor.u32 %v4171_v42, %v4167_v9  ;;  %v10437_v42 = vld [vmem:[#allocation2 + $0x9c] sm:$0xff] }
 0x26b   : > { %v5308_v31 = vsel %vm10630_vm8, %v5002_v12, %v5307_v51  ;;  %v4950_v26 = vpack.c.bf16 %v4918_v8, %v4918_v8  ;;  %v4819_v10 = vadd.f32 %v4745_v1, %v4421_v27  ;;  %v12267_v59 = vld [vmem:[#allocation3 + $0x10] sm:$0xf]  ;;  %v395_v51 = vsel %vm10649_vm9, 0, %v394_v5  ;;  %v5311_v8 = vld [vmem:[#allocation3 + $0x20] sm:$0x1] }
 0x26c   : > { %5309 = vst [vmem:[#allocation3 + $0x18] sm:$0xf] %v5308_v31  ;;  %v12273_v53 = vld [vmem:[#allocation3 + $0x14] sm:$0x1]  ;;  %v5495_v45 = vshll.u32 %v12267_v59, 16  ;;  %v5499_v49 = vshrl.u32 %v12267_v59, 16 }
 0x26d   : > { %v5005_v40 = vshrl.u32 %v4950_v26, 16  ;;  %v4853_v18 = vmul.f32 %v12124_v30, %v4819_v10  ;;  %v5505_v1 = vshll.u32 %v12273_v53, 16  ;;  %v4173_v60 = vrot.slane %v4172_v25, 4  ;;  %396 = vst [vmem:[#allocation3 + $0x38] sm:$0x1] %v395_v51  ;;  %9961 = vmatmul.msk.bf16.gmra.mxu3 %vm1391_vm10, %v4273_v33 }
 0x26e   : > { %v3695_v2 = vpop.f32.mrf.mxu2  ;;  %v5497_v15 = vrot.slane %v5495_v45, 5  ;;  %v5501_v29 = vrot.slane %v5499_v49, 4  ;;  %v5008_v7 = vshll.u32 %v4950_v26, 16  ;;  %v5003_v12 = vrot.slane %v12254_v58, 4  ;;  %v4462_v33 = vld [vmem:[#allocation2 + $0xb4] sm:$0xe] }
 0x26f   : > { %v5007_v44 = vrot.slane %v5005_v40, 7  ;;  %v4887_v36 = vadd.f32 %v12132_v6, %v4853_v18  ;;  %v3768_v52 = vadd.f32 %v3695_v2, %v14879_v46  ;;  %v4750_v27 = vpop.f32.mrf.mxu0  ;;  %v4606_v31 = vrot.slane %v12239_v57, 5 }
 0x270   : > { %v5498_v11 = vsel %vm10695_vm13, %v5493_v62, %v5497_v15  ;;  %v5502_v9 = vor.u32 %v5501_v29, %v5497_v15  ;;  %v5507_v40 = vrot.slane %v5505_v1, 5  ;;  %v4178_v58 = vsel %vm10695_vm13, %v4173_v60, %v12269_v39 }
 0x271   : > { %v5010_v10 = vor.u32 %v5008_v7, %v5007_v44  ;;  %v5012_v26 = vrot.slane %v5007_v44, 4  ;;  %v4919_v45 = vmax.f32 %v4887_v36, 0.0  ;;  %v4422_v49 = vadd.f32 %v12202_v47, %v3768_v52  ;;  %v343_v44 = vld [vmem:[#allocation3 + $0x3c] sm:$0x1] }
 0x272   : > { %v5503_v25 = vrot.slane %v5502_v9, 4  ;;  %v12296_v18 = vunpack.c.l.b16 %v4168_v34  ;;  %9993 = vmatmul.msk.bf16.gmra.mxu0 %vm1391_vm10, %v12211_v19  ;;  %v5849_v1 = vunpack.c.l.b16 %v5498_v11  ;;  %v12308_v34 = vpop.f32.mrf.mxu3  ;;  %v9978_v19 = vrot.slane %v4462_v33, 9 }
 0x273   : > { %v5011_v62 = vsel %vm10620_vm7, %v5003_v12, %v5010_v10  ;;  %v5312_v57 = vsel %vm10589_vm4, %v5012_v26, %v5311_v8  ;;  %v4951_v5 = vpack.c.bf16 %v4919_v45, %v4919_v45  ;;  %v4820_v2 = vadd.f32 %v4747_v50, %v4422_v49  ;;  %v5416_v47 = vld [vmem:[#allocation3 + $0x18] sm:$0xf]  ;;  %9943 = vmatmul.msk.bf16.gmra.mxu2 %vm1391_vm10, %v10437_v42  ;;  %v3837_v10 = vld [vmem:[#allocation2 + $0xc0] sm:$0xf]  ;;  %v5314_v26 = vld [vmem:[#allocation3 + $0x24] sm:$0xf] }
 0x274   : > { %5310 = vst.msk [vmem:[#allocation3 + $0x1c] sm:$0xf] %vm199_vm1, %v5011_v62  ;;  %v5508_v39 = vsel %vm10695_vm13, %v5503_v25, %v5507_v40  ;;  %v5510_v15 = vshrl.u32 %v5416_v47, 16  ;;  %v5513_v29 = vshll.u32 %v5416_v47, 16  ;;  %v344_v46 = vsel %vm10589_vm4, 0, %v343_v44 }
 0x275   : > { %5313 = vst [vmem:[#allocation3 + $0x20] sm:$0x1] %v5312_v57  ;;  %v5014_v51 = vshrl.u32 %v4951_v5, 16  ;;  %v4854_v50 = vmul.f32 %v12124_v30, %v4820_v2  ;;  %v5850_v60 = vunpack.c.l.b16 %v5508_v39  ;;  %v5017_v7 = vshll.u32 %v4951_v5, 16 }
 0x276   : > { %v3698_v36 = vpop.f32.mrf.mxu2  ;;  %v5512_v52 = vrot.slane %v5510_v15, 4  ;;  %v5515_v12 = vrot.slane %v5513_v29, 5  ;;  %345 = vst [vmem:[#allocation3 + $0x3c] sm:$0x1] %v344_v46  ;;  %v4256_v49 = vunpack.c.l.b16 %v4178_v58  ;;  %v4608_v40 = vrot.slane %v4606_v31, 4 }
 0x277   : > { %v12313_v8 = vrot.slane %v5014_v51, 7  ;;  %v4888_v42 = vadd.f32 %v12132_v6, %v4854_v50  ;;  %v3769_v11 = vadd.f32 %v3698_v36, %v11586_v56  ;;  %v5880_v9 = vpack.c.b16 %v5850_v60, %v5849_v1  ;;  %v4752_v45 = vpop.f32.mrf.mxu0  ;;  %v397_v46 = vld [vmem:[#allocation3 + $0x44] sm:$0x1] }
 0x278   : > { %v5516_v25 = vor.u32 %v5515_v12, %v5512_v52  ;;  %v4609_v33 = vrot.slane %v12249_v61, 5  ;;  %v12323_v56 = vsel %vm11082_vm2, %v9978_v19, %v4606_v31  ;;  %v4180_v39 = vshrl.u32 %v3837_v10, 16 }
 0x279   : > { %v5019_v62 = vor.u32 %v5017_v7, %v12313_v8  ;;  %v4920_v57 = vmax.f32 %v4888_v42, 0.0  ;;  %v4423_v5 = vadd.f32 %v12243_v23, %v3769_v11  ;;  %10000 = vmatmul.msk.bf16.gmra.mxu1 %vm1391_vm10, %v5880_v9  ;;  %v5020_v2 = vrot.slane %v12313_v8, 4 }
 0x27a   : > { %v5517_v47 = vrot.slane %v5516_v25, 4  ;;  %v12328_v58 = vsel %vm11082_vm2, %v4608_v40, %v4609_v33  ;;  %v4183_v29 = vshll.u32 %v3837_v10, 16  ;;  %v12334_v51 = vpop.f32.mrf.mxu3  ;;  %v4274_v31 = vpack.c.b16 %v4256_v49, %v12296_v18  ;;  %v12349_v25 = vld [vmem:[#allocation2 + $0xc4] sm:$0xf] }
 0x27b   : > { %v5315_v61 = vsel %vm10630_vm8, %v5019_v62, %v5314_v26  ;;  %v4952_v1 = vpack.c.bf16 %v4920_v57, %v4920_v57  ;;  %v4821_v15 = vadd.f32 %v4750_v27, %v4423_v5  ;;  %v12332_v23 = vld [vmem:[#allocation3 + $0x1c] sm:$0xf]  ;;  %v4653_v19 = vunpack.c.l.b16 %v12323_v56  ;;  %v5318_v40 = vld [vmem:[#allocation3 + $0x2c] sm:$0x1]  ;;  %v10438_v62 = vld [vmem:[#allocation2 + $0xa8] sm:$0xff] }
 0x27c   : > { %5316 = vst [vmem:[#allocation3 + $0x24] sm:$0xf] %v5315_v61  ;;  %v12337_v50 = vld [vmem:[#allocation3 + $0x20] sm:$0x1]  ;;  %v5519_v60 = vshll.u32 %v12332_v23, 16  ;;  %v5523_v44 = vshrl.u32 %v12332_v23, 16  ;;  %v4654_v52 = vunpack.c.l.b16 %v12328_v58 }
 0x27d   : > { %v5022_v7 = vshrl.u32 %v4952_v1, 16  ;;  %v4855_v36 = vmul.f32 %v12124_v30, %v4821_v15  ;;  %v5529_v27 = vshll.u32 %v12337_v50, 16  ;;  %v5025_v12 = vshll.u32 %v4952_v1, 16  ;;  %9962 = vmatmul.msk.bf16.gmra.mxu3 %vm1391_vm10, %v4274_v31 }
 0x27e   : > { %v3700_v8 = vpop.f32.mrf.mxu2  ;;  %v5521_v42 = vrot.slane %v5519_v60, 5  ;;  %v5525_v18 = vrot.slane %v5523_v44, 4  ;;  %v398_v11 = vsel %vm10649_vm9, 0, %v397_v46  ;;  %v4182_v61 = vrot.slane %v4180_v39, 4  ;;  %v12364_v39 = vld [vmem:[#allocation2 + $0xc8] sm:$0x1] }
 0x27f   : > { %v5024_v9 = vrot.slane %v5022_v7, 7  ;;  %v4889_v10 = vadd.f32 %v12132_v6, %v4855_v36  ;;  %v3770_v26 = vadd.f32 %v3700_v8, %v11611_v24  ;;  %v5531_v49 = vrot.slane %v5529_v27, 5  ;;  %399 = vst [vmem:[#allocation3 + $0x44] sm:$0x1] %v398_v11  ;;  %v12351_v33 = vpop.f32.mrf.mxu0 }
 0x280   : > { %v5522_v57 = vsel %vm10695_vm13, %v5517_v47, %v5521_v42  ;;  %v5526_v5 = vor.u32 %v5525_v18, %v5521_v42  ;;  %v4185_v1 = vrot.slane %v4183_v29, 5  ;;  %v4189_v46 = vshll.u32 %v12349_v25, 16 }
 0x281   : > { %v5027_v15 = vor.u32 %v5025_v12, %v5024_v9  ;;  %v5029_v60 = vrot.slane %v5024_v9, 4  ;;  %v4921_v44 = vmax.f32 %v4889_v10, 0.0  ;;  %v4424_v24 = vadd.f32 %v12271_v54, %v3770_v26  ;;  %v346_v26 = vld [vmem:[#allocation3 + $0x48] sm:$0x1] }
 0x282   : > { %v5527_v7 = vrot.slane %v5526_v5, 4  ;;  %v5851_v36 = vunpack.c.l.b16 %v5522_v57  ;;  %v4186_v27 = vor.u32 %v4185_v1, %v4182_v61  ;;  %9994 = vmatmul.msk.bf16.gmra.mxu0 %vm1391_vm10, %v12277_v4  ;;  %v12370_v12 = vpop.f32.mrf.mxu3  ;;  %v4191_v18 = vrot.slane %v4189_v46, 5 }
 0x283   : > { %v5028_v8 = vsel %vm10620_vm7, %v5020_v2, %v5027_v15  ;;  %v5319_v31 = vsel %vm10589_vm4, %v5029_v60, %v5318_v40  ;;  %v4953_v47 = vpack.c.bf16 %v4921_v44, %v4921_v44  ;;  %v4822_v42 = vadd.f32 %v4752_v45, %v4424_v24  ;;  %v5418_v29 = vld [vmem:[#allocation3 + $0x24] sm:$0xf]  ;;  %9944 = vmatmul.msk.bf16.gmra.mxu2 %vm1391_vm10, %v10438_v62  ;;  %v14880_v44 = vld [vmem:[#allocation54_spill] sm:$0xff] }
 0x284   : > { %5317 = vst.msk [vmem:[#allocation3 + $0x28] sm:$0xf] %vm199_vm1, %v5028_v8  ;;  %v5532_v54 = vsel %vm10695_vm13, %v5527_v7, %v5531_v49  ;;  %v4187_v2 = vrot.slane %v4186_v27, 4  ;;  %v4193_v11 = vshrl.u32 %v12349_v25, 16  ;;  %v347_v62 = vsel %vm10589_vm4, 0, %v346_v26  ;;  %v14881_v24 = vld [vmem:[#allocation50_spill] sm:$0xff] }
 0x285   : > { %5320 = vst [vmem:[#allocation3 + $0x2c] sm:$0x1] %v5319_v31  ;;  %v5031_v45 = vshrl.u32 %v4953_v47, 16  ;;  %v5034_v9 = vshll.u32 %v4953_v47, 16  ;;  %v4856_v4 = vmul.f32 %v12124_v30, %v4822_v42  ;;  %v5852_v10 = vunpack.c.l.b16 %v5532_v54  ;;  %v5321_v27 = vld [vmem:[#allocation3 + $0x30] sm:$0xf] }
 0x286   : > { %v3703_v40 = vpop.f32.mrf.mxu2  ;;  %v4192_v49 = vsel %vm10695_vm13, %v4187_v2, %v4191_v18  ;;  %v4195_v57 = vrot.slane %v4193_v11, 4  ;;  %v4199_v5 = vshll.u32 %v12364_v39, 16  ;;  %348 = vst [vmem:[#allocation3 + $0x48] sm:$0x1] %v347_v62  ;;  %v3485_v7 = vadd.f32 %v14881_v24, %v14880_v44 }
 0x287   : > { %v12379_v61 = vrot.slane %v5031_v45, 7  ;;  %v4890_v1 = vadd.f32 %v12132_v6, %v4856_v4  ;;  %v3771_v15 = vadd.f32 %v3703_v40, %v11642_v55  ;;  %v5881_v60 = vpack.c.b16 %v5852_v10, %v5851_v36  ;;  %v4757_v46 = vpop.f32.mrf.mxu0  ;;  %v4463_v36 = vld [vmem:[#allocation2 + $0xc0] sm:$0xe] }
 0x288   : > { %v4196_v8 = vor.u32 %v4195_v57, %v4191_v18  ;;  %v4201_v31 = vrot.slane %v4199_v5, 5  ;;  %v5534_v47 = vshrl.u32 %v5418_v29, 16  ;;  %v4672_v55 = vpack.c.b16 %v4654_v52, %v4653_v19 }
 0x289   : > { %v5036_v42 = vor.u32 %v5034_v9, %v12379_v61  ;;  %v4922_v54 = vmax.f32 %v4890_v1, 0.0  ;;  %v4425_v2 = vadd.f32 %v12308_v34, %v3771_v15  ;;  %10001 = vmatmul.msk.bf16.gmra.mxu1 %vm1391_vm10, %v5881_v60  ;;  %v4257_v45 = vunpack.c.l.b16 %v4192_v49 }
 0x28a   : > { %v4197_v11 = vrot.slane %v4196_v8, 4  ;;  %v5536_v4 = vrot.slane %v5534_v47, 4  ;;  %v5537_v10 = vshll.u32 %v5418_v29, 16  ;;  %v5037_v18 = vrot.slane %v12379_v61, 4  ;;  %v12398_v56 = vpop.f32.mrf.mxu3  ;;  %v400_v61 = vld [vmem:[#allocation3 + $0x50] sm:$0x1] }
 0x28b   : > { %v5322_v9 = vsel %vm10630_vm8, %v5036_v42, %v5321_v27  ;;  %v4954_v26 = vpack.c.bf16 %v4922_v54, %v4922_v54  ;;  %v4823_v34 = vadd.f32 %v12351_v33, %v4425_v2  ;;  %v12396_v40 = vld [vmem:[#allocation3 + $0x28] sm:$0xf]  ;;  %v9979_v29 = vrot.slane %v4463_v36, 9  ;;  %v5325_v8 = vld [vmem:[#allocation3 + $0x38] sm:$0x1]  ;;  %v10439_v2 = vld [vmem:[#allocation2 + $0xb4] sm:$0xff] }
 0x28c   : > { %5323 = vst [vmem:[#allocation3 + $0x30] sm:$0xf] %v5322_v9  ;;  %v4202_v58 = vsel %vm10695_vm13, %v4197_v11, %v4201_v31  ;;  %v5539_v19 = vrot.slane %v5537_v10, 5  ;;  %v5543_v52 = vshll.u32 %v12396_v40, 16  ;;  %v12404_v5 = vld [vmem:[#allocation3 + $0x2c] sm:$0x1] }
 0x28d   : > { %v5039_v62 = vshrl.u32 %v4954_v26, 16  ;;  %v4857_v49 = vmul.f32 %v12124_v30, %v4823_v34  ;;  %v4258_v57 = vunpack.c.l.b16 %v4202_v58  ;;  %v4613_v33 = vrot.slane %v12349_v25, 5 }
 0x28e   : > { %v5042_v1 = vshll.u32 %v4954_v26, 16  ;;  %v3705_v15 = vpop.f32.mrf.mxu2  ;;  %v5540_v60 = vor.u32 %v5539_v19, %v5536_v4  ;;  %v5545_v44 = vrot.slane %v5543_v52, 5  ;;  %v5547_v24 = vshrl.u32 %v12396_v40, 16 }
 0x28f   : > { %v5041_v27 = vrot.slane %v5039_v62, 7  ;;  %v4891_v31 = vadd.f32 %v12132_v6, %v4857_v49  ;;  %v3772_v47 = vadd.f32 %v3705_v15, %v3485_v7  ;;  %v4275_v42 = vpack.c.b16 %v4258_v57, %v4257_v45  ;;  %v12409_v54 = vpop.f32.mrf.mxu0  ;;  %v262_v57 = vld [vmem:[#allocation2 + $0xcc] sm:$0x1] }
 0x290   : > { %v5541_v36 = vrot.slane %v5540_v60, 4  ;;  %v5549_v11 = vrot.slane %v5547_v24, 4  ;;  %v5553_v10 = vshll.u32 %v12404_v5, 16  ;;  %v401_v25 = vsel %vm10649_vm9, 0, %v400_v61  ;;  %v12423_v61 = vld [vmem:[#allocation2 + $0xd0] sm:$0xf] }
 0x291   : > { %v5044_v4 = vor.u32 %v5042_v1, %v5041_v27  ;;  %v5046_v9 = vrot.slane %v5041_v27, 4  ;;  %v4923_v26 = vmax.f32 %v4891_v31, 0.0  ;;  %v4426_v34 = vadd.f32 %v12334_v51, %v3772_v47  ;;  %9963 = vmatmul.msk.bf16.gmra.mxu3 %vm1391_vm10, %v4275_v42  ;;  %402 = vst [vmem:[#allocation3 + $0x50] sm:$0x1] %v401_v25  ;;  %v318_v51 = vld [vmem:[#allocation2 + $0xd4] sm:$0x1] }
 0x292   : > { %v5546_v7 = vsel %vm10695_vm13, %v5541_v36, %v5545_v44  ;;  %v5550_v45 = vor.u32 %v5549_v11, %v5545_v44  ;;  %v4615_v58 = vrot.slane %v4613_v33, 4  ;;  %9995 = vmatmul.msk.bf16.gmra.mxu0 %vm1391_vm10, %v4672_v55  ;;  %v5555_v15 = vrot.slane %v5553_v10, 5  ;;  %v12427_v60 = vpop.f32.mrf.mxu3 }
 0x293   : > { %v5045_v19 = vsel %vm10620_vm7, %v5037_v18, %v5044_v4  ;;  %v5326_v52 = vsel %vm10589_vm4, %v5046_v9, %v5325_v8  ;;  %v4955_v62 = vpack.c.bf16 %v4923_v26, %v4923_v26  ;;  %v4824_v49 = vadd.f32 %v4757_v46, %v4426_v34  ;;  %9945 = vmatmul.msk.bf16.gmra.mxu2 %vm1391_vm10, %v10439_v2  ;;  %v349_v8 = vld [vmem:[#allocation3 + $0x54] sm:$0x1]  ;;  %v6932_v3 = vld [vmem:[#allocation3 + $0x30] sm:$0xf] }
 0x294   : > { %5324 = vst.msk [vmem:[#allocation3 + $0x34] sm:$0xf] %vm199_vm1, %v5045_v19  ;;  %v5551_v1 = vrot.slane %v5550_v45, 4  ;;  %v4614_v18 = vsel %vm11082_vm2, %v9979_v29, %v4613_v33  ;;  %v4616_v44 = vrot.slane %v12364_v39, 5  ;;  %v5853_v27 = vunpack.c.l.b16 %v5546_v7  ;;  %v5328_v33 = vld [vmem:[#allocation3 + $0x3c] sm:$0xf] }
 0x295   : > { %5327 = vst [vmem:[#allocation3 + $0x38] sm:$0x1] %v5326_v52  ;;  %v5048_v46 = vshrl.u32 %v4955_v62, 16  ;;  %v5051_v55 = vshll.u32 %v4955_v62, 16  ;;  %v4858_v24 = vmul.f32 %v12124_v30, %v4824_v49  ;;  %v350_v2 = vsel %vm10589_vm4, 0, %v349_v8  ;;  %v14882_v45 = vld [vmem:[#allocation53_spill] sm:$0xff] }
 0x296   : > { %v3708_v31 = vpop.f32.mrf.mxu2  ;;  %v5556_v47 = vsel %vm10695_vm13, %v5551_v1, %v5555_v15  ;;  %v4617_v42 = vsel %vm11082_vm2, %v4615_v58, %v4616_v44  ;;  %v263_v39 = vsel %vm10589_vm4, 0, %v262_v57  ;;  %351 = vst [vmem:[#allocation3 + $0x54] sm:$0x1] %v350_v2  ;;  %v4655_v4 = vunpack.c.l.b16 %v4614_v18  ;;  %v5420_v7 = vld [vmem:[#allocation3 + $0x30] sm:$0xf] }
 0x297   : > { %v12441_v29 = vrot.slane %v5048_v46, 7  ;;  %v4892_v36 = vadd.f32 %v12132_v6, %v4858_v24  ;;  %v3773_v11 = vadd.f32 %v3708_v31, %v11699_v20  ;;  %v5854_v10 = vunpack.c.l.b16 %v5556_v47  ;;  %v4762_v25 = vpop.f32.mrf.mxu0  ;;  %264 = vst [vmem:[#allocation2 + $0xcc] sm:$0x1] %v263_v39 }
 0x298   : > { %v4656_v9 = vunpack.c.l.b16 %v4617_v42  ;;  %v319_v26 = vsel %vm10649_vm9, 0, %v318_v51  ;;  %v4213_v34 = vshll.u32 %v12423_v61, 16  ;;  %v3487_v58 = vadd.f32 %v14882_v45, %v11716_v21 }
 0x299   : > { %v5053_v19 = vor.u32 %v5051_v55, %v12441_v29  ;;  %v4924_v52 = vmax.f32 %v4892_v36, 0.0  ;;  %v4427_v20 = vadd.f32 %v12370_v12, %v3773_v11  ;;  %320 = vst [vmem:[#allocation2 + $0xd4] sm:$0x1] %v319_v26  ;;  %v5054_v62 = vrot.slane %v12441_v29, 4  ;;  %v5332_v36 = vld [vmem:[#allocation3 + $0x44] sm:$0x1] }
 0x29a   : > { %v5882_v49 = vpack.c.b16 %v5854_v10, %v5853_v27  ;;  %v12453_v57 = vrot.slane %v4213_v34, 5  ;;  %v4217_v1 = vshrl.u32 %v12423_v61, 16  ;;  %v5558_v44 = vshrl.u32 %v5420_v7, 16  ;;  %v12466_v55 = vpop.f32.mrf.mxu3  ;;  %v10440_v34 = vld [vmem:[#allocation2 + $0xc0] sm:$0xff] }
 0x29b   : > { %v5329_v51 = vsel %vm10630_vm8, %v5053_v19, %v5328_v33  ;;  %v4956_v15 = vpack.c.bf16 %v4924_v52, %v4924_v52  ;;  %v4825_v18 = vadd.f32 %v12409_v54, %v4427_v20  ;;  %v12459_v21 = vld [vmem:[#allocation3 + $0x34] sm:$0xf]  ;;  %v12463_v12 = vadd.f32 %v11705_v32, %v11765_v48 }
 0x29c   : > { %5330 = vst [vmem:[#allocation3 + $0x3c] sm:$0xf] %v5329_v51  ;;  %10002 = vmatmul.msk.bf16.gmra.mxu1 %vm1391_vm10, %v5882_v49  ;;  %v4673_v46 = vpack.c.b16 %v4656_v9, %v4655_v4  ;;  %v4219_v24 = vrot.slane %v4217_v1, 4  ;;  %v12468_v27 = vld [vmem:[#allocation3 + $0x38] sm:$0x1]  ;;  %v5561_v8 = vshll.u32 %v5420_v7, 16 }
 0x29d   : > { %v5056_v31 = vshrl.u32 %v4956_v15, 16  ;;  %v5059_v47 = vshll.u32 %v4956_v15, 16  ;;  %v4859_v54 = vmul.f32 %v12124_v30, %v4825_v18  ;;  %v5560_v42 = vrot.slane %v5558_v44, 4 }
 0x29e   : > { %v3710_v2 = vpop.f32.mrf.mxu2  ;;  %v4220_v39 = vor.u32 %v4219_v24, %v12453_v57  ;;  %v5563_v32 = vrot.slane %v5561_v8, 5  ;;  %v5567_v48 = vshll.u32 %v12459_v21, 16  ;;  %v5571_v29 = vshrl.u32 %v12459_v21, 16  ;;  %v3840_v4 = vld [vmem:[#allocation2 + $0xcc] sm:$0xf] }
 0x29f   : > { %v5058_v33 = vrot.slane %v5056_v31, 7  ;;  %v4893_v11 = vadd.f32 %v12132_v6, %v4859_v54  ;;  %v3774_v10 = vadd.f32 %v3710_v2, %v3487_v58  ;;  %v5577_v9 = vshll.u32 %v12468_v27, 16  ;;  %v4765_v26 = vpop.f32.mrf.mxu0 }
 0x2a0   : > { %v12476_v7 = vld [vmem:[#allocation2 + $0xd4] sm:$0x1]  ;;  %v4204_v45 = vshrl.u32 %v3840_v4, 16  ;;  %v4207_v19 = vshll.u32 %v3840_v4, 16  ;;  %v4221_v52 = vrot.slane %v4220_v39, 4  ;;  %v5564_v20 = vor.u32 %v5563_v32, %v5560_v42 }
 0x2a1   : > { %v5061_v49 = vor.u32 %v5059_v47, %v5058_v33  ;;  %v5063_v1 = vrot.slane %v5058_v33, 4  ;;  %v4925_v51 = vmax.f32 %v4893_v11, 0.0  ;;  %v4428_v15 = vadd.f32 %v12398_v56, %v3774_v10  ;;  %v403_v47 = vld [vmem:[#allocation3 + $0x5c] sm:$0x1] }
 0x2a2   : > { %v4206_v18 = vrot.slane %v4204_v45, 4  ;;  %v4209_v44 = vrot.slane %v4207_v19, 5  ;;  %v4223_v58 = vshll.u32 %v12476_v7, 16  ;;  %v5565_v24 = vrot.slane %v5564_v20, 4  ;;  %9996 = vmatmul.msk.bf16.gmra.mxu0 %vm1391_vm10, %v4673_v46  ;;  %v12487_v33 = vpop.f32.mrf.mxu3 }
 0x2a3   : > { %v5062_v8 = vsel %vm10620_vm7, %v5054_v62, %v5061_v49  ;;  %v5333_v31 = vsel %vm10589_vm4, %v5063_v1, %v5332_v36  ;;  %v4957_v54 = vpack.c.bf16 %v4925_v51, %v4925_v51  ;;  %v4826_v2 = vadd.f32 %v4762_v25, %v4428_v15  ;;  %9946 = vmatmul.msk.bf16.gmra.mxu2 %vm1391_vm10, %v10440_v34  ;;  %v4464_v49 = vld [vmem:[#allocation2 + $0xcc] sm:$0xe]  ;;  %v5335_v1 = vld [vmem:[#allocation3 + $0x48] sm:$0xf] }
 0x2a4   : > { %5331 = vst.msk [vmem:[#allocation3 + $0x40] sm:$0xf] %vm199_vm1, %v5062_v8  ;;  %v4210_v56 = vor.u32 %v4209_v44, %v4206_v18  ;;  %v4225_v42 = vrot.slane %v4223_v58, 5  ;;  %v5569_v39 = vrot.slane %v5567_v48, 5  ;;  %v5573_v32 = vrot.slane %v5571_v29, 4 }
 0x2a5   : > { %5334 = vst [vmem:[#allocation3 + $0x44] sm:$0x1] %v5333_v31  ;;  %v5065_v62 = vshrl.u32 %v4957_v54, 16  ;;  %v5068_v11 = vshll.u32 %v4957_v54, 16  ;;  %v4860_v36 = vmul.f32 %v12124_v30, %v4826_v2  ;;  %v5579_v10 = vrot.slane %v5577_v9, 5 }
 0x2a6   : > { %v3713_v25 = vpop.f32.mrf.mxu2  ;;  %v4211_v4 = vrot.slane %v4210_v56, 4  ;;  %v4226_v46 = vsel %vm10695_vm13, %v4221_v52, %v4225_v42  ;;  %v5570_v34 = vsel %vm10695_vm13, %v5565_v24, %v5569_v39  ;;  %v5574_v45 = vor.u32 %v5573_v32, %v5569_v39  ;;  %v352_v56 = vld [vmem:[#allocation3 + $0x60] sm:$0x1]  ;;  %v6255_v42 = vld [vmem:[#allocation3] sm:$0xe] }
 0x2a7   : > { %v12494_v19 = vrot.slane %v5065_v62, 7  ;;  %v4894_v48 = vadd.f32 %v12132_v6, %v4860_v36  ;;  %v3775_v29 = vadd.f32 %v3713_v25, %v11752_v63  ;;  %v4260_v20 = vunpack.c.l.b16 %v4226_v46  ;;  %v12498_v30 = vpop.f32.mrf.mxu0 }
 0x2a8   : > { %v4216_v9 = vsel %vm10695_vm13, %v4211_v4, %v12453_v57  ;;  %v5575_v52 = vrot.slane %v5574_v45, 4  ;;  %v5855_v51 = vunpack.c.l.b16 %v5570_v34  ;;  %v404_v15 = vsel %vm10649_vm9, 0, %v403_v47  ;;  %v5422_v4 = vld [vmem:[#allocation3 + $0x3c] sm:$0xf] }
 0x2a9   : > { %v5070_v18 = vor.u32 %v5068_v11, %v12494_v19  ;;  %v5071_v6 = vrot.slane %v12494_v19, 4  ;;  %v4926_v44 = vmax.f32 %v4894_v48, 0.0  ;;  %v4429_v63 = vadd.f32 %v12427_v60, %v3775_v29  ;;  %405 = vst [vmem:[#allocation3 + $0x5c] sm:$0x1] %v404_v15  ;;  %v5339_v29 = vld [vmem:[#allocation3 + $0x50] sm:$0x1] }
 0x2aa   : > { %v4259_v58 = vunpack.c.l.b16 %v4216_v9  ;;  %v5580_v24 = vsel %vm10695_vm13, %v5575_v52, %v5579_v10  ;;  %v9980_v8 = vrot.slane %v4464_v49, 9  ;;  %v4620_v57 = vrot.slane %v12423_v61, 5  ;;  %v12516_v11 = vpop.f32.mrf.mxu3  ;;  %v12521_v10 = vld [vmem:[%s14739_s3] ss:$0 sm:$0xff]  ;;  %v10535_v15 = vld [vmem:[#allocation3 + $0x4] sm:$0xf] }
 0x2ab   : > { %v5336_v31 = vsel %vm10630_vm8, %v5070_v18, %v5335_v1  ;;  %v4958_v54 = vpack.c.bf16 %v4926_v44, %v4926_v44  ;;  %v4827_v2 = vadd.f32 %v4765_v26, %v4429_v63  ;;  %v5856_v47 = vunpack.c.l.b16 %v5580_v24  ;;  %v10536_v44 = vld [vmem:[#allocation3 + $0x8] sm:$0x1] }
 0x2ac   : > { %5337 = vst [vmem:[#allocation3 + $0x48] sm:$0xf] %v5336_v31  ;;  %v4276_v39 = vpack.c.b16 %v4260_v20, %v4259_v58  ;;  %v4621_v60 = vsel %vm11082_vm2, %v9980_v8, %v4620_v57  ;;  %v4622_v32 = vrot.slane %v4620_v57, 4  ;;  %v4623_v62 = vrot.slane %v12476_v7, 5  ;;  %v12532_v20 = vld [vmem:[%s14739_s3 + $0x1] ss:$0 sm:$0xff] }
 0x2ad   : > { %v5073_v36 = vshrl.u32 %v4958_v54, 16  ;;  %v5076_v61 = vshll.u32 %v4958_v54, 16  ;;  %v4861_v26 = vmul.f32 %v12521_v10, %v4827_v2  ;;  %v5883_v25 = vpack.c.b16 %v5856_v47, %v5855_v51  ;;  %v10441_v51 = vld [vmem:[#allocation2 + $0xcc] sm:$0xff]  ;;  %v12538_v2 = vld [vmem:[#allocation3 + $0x40] sm:$0xf] }
 0x2ae   : > { %9964 = vmatmul.msk.bf16.gmra.mxu3 %vm1391_vm10, %v4276_v39  ;;  %v3715_v46 = vpop.f32.mrf.mxu2  ;;  %v4624_v34 = vsel %vm11082_vm2, %v4622_v32, %v4623_v62  ;;  %v4657_v7 = vunpack.c.l.b16 %v4621_v60  ;;  %v353_v45 = vsel %vm10589_vm4, 0, %v352_v56  ;;  %v10095_v19 = vrot.slane %v6255_v42, 9 }
 0x2af   : > { %v5075_v48 = vrot.slane %v5073_v36, 7  ;;  %v4895_v49 = vadd.f32 %v12532_v20, %v4861_v26  ;;  %10003 = vmatmul.msk.bf16.gmra.mxu1 %vm1391_vm10, %v5883_v25  ;;  %v3776_v1 = vadd.f32 %v3715_v46, %v12463_v12  ;;  %v4658_v9 = vunpack.c.l.b16 %v4624_v34  ;;  %354 = vst [vmem:[#allocation3 + $0x60] sm:$0x1] %v353_v45  ;;  %v4770_v52 = vpop.f32.mrf.mxu0  ;;  %v12552_v36 = vld [vmem:[#allocation3 + $0x44] sm:$0x1] }
 0x2b0   : > { %v6305_v18 = vrot.slane %v10535_v15, 5  ;;  %v6308_v63 = vrot.slane %v10536_v44, 5  ;;  %v5582_v58 = vshrl.u32 %v5422_v4, 16  ;;  %v5585_v24 = vshll.u32 %v5422_v4, 16  ;;  %v406_v46 = vld [vmem:[#allocation3 + $0x68] sm:$0x1] }
 0x2b1   : > { %v5078_v8 = vor.u32 %v5076_v61, %v5075_v48  ;;  %v5080_v57 = vrot.slane %v5075_v48, 4  ;;  %v4927_v31 = vmax.f32 %v4895_v49, 0.0  ;;  %v4430_v54 = vadd.f32 %v12466_v55, %v3776_v1  ;;  %v5342_v15 = vld [vmem:[#allocation3 + $0x54] sm:$0xf] }
 0x2b2   : > { %v4674_v47 = vpack.c.b16 %v4658_v9, %v4657_v7  ;;  %v6306_v12 = vsel %vm11082_vm2, %v10095_v19, %v6305_v18  ;;  %v6307_v56 = vrot.slane %v6305_v18, 4  ;;  %v5584_v42 = vrot.slane %v5582_v58, 4  ;;  %v12555_v26 = vpop.f32.mrf.mxu3 }
 0x2b3   : > { %v5079_v39 = vsel %vm10620_vm7, %v5071_v6, %v5078_v8  ;;  %v5340_v60 = vsel %vm10589_vm4, %v5080_v57, %v5339_v29  ;;  %v4959_v32 = vpack.c.bf16 %v4927_v31, %v4927_v31  ;;  %v4828_v62 = vadd.f32 %v12498_v30, %v4430_v54  ;;  %9947 = vmatmul.msk.bf16.gmra.mxu2 %vm1391_vm10, %v10441_v51  ;;  %v355_v51 = vld [vmem:[#allocation3 + $0x6c] sm:$0x1] }
 0x2b4   : > { %5338 = vst.msk [vmem:[#allocation3 + $0x4c] sm:$0xf] %vm199_vm1, %v5079_v39  ;;  %9997 = vmatmul.msk.bf16.gmra.mxu0 %vm1391_vm10, %v4674_v47  ;;  %v6309_v55 = vsel %vm11082_vm2, %v6307_v56, %v6308_v63  ;;  %v5587_v61 = vrot.slane %v5585_v24, 5  ;;  %v5591_v6 = vshll.u32 %v12538_v2, 16  ;;  %v6417_v4 = vunpack.c.l.b16 %v6306_v12 }
 0x2b5   : > { %5341 = vst [vmem:[#allocation3 + $0x50] sm:$0x1] %v5340_v60  ;;  %v5082_v25 = vshrl.u32 %v4959_v32, 16  ;;  %v4862_v30 = vmul.f32 %v12521_v10, %v4828_v62  ;;  %v6418_v7 = vunpack.c.l.b16 %v6309_v55  ;;  %v5595_v48 = vshrl.u32 %v12538_v2, 16 }
 0x2b6   : > { %v3718_v34 = vpop.f32.mrf.mxu2  ;;  %v5588_v45 = vor.u32 %v5587_v61, %v5584_v42  ;;  %v5593_v19 = vrot.slane %v5591_v6, 5  ;;  %v5085_v49 = vshll.u32 %v4959_v32, 16  ;;  %v5601_v58 = vshll.u32 %v12552_v36, 16 }
 0x2b7   : > { %v12559_v29 = vrot.slane %v5082_v25, 7  ;;  %v4896_v1 = vadd.f32 %v12532_v20, %v4862_v30  ;;  %v3777_v9 = vadd.f32 %v3718_v34, %v11789_v43  ;;  %v12563_v18 = vpop.f32.mrf.mxu0  ;;  %v5597_v63 = vrot.slane %v5595_v48, 4 }
 0x2b8   : > { %v5589_v44 = vrot.slane %v5588_v45, 4  ;;  %v407_v24 = vsel %vm10649_vm9, 0, %v406_v46  ;;  %v6449_v54 = vpack.c.b16 %v6418_v7, %v6417_v4  ;;  %v356_v12 = vsel %vm10589_vm4, 0, %v355_v51  ;;  %v5424_v4 = vld [vmem:[#allocation3 + $0x48] sm:$0xf] }
 0x2b9   : > { %v5087_v8 = vor.u32 %v5085_v49, %v12559_v29  ;;  %v4928_v57 = vmax.f32 %v4896_v1, 0.0  ;;  %v4431_v31 = vadd.f32 %v12487_v33, %v3777_v9  ;;  %408 = vst [vmem:[#allocation3 + $0x68] sm:$0x1] %v407_v24  ;;  %v5598_v47 = vor.u32 %v5597_v63, %v5593_v19  ;;  %v5346_v1 = vld [vmem:[#allocation3 + $0x5c] sm:$0x1] }
 0x2ba   : > { %v5594_v43 = vsel %vm10695_vm13, %v5589_v44, %v5593_v19  ;;  %v3491_v56 = vadd.f32 %v11758_v38, %v11802_v41  ;;  %357 = vst [vmem:[#allocation3 + $0x6c] sm:$0x1] %v356_v12  ;;  %v5088_v33 = vrot.slane %v12559_v29, 4  ;;  %v5603_v62 = vrot.slane %v5601_v58, 5  ;;  %v12579_v55 = vpop.f32.mrf.mxu3  ;;  %v6256_v38 = vld [vmem:[#allocation3 + $0xc] sm:$0xe] }
 0x2bb   : > { %v5343_v42 = vsel %vm10630_vm8, %v5087_v8, %v5342_v15  ;;  %v4960_v39 = vpack.c.bf16 %v4928_v57, %v4928_v57  ;;  %v4829_v60 = vadd.f32 %v4770_v52, %v4431_v31  ;;  %v5599_v32 = vrot.slane %v5598_v47, 4  ;;  %v12588_v49 = vld [vmem:[#allocation3 + $0x4c] sm:$0xf] }
 0x2bc   : > { %5344 = vst [vmem:[#allocation3 + $0x54] sm:$0xf] %v5343_v42  ;;  %v6312_v61 = vrot.slane %v12267_v59, 5  ;;  %v5857_v30 = vunpack.c.l.b16 %v5594_v43  ;;  %v6315_v41 = vrot.slane %v12273_v53, 5  ;;  %v5606_v45 = vshrl.u32 %v5424_v4, 16  ;;  %v10442_v53 = vld [vmem:[#allocation3] sm:$0xff] }
 0x2bd   : > { %v5090_v6 = vshrl.u32 %v4960_v39, 16  ;;  %v4863_v25 = vmul.f32 %v12521_v10, %v4829_v60  ;;  %v5093_v46 = vshll.u32 %v4960_v39, 16  ;;  %v5604_v52 = vsel %vm10695_vm13, %v5599_v32, %v5603_v62  ;;  %v12603_v60 = vld [vmem:[#allocation3 + $0x50] sm:$0x1]  ;;  %v409_v32 = vld [vmem:[#allocation3 + $0x74] sm:$0x1] }
 0x2be   : > { %10112 = vmatmul.msk.bf16.vlgmr.msrb.gmra.mxu3 %vm1391_vm10, %v6449_v54  ;;  %v3720_v34 = vpop.f32.mrf.mxu2  ;;  %v6314_v7 = vrot.slane %v6312_v61, 4  ;;  %v5858_v48 = vunpack.c.l.b16 %v5604_v52  ;;  %v10096_v51 = vrot.slane %v6256_v38, 9  ;;  %v5608_v44 = vrot.slane %v5606_v45, 4  ;;  %v10458_v54 = vld [vmem:[#allocation3 + $0xc] sm:$0xff] }
 0x2bf   : > { %v5092_v19 = vrot.slane %v5090_v6, 7  ;;  %v4897_v59 = vadd.f32 %v12532_v20, %v4863_v25  ;;  %v3778_v29 = vadd.f32 %v3720_v34, %v3491_v56  ;;  %v12590_v9 = vpop.f32.mrf.mxu0  ;;  %v5609_v63 = vshll.u32 %v5424_v4, 16 }
 0x2c0   : > { %v6316_v15 = vsel %vm11082_vm2, %v6314_v7, %v6315_v41  ;;  %v5884_v57 = vpack.c.b16 %v5858_v48, %v5857_v30  ;;  %v6313_v43 = vsel %vm11082_vm2, %v10096_v51, %v6312_v61  ;;  %v5615_v12 = vshll.u32 %v12588_v49, 16  ;;  %v358_v7 = vld [vmem:[#allocation3 + $0x78] sm:$0x1] }
 0x2c1   : > { %v5095_v58 = vor.u32 %v5093_v46, %v5092_v19  ;;  %v5097_v24 = vrot.slane %v5092_v19, 4  ;;  %v4929_v8 = vmax.f32 %v4897_v59, 0.0  ;;  %v4432_v31 = vadd.f32 %v12516_v11, %v3778_v29  ;;  %v6257_v29 = vld [vmem:[#allocation3 + $0x18] sm:$0xe] }
 0x2c2   : > { %v5611_v47 = vrot.slane %v5609_v63, 5  ;;  %10004 = vmatmul.msk.bf16.gmra.mxu1 %vm1391_vm10, %v5884_v57  ;;  %v5619_v11 = vshrl.u32 %v12588_v49, 16  ;;  %v12610_v6 = vpop.f32.mrf.mxu3  ;;  %v5617_v38 = vrot.slane %v5615_v12, 5  ;;  %v5625_v34 = vshll.u32 %v12603_v60, 16  ;;  %v14883_v57 = vld [vmem:[#allocation59_spill] sm:$0xff] }
 0x2c3   : > { %v5096_v56 = vsel %vm10620_vm7, %v5088_v33, %v5095_v58  ;;  %v5347_v42 = vsel %vm10589_vm4, %v5097_v24, %v5346_v1  ;;  %v4961_v39 = vpack.c.bf16 %v4929_v8, %v4929_v8  ;;  %v4830_v62 = vadd.f32 %v12563_v18, %v4432_v31  ;;  %10079 = vmatmul.msk.bf16.vlgmr.msrb.gmra.mxu2 %vm1391_vm10, %v10442_v53  ;;  %v5349_v1 = vld [vmem:[#allocation3 + $0x60] sm:$0xf] }
 0x2c4   : > { %5345 = vst.msk [vmem:[#allocation3 + $0x58] sm:$0xf] %vm199_vm1, %v5096_v56  ;;  %10193 = vmatmul.msk.bf16.vlgmr.msrb.gmra.mxu0 %vm1391_vm10, %v10458_v54  ;;  %v6420_v33 = vunpack.c.l.b16 %v6316_v15  ;;  %v5612_v61 = vor.u32 %v5611_v47, %v5608_v44  ;;  %v5621_v41 = vrot.slane %v5619_v11, 4  ;;  %v410_v18 = vsel %vm10649_vm9, 0, %v409_v32 }
 0x2c5   : > { %5348 = vst [vmem:[#allocation3 + $0x5c] sm:$0x1] %v5347_v42  ;;  %v5099_v25 = vshrl.u32 %v4961_v39, 16  ;;  %v5102_v30 = vshll.u32 %v4961_v39, 16  ;;  %v4864_v4 = vmul.f32 %v12521_v10, %v4830_v62  ;;  %v359_v48 = vsel %vm10589_vm4, 0, %v358_v7 }
 0x2c6   : > { %v3723_v46 = vpop.f32.mrf.mxu2  ;;  %v5613_v52 = vrot.slane %v5612_v61, 4  ;;  %v5622_v59 = vor.u32 %v5621_v41, %v5617_v38  ;;  %411 = vst [vmem:[#allocation3 + $0x74] sm:$0x1] %v410_v18  ;;  %v6419_v15 = vunpack.c.l.b16 %v6313_v43  ;;  %v6319_v63 = vrot.slane %v12332_v23, 5  ;;  %v5426_v62 = vld [vmem:[#allocation3 + $0x54] sm:$0xf] }
 0x2c7   : > { %v12616_v45 = vrot.slane %v5099_v25, 7  ;;  %v3779_v19 = vadd.f32 %v3723_v46, %v11828_v22  ;;  %v4898_v53 = vadd.f32 %v12532_v20, %v4864_v4  ;;  %v4777_v51 = vpop.f32.mrf.mxu0  ;;  %360 = vst [vmem:[#allocation3 + $0x78] sm:$0x1] %v359_v48  ;;  %v5627_v8 = vrot.slane %v5625_v34, 5 }
 0x2c8   : > { %v5618_v44 = vsel %vm10695_vm13, %v5613_v52, %v5617_v38  ;;  %v5623_v24 = vrot.slane %v5622_v59, 4  ;;  %v3493_v31 = vadd.f32 %v14883_v57, %v11840_v0  ;;  %v10097_v47 = vrot.slane %v6257_v29, 9  ;;  %v10459_v57 = vld [vmem:[#allocation3 + $0x18] sm:$0xff] }
 0x2c9   : > { %v5104_v58 = vor.u32 %v5102_v30, %v12616_v45  ;;  %v4433_v22 = vadd.f32 %v12555_v26, %v3779_v19  ;;  %v4930_v54 = vmax.f32 %v4898_v53, 0.0  ;;  %v6321_v12 = vrot.slane %v6319_v63, 4  ;;  %v5353_v53 = vld [vmem:[#allocation3 + $0x68] sm:$0x1] }
 0x2ca   : > { %v6450_v42 = vpack.c.b16 %v6420_v33, %v6419_v15  ;;  %v5628_v23 = vsel %vm10695_vm13, %v5623_v24, %v5627_v8  ;;  %v5859_v26 = vunpack.c.l.b16 %v5618_v44  ;;  %v12634_v32 = vpop.f32.mrf.mxu3  ;;  %v6322_v0 = vrot.slane %v12337_v50, 5 }
 0x2cb   : > { %v5350_v43 = vsel %vm10630_vm8, %v5104_v58, %v5349_v1  ;;  %v4831_v56 = vadd.f32 %v12590_v9, %v4433_v22  ;;  %v4962_v39 = vpack.c.bf16 %v4930_v54, %v4930_v54  ;;  %v5860_v11 = vunpack.c.l.b16 %v5628_v23  ;;  %v12639_v30 = vld [vmem:[#allocation3 + $0x58] sm:$0xf]  ;;  %v412_v22 = vld [vmem:[#allocation3 + $0x80] sm:$0x1] }
 0x2cc   : > { %5351 = vst [vmem:[#allocation3 + $0x60] sm:$0xf] %v5350_v43  ;;  %v5105_v61 = vrot.slane %v12616_v45, 4  ;;  %v5630_v9 = vshrl.u32 %v5426_v62, 16  ;;  %v5633_v33 = vshll.u32 %v5426_v62, 16  ;;  %v12644_v46 = vsel %vm11082_vm2, %v10097_v47, %v6319_v63 }
 0x2cd   : > { %v4865_v25 = vmul.f32 %v12521_v10, %v4831_v56  ;;  %v5107_v38 = vshrl.u32 %v4962_v39, 16  ;;  %v5885_v41 = vpack.c.b16 %v5860_v11, %v5859_v26  ;;  %v12648_v50 = vsel %vm11082_vm2, %v6321_v12, %v6322_v0  ;;  %v12650_v52 = vld [vmem:[#allocation3 + $0x5c] sm:$0x1] }
 0x2ce   : > { %10113 = vmatmul.msk.bf16.gmra.mxu3 %vm1391_vm10, %v6450_v42  ;;  %v3725_v4 = vpop.f32.mrf.mxu2  ;;  %v5632_v7 = vrot.slane %v5630_v9, 4  ;;  %v5635_v45 = vrot.slane %v5633_v33, 5  ;;  %v5110_v59 = vshll.u32 %v4962_v39, 16  ;;  %v5639_v29 = vshll.u32 %v12639_v30, 16  ;;  %v12672_v9 = vld [vmem:[#allocation3 + $0x24] sm:$0xe] }
 0x2cf   : > { %v4899_v34 = vadd.f32 %v12532_v20, %v4865_v25  ;;  %v3780_v18 = vadd.f32 %v3725_v4, %v3493_v31  ;;  %v5109_v19 = vrot.slane %v5107_v38, 7  ;;  %v4780_v48 = vpop.f32.mrf.mxu0  ;;  %v5643_v1 = vshrl.u32 %v12639_v30, 16  ;;  %v10443_v31 = vld [vmem:[#allocation3 + $0xc] sm:$0xff]  ;;  %v361_v25 = vld [vmem:[#allocation3 + $0x84] sm:$0x1] }
 0x2d0   : > { %v5636_v63 = vor.u32 %v5635_v45, %v5632_v7  ;;  %v5649_v58 = vshll.u32 %v12650_v52, 16  ;;  %v5641_v54 = vrot.slane %v5639_v29, 5  ;;  %v6421_v56 = vunpack.c.l.b16 %v12644_v46  ;;  %v14886_v29 = vld [vmem:[#allocation6_spill] sm:$0xff] }
 0x2d1   : > { %v4931_v15 = vmax.f32 %v4899_v34, 0.0  ;;  %v4434_v44 = vadd.f32 %v12579_v55, %v3780_v18  ;;  %v5112_v24 = vor.u32 %v5110_v59, %v5109_v19  ;;  %v5114_v8 = vrot.slane %v5109_v19, 4  ;;  %v5356_v18 = vld [vmem:[#allocation3 + $0x6c] sm:$0xf]  ;;  %v14885_v59 = vld [vmem:[#allocation9_spill] sm:$0xff] }
 0x2d2   : > { %v5645_v47 = vrot.slane %v5643_v1, 4  ;;  %10005 = vmatmul.msk.bf16.gmra.mxu1 %vm1391_vm10, %v5885_v41  ;;  %v5637_v42 = vrot.slane %v5636_v63, 4  ;;  %v12665_v26 = vpop.f32.mrf.mxu3  ;;  %v413_v11 = vsel %vm10649_vm9, 0, %v412_v22  ;;  %v6422_v62 = vunpack.c.l.b16 %v12648_v50  ;;  %v14884_v50 = vld [vmem:[#allocation12_spill] sm:$0xff] }
 0x2d3   : > { %v4963_v12 = vpack.c.bf16 %v4931_v15, %v4931_v15  ;;  %v4832_v43 = vadd.f32 %v4777_v51, %v4434_v44  ;;  %v5113_v55 = vsel %vm10620_vm7, %v5105_v61, %v5112_v24  ;;  %v5354_v23 = vsel %vm10589_vm4, %v5114_v8, %v5353_v53  ;;  %10080 = vmatmul.msk.bf16.gmra.mxu2 %vm1391_vm10, %v10443_v31  ;;  %v6259_v44 = vld [vmem:[#allocation3 + $0x30] sm:$0xe] }
 0x2d4   : > { %10194 = vmatmul.msk.bf16.gmra.mxu0 %vm1391_vm10, %v10459_v57  ;;  %v5646_v39 = vor.u32 %v5645_v47, %v5641_v54  ;;  %5352 = vst.msk [vmem:[#allocation3 + $0x64] sm:$0xf] %vm199_vm1, %v5113_v55  ;;  %v5651_v61 = vrot.slane %v5649_v58, 5  ;;  %v5642_v41 = vsel %vm10695_vm13, %v5637_v42, %v5641_v54  ;;  %v362_v46 = vsel %vm10589_vm4, 0, %v361_v25 }
 0x2d5   : > { %v5116_v51 = vshrl.u32 %v4963_v12, 16  ;;  %v4866_v0 = vmul.f32 %v12521_v10, %v4832_v43  ;;  %5355 = vst [vmem:[#allocation3 + $0x68] sm:$0x1] %v5354_v23  ;;  %v5119_v33 = vshll.u32 %v4963_v12, 16  ;;  %v6326_v19 = vrot.slane %v12396_v40, 5 }
 0x2d6   : > { %v3728_v38 = vpop.f32.mrf.mxu2  ;;  %v5647_v4 = vrot.slane %v5646_v39, 4  ;;  %414 = vst [vmem:[#allocation3 + $0x80] sm:$0x1] %v413_v11  ;;  %v3495_v1 = vadd.f32 %v14886_v29, %v14885_v59  ;;  %v6333_v63 = vrot.slane %v12459_v21, 5  ;;  %v6451_v8 = vpack.c.b16 %v6422_v62, %v6421_v56  ;;  %v12695_v21 = vpop.f32.mrf.mxu1 }
 0x2d7   : > { %v12678_v34 = vrot.slane %v5116_v51, 7  ;;  %v4900_v7 = vadd.f32 %v12532_v20, %v4866_v0  ;;  %v3781_v45 = vadd.f32 %v3728_v38, %v14884_v50  ;;  %v4782_v53 = vpop.f32.mrf.mxu0  ;;  %363 = vst [vmem:[#allocation3 + $0x84] sm:$0x1] %v362_v46  ;;  %v5861_v57 = vunpack.c.l.b16 %v5642_v41 }
 0x2d8   : > { %v5652_v15 = vsel %vm10695_vm13, %v5647_v4, %v5651_v61  ;;  %v10098_v54 = vrot.slane %v12672_v9, 9  ;;  %v6328_v47 = vrot.slane %v6326_v19, 4  ;;  %v10099_v55 = vrot.slane %v6259_v44, 9  ;;  %v5428_v61 = vld [vmem:[#allocation3 + $0x60] sm:$0xf] }
 0x2d9   : > { %v5121_v58 = vor.u32 %v5119_v33, %v12678_v34  ;;  %v4932_v22 = vmax.f32 %v4900_v7, 0.0  ;;  %v4435_v24 = vadd.f32 %v12610_v6, %v3781_v45  ;;  %v5862_v31 = vunpack.c.l.b16 %v5652_v15  ;;  %v5360_v7 = vld [vmem:[#allocation3 + $0x74] sm:$0x1] }
 0x2da   : > { %v5122_v23 = vrot.slane %v12678_v34, 4  ;;  %v12698_v6 = vpop.f32.mrf.mxu3  ;;  %v6329_v56 = vrot.slane %v12404_v5, 5  ;;  %v6335_v39 = vrot.slane %v6333_v63, 4  ;;  %v6336_v11 = vrot.slane %v12468_v27, 5 }
 0x2db   : > { %v5357_v12 = vsel %vm10630_vm8, %v5121_v58, %v5356_v18  ;;  %v4964_v43 = vpack.c.bf16 %v4932_v22, %v4932_v22  ;;  %v4833_v42 = vadd.f32 %v4780_v48, %v4435_v24  ;;  %v5886_v62 = vpack.c.b16 %v5862_v31, %v5861_v57  ;;  %v12703_v25 = vld [vmem:[#allocation3 + $0x64] sm:$0xf]  ;;  %v415_v24 = vld [vmem:[#allocation3 + $0x8c] sm:$0x1]  ;;  %v10444_v57 = vld [vmem:[#allocation3 + $0x18] sm:$0xff] }
 0x2dc   : > { %5358 = vst [vmem:[#allocation3 + $0x6c] sm:$0xf] %v5357_v12  ;;  %v12707_v48 = vsel %vm11082_vm2, %v10099_v55, %v6333_v63  ;;  %v12712_v5 = vsel %vm11082_vm2, %v6328_v47, %v6329_v56  ;;  %v5654_v33 = vshrl.u32 %v5428_v61, 16  ;;  %v5657_v27 = vshll.u32 %v5428_v61, 16  ;;  %v12717_v18 = vld [vmem:[#allocation3 + $0x68] sm:$0x1] }
 0x2dd   : > { %v5124_v51 = vshrl.u32 %v4964_v43, 16  ;;  %v4867_v0 = vmul.f32 %v12521_v10, %v4833_v42  ;;  %v6337_v38 = vsel %vm11082_vm2, %v6335_v39, %v6336_v11  ;;  %v5127_v4 = vshll.u32 %v4964_v43, 16 }
 0x2de   : > { %10114 = vmatmul.msk.bf16.gmra.mxu3 %vm1391_vm10, %v6451_v8  ;;  %v3730_v9 = vpop.f32.mrf.mxu2  ;;  %v5656_v45 = vrot.slane %v5654_v33, 4  ;;  %v5659_v59 = vrot.slane %v5657_v27, 5  ;;  %v5663_v29 = vshll.u32 %v12703_v25, 16  ;;  %v5667_v15 = vshrl.u32 %v12703_v25, 16  ;;  %v10460_v8 = vld [vmem:[#allocation3 + $0x24] sm:$0xff] }
 0x2df   : > { %v5126_v41 = vrot.slane %v5124_v51, 7  ;;  %v4901_v46 = vadd.f32 %v12532_v20, %v4867_v0  ;;  %v3782_v34 = vadd.f32 %v3730_v9, %v3495_v1  ;;  %v12719_v50 = vpop.f32.mrf.mxu0  ;;  %v5673_v12 = vshll.u32 %v12717_v18, 16 }
 0x2e0   : > { %v5660_v1 = vor.u32 %v5659_v59, %v5656_v45  ;;  %v5665_v31 = vrot.slane %v5663_v29, 5  ;;  %v5669_v47 = vrot.slane %v5667_v15, 4  ;;  %v6426_v9 = vunpack.c.l.b16 %v6337_v38  ;;  %v6260_v15 = vld [vmem:[#allocation3 + $0x3c] sm:$0xe] }
 0x2e1   : > { %v5129_v44 = vor.u32 %v5127_v4, %v5126_v41  ;;  %v5131_v63 = vrot.slane %v5126_v41, 4  ;;  %v4933_v58 = vmax.f32 %v4901_v46, 0.0  ;;  %v4436_v22 = vadd.f32 %v12634_v32, %v3782_v34  ;;  %v12731_v32 = vpop.f32.mrf.mxu1  ;;  %v364_v41 = vld [vmem:[#allocation3 + $0x90] sm:$0x1]  ;;  %v5363_v4 = vld [vmem:[#allocation3 + $0x78] sm:$0xf] }
 0x2e2   : > { %10006 = vmatmul.msk.bf16.gmra.mxu1 %vm1391_vm10, %v5886_v62  ;;  %v5661_v39 = vrot.slane %v5660_v1, 4  ;;  %v5670_v11 = vor.u32 %v5669_v47, %v5665_v31  ;;  %v12739_v51 = vpop.f32.mrf.mxu3  ;;  %v5675_v61 = vrot.slane %v5673_v12, 5  ;;  %v6424_v27 = vunpack.c.l.b16 %v12712_v5  ;;  %v14887_v5 = vld [vmem:[#allocation17_spill] sm:$0xff] }
 0x2e3   : > { %v5130_v43 = vsel %vm10620_vm7, %v5122_v23, %v5129_v44  ;;  %v5361_v42 = vsel %vm10589_vm4, %v5131_v63, %v5360_v7  ;;  %v4965_v55 = vpack.c.bf16 %v4933_v58, %v4933_v58  ;;  %v4834_v56 = vadd.f32 %v4782_v53, %v4436_v22  ;;  %10081 = vmatmul.msk.bf16.gmra.mxu2 %vm1391_vm10, %v10444_v57  ;;  %v14888_v63 = vld [vmem:[#allocation18_spill] sm:$0xff] }
 0x2e4   : > { %5359 = vst.msk [vmem:[#allocation3 + $0x70] sm:$0xf] %vm199_vm1, %v5130_v43  ;;  %10195 = vmatmul.msk.bf16.gmra.mxu0 %vm1391_vm10, %v10460_v8  ;;  %v6327_v23 = vsel %vm11082_vm2, %v10098_v54, %v6326_v19  ;;  %v416_v53 = vsel %vm10649_vm9, 0, %v415_v24  ;;  %v5671_v40 = vrot.slane %v5670_v11, 4  ;;  %v6425_v19 = vunpack.c.l.b16 %v12707_v48  ;;  %v14889_v58 = vld [vmem:[#allocation14_spill] sm:$0xff] }
 0x2e5   : > { %5362 = vst [vmem:[#allocation3 + $0x74] sm:$0x1] %v5361_v42  ;;  %v5133_v0 = vshrl.u32 %v4965_v55, 16  ;;  %v4868_v62 = vmul.f32 %v12521_v10, %v4834_v56  ;;  %v5136_v33 = vshll.u32 %v4965_v55, 16  ;;  %v5666_v7 = vsel %vm10695_vm13, %v5661_v39, %v5665_v31 }
 0x2e6   : > { %417 = vst [vmem:[#allocation3 + $0x8c] sm:$0x1] %v416_v53  ;;  %v3733_v34 = vpop.f32.mrf.mxu2  ;;  %v365_v38 = vsel %vm10589_vm4, 0, %v364_v41  ;;  %v5676_v29 = vsel %vm10695_vm13, %v5671_v40, %v5675_v61  ;;  %v12758_v48 = vpack.c.b16 %v6426_v9, %v6425_v19  ;;  %v6340_v44 = vrot.slane %v12538_v2, 5 }
 0x2e7   : > { %v12746_v54 = vrot.slane %v5133_v0, 7  ;;  %v4902_v46 = vadd.f32 %v12532_v20, %v4868_v62  ;;  %v12753_v45 = vpop.f32.mrf.mxu0  ;;  %v3783_v59 = vadd.f32 %v3733_v34, %v14887_v5  ;;  %366 = vst [vmem:[#allocation3 + $0x90] sm:$0x1] %v365_v38  ;;  %v3497_v22 = vadd.f32 %v14889_v58, %v14888_v63  ;;  %v5430_v62 = vld [vmem:[#allocation3 + $0x6c] sm:$0xf] }
 0x2e8   : > { %v5864_v57 = vunpack.c.l.b16 %v5676_v29  ;;  %v6423_v31 = vunpack.c.l.b16 %v6327_v23  ;;  %v6342_v47 = vrot.slane %v6340_v44, 4  ;;  %v6343_v12 = vrot.slane %v12552_v36, 5  ;;  %v5367_v38 = vld [vmem:[#allocation3 + $0x80] sm:$0x1]  ;;  %v418_v63 = vld [vmem:[#allocation3 + $0x98] sm:$0x1] }
 0x2e9   : > { %v5138_v24 = vor.u32 %v5136_v33, %v12746_v54  ;;  %v4934_v8 = vmax.f32 %v4902_v46, 0.0  ;;  %v4437_v1 = vadd.f32 %v12665_v26, %v3783_v59  ;;  %v5863_v55 = vunpack.c.l.b16 %v5666_v7  ;;  %v12777_v33 = vpop.f32.mrf.mxu1 }
 0x2ea   : > { %v10100_v56 = vrot.slane %v6260_v15, 9  ;;  %v5139_v2 = vrot.slane %v12746_v54, 4  ;;  %v6452_v11 = vpack.c.b16 %v6424_v27, %v6423_v31  ;;  %v12770_v53 = vpop.f32.mrf.mxu3  ;;  %v6344_v26 = vsel %vm11082_vm2, %v6342_v47, %v6343_v12  ;;  %v10461_v47 = vld [vmem:[#allocation3 + $0x30] sm:$0xff]  ;;  %v10445_v12 = vld [vmem:[#allocation3 + $0x24] sm:$0xff] }
 0x2eb   : > { %v5364_v43 = vsel %vm10630_vm8, %v5138_v24, %v5363_v4  ;;  %v4966_v42 = vpack.c.bf16 %v4934_v8, %v4934_v8  ;;  %v4835_v39 = vadd.f32 %v12719_v50, %v4437_v1  ;;  %v5887_v36 = vpack.c.b16 %v5864_v57, %v5863_v55  ;;  %v12780_v50 = vld [vmem:[#allocation3 + $0x70] sm:$0xf] }
 0x2ec   : > { %5365 = vst [vmem:[#allocation3 + $0x78] sm:$0xf] %v5364_v43  ;;  %v6341_v61 = vsel %vm11082_vm2, %v10100_v56, %v6340_v44  ;;  %v12782_v27 = vld [vmem:[#allocation3 + $0x74] sm:$0x1]  ;;  %v5678_v40 = vshrl.u32 %v5430_v62, 16  ;;  %v5681_v41 = vshll.u32 %v5430_v62, 16  ;;  %v6428_v19 = vunpack.c.l.b16 %v6344_v26 }
 0x2ed   : > { %v5141_v23 = vshrl.u32 %v4966_v42, 16  ;;  %v5144_v0 = vshll.u32 %v4966_v42, 16  ;;  %v4869_v9 = vmul.f32 %v12521_v10, %v4835_v39  ;;  %v5687_v46 = vshll.u32 %v12780_v50, 16 }
 0x2ee   : > { %10115 = vmatmul.msk.bf16.gmra.mxu3 %vm1391_vm10, %v6452_v11  ;;  %v3735_v4 = vpop.f32.mrf.mxu2  ;;  %v5691_v34 = vshrl.u32 %v12780_v50, 16  ;;  %v5697_v7 = vshll.u32 %v12782_v27, 16  ;;  %v5680_v15 = vrot.slane %v5678_v40, 4  ;;  %v5683_v44 = vrot.slane %v5681_v41, 5  ;;  %v6261_v11 = vld [vmem:[#allocation3 + $0x48] sm:$0xe] }
 0x2ef   : > { %v5143_v54 = vrot.slane %v5141_v23, 7  ;;  %v4903_v5 = vadd.f32 %v12532_v20, %v4869_v9  ;;  %v4790_v59 = vpop.f32.mrf.mxu0  ;;  %v3784_v29 = vadd.f32 %v3735_v4, %v3497_v22  ;;  %v5689_v8 = vrot.slane %v5687_v46, 5 }
 0x2f0   : > { %v5693_v57 = vrot.slane %v5691_v34, 4  ;;  %v5684_v43 = vor.u32 %v5683_v44, %v5680_v15  ;;  %v6427_v42 = vunpack.c.l.b16 %v6341_v61  ;;  %v419_v39 = vsel %vm10649_vm9, 0, %v418_v63  ;;  %v5370_v63 = vld [vmem:[#allocation3 + $0x84] sm:$0xf] }
 0x2f1   : > { %v5146_v58 = vor.u32 %v5144_v0, %v5143_v54  ;;  %v5148_v24 = vrot.slane %v5143_v54, 4  ;;  %v4935_v1 = vmax.f32 %v4903_v5, 0.0  ;;  %v4438_v31 = vadd.f32 %v12698_v6, %v3784_v29  ;;  %420 = vst [vmem:[#allocation3 + $0x98] sm:$0x1] %v419_v39  ;;  %v14890_v29 = vld [vmem:[#allocation21_spill] sm:$0xff]  ;;  %v14891_v39 = vld [vmem:[#allocation22_spill] sm:$0xff] }
 0x2f2   : > { %10007 = vmatmul.msk.bf16.gmra.mxu1 %vm1391_vm10, %v5887_v36  ;;  %v5694_v56 = vor.u32 %v5693_v57, %v5689_v8  ;;  %v5685_v23 = vrot.slane %v5684_v43, 4  ;;  %v5699_v36 = vrot.slane %v5697_v7, 5  ;;  %v12801_v62 = vpop.f32.mrf.mxu3  ;;  %v12803_v61 = vpack.c.b16 %v6428_v19, %v6427_v42 }
 0x2f3   : > { %v5147_v55 = vsel %vm10620_vm7, %v5139_v2, %v5146_v58  ;;  %v5368_v22 = vsel %vm10589_vm4, %v5148_v24, %v5367_v38  ;;  %v4967_v6 = vpack.c.bf16 %v4935_v1, %v4935_v1  ;;  %v4836_v26 = vadd.f32 %v12753_v45, %v4438_v31  ;;  %10082 = vmatmul.msk.bf16.gmra.mxu2 %vm1391_vm10, %v10445_v12  ;;  %v367_v45 = vld [vmem:[#allocation3 + $0x9c] sm:$0x1] }
 0x2f4   : > { %5366 = vst.msk [vmem:[#allocation3 + $0x7c] sm:$0xf] %vm199_vm1, %v5147_v55  ;;  %10196 = vmatmul.msk.bf16.gmra.mxu0 %vm1391_vm10, %v10461_v47  ;;  %v6347_v2 = vrot.slane %v12588_v49, 5  ;;  %v5695_v0 = vrot.slane %v5694_v56, 4  ;;  %v10101_v54 = vrot.slane %v6261_v11, 9  ;;  %v5690_v49 = vsel %vm10695_vm13, %v5685_v23, %v5689_v8  ;;  %v14892_v11 = vld [vmem:[#allocation13_spill] sm:$0xff] }
 0x2f5   : > { %5369 = vst [vmem:[#allocation3 + $0x80] sm:$0x1] %v5368_v22  ;;  %v5150_v9 = vshrl.u32 %v4967_v6, 16  ;;  %v4870_v40 = vmul.f32 %v12521_v10, %v4836_v26  ;;  %v5153_v4 = vshll.u32 %v4967_v6, 16  ;;  %v368_v19 = vsel %vm10589_vm4, 0, %v367_v45 }
 0x2f6   : > { %v12806_v41 = vpop.f32.mrf.mxu1  ;;  %v3738_v46 = vpop.f32.mrf.mxu2  ;;  %v5700_v34 = vsel %vm10695_vm13, %v5695_v0, %v5699_v36  ;;  %369 = vst [vmem:[#allocation3 + $0x9c] sm:$0x1] %v368_v19  ;;  %v6348_v44 = vsel %vm11082_vm2, %v10101_v54, %v6347_v2  ;;  %v6349_v24 = vrot.slane %v6347_v2, 4  ;;  %v6350_v8 = vrot.slane %v12603_v60, 5  ;;  %v5432_v2 = vld [vmem:[#allocation3 + $0x78] sm:$0xf] }
 0x2f7   : > { %v12814_v7 = vrot.slane %v5150_v9, 7  ;;  %v4904_v38 = vadd.f32 %v12532_v20, %v4870_v40  ;;  %v4792_v5 = vpop.f32.mrf.mxu0  ;;  %v3785_v15 = vadd.f32 %v3738_v46, %v14890_v29  ;;  %v5866_v58 = vunpack.c.l.b16 %v5700_v34 }
 0x2f8   : > { %v5865_v47 = vunpack.c.l.b16 %v5690_v49  ;;  %v6351_v12 = vsel %vm11082_vm2, %v6349_v24, %v6350_v8  ;;  %v6429_v43 = vunpack.c.l.b16 %v6348_v44  ;;  %v3499_v6 = vadd.f32 %v14892_v11, %v14891_v39  ;;  %v5374_v44 = vld [vmem:[#allocation3 + $0x8c] sm:$0x1] }
 0x2f9   : > { %v5155_v57 = vor.u32 %v5153_v4, %v12814_v7  ;;  %v4936_v1 = vmax.f32 %v4904_v38, 0.0  ;;  %v4439_v31 = vadd.f32 %v12739_v51, %v3785_v15  ;;  %v6430_v56 = vunpack.c.l.b16 %v6351_v12  ;;  %v421_v15 = vld [vmem:[#allocation3 + $0xa4] sm:$0x1]  ;;  %v10462_v12 = vld [vmem:[#allocation3 + $0x3c] sm:$0xff] }
 0x2fa   : > { %v5156_v60 = vrot.slane %v12814_v7, 4  ;;  %v5888_v26 = vpack.c.b16 %v5866_v58, %v5865_v47  ;;  %v12841_v54 = vpop.f32.mrf.mxu3  ;;  %v5702_v4 = vshrl.u32 %v5432_v2, 16  ;;  %v5705_v46 = vshll.u32 %v5432_v2, 16 }
 0x2fb   : > { %v5371_v42 = vsel %vm10630_vm8, %v5155_v57, %v5370_v63  ;;  %v4968_v55 = vpack.c.bf16 %v4936_v1, %v4936_v1  ;;  %v4837_v22 = vadd.f32 %v4790_v59, %v4439_v31  ;;  %v12835_v9 = vld [vmem:[#allocation3 + $0x7c] sm:$0xf]  ;;  %v12839_v40 = vpack.c.b16 %v6430_v56, %v6429_v43  ;;  %v10446_v43 = vld [vmem:[#allocation3 + $0x30] sm:$0xff] }
 0x2fc   : > { %5372 = vst [vmem:[#allocation3 + $0x84] sm:$0xf] %v5371_v42  ;;  %v12837_v59 = vld [vmem:[#allocation3 + $0x80] sm:$0x1]  ;;  %v5711_v49 = vshll.u32 %v12835_v9, 16  ;;  %v5715_v34 = vshrl.u32 %v12835_v9, 16 }
 0x2fd   : > { %v5158_v51 = vshrl.u32 %v4968_v55, 16  ;;  %v5161_v23 = vshll.u32 %v4968_v55, 16  ;;  %v4871_v0 = vmul.f32 %v12521_v10, %v4837_v22  ;;  %v5721_v29 = vshll.u32 %v12837_v59, 16  ;;  %v6262_v56 = vld [vmem:[#allocation3 + $0x54] sm:$0xe] }
 0x2fe   : > { %10116 = vmatmul.msk.bf16.gmra.mxu3 %vm1391_vm10, %v12758_v48  ;;  %v12833_v36 = vpop.f32.mrf.mxu1  ;;  %v3740_v45 = vpop.f32.mrf.mxu2  ;;  %v5704_v63 = vrot.slane %v5702_v4, 4  ;;  %v5707_v58 = vrot.slane %v5705_v46, 5  ;;  %v5713_v24 = vrot.slane %v5711_v49, 5  ;;  %v5717_v8 = vrot.slane %v5715_v34, 4  ;;  %v370_v4 = vld [vmem:[#allocation3 + $0xa8] sm:$0x1] }
 0x2ff   : > { %v5160_v19 = vrot.slane %v5158_v51, 7  ;;  %v4905_v48 = vadd.f32 %v12532_v20, %v4871_v0  ;;  %v12846_v7 = vpop.f32.mrf.mxu0  ;;  %v3786_v38 = vadd.f32 %v3740_v45, %v3499_v6  ;;  %v422_v22 = vsel %vm10649_vm9, 0, %v421_v15 }
 0x300   : > { %v5708_v42 = vor.u32 %v5707_v58, %v5704_v63  ;;  %v5718_v55 = vor.u32 %v5717_v8, %v5713_v24  ;;  %v5723_v51 = vrot.slane %v5721_v29, 5  ;;  %v10102_v46 = vrot.slane %v6262_v56, 9  ;;  %423 = vst [vmem:[#allocation3 + $0xa4] sm:$0x1] %v422_v22  ;;  %v14893_v29 = vld [vmem:[#allocation60_spill] sm:$0xff] }
 0x301   : > { %v5163_v57 = vor.u32 %v5161_v23, %v5160_v19  ;;  %v5165_v1 = vrot.slane %v5160_v19, 4  ;;  %v4937_v31 = vmax.f32 %v4905_v48, 0.0  ;;  %v4440_v47 = vadd.f32 %v12770_v53, %v3786_v38  ;;  %v5377_v63 = vld [vmem:[#allocation3 + $0x90] sm:$0xf] }
 0x302   : > { %10008 = vmatmul.msk.bf16.gmra.mxu1 %vm1391_vm10, %v5888_v26  ;;  %v5709_v53 = vrot.slane %v5708_v42, 4  ;;  %v5719_v26 = vrot.slane %v5718_v55, 4  ;;  %v6354_v23 = vrot.slane %v12639_v30, 5  ;;  %v371_v30 = vsel %vm10589_vm4, 0, %v370_v4 }
 0x303   : > { %v5164_v39 = vsel %vm10620_vm7, %v5156_v60, %v5163_v57  ;;  %v5375_v11 = vsel %vm10589_vm4, %v5165_v1, %v5374_v44  ;;  %v4969_v6 = vpack.c.bf16 %v4937_v31, %v4937_v31  ;;  %v4838_v2 = vadd.f32 %v4792_v5, %v4440_v47  ;;  %10083 = vmatmul.msk.bf16.gmra.mxu2 %vm1391_vm10, %v10446_v43 }
 0x304   : > { %10197 = vmatmul.msk.bf16.gmra.mxu0 %vm1391_vm10, %v10462_v12  ;;  %5373 = vst.msk [vmem:[#allocation3 + $0x88] sm:$0xf] %vm199_vm1, %v5164_v39  ;;  %v5714_v34 = vsel %vm10695_vm13, %v5709_v53, %v5713_v24  ;;  %v5724_v19 = vsel %vm10695_vm13, %v5719_v26, %v5723_v51  ;;  %v6355_v44 = vsel %vm11082_vm2, %v10102_v46, %v6354_v23  ;;  %v12878_v24 = vpop.f32.mrf.mxu3  ;;  %v6356_v8 = vrot.slane %v6354_v23, 4  ;;  %v12896_v23 = vld [vmem:[%s14739_s3] ss:$0 sm:$0xff] }
 0x305   : > { %5376 = vst [vmem:[#allocation3 + $0x8c] sm:$0x1] %v5375_v11  ;;  %v5167_v0 = vshrl.u32 %v4969_v6, 16  ;;  %v4872_v60 = vmul.f32 %v12521_v10, %v4838_v2  ;;  %v5170_v5 = vshll.u32 %v4969_v6, 16  ;;  %v5868_v58 = vunpack.c.l.b16 %v5724_v19  ;;  %v14895_v11 = vld [vmem:[#allocation25_spill] sm:$0xff] }
 0x306   : > { %v12862_v45 = vpop.f32.mrf.mxu1  ;;  %v3743_v49 = vpop.f32.mrf.mxu2  ;;  %372 = vst [vmem:[#allocation3 + $0xa8] sm:$0x1] %v371_v30  ;;  %v6357_v57 = vrot.slane %v12650_v52, 5  ;;  %v5867_v12 = vunpack.c.l.b16 %v5714_v34  ;;  %v6431_v42 = vunpack.c.l.b16 %v6355_v44  ;;  %v14894_v52 = vld [vmem:[#allocation26_spill] sm:$0xff]  ;;  %v424_v44 = vld [vmem:[#allocation3 + $0xb0] sm:$0x1] }
 0x307   : > { %v12870_v48 = vrot.slane %v5167_v0, 7  ;;  %v4906_v10 = vadd.f32 %v12532_v20, %v4872_v60  ;;  %v12873_v38 = vpop.f32.mrf.mxu0  ;;  %v3787_v15 = vadd.f32 %v3743_v49, %v14893_v29  ;;  %v3501_v6 = vadd.f32 %v14895_v11, %v14894_v52  ;;  %v6263_v11 = vld [vmem:[#allocation3 + $0x60] sm:$0xe] }
 0x308   : > { %v6358_v43 = vsel %vm11082_vm2, %v6356_v8, %v6357_v57  ;;  %v5889_v2 = vpack.c.b16 %v5868_v58, %v5867_v12  ;;  %v425_v52 = vsel %vm10649_vm9, 0, %v424_v44 }
 0x309   : > { %v5172_v1 = vor.u32 %v5170_v5, %v12870_v48  ;;  %v4938_v31 = vmax.f32 %v4906_v10, 0.0  ;;  %v4441_v20 = vadd.f32 %v12801_v62, %v3787_v15  ;;  %v5173_v47 = vrot.slane %v12870_v48, 4  ;;  %v5434_v62 = vld [vmem:[#allocation3 + $0x84] sm:$0xf]  ;;  %v12912_v48 = vld [vmem:[%s14739_s3 + $0x1] ss:$0 sm:$0xff] }
 0x30a   : > { %v6432_v39 = vunpack.c.l.b16 %v6358_v43  ;;  %v5726_v5 = vshrl.u32 %v5434_v62, 16  ;;  %v5729_v49 = vshll.u32 %v5434_v62, 16  ;;  %426 = vst [vmem:[#allocation3 + $0xb0] sm:$0x1] %v425_v52 }
 0x30b   : > { %v5378_v55 = vsel %vm10630_vm8, %v5172_v1, %v5377_v63  ;;  %v4970_v22 = vpack.c.bf16 %v4938_v31, %v4938_v31  ;;  %v4839_v56 = vadd.f32 %v12846_v7, %v4441_v20  ;;  %v12891_v53 = vld [vmem:[#allocation3 + $0x88] sm:$0xf]  ;;  %v5381_v63 = vld [vmem:[#allocation3 + $0x98] sm:$0x1] }
 0x30c   : > { %5379 = vst [vmem:[#allocation3 + $0x90] sm:$0xf] %v5378_v55  ;;  %v12901_v7 = vld [vmem:[#allocation3 + $0x8c] sm:$0x1]  ;;  %v12903_v60 = vpack.c.b16 %v6432_v39, %v6431_v42  ;;  %v5735_v34 = vshll.u32 %v12891_v53, 16  ;;  %v5739_v19 = vshrl.u32 %v12891_v53, 16  ;;  %v12920_v55 = vpop.f32.mrf.mxu3 }
 0x30d   : > { %v5175_v26 = vshrl.u32 %v4970_v22, 16  ;;  %v5178_v51 = vshll.u32 %v4970_v22, 16  ;;  %v4873_v0 = vmul.f32 %v12896_v23, %v4839_v56  ;;  %v5745_v15 = vshll.u32 %v12901_v7, 16  ;;  %v10463_v42 = vld [vmem:[#allocation3 + $0x48] sm:$0xff]  ;;  %v10447_v22 = vld [vmem:[#allocation3 + $0x3c] sm:$0xff] }
 0x30e   : > { %10117 = vmatmul.msk.bf16.gmra.mxu3 %vm1391_vm10, %v12803_v61  ;;  %v3745_v4 = vpop.f32.mrf.mxu2  ;;  %v12905_v46 = vpop.f32.mrf.mxu1  ;;  %v5728_v58 = vrot.slane %v5726_v5, 4  ;;  %v5731_v8 = vrot.slane %v5729_v49, 5  ;;  %v5737_v57 = vrot.slane %v5735_v34, 5  ;;  %v5741_v1 = vrot.slane %v5739_v19, 4  ;;  %v373_v49 = vld [vmem:[#allocation3 + $0xb4] sm:$0x1] }
 0x30f   : > { %v5177_v30 = vrot.slane %v5175_v26, 7  ;;  %v4907_v61 = vadd.f32 %v12912_v48, %v4873_v0  ;;  %v12915_v10 = vpop.f32.mrf.mxu0  ;;  %v3788_v29 = vadd.f32 %v3745_v4, %v3501_v6  ;;  %v5747_v0 = vrot.slane %v5745_v15, 5 }
 0x310   : > { %v5732_v56 = vor.u32 %v5731_v8, %v5728_v58  ;;  %v5742_v39 = vor.u32 %v5741_v1, %v5737_v57  ;;  %v6361_v4 = vrot.slane %v12703_v25, 5  ;;  %v10103_v34 = vrot.slane %v6263_v11, 9 }
 0x311   : > { %v5180_v31 = vor.u32 %v5178_v51, %v5177_v30  ;;  %v5182_v20 = vrot.slane %v5177_v30, 4  ;;  %v4939_v12 = vmax.f32 %v4907_v61, 0.0  ;;  %v4442_v43 = vadd.f32 %v12841_v54, %v3788_v29 }
 0x312   : > { %10009 = vmatmul.msk.bf16.gmra.mxu1 %vm1391_vm10, %v5889_v2  ;;  %v5733_v2 = vrot.slane %v5732_v56, 4  ;;  %v5743_v51 = vrot.slane %v5742_v39, 4  ;;  %v374_v29 = vsel %vm10589_vm4, 0, %v373_v49  ;;  %v6362_v8 = vsel %vm11082_vm2, %v10103_v34, %v6361_v4 }
 0x313   : > { %v5181_v6 = vsel %vm10620_vm7, %v5173_v47, %v5180_v31  ;;  %v5382_v62 = vsel %vm10589_vm4, %v5182_v20, %v5381_v63  ;;  %v4971_v26 = vpack.c.bf16 %v4939_v12, %v4939_v12  ;;  %v4840_v54 = vadd.f32 %v12873_v38, %v4442_v43  ;;  %10084 = vmatmul.msk.bf16.gmra.mxu2 %vm1391_vm10, %v10447_v22  ;;  %v14896_v63 = vld [vmem:[#allocation61_spill] sm:$0xff] }
 0x314   : > { %10198 = vmatmul.msk.bf16.gmra.mxu0 %vm1391_vm10, %v10463_v42  ;;  %5380 = vst.msk [vmem:[#allocation3 + $0x94] sm:$0xf] %vm199_vm1, %v5181_v6  ;;  %v5738_v38 = vsel %vm10695_vm13, %v5733_v2, %v5737_v57  ;;  %v5748_v61 = vsel %vm10695_vm13, %v5743_v51, %v5747_v0  ;;  %v5384_v57 = vld [vmem:[#allocation3 + $0x9c] sm:$0xf]  ;;  %v6363_v20 = vrot.slane %v6361_v4, 4  ;;  %v6364_v12 = vrot.slane %v12717_v18, 5 }
 0x315   : > { %5383 = vst [vmem:[#allocation3 + $0x98] sm:$0x1] %v5382_v62  ;;  %v5184_v5 = vshrl.u32 %v4971_v26, 16  ;;  %v4874_v47 = vmul.f32 %v12896_v23, %v4840_v54  ;;  %v5187_v19 = vshll.u32 %v4971_v26, 16  ;;  %v5870_v31 = vunpack.c.l.b16 %v5748_v61  ;;  %v14897_v18 = vld [vmem:[#allocation32_spill] sm:$0xff]  ;;  %v14898_v2 = vld [vmem:[#allocation29_spill] sm:$0xff] }
 0x316   : > { %v3748_v30 = vpop.f32.mrf.mxu2  ;;  %375 = vst [vmem:[#allocation3 + $0xb4] sm:$0x1] %v374_v29  ;;  %v5869_v39 = vunpack.c.l.b16 %v5738_v38  ;;  %v6365_v52 = vsel %vm11082_vm2, %v6363_v20, %v6364_v12  ;;  %v6433_v11 = vunpack.c.l.b16 %v6362_v8  ;;  %v3503_v51 = vadd.f32 %v14898_v2, %v14897_v18  ;;  %v5436_v4 = vld [vmem:[#allocation3 + $0x90] sm:$0xf] }
 0x317   : > { %v12940_v15 = vrot.slane %v5184_v5, 7  ;;  %v4908_v25 = vadd.f32 %v12912_v48, %v4874_v47  ;;  %v12943_v44 = vpop.f32.mrf.mxu0  ;;  %v3789_v58 = vadd.f32 %v3748_v30, %v14896_v63  ;;  %v6434_v54 = vunpack.c.l.b16 %v6365_v52 }
 0x318   : > { %v5890_v0 = vpack.c.b16 %v5870_v31, %v5869_v39  ;;  %v5750_v38 = vshrl.u32 %v5436_v4, 16  ;;  %v5753_v61 = vshll.u32 %v5436_v4, 16  ;;  %v5388_v31 = vld [vmem:[#allocation3 + $0xa4] sm:$0x1] }
 0x319   : > { %v12948_v1 = vpop.f32.mrf.mxu1  ;;  %v5189_v43 = vor.u32 %v5187_v19, %v12940_v15  ;;  %v4940_v42 = vmax.f32 %v4908_v25, 0.0  ;;  %v4443_v22 = vadd.f32 %v12878_v24, %v3789_v58  ;;  %v5190_v56 = vrot.slane %v12940_v15, 4  ;;  %v12961_v24 = vpop.f32.mrf.mxu3 }
 0x31a   : > { %v5752_v20 = vrot.slane %v5750_v38, 4  ;;  %v5755_v12 = vrot.slane %v5753_v61, 5  ;;  %v6368_v38 = vrot.slane %v12780_v50, 5 }
 0x31b   : > { %v5385_v6 = vsel %vm10630_vm8, %v5189_v43, %v5384_v57  ;;  %v4972_v62 = vpack.c.bf16 %v4940_v42, %v4940_v42  ;;  %v4841_v26 = vadd.f32 %v12915_v10, %v4443_v22  ;;  %v12963_v5 = vld [vmem:[#allocation3 + $0x94] sm:$0xf]  ;;  %v12970_v10 = vpack.c.b16 %v6434_v54, %v6433_v11 }
 0x31c   : > { %5386 = vst [vmem:[#allocation3 + $0x9c] sm:$0xf] %v5385_v6  ;;  %v12968_v19 = vld [vmem:[#allocation3 + $0x98] sm:$0x1]  ;;  %v5759_v29 = vshll.u32 %v12963_v5, 16  ;;  %v5763_v15 = vshrl.u32 %v12963_v5, 16  ;;  %v5756_v54 = vor.u32 %v5755_v12, %v5752_v20 }
 0x31d   : > { %v5192_v47 = vshrl.u32 %v4972_v62, 16  ;;  %v5195_v49 = vshll.u32 %v4972_v62, 16  ;;  %v4875_v34 = vmul.f32 %v12896_v23, %v4841_v26  ;;  %v5769_v57 = vshll.u32 %v12968_v19, 16  ;;  %v10464_v62 = vld [vmem:[#allocation3 + $0x54] sm:$0xff]  ;;  %v10448_v26 = vld [vmem:[#allocation3 + $0x48] sm:$0xff]  ;;  %v14899_v12 = vld [vmem:[#allocation33_spill] sm:$0xff] }
 0x31e   : > { %10118 = vmatmul.msk.bf16.gmra.mxu3 %vm1391_vm10, %v12839_v40  ;;  %v3750_v30 = vpop.f32.mrf.mxu2  ;;  %v427_v40 = vld [vmem:[#allocation3 + $0xbc] sm:$0x1]  ;;  %v5761_v43 = vrot.slane %v5759_v29, 5  ;;  %v5765_v42 = vrot.slane %v5763_v15, 4  ;;  %v376_v29 = vld [vmem:[#allocation3 + $0xc0] sm:$0x1] }
 0x31f   : > { %v5194_v25 = vrot.slane %v5192_v47, 7  ;;  %v4909_v63 = vadd.f32 %v12912_v48, %v4875_v34  ;;  %v12975_v58 = vpop.f32.mrf.mxu0  ;;  %v3790_v8 = vadd.f32 %v3750_v30, %v3503_v51  ;;  %v428_v2 = vsel %vm10649_vm9, 0, %v427_v40  ;;  %v6264_v51 = vld [vmem:[#allocation3 + $0x6c] sm:$0xe] }
 0x320   : > { %v5766_v18 = vor.u32 %v5765_v42, %v5761_v43  ;;  %v5771_v30 = vrot.slane %v5769_v57, 5  ;;  %v10104_v15 = vrot.slane %v6264_v51, 9  ;;  %429 = vst [vmem:[#allocation3 + $0xbc] sm:$0x1] %v428_v2  ;;  %v377_v57 = vsel %vm10589_vm4, 0, %v376_v29 }
 0x321   : > { %v5197_v22 = vor.u32 %v5195_v49, %v5194_v25  ;;  %v5199_v39 = vrot.slane %v5194_v25, 4  ;;  %v4941_v52 = vmax.f32 %v4909_v63, 0.0  ;;  %v4444_v11 = vadd.f32 %v12920_v55, %v3790_v8  ;;  %v12979_v6 = vpop.f32.mrf.mxu1  ;;  %v4409_v63 = vpop.f32.mrf.mxu3  ;;  %378 = vst [vmem:[#allocation3 + $0xc0] sm:$0x1] %v377_v57 }
 0x322   : > { %10010 = vmatmul.msk.bf16.gmra.mxu1 %vm1391_vm10, %v5890_v0  ;;  %v5757_v0 = vrot.slane %v5756_v54, 4  ;;  %v5767_v34 = vrot.slane %v5766_v18, 4 }
 0x323   : > { %v5198_v4 = vsel %vm10620_vm7, %v5190_v56, %v5197_v22  ;;  %v5389_v47 = vsel %vm10589_vm4, %v5199_v39, %v5388_v31  ;;  %v4973_v49 = vpack.c.bf16 %v4941_v52, %v4941_v52  ;;  %v4842_v55 = vadd.f32 %v12943_v44, %v4444_v11  ;;  %10085 = vmatmul.msk.bf16.gmra.mxu2 %vm1391_vm10, %v10448_v26  ;;  %v5391_v39 = vld [vmem:[#allocation3 + $0xa8] sm:$0xf] }
 0x324   : > { %10199 = vmatmul.msk.bf16.gmra.mxu0 %vm1391_vm10, %v10464_v62  ;;  %5387 = vst.msk [vmem:[#allocation3 + $0xa0] sm:$0xf] %vm199_vm1, %v5198_v4  ;;  %v5762_v8 = vsel %vm10695_vm13, %v5757_v0, %v5761_v43  ;;  %v5772_v40 = vsel %vm10695_vm13, %v5767_v34, %v5771_v30  ;;  %v6369_v22 = vsel %vm11082_vm2, %v10104_v15, %v6368_v38  ;;  %v6370_v43 = vrot.slane %v6368_v38, 4  ;;  %v14901_v30 = vld [vmem:[#allocation36_spill] sm:$0xff] }
 0x325   : > { %5390 = vst [vmem:[#allocation3 + $0xa4] sm:$0x1] %v5389_v47  ;;  %v5201_v61 = vshrl.u32 %v4973_v49, 16  ;;  %v4876_v56 = vmul.f32 %v12896_v23, %v4842_v55  ;;  %v5204_v25 = vshll.u32 %v4973_v49, 16  ;;  %v5872_v52 = vunpack.c.l.b16 %v5772_v40 }
 0x326   : > { %v3753_v44 = vpop.f32.mrf.mxu2  ;;  %v6371_v11 = vrot.slane %v12782_v27, 5  ;;  %v5871_v2 = vunpack.c.l.b16 %v5762_v8  ;;  %v6435_v4 = vunpack.c.l.b16 %v6369_v22  ;;  %v14900_v27 = vld [vmem:[#allocation62_spill] sm:$0xff] }
 0x327   : > { %v5203_v50 = vrot.slane %v5201_v61, 7  ;;  %v4910_v31 = vadd.f32 %v12912_v48, %v4876_v56  ;;  %v4807_v20 = vpop.f32.mrf.mxu0  ;;  %v3791_v42 = vadd.f32 %v3753_v44, %v14899_v12  ;;  %v3505_v38 = vadd.f32 %v14901_v30, %v14900_v27  ;;  %v5438_v61 = vld [vmem:[#allocation3 + $0x9c] sm:$0xf] }
 0x328   : > { %v6372_v51 = vsel %vm11082_vm2, %v6370_v43, %v6371_v11  ;;  %v5774_v40 = vshrl.u32 %v5438_v61, 16  ;;  %v5777_v57 = vshll.u32 %v5438_v61, 16  ;;  %v5395_v43 = vld [vmem:[#allocation3 + $0xb0] sm:$0x1] }
 0x329   : > { %v5206_v62 = vor.u32 %v5204_v25, %v5203_v50  ;;  %v4942_v26 = vmax.f32 %v4910_v31, 0.0  ;;  %v4445_v54 = vadd.f32 %v12961_v24, %v3791_v42  ;;  %v5207_v18 = vrot.slane %v5203_v50, 4 }
 0x32a   : > { %v6436_v34 = vunpack.c.l.b16 %v6372_v51  ;;  %v5891_v24 = vpack.c.b16 %v5872_v52, %v5871_v2  ;;  %v430_v52 = vld [vmem:[#allocation3 + $0xc8] sm:$0x1] }
 0x32b   : > { %v5392_v47 = vsel %vm10630_vm8, %v5206_v62, %v5391_v39  ;;  %v4974_v49 = vpack.c.bf16 %v4942_v26, %v4942_v26  ;;  %v4843_v55 = vadd.f32 %v12975_v58, %v4445_v54  ;;  %v13015_v56 = vld [vmem:[#allocation3 + $0xa0] sm:$0xf]  ;;  %v5776_v62 = vrot.slane %v5774_v40, 4 }
 0x32c   : > { %v13011_v0 = vpop.f32.mrf.mxu1  ;;  %5393 = vst [vmem:[#allocation3 + $0xa8] sm:$0xf] %v5392_v47  ;;  %v13020_v44 = vld [vmem:[#allocation3 + $0xa4] sm:$0x1]  ;;  %v13022_v58 = vpack.c.b16 %v6436_v34, %v6435_v4  ;;  %v5783_v50 = vshll.u32 %v13015_v56, 16  ;;  %v5787_v31 = vshrl.u32 %v13015_v56, 16 }
 0x32d   : > { %v5209_v29 = vshrl.u32 %v4974_v49, 16  ;;  %v5212_v15 = vshll.u32 %v4974_v49, 16  ;;  %v4877_v25 = vmul.f32 %v12896_v23, %v4843_v55  ;;  %v5793_v39 = vshll.u32 %v13020_v44, 16  ;;  %v10465_v55 = vld [vmem:[#allocation3 + $0x60] sm:$0xff]  ;;  %v10449_v34 = vld [vmem:[#allocation3 + $0x54] sm:$0xff] }
 0x32e   : > { %10119 = vmatmul.msk.bf16.gmra.mxu3 %vm1391_vm10, %v12903_v60  ;;  %v3755_v8 = vpop.f32.mrf.mxu2  ;;  %v5779_v26 = vrot.slane %v5777_v57, 5  ;;  %v5785_v54 = vrot.slane %v5783_v50, 5  ;;  %v5789_v2 = vrot.slane %v5787_v31, 4 }
 0x32f   : > { %v5211_v12 = vrot.slane %v5209_v29, 7  ;;  %v4911_v42 = vadd.f32 %v12912_v48, %v4877_v25  ;;  %v3792_v22 = vadd.f32 %v3755_v8, %v3505_v38  ;;  %v431_v38 = vsel %vm10649_vm9, 0, %v430_v52  ;;  %v6265_v8 = vld [vmem:[#allocation3 + $0x78] sm:$0xe] }
 0x330   : > { %v5780_v27 = vor.u32 %v5779_v26, %v5776_v62  ;;  %v5790_v30 = vor.u32 %v5789_v2, %v5785_v54  ;;  %432 = vst [vmem:[#allocation3 + $0xc8] sm:$0x1] %v431_v38  ;;  %v5398_v26 = vld [vmem:[#allocation3 + $0xb4] sm:$0xf] }
 0x331   : > { %v4412_v60 = vpop.f32.mrf.mxu3  ;;  %v4810_v11 = vpop.f32.mrf.mxu0  ;;  %v5214_v51 = vor.u32 %v5212_v15, %v5211_v12  ;;  %v5216_v4 = vrot.slane %v5211_v12, 4  ;;  %v4943_v47 = vmax.f32 %v4911_v42, 0.0  ;;  %v4446_v49 = vadd.f32 %v4409_v63, %v3792_v22 }
 0x332   : > { %10011 = vmatmul.msk.bf16.gmra.mxu1 %vm1391_vm10, %v5891_v24  ;;  %v5791_v63 = vrot.slane %v5790_v30, 4  ;;  %v5795_v24 = vrot.slane %v5793_v39, 5  ;;  %v6375_v22 = vrot.slane %v12835_v9, 5  ;;  %v3507_v30 = vadd.f32 %v12695_v21, %v12098_v16 }
 0x333   : > { %v5215_v61 = vsel %vm10620_vm7, %v5207_v18, %v5214_v51  ;;  %v5396_v29 = vsel %vm10589_vm4, %v5216_v4, %v5395_v43  ;;  %v4975_v25 = vpack.c.bf16 %v4943_v47, %v4943_v47  ;;  %v4844_v15 = vadd.f32 %v4807_v20, %v4446_v49  ;;  %10086 = vmatmul.msk.bf16.gmra.mxu2 %vm1391_vm10, %v10449_v34  ;;  %v5440_v31 = vld [vmem:[#allocation3 + $0xa8] sm:$0xf] }
 0x334   : > { %10200 = vmatmul.msk.bf16.gmra.mxu0 %vm1391_vm10, %v10465_v55  ;;  %5394 = vst.msk [vmem:[#allocation3 + $0xac] sm:$0xf] %vm199_vm1, %v5215_v61  ;;  %v13039_v50 = vpop.f32.mrf.mxu1  ;;  %v5781_v18 = vrot.slane %v5780_v27, 4  ;;  %v5796_v20 = vsel %vm10695_vm13, %v5791_v63, %v5795_v24  ;;  %v5798_v4 = vshrl.u32 %v5440_v31, 16  ;;  %v5801_v47 = vshll.u32 %v5440_v31, 16 }
 0x335   : > { %5397 = vst [vmem:[#allocation3 + $0xb0] sm:$0x1] %v5396_v29  ;;  %v5218_v40 = vshrl.u32 %v4975_v25, 16  ;;  %v4878_v57 = vmul.f32 %v12896_v23, %v4844_v15  ;;  %v5221_v12 = vshll.u32 %v4975_v25, 16  ;;  %v10105_v49 = vrot.slane %v6265_v8, 9 }
 0x336   : > { %v3758_v42 = vpop.f32.mrf.mxu2  ;;  %v5786_v62 = vsel %vm10695_vm13, %v5781_v18, %v5785_v54  ;;  %v5874_v9 = vunpack.c.l.b16 %v5796_v20  ;;  %v6377_v61 = vrot.slane %v6375_v22, 4  ;;  %v5803_v24 = vrot.slane %v5801_v47, 5 }
 0x337   : > { %v13044_v52 = vrot.slane %v5218_v40, 7  ;;  %v4912_v39 = vadd.f32 %v12912_v48, %v4878_v57  ;;  %v3793_v43 = vadd.f32 %v3758_v42, %v12080_v35  ;;  %v5873_v38 = vunpack.c.l.b16 %v5786_v62 }
 0x338   : > { %v6378_v35 = vrot.slane %v12837_v59, 5  ;;  %v6376_v63 = vsel %vm11082_vm2, %v10105_v49, %v6375_v22 }
 0x339   : > { %v4414_v2 = vpop.f32.mrf.mxu3  ;;  %v4812_v51 = vpop.f32.mrf.mxu0  ;;  %v5223_v55 = vor.u32 %v5221_v12, %v13044_v52  ;;  %v4944_v34 = vmax.f32 %v4912_v39, 0.0  ;;  %v4447_v27 = vadd.f32 %v4412_v60, %v3793_v43  ;;  %v5800_v60 = vrot.slane %v5798_v4, 4  ;;  %v5402_v4 = vld [vmem:[#allocation3 + $0xbc] sm:$0x1] }
 0x33a   : > { %v6379_v16 = vsel %vm11082_vm2, %v6377_v61, %v6378_v35  ;;  %v6437_v42 = vunpack.c.l.b16 %v6376_v63  ;;  %v6382_v63 = vrot.slane %v12891_v53, 5 }
 0x33b   : > { %v5399_v54 = vsel %vm10630_vm8, %v5223_v55, %v5398_v26  ;;  %v4976_v29 = vpack.c.bf16 %v4944_v34, %v4944_v34  ;;  %v4845_v25 = vadd.f32 %v4810_v11, %v4447_v27  ;;  %v13056_v15 = vld [vmem:[#allocation3 + $0xac] sm:$0xf]  ;;  %v5892_v11 = vpack.c.b16 %v5874_v9, %v5873_v38 }
 0x33c   : > { %5400 = vst [vmem:[#allocation3 + $0xb4] sm:$0xf] %v5399_v54  ;;  %v5807_v8 = vshll.u32 %v13056_v15, 16  ;;  %v13066_v40 = vld [vmem:[#allocation3 + $0xb0] sm:$0x1]  ;;  %v5811_v57 = vshrl.u32 %v13056_v15, 16  ;;  %v6438_v20 = vunpack.c.l.b16 %v6379_v16  ;;  %v5804_v55 = vor.u32 %v5803_v24, %v5800_v60 }
 0x33d   : > { %v5226_v21 = vshrl.u32 %v4976_v29, 16  ;;  %v4879_v59 = vmul.f32 %v12896_v23, %v4845_v25  ;;  %v5229_v18 = vshll.u32 %v4976_v29, 16  ;;  %v5817_v34 = vshll.u32 %v13066_v40, 16  ;;  %v10466_v54 = vld [vmem:[#allocation3 + $0x6c] sm:$0xff]  ;;  %v6266_v29 = vld [vmem:[#allocation3 + $0x84] sm:$0xe] }
 0x33e   : > { %10120 = vmatmul.msk.bf16.gmra.mxu3 %vm1391_vm10, %v12970_v10  ;;  %v3760_v31 = vpop.f32.mrf.mxu2  ;;  %v13069_v12 = vrot.slane %v5807_v8, 5  ;;  %v5813_v26 = vrot.slane %v5811_v57, 4  ;;  %v5224_v10 = vrot.slane %v13044_v52, 4  ;;  %v13078_v27 = vpack.c.b16 %v6438_v20, %v6437_v42  ;;  %v10242_v25 = vld [vmem:[%s14738_s2 + $0xa] sm:$0x3] }
 0x33f   : > { %v5228_v22 = vrot.slane %v5226_v21, 7  ;;  %v4913_v39 = vadd.f32 %v12912_v48, %v4879_v59  ;;  %v13072_v43 = vpop.f32.mrf.mxu1  ;;  %v3794_v62 = vadd.f32 %v3760_v31, %v3507_v30  ;;  %v10450_v30 = vld [vmem:[#allocation3 + $0x60] sm:$0xff]  ;;  %v7852_v21 = vsel %vm1440_vm0, %v10242_v25, 0 }
 0x340   : > { %v5814_v52 = vor.u32 %v5813_v26, %v13069_v12  ;;  %v10106_v59 = vrot.slane %v6266_v29, 9  ;;  %v5805_v57 = vrot.slane %v5804_v55, 4  ;;  %7861 = vmatpush.bf16.msra.mxu2 %v7852_v21  ;;  %v10259_v55 = vld [vmem:[%s14738_s2 + $0xc] sm:$0x3] }
 0x341   : > { %v6525_v47 = vpop.f32.mrf.mxu3  ;;  %v13075_v49 = vpop.f32.mrf.mxu0  ;;  %v5231_v9 = vor.u32 %v5229_v18, %v5228_v22  ;;  %v5233_v38 = vrot.slane %v5228_v22, 4  ;;  %v4945_v61 = vmax.f32 %v4913_v39, 0.0  ;;  %v4448_v35 = vadd.f32 %v4414_v2, %v3794_v62 }
 0x342   : > { %10012 = vmatmul.msk.bf16.gmra.mxu1 %vm1391_vm10, %v5892_v11  ;;  %v5815_v16 = vrot.slane %v5814_v52, 4  ;;  %v5819_v18 = vrot.slane %v5817_v34, 5  ;;  %v6383_v20 = vsel %vm11082_vm2, %v10106_v59, %v6382_v63  ;;  %v6384_v22 = vrot.slane %v6382_v63, 4  ;;  %v5405_v34 = vld [vmem:[#allocation3 + $0xc0] sm:$0xf] }
 0x343   : > { %v5232_v60 = vsel %vm10620_vm7, %v5224_v10, %v5231_v9  ;;  %v5403_v24 = vsel %vm10589_vm4, %v5233_v38, %v5402_v4  ;;  %v4977_v2 = vpack.c.bf16 %v4945_v61, %v4945_v61  ;;  %v4846_v8 = vadd.f32 %v4812_v51, %v4448_v35  ;;  %10087 = vmatmul.msk.bf16.gmra.mxu2 %vm1391_vm10, %v10450_v30  ;;  %v5442_v51 = vld [vmem:[#allocation3 + $0xb4] sm:$0xf] }
 0x344   : > { %10201 = vmatmul.msk.bf16.gmra.mxu0 %vm1391_vm10, %v10466_v54  ;;  %5401 = vst.msk [vmem:[#allocation3 + $0xb8] sm:$0xf] %vm199_vm1, %v5232_v60  ;;  %v6385_v39 = vrot.slane %v12901_v7, 5  ;;  %v5810_v7 = vsel %vm10695_vm13, %v5805_v57, %v13069_v12  ;;  %v5822_v29 = vshrl.u32 %v5442_v51, 16  ;;  %v5825_v52 = vshll.u32 %v5442_v51, 16 }
 0x345   : > { %5404 = vst [vmem:[#allocation3 + $0xbc] sm:$0x1] %v5403_v24  ;;  %v5235_v53 = vshrl.u32 %v4977_v2, 16  ;;  %v4880_v11 = vmul.f32 %v12896_v23, %v4846_v8  ;;  %v5238_v31 = vshll.u32 %v4977_v2, 16  ;;  %v5820_v23 = vsel %vm10695_vm13, %v5815_v16, %v5819_v18 }
 0x346   : > { %v6175_v42 = vpop.f32.mrf.mxu2  ;;  %v5876_v30 = vunpack.c.l.b16 %v5820_v23  ;;  %v6439_v25 = vunpack.c.l.b16 %v6383_v20  ;;  %v5875_v2 = vunpack.c.l.b16 %v5810_v7  ;;  %v5824_v59 = vrot.slane %v5822_v29, 4 }
 0x347   : > { %v5237_v62 = vrot.slane %v5235_v53, 7  ;;  %v4914_v26 = vadd.f32 %v12912_v48, %v4880_v11  ;;  %v13099_v10 = vpop.f32.mrf.mxu1  ;;  %v6176_v4 = vadd.f32 %v6175_v42, %v12731_v32  ;;  %v8139_v48 = vsel %vm1440_vm0, %v10259_v55, 0 }
 0x348   : > { %v6386_v32 = vsel %vm11082_vm2, %v6384_v22, %v6385_v39  ;;  %8148 = vmatpush.bf16.msra.mxu3 %v8139_v48  ;;  %v5893_v53 = vpack.c.b16 %v5876_v30, %v5875_v2  ;;  %v5827_v57 = vrot.slane %v5825_v52, 5  ;;  %v10340_v39 = vld [vmem:[%s14738_s2 + $0xe] sm:$0x3] }
 0x349   : > { %v6527_v9 = vpop.f32.mrf.mxu3  ;;  %v13107_v38 = vpop.f32.mrf.mxu0  ;;  %v5240_v61 = vor.u32 %v5238_v31, %v5237_v62  ;;  %v4946_v35 = vmax.f32 %v4914_v26, 0.0  ;;  %v13115_v54 = vadd.f32 %v6525_v47, %v6176_v4  ;;  %v6440_v63 = vunpack.c.l.b16 %v6386_v32 }
 0x34a   : > { %v5241_v26 = vrot.slane %v5237_v62, 4  ;;  %v5828_v29 = vor.u32 %v5827_v57, %v5824_v59  ;;  %v10373_v62 = vld [vmem:[%s14738_s2 + $0x10] sm:$0x3]  ;;  %v6923_v57 = vld [vmem:[#allocation3 + $0xc] sm:$0xf] }
 0x34b   : > { %v5406_v60 = vsel %vm10630_vm8, %v5240_v61, %v5405_v34  ;;  %v4978_v24 = vpack.c.bf16 %v4946_v35, %v4946_v35  ;;  %v13119_v12 = vld [vmem:[#allocation3 + $0xb8] sm:$0xf]  ;;  %v13123_v47 = vpack.c.b16 %v6440_v63, %v6439_v25  ;;  %v8793_v34 = vsel %vm1440_vm0, %v10340_v39, 0 }
 0x34c   : > { %5407 = vst [vmem:[#allocation3 + $0xc0] sm:$0xf] %v5406_v60  ;;  %v5831_v8 = vshll.u32 %v13119_v12, 16  ;;  %v5835_v16 = vshrl.u32 %v13119_v12, 16  ;;  %v13127_v17 = vld [vmem:[#allocation3 + $0xbc] sm:$0x1]  ;;  %8802 = vmatpush.bf16.msra.mxu0 %v8793_v34 }
 0x34d   : > { %v5243_v21 = vshrl.u32 %v4978_v24, 16  ;;  %v5246_v51 = vshll.u32 %v4978_v24, 16  ;;  %v10467_v61 = vld [vmem:[#allocation3 + $0x78] sm:$0xff]  ;;  %v5841_v35 = vshll.u32 %v13127_v17, 16  ;;  %v9191_v25 = vsel %vm1440_vm0, %v10373_v62, 0  ;;  %v10468_v62 = vld [vmem:[#allocation3 + $0x84] sm:$0xff] }
 0x34e   : > { %10121 = vmatmul.msk.bf16.gmra.mxu3 %vm1391_vm10, %v13022_v58  ;;  %v6177_v11 = vpop.f32.mrf.mxu2  ;;  %v5833_v18 = vrot.slane %v5831_v8, 5  ;;  %v5837_v31 = vrot.slane %v5835_v16, 4  ;;  %v5409_v58 = vld [vmem:[#allocation3 + $0xc8] sm:$0x1]  ;;  %9200 = vmatpush.bf16.msra.mxu1 %v9191_v25  ;;  %v13153_v24 = vld [vmem:[#allocation3 + $0x10] sm:$0xf] }
 0x34f   : > { %v5245_v42 = vrot.slane %v5243_v21, 7  ;;  %v13129_v20 = vpop.f32.mrf.mxu1  ;;  %v6178_v22 = vadd.f32 %v6177_v11, %v12777_v33  ;;  %v10451_v33 = vld [vmem:[#allocation3 + $0x6c] sm:$0xff]  ;;  %v5843_v63 = vrot.slane %v5841_v35, 5  ;;  %v5829_v8 = vrot.slane %v5828_v29, 4 }
 0x350   : > { %v5838_v55 = vor.u32 %v5837_v31, %v5833_v18  ;;  %v6981_v31 = vshll.u32 %v13153_v24, 16  ;;  %v6975_v39 = vshll.u32 %v6923_v57, 16 }
 0x351   : > { %v6530_v4 = vpop.f32.mrf.mxu3  ;;  %v13135_v23 = vpop.f32.mrf.mxu0  ;;  %v5248_v7 = vor.u32 %v5246_v51, %v5245_v42  ;;  %v5250_v48 = vrot.slane %v5245_v42, 4  ;;  %v13138_v32 = vadd.f32 %v6527_v9, %v6178_v22  ;;  %v5834_v11 = vsel %vm10695_vm13, %v5829_v8, %v5833_v18 }
 0x352   : > { %14902 = vst [vmem:[#allocation37_spill] sm:$0xff] %v13135_v23  ;;  %10013 = vmatmul.msk.bf16.gmra.mxu1 %vm1391_vm10, %v5893_v53  ;;  %v5839_v9 = vrot.slane %v5838_v55, 4  ;;  %v6985_v42 = vshrl.u32 %v13153_v24, 16  ;;  %v5877_v22 = vunpack.c.l.b16 %v5834_v11 }
 0x353   : > { %v5249_v30 = vsel %vm10620_vm7, %v5241_v26, %v5248_v7  ;;  %v5410_v52 = vsel %vm10589_vm4, %v5250_v48, %v5409_v58  ;;  %10088 = vmatmul.msk.bf16.gmra.mxu2 %vm1391_vm10, %v10451_v33  ;;  %v6983_v26 = vrot.slane %v6981_v31, 5  ;;  %v6977_v33 = vrot.slane %v6975_v39, 5 }
 0x354   : > { %10202 = vmatmul.msk.bf16.gmra.mxu0 %vm1391_vm10, %v10467_v61  ;;  %5408 = vst.msk [vmem:[#allocation3 + $0xc4] sm:$0xf] %vm199_vm1, %v5249_v30  ;;  %v5844_v16 = vsel %vm10695_vm13, %v5839_v9, %v5843_v63  ;;  %v6987_v58 = vrot.slane %v6985_v42, 4  ;;  %v13175_v61 = vld [vmem:[#allocation3 + $0x14] sm:$0x1] }
 0x355   : > { %5411 = vst [vmem:[#allocation3 + $0xc8] sm:$0x1] %v5410_v52  ;;  %v5878_v51 = vunpack.c.l.b16 %v5844_v16  ;;  %v6991_v52 = vshll.u32 %v13175_v61, 16  ;;  %v13183_v63 = vld [vmem:[#allocation3 + $0x1c] sm:$0xf] }
 0x356   : > { %v6180_v60 = vpop.f32.mrf.mxu2  ;;  %v6988_v30 = vor.u32 %v6987_v58, %v6983_v26  ;;  %v6926_v42 = vld [vmem:[#allocation3 + $0x18] sm:$0xf] }
 0x357   : > { %v13155_v14 = vpop.f32.mrf.mxu1  ;;  %v6181_v2 = vadd.f32 %v6180_v60, %v12806_v41  ;;  %v6972_v41 = vshrl.u32 %v6923_v57, 16  ;;  %v5894_v55 = vpack.c.b16 %v5878_v51, %v5877_v22  ;;  %v6993_v8 = vrot.slane %v6991_v52, 5 }
 0x358   : > { %v6989_v9 = vrot.slane %v6988_v30, 4  ;;  %v7005_v51 = vshll.u32 %v13183_v63, 16  ;;  %v7009_v22 = vshrl.u32 %v13183_v63, 16  ;;  %v6996_v58 = vshrl.u32 %v6926_v42, 16  ;;  %v6928_v30 = vld [vmem:[#allocation3 + $0x20] sm:$0x1] }
 0x359   : > { %v6532_v21 = vpop.f32.mrf.mxu3  ;;  %v13160_v59 = vpop.f32.mrf.mxu0  ;;  %v13162_v53 = vadd.f32 %v6530_v4, %v6181_v2  ;;  %v6974_v35 = vrot.slane %v6972_v41, 4 }
 0x35a   : > { %14903 = vst [vmem:[#allocation40_spill] sm:$0xff] %v13160_v59  ;;  %v6994_v31 = vsel %vm10695_vm13, %v6989_v9, %v6993_v8  ;;  %v13371_v59 = vld [vmem:[#allocation3 + $0x38] sm:$0x1] }
 0x35b   : > { %14904 = vst [vmem:[#allocation47_spill] sm:$0xff] %v13162_v53  ;;  %v7358_v39 = vunpack.c.l.b16 %v6994_v31  ;;  %v6392_v31 = vrot.slane %v12968_v19, 5 }
 0x35e   : > { %10122 = vmatmul.msk.bf16.gmra.mxu3 %vm1391_vm10, %v13078_v27  ;;  %v6182_v4 = vpop.f32.mrf.mxu2  ;;  %v10452_v27 = vld [vmem:[#allocation3 + $0x78] sm:$0xff] }
 0x35f   : > { %v13170_v34 = vpop.f32.mrf.mxu1  ;;  %v6183_v18 = vadd.f32 %v6182_v4, %v12833_v36  ;;  %v6978_v36 = vor.u32 %v6977_v33, %v6974_v35  ;;  %v13201_v4 = vrot.slane %v7005_v51, 5 }
 0x361   : > { %v6535_v7 = vpop.f32.mrf.mxu3  ;;  %v13173_v48 = vpop.f32.mrf.mxu0  ;;  %v13177_v29 = vadd.f32 %v6532_v21, %v6183_v18  ;;  %v6979_v11 = vrot.slane %v6978_v36, 4  ;;  %v7011_v18 = vrot.slane %v7009_v22, 4  ;;  %v6998_v36 = vrot.slane %v6996_v58, 4 }
 0x362   : > { %14905 = vst [vmem:[#allocation54_spill] sm:$0xff] %v13173_v48  ;;  %10014 = vmatmul.msk.bf16.gmra.mxu1 %vm1391_vm10, %v5894_v55  ;;  %v6999_v55 = vshll.u32 %v6926_v42, 16  ;;  %v6929_v42 = vld [vmem:[#allocation3 + $0x24] sm:$0xf]  ;;  %v8918_v48 = vld [vmem:[#allocation3 + $0x30] sm:$0xe] }
 0x363   : > { %14906 = vst [vmem:[#allocation50_spill] sm:$0xff] %v13177_v29  ;;  %10089 = vmatmul.msk.bf16.gmra.mxu2 %vm1391_vm10, %v10452_v27  ;;  %v6984_v41 = vsel %vm10695_vm13, %v6979_v11, %v6983_v26  ;;  %v7012_v8 = vor.u32 %v7011_v18, %v13201_v4  ;;  %v10453_v11 = vld [vmem:[#allocation3 + $0x84] sm:$0xff]  ;;  %v7020_v19 = vshrl.u32 %v6929_v42, 16 }
 0x364   : > { %10203 = vmatmul.msk.bf16.gmra.mxu0 %vm1391_vm10, %v10468_v62  ;;  %v7001_v9 = vrot.slane %v6999_v55, 5 }
 0x366   : > { %v6185_v25 = vpop.f32.mrf.mxu2  ;;  %v7002_v22 = vor.u32 %v7001_v9, %v6998_v36 }
 0x367   : > { %v13185_v60 = vpop.f32.mrf.mxu1  ;;  %v6186_v2 = vadd.f32 %v6185_v25, %v12862_v45  ;;  %v6389_v45 = vrot.slane %v12963_v5, 5 }
 0x369   : > { %v6537_v16 = vpop.f32.mrf.mxu3  ;;  %v13188_v21 = vpop.f32.mrf.mxu0  ;;  %v13190_v57 = vadd.f32 %v6535_v7, %v6186_v2  ;;  %v7357_v7 = vunpack.c.l.b16 %v6984_v41  ;;  %v6391_v5 = vrot.slane %v6389_v45, 4  ;;  %v6267_v2 = vld [vmem:[#allocation3 + $0x90] sm:$0xe]  ;;  %v13217_v41 = vld [vmem:[#allocation3 + $0x28] sm:$0xf] }
 0x36a   : > { %14907 = vst [vmem:[#allocation53_spill] sm:$0xff] %v13188_v21  ;;  %v10107_v51 = vrot.slane %v6267_v2, 9  ;;  %v7003_v2 = vrot.slane %v7002_v22, 4 }
 0x36b   : > { %14908 = vst [vmem:[#allocation59_spill] sm:$0xff] %v13190_v57  ;;  %v7389_v27 = vpack.c.b16 %v7358_v39, %v7357_v7  ;;  %v7013_v39 = vrot.slane %v7012_v8, 4  ;;  %v7023_v7 = vshll.u32 %v6929_v42, 16  ;;  %v7578_v8 = vld [vmem:[#allocation3 + $0x18] sm:$0xe] }
 0x36c   : > { %v6390_v55 = vsel %vm11082_vm2, %v10107_v51, %v6389_v45  ;;  %v7650_v51 = vrot.slane %v13183_v63, 5 }
 0x36d   : > { %v6441_v45 = vunpack.c.l.b16 %v6390_v55  ;;  %v7025_v42 = vrot.slane %v7023_v7, 5  ;;  %v6396_v55 = vrot.slane %v13015_v56, 5 }
 0x36e   : > { %10123 = vmatmul.msk.bf16.gmra.mxu3 %vm1391_vm10, %v13123_v47  ;;  %v6187_v35 = vpop.f32.mrf.mxu2  ;;  %v10469_v47 = vld [vmem:[#allocation3 + $0x90] sm:$0xff] }
 0x36f   : > { %v13203_v33 = vpop.f32.mrf.mxu1  ;;  %v6188_v62 = vadd.f32 %v6187_v35, %v12905_v46  ;;  %v7015_v46 = vshll.u32 %v6928_v30, 16 }
 0x371   : > { %v6540_v26 = vpop.f32.mrf.mxu3  ;;  %v13206_v52 = vpop.f32.mrf.mxu0  ;;  %v13208_v25 = vadd.f32 %v6537_v16, %v6188_v62  ;;  %v6393_v16 = vsel %vm11082_vm2, %v6391_v5, %v6392_v31  ;;  %v7017_v18 = vrot.slane %v7015_v46, 5  ;;  %v7033_v5 = vshrl.u32 %v13217_v41, 16 }
 0x372   : > { %14909 = vst [vmem:[#allocation12_spill] sm:$0xff] %v13206_v52  ;;  %10210 = vmatmul.msk.bf16.vlgmr.msrb.gmra.mxu1 %vm1391_vm10, %v7389_v27  ;;  %v6442_v27 = vunpack.c.l.b16 %v6393_v16  ;;  %v7022_v46 = vrot.slane %v7020_v19, 4  ;;  %v10470_v52 = vld [vmem:[#allocation3 + $0x9c] sm:$0xff] }
 0x373   : > { %14910 = vst [vmem:[#allocation9_spill] sm:$0xff] %v13208_v25  ;;  %10090 = vmatmul.msk.bf16.gmra.mxu2 %vm1391_vm10, %v10453_v11  ;;  %v7018_v31 = vsel %vm10695_vm13, %v7013_v39, %v7017_v18  ;;  %v7035_v22 = vrot.slane %v7033_v5, 4  ;;  %v7652_v39 = vrot.slane %v7650_v51, 4  ;;  %v7653_v18 = vrot.slane %v6928_v30, 5  ;;  %v13292_v25 = vld [vmem:[#allocation3 + $0x20] sm:$0x1] }
 0x374   : > { %10204 = vmatmul.msk.bf16.gmra.mxu0 %vm1391_vm10, %v10469_v47  ;;  %v7029_v47 = vshll.u32 %v13217_v41, 16  ;;  %v6461_v16 = vpack.c.b16 %v6442_v27, %v6441_v45  ;;  %v13245_v27 = vld [vmem:[#allocation3 + $0x34] sm:$0xf] }
 0x376   : > { %v6190_v58 = vpop.f32.mrf.mxu2  ;;  %v13238_v28 = vrot.slane %v7029_v47, 5  ;;  %v7654_v47 = vsel %vm11082_vm2, %v7652_v39, %v7653_v18  ;;  %v7047_v39 = vshll.u32 %v6932_v3, 16  ;;  %v7053_v18 = vshll.u32 %v13245_v27, 16 }
 0x377   : > { %v13221_v35 = vpop.f32.mrf.mxu1  ;;  %v6191_v62 = vadd.f32 %v6190_v58, %v12948_v1  ;;  %v7008_v1 = vsel %vm10695_vm13, %v7003_v2, %v13201_v4  ;;  %v13236_v58 = vld [vmem:[#allocation3 + $0x2c] sm:$0x1]  ;;  %v7026_v2 = vor.u32 %v7025_v42, %v7022_v46  ;;  %v6399_v46 = vrot.slane %v13020_v44, 5 }
 0x378   : > { %v7359_v19 = vunpack.c.l.b16 %v7008_v1  ;;  %v7039_v7 = vshll.u32 %v13236_v58, 16  ;;  %v7036_v30 = vor.u32 %v7035_v22, %v13238_v28  ;;  %v6398_v1 = vrot.slane %v6396_v55, 4 }
 0x379   : > { %v6542_v36 = vpop.f32.mrf.mxu3  ;;  %v13226_v9 = vpop.f32.mrf.mxu0  ;;  %v13228_v11 = vadd.f32 %v6540_v26, %v6191_v62  ;;  %v10227_v26 = vrot.slane %v7578_v8, 9  ;;  %v7360_v62 = vunpack.c.l.b16 %v7018_v31  ;;  %v7044_v8 = vshrl.u32 %v6932_v3, 16 }
 0x37a   : > { %14911 = vst [vmem:[#allocation6_spill] sm:$0xff] %v13226_v9  ;;  %v7057_v42 = vshrl.u32 %v13245_v27, 16  ;;  %v7657_v44 = vrot.slane %v13217_v41, 5 }
 0x37b   : > { %14912 = vst [vmem:[#allocation17_spill] sm:$0xff] %v13228_v11  ;;  %v7651_v4 = vsel %vm11082_vm2, %v10227_v26, %v7650_v51  ;;  %v7390_v45 = vpack.c.b16 %v7360_v62, %v7359_v19  ;;  %v7758_v26 = vunpack.c.l.b16 %v7654_v47  ;;  %v6268_v11 = vld [vmem:[#allocation3 + $0x9c] sm:$0xe]  ;;  %v7579_v62 = vld [vmem:[#allocation3 + $0x24] sm:$0xe]  ;;  %v7046_v19 = vrot.slane %v7044_v8, 4 }
 0x37c   : > { %v10108_v3 = vrot.slane %v6268_v11, 9  ;;  %v6400_v47 = vsel %vm11082_vm2, %v6398_v1, %v6399_v46  ;;  %v7059_v8 = vrot.slane %v7057_v42, 4 }
 0x37d   : > { %v6444_v1 = vunpack.c.l.b16 %v6400_v47 }
 0x37e   : > { %10124 = vmatmul.msk.bf16.gmra.mxu3 %vm1391_vm10, %v6461_v16  ;;  %v6192_v63 = vpop.f32.mrf.mxu2  ;;  %v7757_v16 = vunpack.c.l.b16 %v7651_v4  ;;  %v7027_v4 = vrot.slane %v7026_v2, 4  ;;  %v13273_v2 = vld [vmem:[#allocation3 + $0x38] sm:$0x1] }
 0x37f   : > { %v13249_v5 = vpop.f32.mrf.mxu1  ;;  %v6193_v56 = vadd.f32 %v6192_v63, %v12979_v6  ;;  %v10454_v6 = vld [vmem:[#allocation3 + $0x90] sm:$0xff]  ;;  %v6935_v63 = vld [vmem:[#allocation3 + $0x3c] sm:$0xf] }
 0x380   : > { %v13261_v22 = vpack.c.b16 %v7758_v26, %v7757_v16  ;;  %v10228_v16 = vrot.slane %v7579_v62, 9  ;;  %v7580_v26 = vld [vmem:[#allocation3 + $0x30] sm:$0xe]  ;;  %v7068_v11 = vshrl.u32 %v6935_v63, 16  ;;  %v13285_v62 = vld [vmem:[#allocation3 + $0x1c] sm:$0xf] }
 0x381   : > { %v6545_v31 = vpop.f32.mrf.mxu3  ;;  %v13253_v51 = vpop.f32.mrf.mxu0  ;;  %v13255_v9 = vadd.f32 %v6542_v36, %v6193_v56  ;;  %v7041_v36 = vrot.slane %v7039_v7, 5  ;;  %v7037_v56 = vrot.slane %v7036_v30, 4  ;;  %v6397_v7 = vsel %vm11082_vm2, %v10108_v3, %v6396_v55 }
 0x382   : > { %14913 = vst [vmem:[#allocation18_spill] sm:$0xff] %v13253_v51  ;;  %10211 = vmatmul.msk.bf16.gmra.mxu1 %vm1391_vm10, %v7390_v45  ;;  %v7049_v45 = vrot.slane %v7047_v39, 5  ;;  %v13268_v51 = vrot.slane %v7053_v18, 5  ;;  %v7658_v41 = vsel %vm11082_vm2, %v10228_v16, %v7657_v44  ;;  %v7659_v39 = vrot.slane %v7657_v44, 4 }
 0x383   : > { %14914 = vst [vmem:[#allocation14_spill] sm:$0xff] %v13255_v9  ;;  %10091 = vmatmul.msk.bf16.gmra.mxu2 %vm1391_vm10, %v10454_v6  ;;  %v7071_v6 = vshll.u32 %v6935_v63, 16  ;;  %v7660_v18 = vrot.slane %v13236_v58, 5  ;;  %v7042_v42 = vsel %vm10695_vm13, %v7037_v56, %v7041_v36  ;;  %v10229_v63 = vrot.slane %v7580_v26, 9 }
 0x384   : > { %10205 = vmatmul.msk.bf16.gmra.mxu0 %vm1391_vm10, %v10470_v52  ;;  %v7664_v52 = vrot.slane %v13245_v27, 5  ;;  %v6443_v21 = vunpack.c.l.b16 %v6397_v7  ;;  %v7050_v47 = vor.u32 %v7049_v45, %v7046_v19  ;;  %v7667_v44 = vrot.slane %v13273_v2, 5  ;;  %v8916_v45 = vld [vmem:[#allocation3 + $0x18] sm:$0xe] }
 0x385   : > { %v7661_v16 = vsel %vm11082_vm2, %v7659_v39, %v7660_v18  ;;  %v7032_v26 = vsel %vm10695_vm13, %v7027_v4, %v13238_v28  ;;  %v8982_v7 = vrot.slane %v13285_v62, 5  ;;  %v8985_v28 = vrot.slane %v13292_v25, 5 }
 0x386   : > { %v6195_v30 = vpop.f32.mrf.mxu2  ;;  %v7666_v3 = vrot.slane %v7664_v52, 4  ;;  %v7665_v36 = vsel %vm11082_vm2, %v10229_v63, %v7664_v52  ;;  %v6462_v56 = vpack.c.b16 %v6444_v1, %v6443_v21  ;;  %v7361_v4 = vunpack.c.l.b16 %v7032_v26  ;;  %v6936_v63 = vld [vmem:[#allocation3 + $0x40] sm:$0xf]  ;;  %v7581_v26 = vld [vmem:[#allocation3 + $0x3c] sm:$0xe] }
 0x387   : > { %v13275_v9 = vpop.f32.mrf.mxu1  ;;  %v6196_v55 = vadd.f32 %v6195_v30, %v13011_v0  ;;  %v7760_v0 = vunpack.c.l.b16 %v7661_v16  ;;  %v6403_v30 = vrot.slane %v13056_v15, 5  ;;  %v7761_v21 = vunpack.c.l.b16 %v7665_v36  ;;  %v6269_v16 = vld [vmem:[#allocation3 + $0xa8] sm:$0xe] }
 0x388   : > { %v7668_v19 = vsel %vm11082_vm2, %v7666_v3, %v7667_v44  ;;  %v8984_v1 = vrot.slane %v8982_v7, 4  ;;  %v7051_v18 = vrot.slane %v7050_v47, 4  ;;  %v10357_v3 = vrot.slane %v8916_v45, 9  ;;  %v10471_v45 = vld [vmem:[#allocation3 + $0xa8] sm:$0xff] }
 0x389   : > { %v6547_v46 = vpop.f32.mrf.mxu3  ;;  %v13280_v27 = vpop.f32.mrf.mxu0  ;;  %v13290_v58 = vadd.f32 %v6545_v31, %v6196_v55  ;;  %v7362_v31 = vunpack.c.l.b16 %v7042_v42  ;;  %v7762_v52 = vunpack.c.l.b16 %v7668_v19  ;;  %v7063_v55 = vshll.u32 %v13273_v2, 16 }
 0x38a   : > { %14915 = vst [vmem:[#allocation21_spill] sm:$0xff] %v13280_v27  ;;  %v7759_v27 = vunpack.c.l.b16 %v7658_v41  ;;  %v7060_v41 = vor.u32 %v7059_v8, %v13268_v51  ;;  %v13311_v8 = vrot.slane %v7068_v11, 4  ;;  %v6405_v2 = vrot.slane %v6403_v30, 4 }
 0x38b   : > { %14916 = vst [vmem:[#allocation22_spill] sm:$0xff] %v13290_v58  ;;  %v13315_v44 = vpack.c.b16 %v7762_v52, %v7761_v21  ;;  %v7391_v36 = vpack.c.b16 %v7362_v31, %v7361_v4  ;;  %v8983_v19 = vsel %vm11082_vm2, %v10357_v3, %v8982_v7  ;;  %v7056_v11 = vsel %vm10695_vm13, %v7051_v18, %v13268_v51  ;;  %v13325_v52 = vld [vmem:[#allocation3 + $0x18] sm:$0xf]  ;;  %v6937_v4 = vld [vmem:[#allocation3 + $0x44] sm:$0x1] }
 0x38c   : > { %v13304_v39 = vpack.c.b16 %v7760_v0, %v7759_v27  ;;  %v13313_v27 = vrot.slane %v7071_v6, 5  ;;  %v8986_v0 = vsel %vm11082_vm2, %v8984_v1, %v8985_v28  ;;  %v7061_v6 = vrot.slane %v7060_v41, 4  ;;  %v10455_v1 = vld [vmem:[#allocation3 + $0x9c] sm:$0xff] }
 0x38d   : > { %v7077_v21 = vshll.u32 %v6936_v63, 16  ;;  %v9095_v58 = vunpack.c.l.b16 %v8986_v0  ;;  %v10109_v28 = vrot.slane %v6269_v16, 9  ;;  %v6406_v7 = vrot.slane %v13066_v40, 5  ;;  %v13342_v16 = vld [vmem:[#allocation3 + $0x28] sm:$0xf] }
 0x38e   : > { %10125 = vmatmul.msk.bf16.gmra.mxu3 %vm1391_vm10, %v6462_v56  ;;  %v6197_v15 = vpop.f32.mrf.mxu2  ;;  %v7081_v3 = vshrl.u32 %v6936_v63, 16  ;;  %v7065_v51 = vrot.slane %v7063_v55, 5  ;;  %v10230_v41 = vrot.slane %v7581_v26, 9  ;;  %v7671_v18 = vrot.slane %v6936_v63, 5 }
 0x38f   : > { %v13309_v42 = vpop.f32.mrf.mxu1  ;;  %v6198_v47 = vadd.f32 %v6197_v15, %v13039_v50  ;;  %v9094_v15 = vunpack.c.l.b16 %v8983_v19  ;;  %v6404_v0 = vsel %vm11082_vm2, %v10109_v28, %v6403_v30  ;;  %v8311_v40 = vshrl.u32 %v13325_v52, 16  ;;  %v13356_v28 = vld [vmem:[#allocation3 + $0x34] sm:$0xf] }
 0x390   : > { %v7672_v55 = vsel %vm11082_vm2, %v10230_v41, %v7671_v18  ;;  %v7673_v63 = vrot.slane %v7671_v18, 4  ;;  %v7674_v26 = vrot.slane %v6937_v4, 5  ;;  %v7066_v30 = vsel %vm10695_vm13, %v7061_v6, %v7065_v51 }
 0x391   : > { %v6550_v56 = vpop.f32.mrf.mxu3  ;;  %v13328_v31 = vpop.f32.mrf.mxu0  ;;  %v13330_v50 = vadd.f32 %v6547_v46, %v6198_v47  ;;  %v6407_v46 = vsel %vm11082_vm2, %v6405_v2, %v6406_v7  ;;  %v8917_v47 = vld [vmem:[#allocation3 + $0x24] sm:$0xe]  ;;  %v13346_v19 = vpack.c.b16 %v9095_v58, %v9094_v15  ;;  %v7074_v2 = vor.u32 %v13313_v27, %v13311_v8 }
 0x392   : > { %10212 = vmatmul.msk.bf16.gmra.mxu1 %vm1391_vm10, %v7391_v36  ;;  %14917 = vst [vmem:[#allocation13_spill] sm:$0xff] %v13328_v31  ;;  %v13339_v36 = vunpack.c.l.b16 %v7056_v11  ;;  %v7083_v11 = vrot.slane %v7081_v3, 4  ;;  %v6446_v18 = vunpack.c.l.b16 %v6407_v46  ;;  %v7675_v58 = vsel %vm11082_vm2, %v7673_v63, %v7674_v26 }
 0x393   : > { %14918 = vst [vmem:[#allocation60_spill] sm:$0xff] %v13330_v50  ;;  %10092 = vmatmul.msk.bf16.gmra.mxu2 %vm1391_vm10, %v10455_v1  ;;  %v13354_v1 = vld [vmem:[#allocation3 + $0x2c] sm:$0x1]  ;;  %v10358_v15 = vrot.slane %v8917_v47, 9  ;;  %v8989_v6 = vrot.slane %v13342_v16, 5  ;;  %v6445_v27 = vunpack.c.l.b16 %v6404_v0  ;;  %v7764_v3 = vunpack.c.l.b16 %v7675_v58 }
 0x394   : > { %10206 = vmatmul.msk.bf16.gmra.mxu0 %vm1391_vm10, %v10471_v45  ;;  %14919 = vst [vmem:[#allocation26_spill] sm:$0xff] %v13346_v19  ;;  %v13352_v45 = vrot.slane %v7077_v21, 5  ;;  %v7763_v21 = vunpack.c.l.b16 %v7672_v55  ;;  %v8992_v50 = vrot.slane %v13354_v1, 5  ;;  %v8996_v46 = vrot.slane %v13356_v28, 5 }
 0x395   : > { %v8990_v19 = vsel %vm11082_vm2, %v10358_v15, %v8989_v6  ;;  %v8991_v31 = vrot.slane %v8989_v6, 4  ;;  %v7364_v47 = vunpack.c.l.b16 %v7066_v30  ;;  %v7087_v63 = vshll.u32 %v6937_v4, 16 }
 0x396   : > { %v6200_v41 = vpop.f32.mrf.mxu2  ;;  %v8314_v26 = vshll.u32 %v13325_v52, 16  ;;  %v7084_v0 = vor.u32 %v7083_v11, %v13352_v45  ;;  %v13374_v55 = vpack.c.b16 %v7764_v3, %v7763_v21  ;;  %v6410_v15 = vrot.slane %v13119_v12, 5 }
 0x397   : > { %v13358_v7 = vpop.f32.mrf.mxu1  ;;  %v6201_v8 = vadd.f32 %v6200_v41, %v13072_v43  ;;  %v6463_v43 = vpack.c.b16 %v6446_v18, %v6445_v27  ;;  %v8993_v41 = vsel %vm11082_vm2, %v8991_v31, %v8992_v50  ;;  %v10359_v30 = vrot.slane %v8918_v48, 9  ;;  %v13390_v31 = vld [vmem:[#allocation3 + $0x40] sm:$0xf] }
 0x398   : > { %14921 = vst [vmem:[#allocation61_spill] sm:$0xff] %v13374_v55  ;;  %v9097_v6 = vunpack.c.l.b16 %v8993_v41  ;;  %v13382_v52 = vrot.slane %v7074_v2, 4  ;;  %v13384_v4 = vrot.slane %v8311_v40, 4  ;;  %v8998_v18 = vrot.slane %v8996_v46, 4  ;;  %v13405_v41 = vld [vmem:[#allocation3 + $0x4c] sm:$0xf] }
 0x399   : > { %v6552_v51 = vpop.f32.mrf.mxu3  ;;  %v13368_v57 = vadd.f32 %v6550_v56, %v6201_v8  ;;  %v13378_v58 = vpop.f32.mrf.mxu0  ;;  %v9096_v56 = vunpack.c.l.b16 %v8990_v19  ;;  %v8999_v11 = vrot.slane %v13371_v59, 5  ;;  %v7392_v8 = vpack.c.b16 %v7364_v47, %v13339_v36 }
 0x39a   : > { %14922 = vst [vmem:[#allocation32_spill] sm:$0xff] %v13378_v58  ;;  %v13388_v27 = vrot.slane %v7087_v63, 5  ;;  %v8997_v12 = vsel %vm11082_vm2, %v10359_v30, %v8996_v46  ;;  %v13398_v2 = vrot.slane %v8314_v26, 5  ;;  %v8320_v40 = vshll.u32 %v13285_v62, 16  ;;  %v13407_v46 = vld [vmem:[#allocation3 + $0x50] sm:$0x1] }
 0x39b   : > { %14920 = vst [vmem:[#allocation25_spill] sm:$0xff] %v13368_v57  ;;  %v13392_v50 = vpack.c.b16 %v9097_v6, %v9096_v56  ;;  %v8324_v21 = vshrl.u32 %v13285_v62, 16  ;;  %v9000_v36 = vsel %vm11082_vm2, %v8998_v18, %v8999_v11  ;;  %v6412_v63 = vrot.slane %v6410_v15, 4  ;;  %v10472_v6 = vld [vmem:[#allocation3 + $0xb4] sm:$0xff]  ;;  %v7582_v30 = vld [vmem:[#allocation3 + $0x48] sm:$0xe] }
 0x39c   : > { %v9099_v56 = vunpack.c.l.b16 %v9000_v36  ;;  %v6270_v26 = vld [vmem:[#allocation3 + $0xb4] sm:$0xe]  ;;  %v9003_v58 = vrot.slane %v13390_v31, 5  ;;  %v10456_v18 = vld [vmem:[#allocation3 + $0xa8] sm:$0xff]  ;;  %v13414_v11 = vld [vmem:[#allocation3 + $0x44] sm:$0x1] }
 0x39d   : > { %14923 = vst [vmem:[#allocation29_spill] sm:$0xff] %v13392_v50  ;;  %v9098_v50 = vunpack.c.l.b16 %v8997_v12  ;;  %v13417_v36 = vrot.slane %v8320_v40, 5  ;;  %v8326_v57 = vrot.slane %v8324_v21, 4  ;;  %v7678_v12 = vrot.slane %v13405_v41, 5 }
 0x39e   : > { %10126 = vmatmul.msk.bf16.gmra.mxu3 %vm1391_vm10, %v6463_v43  ;;  %v6202_v19 = vpop.f32.mrf.mxu2  ;;  %v7085_v43 = vrot.slane %v7084_v0, 4  ;;  %v8919_v0 = vld [vmem:[#allocation3 + $0x3c] sm:$0xe]  ;;  %v7681_v55 = vrot.slane %v13407_v46, 5  ;;  %v9006_v40 = vrot.slane %v13414_v11, 5 }
 0x39f   : > { %v13396_v48 = vpop.f32.mrf.mxu1  ;;  %v6203_v47 = vadd.f32 %v6202_v19, %v13099_v10  ;;  %v6413_v10 = vrot.slane %v13127_v17, 5  ;;  %v6938_v19 = vld [vmem:[#allocation3 + $0x48] sm:$0xf]  ;;  %v13420_v29 = vpack.c.b16 %v9099_v56, %v9098_v50  ;;  %v10231_v17 = vrot.slane %v7582_v30, 9 }
 0x3a0   : > { %v7090_v21 = vsel %vm10695_vm13, %v7085_v43, %v13388_v27  ;;  %v7092_v56 = vshrl.u32 %v6938_v19, 16  ;;  %v7095_v43 = vshll.u32 %v6938_v19, 16  ;;  %v8330_v19 = vshll.u32 %v13292_v25, 16 }
 0x3a1   : > { %v6555_v3 = vpop.f32.mrf.mxu3  ;;  %v13411_v62 = vadd.f32 %v6552_v51, %v6203_v47  ;;  %14925 = vst [vmem:[#allocation62_spill] sm:$0xff] %v13420_v29  ;;  %v10110_v51 = vrot.slane %v6270_v26, 9  ;;  %v9005_v47 = vrot.slane %v9003_v58, 4  ;;  %v13427_v23 = vpop.f32.mrf.mxu0 }
 0x3a2   : > { %10213 = vmatmul.msk.bf16.gmra.mxu1 %vm1391_vm10, %v7392_v8  ;;  %v6414_v8 = vsel %vm11082_vm2, %v6412_v63, %v6413_v10  ;;  %14926 = vst [vmem:[#allocation36_spill] sm:$0xff] %v13427_v23  ;;  %v7679_v63 = vsel %vm11082_vm2, %v10231_v17, %v7678_v12  ;;  %v7101_v17 = vshll.u32 %v13405_v41, 16 }
 0x3a3   : > { %14924 = vst [vmem:[#allocation33_spill] sm:$0xff] %v13411_v62  ;;  %10093 = vmatmul.msk.bf16.gmra.mxu2 %vm1391_vm10, %v10456_v18  ;;  %v7680_v62 = vrot.slane %v7678_v12, 4  ;;  %v6411_v50 = vsel %vm11082_vm2, %v10110_v51, %v6410_v15  ;;  %v6448_v18 = vunpack.c.l.b16 %v6414_v8  ;;  %v9007_v15 = vsel %vm11082_vm2, %v9005_v47, %v9006_v40 }
 0x3a4   : > { %10207 = vmatmul.msk.bf16.gmra.mxu0 %vm1391_vm10, %v10472_v6  ;;  %v10360_v6 = vrot.slane %v8919_v0, 9  ;;  %v9101_v23 = vunpack.c.l.b16 %v9007_v15  ;;  %v6447_v12 = vunpack.c.l.b16 %v6411_v50  ;;  %v7105_v8 = vshrl.u32 %v13405_v41, 16 }
 0x3a5   : > { %v7682_v10 = vsel %vm11082_vm2, %v7680_v62, %v7681_v55  ;;  %v8327_v55 = vor.u32 %v8326_v57, %v13417_v36  ;;  %v7366_v41 = vunpack.c.l.b16 %v7090_v21  ;;  %v7097_v57 = vrot.slane %v7095_v43, 5 }
 0x3a6   : > { %v6205_v30 = vpop.f32.mrf.mxu2  ;;  %v9004_v0 = vsel %vm11082_vm2, %v10360_v6, %v9003_v58  ;;  %v7766_v29 = vunpack.c.l.b16 %v7682_v10  ;;  %v7643_v58 = vrot.slane %v13153_v24, 5  ;;  %v6464_v47 = vpack.c.b16 %v6448_v18, %v6447_v12  ;;  %v7577_v6 = vld [vmem:[#allocation3 + $0xc] sm:$0xe] }
 0x3a7   : > { %v13436_v26 = vpop.f32.mrf.mxu1  ;;  %v6206_v27 = vadd.f32 %v6205_v30, %v13129_v20  ;;  %v9100_v62 = vunpack.c.l.b16 %v9004_v0  ;;  %v7080_v20 = vsel %vm10695_vm13, %v13382_v52, %v13352_v45  ;;  %v7094_v24 = vrot.slane %v7092_v56, 4 }
 0x3a8   : > { %14927 = vst [vmem:[#allocation63_spill] sm:$0xff] %v13436_v26  ;;  %v7765_v26 = vunpack.c.l.b16 %v7679_v63  ;;  %v13463_v63 = vrot.slane %v7101_v17, 5  ;;  %v7107_v30 = vrot.slane %v7105_v8, 4  ;;  %v7365_v18 = vunpack.c.l.b16 %v7080_v20  ;;  %v6942_v8 = vld [vmem:[#allocation3 + $0x58] sm:$0xf] }
 0x3a9   : > { %v6557_v51 = vpop.f32.mrf.mxu3  ;;  %v13447_v53 = vadd.f32 %v6555_v3, %v6206_v27  ;;  %v8317_v3 = vor.u32 %v13398_v2, %v13384_v4  ;;  %v13460_v50 = vpack.c.b16 %v9101_v23, %v9100_v62  ;;  %v8328_v45 = vrot.slane %v8327_v55, 4  ;;  %v13467_v0 = vpop.f32.mrf.mxu0  ;;  %v10473_v27 = vld [vmem:[#allocation3 + $0xc0] sm:$0xff]  ;;  %v7583_v55 = vld [vmem:[#allocation3 + $0x54] sm:$0xe] }
 0x3aa   : > { %v13456_v40 = vpack.c.b16 %v7766_v29, %v7765_v26  ;;  %v10226_v52 = vrot.slane %v7577_v6, 9  ;;  %v7645_v25 = vrot.slane %v7643_v58, 4  ;;  %v8332_v21 = vrot.slane %v8330_v19, 5  ;;  %v8265_v26 = vld [vmem:[#allocation3 + $0x24] sm:$0xf]  ;;  %14929 = vst [vmem:[#allocation65_spill] sm:$0xff] %v13467_v0 }
 0x3ab   : > { %14928 = vst [vmem:[#allocation64_spill] sm:$0xff] %v13460_v50  ;;  %v7393_v23 = vpack.c.b16 %v7366_v41, %v7365_v18  ;;  %v7646_v15 = vrot.slane %v13175_v61, 5  ;;  %v7098_v43 = vor.u32 %v7097_v57, %v7094_v24  ;;  %v7108_v12 = vor.u32 %v7107_v30, %v13463_v63  ;;  %v8920_v50 = vld [vmem:[#allocation3 + $0x48] sm:$0xe] }
 0x3ac   : > { %v13472_v56 = vsel %vm11082_vm2, %v10226_v52, %v7643_v58  ;;  %v8318_v17 = vrot.slane %v8317_v3, 4  ;;  %v8335_v20 = vshrl.u32 %v8265_v26, 16  ;;  %v7111_v61 = vshll.u32 %v13407_v46, 16 }
 0x3ad   : > { %v7647_v58 = vsel %vm11082_vm2, %v7645_v25, %v7646_v15  ;;  %v7755_v6 = vunpack.c.l.b16 %v13472_v56  ;;  %v8338_v41 = vshll.u32 %v8265_v26, 16  ;;  %v8344_v3 = vshll.u32 %v13342_v16, 16  ;;  %v6941_v56 = vld [vmem:[#allocation3 + $0x54] sm:$0xf] }
 0x3ae   : > { %10127 = vmatmul.msk.bf16.gmra.mxu3 %vm1391_vm10, %v6464_v47  ;;  %v6207_v29 = vpop.f32.mrf.mxu2  ;;  %v10457_v47 = vld [vmem:[#allocation3 + $0xb4] sm:$0xff]  ;;  %v8323_v19 = vsel %vm10695_vm13, %v8318_v17, %v13417_v36  ;;  %v8348_v24 = vshrl.u32 %v13342_v16, 16  ;;  %v10232_v57 = vrot.slane %v7583_v55, 9  ;;  %v7685_v30 = vrot.slane %v6942_v8, 5  ;;  %v13496_v36 = vld [vmem:[#allocation3 + $0x4c] sm:$0xf] }
 0x3af   : > { %v13465_v10 = vpop.f32.mrf.mxu1  ;;  %v6208_v2 = vadd.f32 %v6207_v29, %v13155_v14  ;;  %v8333_v14 = vsel %vm10695_vm13, %v8328_v45, %v8332_v21  ;;  %v7099_v18 = vrot.slane %v7098_v43, 4  ;;  %v7109_v45 = vrot.slane %v7108_v12, 4 }
 0x3b0   : > { %v13494_v46 = vunpack.c.l.b16 %v8333_v14  ;;  %v7756_v52 = vunpack.c.l.b16 %v7647_v58  ;;  %v8337_v25 = vrot.slane %v8335_v20, 4  ;;  %v7686_v29 = vsel %vm11082_vm2, %v10232_v57, %v7685_v30 }
 0x3b1   : > { %v6560_v4 = vpop.f32.mrf.mxu3  ;;  %v13477_v62 = vadd.f32 %v6557_v51, %v6208_v2  ;;  %v13489_v51 = vld [vmem:[#allocation3 + $0x5c] sm:$0x1]  ;;  %v7687_v21 = vrot.slane %v7685_v30, 4  ;;  %v7113_v16 = vrot.slane %v7111_v61, 5  ;;  %v7125_v15 = vshll.u32 %v6942_v8, 16  ;;  %v13511_v30 = vpop.f32.mrf.mxu0 }
 0x3b2   : > { %10214 = vmatmul.msk.bf16.gmra.mxu1 %vm1391_vm10, %v7393_v23  ;;  %v7688_v26 = vrot.slane %v13489_v51, 5  ;;  %v8340_v43 = vrot.slane %v8338_v41, 5  ;;  %v13504_v55 = vrot.slane %v8344_v3, 5  ;;  %v7767_v20 = vunpack.c.l.b16 %v7686_v29  ;;  %14931 = vst [vmem:[#allocation67_spill] sm:$0xff] %v13511_v30 }
 0x3b3   : > { %14930 = vst [vmem:[#allocation66_spill] sm:$0xff] %v13477_v62  ;;  %10094 = vmatmul.msk.bf16.gmra.mxu2 %vm1391_vm10, %v10457_v47  ;;  %v8350_v47 = vrot.slane %v8348_v24, 4  ;;  %v7114_v58 = vsel %vm10695_vm13, %v7109_v45, %v7113_v16  ;;  %v9010_v61 = vrot.slane %v13496_v36, 5  ;;  %v8696_v41 = vunpack.c.l.b16 %v8323_v19  ;;  %v13518_v24 = vld [vmem:[#allocation3 + $0x50] sm:$0x1] }
 0x3b4   : > { %10208 = vmatmul.msk.bf16.gmra.mxu0 %vm1391_vm10, %v10473_v27  ;;  %v7129_v27 = vshrl.u32 %v6942_v8, 16  ;;  %v7689_v14 = vsel %vm11082_vm2, %v7687_v21, %v7688_v26  ;;  %v7116_v3 = vshrl.u32 %v6941_v56, 16  ;;  %v10474_v21 = vld [vmem:[#allocation3 + $0x18] sm:$0xff]  ;;  %v7119_v26 = vshll.u32 %v6941_v56, 16 }
 0x3b5   : > { %v7768_v57 = vunpack.c.l.b16 %v7689_v14  ;;  %v7368_v16 = vunpack.c.l.b16 %v7114_v58  ;;  %v8728_v14 = vpack.c.b16 %v13494_v46, %v8696_v41  ;;  %v8354_v19 = vshll.u32 %v13354_v1, 16 }
 0x3b6   : > { %v6210_v2 = vpop.f32.mrf.mxu2  ;;  %v7131_v45 = vrot.slane %v7129_v27, 4  ;;  %v9012_v30 = vrot.slane %v9010_v61, 4  ;;  %v9013_v56 = vrot.slane %v13518_v24, 5  ;;  %v7118_v27 = vrot.slane %v7116_v3, 4 }
 0x3b7   : > { %v13501_v23 = vpop.f32.mrf.mxu1  ;;  %v6211_v17 = vadd.f32 %v6210_v2, %v13170_v34  ;;  %v7104_v34 = vsel %vm10695_vm13, %v7099_v18, %v13463_v63  ;;  %v13520_v2 = vrot.slane %v7125_v15, 5  ;;  %v13522_v29 = vpack.c.b16 %v7768_v57, %v7767_v20  ;;  %v8268_v18 = vld [vmem:[#allocation3 + $0x30] sm:$0xf] }
 0x3b8   : > { %v8351_v63 = vor.u32 %v8350_v47, %v13504_v55  ;;  %v7367_v15 = vunpack.c.l.b16 %v7104_v34  ;;  %v8368_v20 = vshll.u32 %v13356_v28, 16  ;;  %v8372_v58 = vshrl.u32 %v13356_v28, 16  ;;  %v6945_v28 = vld [vmem:[#allocation3 + $0x64] sm:$0xf] }
 0x3b9   : > { %v6562_v12 = vpop.f32.mrf.mxu3  ;;  %v13513_v8 = vadd.f32 %v6560_v4, %v6211_v17  ;;  %v7787_v4 = vpack.c.b16 %v7756_v52, %v7755_v6  ;;  %v8341_v17 = vor.u32 %v8340_v43, %v8337_v25  ;;  %v7121_v52 = vrot.slane %v7119_v26, 5 }
 0x3ba   : > { %v7132_v25 = vor.u32 %v7131_v45, %v13520_v2  ;;  %v10361_v43 = vrot.slane %v8920_v50, 9  ;;  %v9014_v1 = vsel %vm11082_vm2, %v9012_v30, %v9013_v56  ;;  %v7394_v47 = vpack.c.b16 %v7368_v16, %v7367_v15  ;;  %v7584_v16 = vld [vmem:[#allocation3 + $0x60] sm:$0xe] }
 0x3bb   : > { %14932 = vst [vmem:[#allocation68_spill] sm:$0xff] %v13513_v8  ;;  %v8342_v34 = vrot.slane %v8341_v17, 4  ;;  %v8359_v3 = vshrl.u32 %v8268_v18, 16  ;;  %v8352_v8 = vrot.slane %v8351_v63, 4  ;;  %v8362_v0 = vshll.u32 %v8268_v18, 16  ;;  %v13548_v18 = vpop.f32.mrf.mxu0 }
 0x3bc   : > { %v9011_v26 = vsel %vm11082_vm2, %v10361_v43, %v9010_v61  ;;  %v13543_v45 = vrot.slane %v8368_v20, 5  ;;  %v8374_v30 = vrot.slane %v8372_v58, 4  ;;  %v9103_v56 = vunpack.c.l.b16 %v9014_v1  ;;  %v13546_v63 = vld [vmem:[#allocation3 + $0x68] sm:$0x1]  ;;  %14934 = vst [vmem:[#allocation70_spill] sm:$0xff] %v13548_v18 }
 0x3bd   : > { %v7133_v17 = vrot.slane %v7132_v25, 4  ;;  %v8361_v61 = vrot.slane %v8359_v3, 4  ;;  %v7692_v15 = vrot.slane %v6945_v28, 5  ;;  %v9102_v20 = vunpack.c.l.b16 %v9011_v26  ;;  %v13578_v18 = vld [vmem:[#allocation3 + $0x5c] sm:$0x1] }
 0x3be   : > { %10324 = vmatmul.msk.bf16.vlgmr.msra.gmra.mxu3 %vm1391_vm10, %v10474_v21  ;;  %v6212_v6 = vpop.f32.mrf.mxu2  ;;  %v7135_v21 = vshll.u32 %v13489_v51, 16  ;;  %v8356_v51 = vrot.slane %v8354_v19, 5  ;;  %v8375_v19 = vor.u32 %v8374_v30, %v13543_v45  ;;  %v7149_v26 = vshll.u32 %v6945_v28, 16 }
 0x3bf   : > { %v13531_v46 = vpop.f32.mrf.mxu1  ;;  %v6213_v41 = vadd.f32 %v6212_v6, %v13185_v60  ;;  %v7122_v60 = vor.u32 %v7121_v52, %v7118_v27  ;;  %v8364_v27 = vrot.slane %v8362_v0, 5  ;;  %v10233_v6 = vrot.slane %v7584_v16, 9  ;;  %v13557_v52 = vld [vmem:[#allocation3 + $0x58] sm:$0xf] }
 0x3c0   : > { %v7137_v58 = vrot.slane %v7135_v21, 5  ;;  %v7694_v25 = vrot.slane %v7692_v15, 4  ;;  %v13560_v43 = vpack.c.b16 %v9103_v56, %v9102_v20  ;;  %v6944_v21 = vld [vmem:[#allocation3 + $0x60] sm:$0xf]  ;;  %v7153_v30 = vshrl.u32 %v6945_v28, 16 }
 0x3c1   : > { %v6565_v57 = vpop.f32.mrf.mxu3  ;;  %v13541_v50 = vadd.f32 %v6562_v12, %v6213_v41  ;;  %v8347_v12 = vsel %vm10695_vm13, %v8342_v34, %v13504_v55  ;;  %v7693_v0 = vsel %vm11082_vm2, %v10233_v6, %v7692_v15  ;;  %v9017_v20 = vrot.slane %v13557_v52, 5 }
 0x3c2   : > { %10215 = vmatmul.msk.bf16.gmra.mxu1 %vm1391_vm10, %v7394_v47  ;;  %14935 = vst [vmem:[#allocation71_spill] sm:$0xff] %v13560_v43  ;;  %v7123_v47 = vrot.slane %v7122_v60, 4  ;;  %v7138_v41 = vsel %vm10695_vm13, %v7133_v17, %v7137_v58  ;;  %v8376_v58 = vrot.slane %v8375_v19, 4  ;;  %v7140_v28 = vshrl.u32 %v6944_v21, 16 }
 0x3c3   : > { %14933 = vst [vmem:[#allocation69_spill] sm:$0xff] %v13541_v50  ;;  %10243 = vmatmul.msk.bf16.vlgmr.msra.gmra.mxu2 %vm1391_vm10, %v7787_v4  ;;  %v7695_v4 = vrot.slane %v13546_v63, 5  ;;  %v7370_v6 = vunpack.c.l.b16 %v7138_v41  ;;  %v7143_v43 = vshll.u32 %v6944_v21, 16  ;;  %v13585_v19 = vpop.f32.mrf.mxu0  ;;  %v8271_v41 = vld [vmem:[#allocation3 + $0x3c] sm:$0xf]  ;;  %v9020_v21 = vrot.slane %v13578_v18, 5 }
 0x3c4   : > { %10341 = vmatmul.msk.bf16.vlgmr.msra.gmra.mxu0 %vm1391_vm10, %v8728_v14  ;;  %v8357_v14 = vsel %vm10695_vm13, %v8352_v8, %v8356_v51  ;;  %v8378_v8 = vshll.u32 %v13371_v59, 16  ;;  %v8365_v51 = vor.u32 %v8364_v27, %v8361_v61  ;;  %v10475_v59 = vld [vmem:[#allocation3 + $0x24] sm:$0xff]  ;;  %v7128_v15 = vsel %vm10695_vm13, %v7123_v47, %v13520_v2  ;;  %14937 = vst [vmem:[#allocation73_spill] sm:$0xff] %v13585_v19 }
 0x3c5   : > { %v7696_v16 = vsel %vm11082_vm2, %v7694_v25, %v7695_v4  ;;  %v8699_v56 = vunpack.c.l.b16 %v8357_v14  ;;  %v8921_v14 = vld [vmem:[#allocation3 + $0x54] sm:$0xe]  ;;  %v13580_v61 = vrot.slane %v7149_v26, 5  ;;  %v7155_v27 = vrot.slane %v7153_v30, 4 }
 0x3c6   : > { %v6215_v55 = vpop.f32.mrf.mxu2  ;;  %v7770_v60 = vunpack.c.l.b16 %v7696_v16  ;;  %v8380_v25 = vrot.slane %v8378_v8, 5  ;;  %v7369_v4 = vunpack.c.l.b16 %v7128_v15  ;;  %v9019_v2 = vrot.slane %v9017_v20, 4 }
 0x3c7   : > { %v13562_v1 = vpop.f32.mrf.mxu1  ;;  %v6216_v3 = vadd.f32 %v6215_v55, %v13203_v33  ;;  %v7769_v33 = vunpack.c.l.b16 %v7693_v0  ;;  %v8698_v55 = vunpack.c.l.b16 %v8347_v12  ;;  %v10362_v0 = vrot.slane %v8921_v14, 9 }
 0x3c8   : > { %v8381_v12 = vsel %vm10695_vm13, %v8376_v58, %v8380_v25  ;;  %v7395_v8 = vpack.c.b16 %v7370_v6, %v7369_v4  ;;  %v7142_v16 = vrot.slane %v7140_v28, 4  ;;  %v7156_v15 = vor.u32 %v7155_v27, %v13580_v61  ;;  %v6948_v6 = vld [vmem:[#allocation3 + $0x70] sm:$0xf] }
 0x3c9   : > { %v6567_v34 = vpop.f32.mrf.mxu3  ;;  %v13573_v17 = vadd.f32 %v6565_v57, %v6216_v3  ;;  %v13582_v57 = vpack.c.b16 %v7770_v60, %v7769_v33  ;;  %v8366_v3 = vrot.slane %v8365_v51, 4  ;;  %v8729_v47 = vpack.c.b16 %v8699_v56, %v8698_v55 }
 0x3ca   : > { %v7145_v60 = vrot.slane %v7143_v43, 5  ;;  %v9018_v58 = vsel %vm11082_vm2, %v10362_v0, %v9017_v20  ;;  %v9021_v33 = vsel %vm11082_vm2, %v9019_v2, %v9020_v21  ;;  %v13601_v55 = vunpack.c.l.b16 %v8381_v12  ;;  %v13614_v12 = vld [vmem:[#allocation3 + $0x74] sm:$0x1] }
 0x3cb   : > { %14936 = vst [vmem:[#allocation72_spill] sm:$0xff] %v13573_v17  ;;  %v8371_v51 = vsel %vm10695_vm13, %v8366_v3, %v13543_v45  ;;  %v8383_v28 = vshrl.u32 %v8271_v41, 16  ;;  %v8386_v43 = vshll.u32 %v8271_v41, 16  ;;  %v9105_v14 = vunpack.c.l.b16 %v9021_v33  ;;  %v13631_v33 = vpop.f32.mrf.mxu0 }
 0x3cc   : > { %v8392_v27 = vshll.u32 %v13390_v31, 16  ;;  %v8396_v25 = vshrl.u32 %v13390_v31, 16  ;;  %v7146_v20 = vor.u32 %v7145_v60, %v7142_v16  ;;  %v9104_v4 = vunpack.c.l.b16 %v9018_v58  ;;  %14940 = vst [vmem:[#allocation76_spill] sm:$0xff] %v13631_v33 }
 0x3cd   : > { %v7157_v3 = vrot.slane %v7156_v15, 4  ;;  %v13612_v2 = vunpack.c.l.b16 %v8371_v51  ;;  %v7699_v41 = vrot.slane %v6948_v6, 5  ;;  %v13616_v0 = vrot.slane %v8383_v28, 4  ;;  %v13628_v51 = vld [vmem:[#allocation3 + $0x64] sm:$0xf] }
 0x3ce   : > { %10325 = vmatmul.msk.bf16.gmra.mxu3 %vm1391_vm10, %v10475_v59  ;;  %v6217_v30 = vpop.f32.mrf.mxu2  ;;  %v13620_v21 = vpack.c.b16 %v9105_v14, %v9104_v4  ;;  %v7147_v60 = vrot.slane %v7146_v20, 4  ;;  %v7702_v58 = vrot.slane %v13614_v12, 5  ;;  %v8416_v4 = vshll.u32 %v13496_v36, 16 }
 0x3cf   : > { %v13590_v26 = vpop.f32.mrf.mxu1  ;;  %v6218_v56 = vadd.f32 %v6217_v30, %v13221_v35  ;;  %v7159_v35 = vshll.u32 %v13546_v63, 16  ;;  %v13618_v63 = vrot.slane %v8386_v43, 5  ;;  %v7701_v15 = vrot.slane %v7699_v41, 4 }
 0x3d0   : > { %14939 = vst [vmem:[#allocation75_spill] sm:$0xff] %v13620_v21 }
 0x3d1   : > { %v6570_v59 = vpop.f32.mrf.mxu3  ;;  %v13604_v45 = vadd.f32 %v6567_v34, %v6218_v56  ;;  %v7585_v34 = vld [vmem:[#allocation3 + $0x6c] sm:$0xe]  ;;  %v7161_v31 = vrot.slane %v7159_v35, 5  ;;  %v8389_v20 = vor.u32 %v13618_v63, %v13616_v0  ;;  %v10476_v0 = vld [vmem:[#allocation3 + $0x30] sm:$0xff] }
 0x3d2   : > { %10216 = vmatmul.msk.bf16.gmra.mxu1 %vm1391_vm10, %v7395_v8  ;;  %v13624_v8 = vrot.slane %v8392_v27, 5  ;;  %v10234_v56 = vrot.slane %v7585_v34, 9  ;;  %v6947_v35 = vld [vmem:[#allocation3 + $0x6c] sm:$0xf]  ;;  %v7173_v27 = vshll.u32 %v6948_v6, 16 }
 0x3d3   : > { %14938 = vst [vmem:[#allocation74_spill] sm:$0xff] %v13604_v45  ;;  %10244 = vmatmul.msk.bf16.gmra.mxu2 %vm1391_vm10, %v13261_v22  ;;  %v8398_v22 = vrot.slane %v8396_v25, 4  ;;  %v7162_v14 = vsel %vm10695_vm13, %v7157_v3, %v7161_v31  ;;  %v7177_v25 = vshrl.u32 %v6948_v6, 16  ;;  %v8274_v3 = vld [vmem:[#allocation3 + $0x48] sm:$0xf]  ;;  %v8420_v6 = vshrl.u32 %v13496_v36, 16 }
 0x3d4   : > { %10342 = vmatmul.msk.bf16.gmra.mxu0 %vm1391_vm10, %v8729_v47  ;;  %v7700_v34 = vsel %vm11082_vm2, %v10234_v56, %v7699_v41  ;;  %v7703_v47 = vsel %vm11082_vm2, %v7701_v15, %v7702_v58  ;;  %v9024_v31 = vrot.slane %v13628_v51, 5  ;;  %v7372_v63 = vunpack.c.l.b16 %v7162_v14  ;;  %v13651_v56 = vld [vmem:[#allocation3 + $0x68] sm:$0x1] }
 0x3d5   : > { %v7167_v33 = vshll.u32 %v6947_v35, 16  ;;  %v8399_v41 = vor.u32 %v8398_v22, %v13624_v8  ;;  %v13653_v15 = vrot.slane %v7173_v27, 5  ;;  %v7771_v58 = vunpack.c.l.b16 %v7700_v34 }
 0x3d6   : > { %v6220_v16 = vpop.f32.mrf.mxu2  ;;  %v8410_v36 = vshll.u32 %v8274_v3, 16  ;;  %v8422_v45 = vrot.slane %v8420_v6, 4  ;;  %v9026_v19 = vrot.slane %v9024_v31, 4  ;;  %v9027_v22 = vrot.slane %v13651_v56, 5 }
 0x3d7   : > { %v13626_v30 = vpop.f32.mrf.mxu1  ;;  %v6221_v43 = vadd.f32 %v6220_v16, %v13249_v5  ;;  %v7152_v5 = vsel %vm10695_vm13, %v7147_v60, %v13580_v61  ;;  %v7164_v16 = vshrl.u32 %v6947_v35, 16  ;;  %v8407_v60 = vshrl.u32 %v8274_v3, 16  ;;  %v8922_v35 = vld [vmem:[#allocation3 + $0x60] sm:$0xe] }
 0x3d8   : > { %v7371_v61 = vunpack.c.l.b16 %v7152_v5  ;;  %v8412_v62 = vrot.slane %v8410_v36, 5 }
 0x3d9   : > { %v6572_v28 = vpop.f32.mrf.mxu3  ;;  %v13643_v21 = vadd.f32 %v6570_v59, %v6221_v43  ;;  %v7179_v59 = vrot.slane %v7177_v25, 4  ;;  %v7772_v43 = vunpack.c.l.b16 %v7703_v47  ;;  %v7166_v34 = vrot.slane %v7164_v16, 4  ;;  %v13671_v16 = vpop.f32.mrf.mxu0 }
 0x3da   : > { %v7396_v27 = vpack.c.b16 %v7372_v63, %v7371_v61  ;;  %v8400_v47 = vrot.slane %v8399_v41, 4  ;;  %v8409_v50 = vrot.slane %v8407_v60, 4  ;;  %v8426_v63 = vshll.u32 %v13518_v24, 16 }
 0x3db   : > { %14941 = vst [vmem:[#allocation77_spill] sm:$0xff] %v13643_v21  ;;  %v13656_v21 = vrot.slane %v8416_v4, 5  ;;  %v13658_v14 = vpack.c.b16 %v7772_v43, %v7771_v58  ;;  %v7169_v4 = vrot.slane %v7167_v33, 5  ;;  %v7180_v6 = vor.u32 %v7179_v59, %v13653_v15  ;;  %v13666_v58 = vld [vmem:[#allocation3 + $0x7c] sm:$0xf] }
 0x3dc   : > { %v9028_v43 = vsel %vm11082_vm2, %v9026_v19, %v9027_v22  ;;  %v10363_v61 = vrot.slane %v8922_v35, 9  ;;  %v13677_v33 = vld [vmem:[#allocation3 + $0x80] sm:$0x1]  ;;  %v7586_v59 = vld [vmem:[#allocation3 + $0x78] sm:$0xe]  ;;  %v7706_v19 = vrot.slane %v13666_v58, 5  ;;  %v14942_v60 = vpack.c.b16 %v13601_v55, %v13612_v2 }
 0x3dd   : > { %v8423_v41 = vor.u32 %v8422_v45, %v13656_v21  ;;  %v8390_v24 = vrot.slane %v8389_v20, 4  ;;  %v7181_v35 = vrot.slane %v7180_v6, 4  ;;  %v10235_v2 = vrot.slane %v7586_v59, 9 }
 0x3de   : > { %10326 = vmatmul.msk.bf16.gmra.mxu3 %vm1391_vm10, %v10476_v0  ;;  %v6222_v25 = vpop.f32.mrf.mxu2  ;;  %v8402_v0 = vshll.u32 %v13414_v11, 16  ;;  %v9025_v22 = vsel %vm11082_vm2, %v10363_v61, %v9024_v31  ;;  %v7709_v20 = vrot.slane %v13677_v33, 5  ;;  %v9107_v6 = vunpack.c.l.b16 %v9028_v43 }
 0x3df   : > { %v13661_v17 = vpop.f32.mrf.mxu1  ;;  %v6223_v3 = vadd.f32 %v6222_v25, %v13275_v9  ;;  %v7183_v9 = vshll.u32 %v13614_v12, 16  ;;  %v7708_v12 = vrot.slane %v7706_v19, 4  ;;  %v8395_v45 = vsel %vm10695_vm13, %v8390_v24, %v13624_v8 }
 0x3e0   : > { %v8404_v36 = vrot.slane %v8402_v0, 5  ;;  %v8413_v25 = vor.u32 %v8412_v62, %v8409_v50  ;;  %v8424_v0 = vrot.slane %v8423_v41, 4  ;;  %v7707_v31 = vsel %vm11082_vm2, %v10235_v2, %v7706_v19 }
 0x3e1   : > { %v6575_v5 = vpop.f32.mrf.mxu3  ;;  %v13674_v11 = vadd.f32 %v6572_v28, %v6223_v3  ;;  %v7170_v28 = vor.u32 %v7169_v4, %v7166_v34  ;;  %v7710_v4 = vsel %vm11082_vm2, %v7708_v12, %v7709_v20  ;;  %v9106_v8 = vunpack.c.l.b16 %v9025_v22  ;;  %v13715_v20 = vpop.f32.mrf.mxu0 }
 0x3e2   : > { %10217 = vmatmul.msk.bf16.gmra.mxu1 %vm1391_vm10, %v7396_v27  ;;  %v8405_v55 = vsel %vm10695_vm13, %v8400_v47, %v8404_v36  ;;  %v7185_v27 = vrot.slane %v7183_v9, 5  ;;  %v7774_v50 = vunpack.c.l.b16 %v7710_v4  ;;  %v7197_v9 = vshll.u32 %v13666_v58, 16  ;;  %14945 = vst [vmem:[#allocation80_spill] sm:$0xff] %v13715_v20 }
 0x3e3   : > { %10245 = vmatmul.msk.bf16.gmra.mxu2 %vm1391_vm10, %v13304_v39  ;;  %v8428_v39 = vrot.slane %v8426_v63, 5  ;;  %v7171_v59 = vrot.slane %v7170_v28, 4  ;;  %v6950_v63 = vld [vmem:[#allocation3 + $0x78] sm:$0xf]  ;;  %v7201_v41 = vshrl.u32 %v13666_v58, 16  ;;  %v13706_v19 = vpack.c.b16 %v9107_v6, %v9106_v8  ;;  %v10477_v28 = vld [vmem:[#allocation3 + $0x3c] sm:$0xff] }
 0x3e4   : > { %10343 = vmatmul.msk.bf16.gmra.mxu0 %vm1391_vm10, %v14942_v60  ;;  %v7186_v62 = vsel %vm10695_vm13, %v7181_v35, %v7185_v27  ;;  %v8277_v60 = vld [vmem:[#allocation3 + $0x54] sm:$0xf]  ;;  %v7773_v36 = vunpack.c.l.b16 %v7707_v31  ;;  %v8702_v35 = vunpack.c.l.b16 %v8395_v45  ;;  %v8414_v22 = vrot.slane %v8413_v25, 4 }
 0x3e5   : > { %14943 = vst [vmem:[#allocation78_spill] sm:$0xff] %v13706_v19  ;;  %v7176_v43 = vsel %vm10695_vm13, %v7171_v59, %v13653_v15  ;;  %v7374_v12 = vunpack.c.l.b16 %v7186_v62  ;;  %v8429_v2 = vsel %vm10695_vm13, %v8424_v0, %v8428_v39  ;;  %v7188_v58 = vshrl.u32 %v6950_v63, 16 }
 0x3e6   : > { %v6225_v3 = vpop.f32.mrf.mxu2  ;;  %v7191_v27 = vshll.u32 %v6950_v63, 16  ;;  %v7373_v4 = vunpack.c.l.b16 %v7176_v43  ;;  %v13720_v15 = vrot.slane %v7197_v9, 5  ;;  %v8434_v31 = vshll.u32 %v8277_v60, 16 }
 0x3e7   : > { %v13695_v34 = vpop.f32.mrf.mxu1  ;;  %v6226_v47 = vadd.f32 %v6225_v3, %v13309_v42  ;;  %v8703_v42 = vunpack.c.l.b16 %v8405_v55  ;;  %v8431_v3 = vshrl.u32 %v8277_v60, 16  ;;  %v7203_v55 = vrot.slane %v7201_v41, 4  ;;  %v6954_v41 = vld [vmem:[#allocation3 + $0x88] sm:$0xf]  ;;  %v13734_v60 = vld [vmem:[#allocation3 + $0x70] sm:$0xf] }
 0x3e8   : > { %v6891_v45 = vadd.f32 %v13075_v49, %v13115_v54  ;;  %v8419_v0 = vsel %vm10695_vm13, %v8414_v22, %v13656_v21  ;;  %v7397_v8 = vpack.c.b16 %v7374_v12, %v7373_v4  ;;  %v8440_v59 = vshll.u32 %v13557_v52, 16  ;;  %v7587_v12 = vld [vmem:[#allocation3 + $0x84] sm:$0xe] }
 0x3e9   : > { %v6577_v61 = vpop.f32.mrf.mxu3  ;;  %v13708_v24 = vadd.f32 %v6575_v5, %v6226_v47  ;;  %v13717_v5 = vpack.c.b16 %v7774_v50, %v7773_v36  ;;  %v8731_v25 = vpack.c.b16 %v8703_v42, %v8702_v35  ;;  %v13727_v47 = vunpack.c.l.b16 %v8429_v2  ;;  %v6953_v22 = vld [vmem:[#allocation3 + $0x84] sm:$0xf] }
 0x3ea   : > { %v8444_v62 = vshrl.u32 %v13557_v52, 16  ;;  %v7190_v49 = vrot.slane %v7188_v58, 4  ;;  %v7193_v54 = vrot.slane %v7191_v27, 5  ;;  %v7204_v21 = vor.u32 %v7203_v55, %v13720_v15  ;;  %v13753_v58 = vld [vmem:[#allocation3 + $0x74] sm:$0x1] }
 0x3eb   : > { %14944 = vst [vmem:[#allocation79_spill] sm:$0xff] %v13708_v24  ;;  %v13737_v43 = vunpack.c.l.b16 %v8419_v0  ;;  %v13739_v42 = vrot.slane %v8431_v3, 4  ;;  %v13741_v36 = vrot.slane %v8434_v31, 5  ;;  %v7713_v35 = vrot.slane %v6954_v41, 5  ;;  %v8923_v27 = vld [vmem:[#allocation3 + $0x6c] sm:$0xe]  ;;  %v13763_v0 = vpop.f32.mrf.mxu0 }
 0x3ec   : > { %v8450_v2 = vshll.u32 %v13578_v18, 16  ;;  %v9031_v3 = vrot.slane %v13734_v60, 5  ;;  %v8446_v4 = vrot.slane %v8444_v62, 4  ;;  %v6892_v31 = vadd.f32 %v13107_v38, %v13138_v32  ;;  %14947 = vst [vmem:[#allocation82_spill] sm:$0xff] %v13763_v0 }
 0x3ed   : > { %v7715_v55 = vrot.slane %v7713_v35, 4 }
 0x3ee   : > { %10327 = vmatmul.msk.bf16.gmra.mxu3 %vm1391_vm10, %v10477_v28  ;;  %v6227_v6 = vpop.f32.mrf.mxu2  ;;  %v7207_v28 = vshll.u32 %v13677_v33, 16  ;;  %v7194_v33 = vor.u32 %v7193_v54, %v7190_v49  ;;  %v9033_v32 = vrot.slane %v9031_v3, 4 }
 0x3ef   : > { %v7465_v39 = vpop.f32.mrf.mxu1  ;;  %v6228_v9 = vadd.f32 %v6227_v6, %v13358_v7  ;;  %v13747_v7 = vld [vmem:[#allocation3 + $0x8c] sm:$0x1]  ;;  %v10364_v6 = vrot.slane %v8923_v27, 9 }
 0x3f0   : > { %v13731_v50 = vadd.f32 %v7465_v39, %v6891_v45  ;;  %v7205_v45 = vrot.slane %v7204_v21, 4  ;;  %v7716_v18 = vrot.slane %v13747_v7, 5  ;;  %v7209_v39 = vrot.slane %v7207_v28, 5 }
 0x3f1   : > { %v6580_v63 = vpop.f32.mrf.mxu3  ;;  %v13744_v52 = vadd.f32 %v6577_v61, %v6228_v9  ;;  %v13758_v61 = vrot.slane %v8440_v59, 5  ;;  %v9034_v9 = vrot.slane %v13753_v58, 5  ;;  %v7225_v59 = vshrl.u32 %v6954_v41, 16 }
 0x3f2   : > { %10218 = vmatmul.msk.bf16.gmra.mxu1 %vm1391_vm10, %v7397_v8  ;;  %v7221_v8 = vshll.u32 %v6954_v41, 16  ;;  %v7717_v38 = vsel %vm11082_vm2, %v7715_v55, %v7716_v18  ;;  %v7195_v28 = vrot.slane %v7194_v33, 4  ;;  %v7210_v19 = vsel %vm10695_vm13, %v7205_v45, %v7209_v39 }
 0x3f3   : > { %14946 = vst [vmem:[#allocation81_spill] sm:$0xff] %v13744_v52  ;;  %10246 = vmatmul.msk.bf16.gmra.mxu2 %vm1391_vm10, %v13315_v44  ;;  %v8447_v27 = vor.u32 %v8446_v4, %v13758_v61  ;;  %v7776_v41 = vunpack.c.l.b16 %v7717_v38  ;;  %v9035_v55 = vsel %vm11082_vm2, %v9033_v32, %v9034_v9  ;;  %v8437_v33 = vor.u32 %v13741_v36, %v13739_v42  ;;  %v8280_v4 = vld [vmem:[#allocation3 + $0x60] sm:$0xf] }
 0x3f4   : > { %10344 = vmatmul.msk.bf16.gmra.mxu0 %vm1391_vm10, %v8731_v25  ;;  %v10236_v25 = vrot.slane %v7587_v12, 9  ;;  %v7212_v45 = vshrl.u32 %v6953_v22, 16  ;;  %v7215_v39 = vshll.u32 %v6953_v22, 16  ;;  %v7376_v9 = vunpack.c.l.b16 %v7210_v19  ;;  %v14949_v22 = vld [vmem:[#allocation47_spill] sm:$0xff] }
 0x3f5   : > { %v9109_v38 = vunpack.c.l.b16 %v9035_v55  ;;  %v13796_v32 = vrot.slane %v8450_v2, 5  ;;  %v8455_v42 = vshrl.u32 %v8280_v4, 16  ;;  %v8458_v36 = vshll.u32 %v8280_v4, 16  ;;  %v13807_v4 = vpop.f32.mrf.mxu0 }
 0x3f6   : > { %v6230_v49 = vpop.f32.mrf.mxu2  ;;  %v7714_v62 = vsel %vm11082_vm2, %v10236_v25, %v7713_v35  ;;  %v9032_v35 = vsel %vm11082_vm2, %v10364_v6, %v9031_v3  ;;  %v7227_v3 = vrot.slane %v7225_v59, 4  ;;  %v13789_v6 = vld [vmem:[#allocation3 + $0x7c] sm:$0xf]  ;;  %v7214_v55 = vrot.slane %v7212_v45, 4 }
 0x3f7   : > { %v7467_v44 = vpop.f32.mrf.mxu1  ;;  %v6231_v12 = vadd.f32 %v6230_v49, %v13396_v48  ;;  %v7200_v48 = vsel %vm10695_vm13, %v7195_v28, %v13720_v15  ;;  %v7775_v18 = vunpack.c.l.b16 %v7714_v62  ;;  %v9108_v49 = vunpack.c.l.b16 %v9032_v35  ;;  %v8924_v62 = vld [vmem:[#allocation3 + $0x78] sm:$0xe] }
 0x3f8   : > { %v13770_v54 = vadd.f32 %v7467_v44, %v6892_v31  ;;  %v10478_v31 = vld [vmem:[#allocation3 + $0x48] sm:$0xff]  ;;  %v13787_v44 = vrot.slane %v7221_v8, 5  ;;  %v13794_v15 = vrot.slane %v8447_v27, 4  ;;  %v14950_v8 = vld [vmem:[#allocation37_spill] sm:$0xff]  ;;  %v7375_v59 = vunpack.c.l.b16 %v7200_v48 }
 0x3f9   : > { %v6582_v21 = vpop.f32.mrf.mxu3  ;;  %v13780_v25 = vadd.f32 %v6580_v63, %v6231_v12  ;;  %v13791_v63 = vpack.c.b16 %v7776_v41, %v7775_v18  ;;  %v6893_v12 = vadd.f32 %v14950_v8, %v14949_v22  ;;  %v13800_v28 = vpack.c.b16 %v9109_v38, %v9108_v49  ;;  %14952 = vst [vmem:[#allocation37_spill] sm:$0xff] %v13807_v4  ;;  %v14953_v49 = vld [vmem:[#allocation63_spill] sm:$0xff] }
 0x3fa   : > { %v9038_v19 = vrot.slane %v13789_v6, 5  ;;  %v7217_v18 = vrot.slane %v7215_v39, 5  ;;  %v7228_v27 = vor.u32 %v7227_v3, %v13787_v44  ;;  %v8464_v2 = vshll.u32 %v13628_v51, 16 }
 0x3fb   : > { %14948 = vst [vmem:[#allocation83_spill] sm:$0xff] %v13780_v25  ;;  %v7398_v22 = vpack.c.b16 %v7376_v9, %v7375_v59  ;;  %v10365_v8 = vrot.slane %v8924_v62, 9  ;;  %v8457_v52 = vrot.slane %v8455_v42, 4  ;;  %v8460_v45 = vrot.slane %v8458_v36, 5  ;;  %v13824_v36 = vld [vmem:[#allocation3 + $0x88] sm:$0xf] }
 0x3fc   : > { %14951 = vst [vmem:[#allocation47_spill] sm:$0xff] %v13800_v28  ;;  %v7231_v28 = vshll.u32 %v13747_v7, 16  ;;  %v8468_v39 = vshrl.u32 %v13628_v51, 16  ;;  %v14955_v59 = vpack.c.b16 %v13727_v47, %v13737_v43  ;;  %v7218_v7 = vor.u32 %v7217_v18, %v7214_v55  ;;  %v14956_v51 = vld [vmem:[#allocation61_spill] sm:$0xff] }
 0x3fd   : > { %v9039_v4 = vsel %vm11082_vm2, %v10365_v8, %v9038_v19  ;;  %v7229_v42 = vrot.slane %v7228_v27, 4  ;;  %v8453_v62 = vsel %vm10695_vm13, %v13794_v15, %v13796_v32  ;;  %v8925_v43 = vld [vmem:[#allocation3 + $0x84] sm:$0xe]  ;;  %v8474_v8 = vshll.u32 %v13651_v56, 16 }
 0x3fe   : > { %10328 = vmatmul.msk.bf16.gmra.mxu3 %vm1391_vm10, %v10478_v31  ;;  %v6232_v35 = vpop.f32.mrf.mxu2  ;;  %v13805_v31 = vld [vmem:[#allocation3 + $0x80] sm:$0x1]  ;;  %v8470_v55 = vrot.slane %v8468_v39, 4  ;;  %v9110_v18 = vunpack.c.l.b16 %v9039_v4  ;;  %v9045_v15 = vrot.slane %v13824_v36, 5  ;;  %v10366_v4 = vrot.slane %v8925_v43, 9 }
 0x3ff   : > { %v7470_v41 = vpop.f32.mrf.mxu1  ;;  %v6233_v38 = vadd.f32 %v6232_v35, %v14953_v49  ;;  %v9041_v9 = vrot.slane %v13805_v31, 5  ;;  %v13836_v35 = vld [vmem:[#allocation3 + $0x94] sm:$0xf]  ;;  %v14958_v49 = vld [vmem:[#allocation40_spill] sm:$0xff] }
 0x400   : > { %v13809_v25 = vadd.f32 %v7470_v41, %v6893_v12  ;;  %v9040_v12 = vrot.slane %v9038_v19, 4  ;;  %v13832_v19 = vrot.slane %v8464_v2, 5  ;;  %v7233_v41 = vrot.slane %v7231_v28, 5 }
 0x401   : > { %v6585_v48 = vpop.f32.mrf.mxu3  ;;  %v13815_v3 = vadd.f32 %v6582_v21, %v6233_v38  ;;  %v8438_v21 = vrot.slane %v8437_v33, 4  ;;  %v8461_v38 = vor.u32 %v8460_v45, %v8457_v52  ;;  %v6956_v45 = vld [vmem:[#allocation3 + $0x90] sm:$0xf]  ;;  %v7245_v56 = vshll.u32 %v13836_v35, 16 }
 0x402   : > { %10219 = vmatmul.msk.bf16.gmra.mxu1 %vm1391_vm10, %v7398_v22  ;;  %v9042_v47 = vsel %vm11082_vm2, %v9040_v12, %v9041_v9  ;;  %v14957_v22 = vld [vmem:[#allocation50_spill] sm:$0xff]  ;;  %v7219_v12 = vrot.slane %v7218_v7, 4  ;;  %v7234_v28 = vsel %vm10695_vm13, %v7229_v42, %v7233_v41  ;;  %v9046_v7 = vsel %vm11082_vm2, %v10366_v4, %v9045_v15  ;;  %v13857_v41 = vpop.f32.mrf.mxu0 }
 0x403   : > { %14954 = vst [vmem:[#allocation63_spill] sm:$0xff] %v13815_v3  ;;  %10247 = vmatmul.msk.bf16.gmra.mxu2 %vm1391_vm10, %v14956_v51  ;;  %v9111_v27 = vunpack.c.l.b16 %v9042_v47  ;;  %v6894_v33 = vadd.f32 %v14958_v49, %v14957_v22  ;;  %v7249_v47 = vshrl.u32 %v13836_v35, 16  ;;  %v8471_v22 = vor.u32 %v8470_v55, %v13832_v19  ;;  %v10479_v55 = vld [vmem:[#allocation3 + $0x54] sm:$0xff] }
 0x404   : > { %10345 = vmatmul.msk.bf16.gmra.mxu0 %vm1391_vm10, %v14955_v59  ;;  %v13841_v59 = vld [vmem:[#allocation3 + $0x8c] sm:$0x1]  ;;  %v9047_v49 = vrot.slane %v9045_v15, 4  ;;  %14960 = vst [vmem:[#allocation50_spill] sm:$0xff] %v13857_v41 }
 0x405   : > { %v13846_v9 = vpack.c.b16 %v9111_v27, %v9110_v18  ;;  %v9048_v42 = vrot.slane %v13841_v59, 5  ;;  %v8443_v18 = vsel %vm10695_vm13, %v8438_v21, %v13758_v61  ;;  %v8707_v27 = vunpack.c.l.b16 %v8453_v62  ;;  %v8283_v15 = vld [vmem:[#allocation3 + $0x6c] sm:$0xf]  ;;  %v14962_v62 = vld [vmem:[#allocation59_spill] sm:$0xff] }
 0x406   : > { %v6235_v2 = vpop.f32.mrf.mxu2  ;;  %v13874_v61 = vrot.slane %v8471_v22, 4  ;;  %v13876_v21 = vrot.slane %v8474_v8, 5  ;;  %v8479_v41 = vshrl.u32 %v8283_v15, 16 }
 0x407   : > { %v7472_v32 = vpop.f32.mrf.mxu1  ;;  %14959 = vst [vmem:[#allocation61_spill] sm:$0xff] %v13846_v9  ;;  %v6236_v52 = vadd.f32 %v6235_v2, %v13465_v10  ;;  %v7224_v10 = vsel %vm10695_vm13, %v7219_v12, %v13787_v44  ;;  %v7239_v2 = vshll.u32 %v6956_v45, 16  ;;  %v9049_v4 = vsel %vm11082_vm2, %v9047_v49, %v9048_v42  ;;  %v6958_v42 = vld [vmem:[#allocation3 + $0x98] sm:$0x1] }
 0x408   : > { %v13848_v39 = vadd.f32 %v7472_v32, %v6894_v33  ;;  %v7378_v33 = vunpack.c.l.b16 %v7234_v28  ;;  %v7236_v32 = vshrl.u32 %v6956_v45, 16  ;;  %v13869_v9 = vrot.slane %v7245_v56, 5  ;;  %v14963_v28 = vld [vmem:[#allocation54_spill] sm:$0xff] }
 0x409   : > { %v6587_v51 = vpop.f32.mrf.mxu3  ;;  %v13859_v43 = vadd.f32 %v6585_v48, %v6236_v52  ;;  %v7251_v48 = vrot.slane %v7249_v47, 4  ;;  %v9112_v52 = vunpack.c.l.b16 %v9046_v7  ;;  %v8706_v44 = vunpack.c.l.b16 %v8443_v18  ;;  %v7588_v18 = vld [vmem:[#allocation3 + $0x90] sm:$0xe] }
 0x40a   : > { %v13872_v12 = vrot.slane %v8461_v38, 4  ;;  %v6895_v45 = vadd.f32 %v14963_v28, %v14962_v62  ;;  %v7377_v3 = vunpack.c.l.b16 %v7224_v10  ;;  %v13886_v62 = vld [vmem:[#allocation3 + $0x94] sm:$0xf]  ;;  %v8482_v10 = vshll.u32 %v8283_v15, 16 }
 0x40b   : > { %14961 = vst [vmem:[#allocation40_spill] sm:$0xff] %v13859_v43  ;;  %v9113_v43 = vunpack.c.l.b16 %v9049_v4  ;;  %v8733_v7 = vpack.c.b16 %v8707_v27, %v8706_v44  ;;  %v7238_v4 = vrot.slane %v7236_v32, 4  ;;  %v7252_v24 = vor.u32 %v7251_v48, %v13869_v9  ;;  %v13906_v44 = vpop.f32.mrf.mxu0 }
 0x40c   : > { %v7399_v22 = vpack.c.b16 %v7378_v33, %v7377_v3  ;;  %v8488_v27 = vshll.u32 %v13734_v60, 16  ;;  %v8492_v32 = vshrl.u32 %v13734_v60, 16  ;;  %v7255_v33 = vshll.u32 %v6958_v42, 16  ;;  %14966 = vst [vmem:[#allocation84_spill] sm:$0xff] %v13906_v44 }
 0x40d   : > { %v13880_v49 = vpack.c.b16 %v9113_v43, %v9112_v52  ;;  %v8467_v43 = vsel %vm10695_vm13, %v13872_v12, %v13832_v19  ;;  %v8477_v19 = vsel %vm10695_vm13, %v13874_v61, %v13876_v21  ;;  %v8481_v15 = vrot.slane %v8479_v41, 4  ;;  %v13903_v52 = vld [vmem:[#allocation3 + $0x98] sm:$0x1] }
 0x40e   : > { %10329 = vmatmul.msk.bf16.gmra.mxu3 %vm1391_vm10, %v10479_v55  ;;  %v6237_v47 = vpop.f32.mrf.mxu2  ;;  %v7241_v55 = vrot.slane %v7239_v2, 5  ;;  %v7720_v2 = vrot.slane %v13836_v35, 5  ;;  %v9052_v60 = vrot.slane %v13886_v62, 5  ;;  %v7723_v28 = vrot.slane %v6958_v42, 5 }
 0x40f   : > { %14964 = vst [vmem:[#allocation59_spill] sm:$0xff] %v13880_v49  ;;  %v7475_v56 = vpop.f32.mrf.mxu1  ;;  %v6238_v8 = vadd.f32 %v6237_v47, %v13501_v23  ;;  %v10237_v23 = vrot.slane %v7588_v18, 9  ;;  %v14968_v47 = vld [vmem:[#allocation53_spill] sm:$0xff]  ;;  %v8484_v41 = vrot.slane %v8482_v10, 5  ;;  %v13914_v21 = vrot.slane %v8488_v27, 5 }
 0x410   : > { %v13882_v38 = vadd.f32 %v7475_v56, %v6895_v45  ;;  %v7242_v48 = vor.u32 %v7241_v55, %v7238_v4  ;;  %v7722_v12 = vrot.slane %v7720_v2, 4  ;;  %v8926_v45 = vld [vmem:[#allocation3 + $0x90] sm:$0xe]  ;;  %v14967_v56 = vld [vmem:[#allocation9_spill] sm:$0xff]  ;;  %v7257_v4 = vrot.slane %v7255_v33, 5 }
 0x411   : > { %v6590_v0 = vpop.f32.mrf.mxu3  ;;  %v13895_v3 = vadd.f32 %v6587_v51, %v6238_v8  ;;  %v7253_v51 = vrot.slane %v7252_v24, 4  ;;  %v7721_v35 = vsel %vm11082_vm2, %v10237_v23, %v7720_v2  ;;  %v6896_v61 = vadd.f32 %v14968_v47, %v14967_v56  ;;  %v13916_v55 = vld [vmem:[#allocation3 + $0xa0] sm:$0xf] }
 0x412   : > { %10220 = vmatmul.msk.bf16.gmra.mxu1 %vm1391_vm10, %v7399_v22  ;;  %v9054_v24 = vrot.slane %v9052_v60, 4  ;;  %v9055_v18 = vrot.slane %v13903_v52, 5  ;;  %v7243_v42 = vrot.slane %v7242_v48, 4  ;;  %v7777_v23 = vunpack.c.l.b16 %v7721_v35 }
 0x413   : > { %14965 = vst [vmem:[#allocation54_spill] sm:$0xff] %v13895_v3  ;;  %10248 = vmatmul.msk.bf16.gmra.mxu2 %vm1391_vm10, %v13456_v40  ;;  %v7724_v40 = vsel %vm11082_vm2, %v7722_v12, %v7723_v28  ;;  %v10367_v49 = vrot.slane %v8926_v45, 9  ;;  %v6959_v12 = vld [vmem:[#allocation3 + $0x9c] sm:$0xf]  ;;  %v7269_v28 = vshll.u32 %v13916_v55, 16  ;;  %v7273_v47 = vshrl.u32 %v13916_v55, 16 }
 0x414   : > { %10346 = vmatmul.msk.bf16.gmra.mxu0 %vm1391_vm10, %v8733_v7  ;;  %v8494_v7 = vrot.slane %v8492_v32, 4  ;;  %v7778_v2 = vunpack.c.l.b16 %v7724_v40  ;;  %v7258_v32 = vsel %vm10695_vm13, %v7253_v51, %v7257_v4  ;;  %v9056_v33 = vsel %vm11082_vm2, %v9054_v24, %v9055_v18  ;;  %v10480_v4 = vld [vmem:[#allocation3 + $0x60] sm:$0xff] }
 0x415   : > { %v9053_v35 = vsel %vm11082_vm2, %v10367_v49, %v9052_v60  ;;  %v8485_v51 = vor.u32 %v8484_v41, %v8481_v15  ;;  %v7380_v40 = vunpack.c.l.b16 %v7258_v32  ;;  %v8708_v24 = vunpack.c.l.b16 %v8467_v43  ;;  %v13944_v15 = vpop.f32.mrf.mxu0  ;;  %v14971_v41 = vld [vmem:[#allocation17_spill] sm:$0xff] }
 0x416   : > { %v6240_v8 = vpop.f32.mrf.mxu2  ;;  %v13930_v48 = vpack.c.b16 %v7778_v2, %v7777_v23  ;;  %v8498_v18 = vshll.u32 %v13753_v58, 16  ;;  %v8286_v23 = vld [vmem:[#allocation3 + $0x78] sm:$0xf]  ;;  %v9114_v2 = vunpack.c.l.b16 %v9053_v35  ;;  %v9115_v3 = vunpack.c.l.b16 %v9056_v33  ;;  %14970 = vst [vmem:[#allocation53_spill] sm:$0xff] %v13944_v15 }
 0x417   : > { %v7477_v22 = vpop.f32.mrf.mxu1  ;;  %v6241_v27 = vadd.f32 %v6240_v8, %v13531_v46  ;;  %v7248_v46 = vsel %vm10695_vm13, %v7243_v42, %v13869_v9  ;;  %v7263_v8 = vshll.u32 %v6959_v12, 16  ;;  %v8709_v49 = vunpack.c.l.b16 %v8477_v19 }
 0x418   : > { %v13921_v56 = vadd.f32 %v7477_v22, %v6896_v61  ;;  %v8495_v61 = vor.u32 %v8494_v7, %v13914_v21  ;;  %v7260_v22 = vshrl.u32 %v6959_v12, 16  ;;  %v13942_v60 = vrot.slane %v7269_v28, 5  ;;  %v14972_v7 = vld [vmem:[#allocation12_spill] sm:$0xff] }
 0x419   : > { %v6592_v10 = vpop.f32.mrf.mxu3  ;;  %v13934_v45 = vadd.f32 %v6590_v0, %v6241_v27  ;;  %v7379_v0 = vunpack.c.l.b16 %v7248_v46  ;;  %v7275_v9 = vrot.slane %v7273_v47, 4  ;;  %v6897_v42 = vadd.f32 %v14972_v7, %v14971_v41  ;;  %v6961_v47 = vld [vmem:[#allocation3 + $0xa4] sm:$0x1]  ;;  %v14975_v41 = vld [vmem:[#allocation6_spill] sm:$0xff] }
 0x41a   : > { %v8486_v43 = vrot.slane %v8485_v51, 4  ;;  %v8496_v27 = vrot.slane %v8495_v61, 4  ;;  %v13948_v58 = vpack.c.b16 %v9115_v3, %v9114_v2  ;;  %v8500_v33 = vrot.slane %v8498_v18, 5  ;;  %v13974_v7 = vld [vmem:[#allocation3 + $0xac] sm:$0xf] }
 0x41b   : > { %14969 = vst [vmem:[#allocation9_spill] sm:$0xff] %v13934_v45  ;;  %v7400_v12 = vpack.c.b16 %v7380_v40, %v7379_v0  ;;  %v8503_v45 = vshrl.u32 %v8286_v23, 16  ;;  %v7262_v15 = vrot.slane %v7260_v22, 4  ;;  %v7265_v44 = vrot.slane %v7263_v8, 5 }
 0x41c   : > { %14973 = vst [vmem:[#allocation17_spill] sm:$0xff] %v13948_v58  ;;  %v8734_v20 = vpack.c.b16 %v8709_v49, %v8708_v24  ;;  %v7276_v51 = vor.u32 %v7275_v9, %v13942_v60  ;;  %v8491_v3 = vsel %vm10695_vm13, %v8486_v43, %v13914_v21  ;;  %v8501_v40 = vsel %vm10695_vm13, %v8496_v27, %v8500_v33  ;;  %v14974_v9 = vld [vmem:[#allocation14_spill] sm:$0xff] }
 0x41d   : > { %v8512_v18 = vshll.u32 %v13789_v6, 16  ;;  %v7279_v24 = vshll.u32 %v6961_v47, 16  ;;  %v8505_v22 = vrot.slane %v8503_v45, 4  ;;  %v7266_v21 = vor.u32 %v7265_v44, %v7262_v15  ;;  %v13978_v15 = vld [vmem:[#allocation3 + $0xa0] sm:$0xf] }
 0x41e   : > { %10330 = vmatmul.msk.bf16.gmra.mxu3 %vm1391_vm10, %v10480_v4  ;;  %v6242_v35 = vpop.f32.mrf.mxu2  ;;  %v8506_v4 = vshll.u32 %v8286_v23, 16  ;;  %v7589_v23 = vld [vmem:[#allocation3 + $0x9c] sm:$0xe]  ;;  %v7277_v2 = vrot.slane %v7276_v51, 4  ;;  %v13968_v0 = vunpack.c.l.b16 %v8491_v3  ;;  %v13970_v49 = vunpack.c.l.b16 %v8501_v40  ;;  %v6962_v51 = vld [vmem:[#allocation3 + $0xa8] sm:$0xf] }
 0x41f   : > { %v7480_v32 = vpop.f32.mrf.mxu1  ;;  %v6243_v28 = vadd.f32 %v6242_v35, %v13562_v1  ;;  %v8516_v1 = vshrl.u32 %v13789_v6, 16  ;;  %v6898_v6 = vadd.f32 %v14975_v41, %v14974_v9  ;;  %v14000_v9 = vld [vmem:[#allocation3 + $0xa4] sm:$0x1] }
 0x420   : > { %v13950_v46 = vadd.f32 %v7480_v32, %v6897_v42  ;;  %v8508_v8 = vrot.slane %v8506_v4, 5  ;;  %v10238_v42 = vrot.slane %v7589_v23, 9  ;;  %v7730_v32 = vrot.slane %v6961_v47, 5  ;;  %v8289_v47 = vld [vmem:[#allocation3 + $0x84] sm:$0xf] }
 0x421   : > { %v6595_v19 = vpop.f32.mrf.mxu3  ;;  %v13958_v61 = vadd.f32 %v6592_v10, %v6243_v28  ;;  %v7727_v10 = vrot.slane %v13916_v55, 5  ;;  %v8518_v45 = vrot.slane %v8516_v1, 4  ;;  %v7267_v28 = vrot.slane %v7266_v21, 4  ;;  %v10481_v21 = vld [vmem:[#allocation3 + $0x6c] sm:$0xff] }
 0x422   : > { %10221 = vmatmul.msk.bf16.gmra.mxu1 %vm1391_vm10, %v7400_v12  ;;  %v8509_v44 = vor.u32 %v8508_v8, %v8505_v22  ;;  %v13980_v12 = vpop.f32.mrf.mxu0  ;;  %v7297_v1 = vshrl.u32 %v13974_v7, 16  ;;  %v14775_v23 = vrot.slane %v13978_v15, 5  ;;  %v15026_v13 = vld [vmem:[#allocation9_spill] sm:$0xff] }
 0x423   : > { %10249 = vmatmul.msk.bf16.gmra.mxu2 %vm1391_vm10, %v13522_v29  ;;  %v7281_v29 = vrot.slane %v7279_v24, 5  ;;  %v7729_v55 = vrot.slane %v7727_v10, 4  ;;  %v7728_v3 = vsel %vm11082_vm2, %v10238_v42, %v7727_v10  ;;  %v7284_v10 = vshrl.u32 %v6962_v51, 16 }
 0x424   : > { %10347 = vmatmul.msk.bf16.gmra.mxu0 %vm1391_vm10, %v8734_v20  ;;  %v13976_v20 = vrot.slane %v8512_v18, 5  ;;  %v7293_v18 = vshll.u32 %v13974_v7, 16  ;;  %v7779_v41 = vunpack.c.l.b16 %v7728_v3  ;;  %v9061_v3 = vrot.slane %v14775_v23, 4 }
 0x425   : > { %v7282_v40 = vsel %vm10695_vm13, %v7277_v2, %v7281_v29  ;;  %v7731_v24 = vsel %vm11082_vm2, %v7729_v55, %v7730_v32  ;;  %v7287_v2 = vshll.u32 %v6962_v51, 16  ;;  %v8530_v29 = vshll.u32 %v8289_v47, 16  ;;  %v14976_v32 = vld [vmem:[#allocation22_spill] sm:$0xff] }
 0x426   : > { %v6245_v27 = vpop.f32.mrf.mxu2  ;;  %v8519_v8 = vor.u32 %v8518_v45, %v13976_v20  ;;  %v7382_v42 = vunpack.c.l.b16 %v7282_v40  ;;  %v7299_v45 = vrot.slane %v7297_v1, 4  ;;  %v7286_v40 = vrot.slane %v7284_v10, 4 }
 0x427   : > { %v7482_v43 = vpop.f32.mrf.mxu1  ;;  %v6246_v4 = vadd.f32 %v6245_v27, %v13590_v26  ;;  %v7272_v26 = vsel %vm10695_vm13, %v7267_v28, %v13942_v60  ;;  %v8527_v27 = vshrl.u32 %v8289_v47, 16  ;;  %v14006_v60 = vrot.slane %v7293_v18, 5 }
 0x428   : > { %v13982_v35 = vadd.f32 %v7482_v43, %v6898_v6  ;;  %v7780_v6 = vunpack.c.l.b16 %v7731_v24  ;;  %v8522_v43 = vshll.u32 %v13805_v31, 16  ;;  %v7381_v51 = vunpack.c.l.b16 %v7272_v26  ;;  %v6964_v26 = vld [vmem:[#allocation3 + $0xb0] sm:$0x1] }
 0x429   : > { %v6597_v33 = vpop.f32.mrf.mxu3  ;;  %v13993_v22 = vadd.f32 %v6595_v19, %v6246_v4  ;;  %v8735_v19 = vpack.c.b16 %v13970_v49, %v13968_v0  ;;  %v14977_v4 = vld [vmem:[#allocation18_spill] sm:$0xff]  ;;  %v9062_v0 = vrot.slane %v14000_v9, 5  ;;  %v7289_v24 = vrot.slane %v7287_v2, 5 }
 0x42a   : > { %v14008_v55 = vpack.c.b16 %v7780_v6, %v7779_v41  ;;  %v6899_v28 = vadd.f32 %v14977_v4, %v14976_v32  ;;  %v14017_v18 = vrot.slane %v8519_v8, 4  ;;  %v7401_v47 = vpack.c.b16 %v7382_v42, %v7381_v51  ;;  %v7590_v2 = vld [vmem:[#allocation3 + $0xa8] sm:$0xe]  ;;  %v14028_v8 = vpop.f32.mrf.mxu0 }
 0x42b   : > { %v14024_v32 = vsel %vm11082_vm2, %v9061_v3, %v9062_v0  ;;  %v7300_v4 = vor.u32 %v7299_v45, %v14006_v60  ;;  %v8529_v23 = vrot.slane %v8527_v27, 4  ;;  %v8532_v10 = vrot.slane %v8530_v29, 5  ;;  %v8927_v3 = vld [vmem:[#allocation3 + $0x9c] sm:$0xe]  ;;  %v14045_v0 = vld [vmem:[#allocation3 + $0xb8] sm:$0xf] }
 0x42c   : > { %v8540_v51 = vshrl.u32 %v13824_v36, 16  ;;  %v7290_v45 = vor.u32 %v7289_v24, %v7286_v40  ;;  %v7303_v27 = vshll.u32 %v6964_v26, 16  ;;  %v14980_v40 = vld [vmem:[#allocation60_spill] sm:$0xff]  ;;  %v14981_v24 = vld [vmem:[#allocation21_spill] sm:$0xff] }
 0x42e   : > { %10331 = vmatmul.msk.bf16.gmra.mxu3 %vm1391_vm10, %v10481_v21  ;;  %v6247_v31 = vpop.f32.mrf.mxu2  ;;  %v14015_v21 = vrot.slane %v8509_v44, 4  ;;  %v7734_v44 = vrot.slane %v13974_v7, 5 }
 0x42f   : > { %v7485_v49 = vpop.f32.mrf.mxu1  ;;  %v6248_v6 = vadd.f32 %v6247_v31, %v13626_v30  ;;  %v8536_v30 = vshll.u32 %v13824_v36, 16  ;;  %v7301_v36 = vrot.slane %v7300_v4, 4  ;;  %v10368_v31 = vrot.slane %v8927_v3, 9 }
 0x430   : > { %v14019_v1 = vadd.f32 %v7485_v49, %v6899_v28  ;;  %v8524_v28 = vrot.slane %v8522_v43, 5  ;;  %v8515_v7 = vsel %vm10695_vm13, %v14015_v21, %v13976_v20  ;;  %v10239_v43 = vrot.slane %v7590_v2, 9 }
 0x431   : > { %v6600_v41 = vpop.f32.mrf.mxu3  ;;  %v14031_v42 = vadd.f32 %v6597_v33, %v6248_v6  ;;  %v7736_v29 = vrot.slane %v7734_v44, 4  ;;  %v7737_v49 = vrot.slane %v6964_v26, 5  ;;  %v8542_v6 = vrot.slane %v8540_v51, 4  ;;  %v6965_v51 = vld [vmem:[#allocation3 + $0xb4] sm:$0xf] }
 0x432   : > { %14978 = vst [vmem:[#allocation12_spill] sm:$0xff] %v14019_v1  ;;  %10222 = vmatmul.msk.bf16.gmra.mxu1 %vm1391_vm10, %v7401_v47  ;;  %v8525_v33 = vsel %vm10695_vm13, %v14017_v18, %v8524_v28  ;;  %v14049_v47 = vrot.slane %v8536_v30, 5  ;;  %v7735_v20 = vsel %vm11082_vm2, %v10239_v43, %v7734_v44  ;;  %v7291_v18 = vrot.slane %v7290_v45, 4 }
 0x433   : > { %14979 = vst [vmem:[#allocation14_spill] sm:$0xff] %v14031_v42  ;;  %10250 = vmatmul.msk.bf16.gmra.mxu2 %vm1391_vm10, %v13582_v57  ;;  %v6900_v57 = vadd.f32 %v14981_v24, %v14980_v40  ;;  %v7305_v2 = vrot.slane %v7303_v27, 5  ;;  %v7738_v4 = vsel %vm11082_vm2, %v7736_v29, %v7737_v49  ;;  %v7317_v44 = vshll.u32 %v14045_v0, 16 }
 0x434   : > { %10348 = vmatmul.msk.bf16.gmra.mxu0 %vm1391_vm10, %v8735_v19  ;;  %v8533_v19 = vor.u32 %v8532_v10, %v8529_v23  ;;  %v14982_v23 = vrot.slane %v13978_v15, 5  ;;  %v7321_v3 = vshrl.u32 %v14045_v0, 16  ;;  %v7781_v27 = vunpack.c.l.b16 %v7735_v20  ;;  %v14075_v20 = vpop.f32.mrf.mxu0 }
 0x435   : > { %v7306_v45 = vsel %vm10695_vm13, %v7301_v36, %v7305_v2  ;;  %v7782_v43 = vunpack.c.l.b16 %v7738_v4  ;;  %v9117_v29 = vunpack.c.l.b16 %v14024_v32  ;;  %v7308_v24 = vshrl.u32 %v6965_v51, 16 }
 0x436   : > { %v6250_v1 = vpop.f32.mrf.mxu2  ;;  %v9060_v26 = vsel %vm11082_vm2, %v10368_v31, %v14982_v23  ;;  %v7296_v31 = vsel %vm10695_vm13, %v7291_v18, %v14006_v60  ;;  %v8534_v40 = vrot.slane %v8533_v19, 4  ;;  %v7384_v2 = vunpack.c.l.b16 %v7306_v45 }
 0x437   : > { %v7487_v21 = vpop.f32.mrf.mxu1  ;;  %v6251_v30 = vadd.f32 %v6250_v1, %v13661_v17  ;;  %v8543_v17 = vor.u32 %v8542_v6, %v14049_v47  ;;  %v10482_v1 = vld [vmem:[#allocation3 + $0x78] sm:$0xff]  ;;  %v14073_v23 = vpack.c.b16 %v7782_v43, %v7781_v27  ;;  %v9116_v36 = vunpack.c.l.b16 %v9060_v26  ;;  %v14986_v26 = vld [vmem:[#allocation25_spill] sm:$0xff] }
 0x438   : > { %v14059_v10 = vadd.f32 %v7487_v21, %v6900_v57  ;;  %v7311_v57 = vshll.u32 %v6965_v51, 16  ;;  %v8292_v21 = vld [vmem:[#allocation3 + $0x90] sm:$0xf]  ;;  %v8712_v32 = vunpack.c.l.b16 %v8515_v7  ;;  %v7323_v4 = vrot.slane %v7321_v3, 4  ;;  %v14987_v51 = vld [vmem:[#allocation13_spill] sm:$0xff] }
 0x439   : > { %v6602_v28 = vpop.f32.mrf.mxu3  ;;  %v14067_v49 = vadd.f32 %v6600_v41, %v6251_v30  ;;  %v14077_v41 = vrot.slane %v7317_v44, 5  ;;  %v14079_v30 = vld [vmem:[#allocation3 + $0xac] sm:$0xf]  ;;  %v8713_v60 = vunpack.c.l.b16 %v8525_v33  ;;  %v8539_v19 = vsel %vm10695_vm13, %v8534_v40, %v14049_v47 }
 0x43a   : > { %14983 = vst [vmem:[#allocation6_spill] sm:$0xff] %v14059_v10  ;;  %v8546_v6 = vshll.u32 %v13841_v59, 16  ;;  %v14086_v18 = vpack.c.b16 %v9117_v29, %v9116_v36  ;;  %v6901_v45 = vadd.f32 %v14987_v51, %v14986_v26  ;;  %v7383_v7 = vunpack.c.l.b16 %v7296_v31  ;;  %v6967_v10 = vld [vmem:[#allocation3 + $0xbc] sm:$0x1]  ;;  %v14101_v51 = vld [vmem:[#allocation3 + $0xb0] sm:$0x1] }
 0x43b   : > { %14984 = vst [vmem:[#allocation22_spill] sm:$0xff] %v14067_v49  ;;  %v8544_v44 = vrot.slane %v8543_v17, 4  ;;  %v8551_v27 = vshrl.u32 %v8292_v21, 16  ;;  %v7310_v58 = vrot.slane %v7308_v24, 4  ;;  %v8554_v33 = vshll.u32 %v8292_v21, 16 }
 0x43c   : > { %14985 = vst [vmem:[#allocation18_spill] sm:$0xff] %v14086_v18  ;;  %v9066_v49 = vrot.slane %v14079_v30, 5  ;;  %v7402_v47 = vpack.c.b16 %v7384_v2, %v7383_v7  ;;  %v7324_v40 = vor.u32 %v7323_v4, %v14077_v41  ;;  %v8736_v36 = vpack.c.b16 %v8713_v60, %v8712_v32  ;;  %v7591_v17 = vld [vmem:[#allocation3 + $0xb4] sm:$0xe]  ;;  %v8928_v4 = vld [vmem:[#allocation3 + $0xa8] sm:$0xe] }
 0x43d   : > { %v8548_v31 = vrot.slane %v8546_v6, 5  ;;  %v7741_v26 = vrot.slane %v14045_v0, 5  ;;  %v14099_v21 = vunpack.c.l.b16 %v8539_v19  ;;  %v14106_v32 = vrot.slane %v8551_v27, 4  ;;  %v14989_v27 = vld [vmem:[#allocation33_spill] sm:$0xff] }
 0x43e   : > { %10332 = vmatmul.msk.bf16.gmra.mxu3 %vm1391_vm10, %v10482_v1  ;;  %v6252_v43 = vpop.f32.mrf.mxu2  ;;  %v7313_v1 = vrot.slane %v7311_v57, 5  ;;  %v7327_v57 = vshll.u32 %v6967_v10, 16  ;;  %v9068_v60 = vrot.slane %v9066_v49, 4  ;;  %v7325_v0 = vrot.slane %v7324_v40, 4 }
 0x43f   : > { %v7490_v3 = vpop.f32.mrf.mxu1  ;;  %v6253_v29 = vadd.f32 %v6252_v43, %v13695_v34  ;;  %v8549_v34 = vsel %vm10695_vm13, %v8544_v44, %v8548_v31  ;;  %v10240_v19 = vrot.slane %v7591_v17, 9  ;;  %v7743_v6 = vrot.slane %v7741_v26, 4  ;;  %v14115_v44 = vpop.f32.mrf.mxu0  ;;  %v14990_v43 = vld [vmem:[#allocation32_spill] sm:$0xff] }
 0x440   : > { %v14091_v42 = vadd.f32 %v7490_v3, %v6901_v45  ;;  %v7314_v2 = vor.u32 %v7313_v1, %v7310_v58  ;;  %v8560_v45 = vshll.u32 %v13886_v62, 16  ;;  %v8564_v7 = vshrl.u32 %v13886_v62, 16 }
 0x441   : > { %v8150_v59 = vpop.f32.mrf.mxu3  ;;  %v14097_v24 = vadd.f32 %v6602_v28, %v6253_v29  ;;  %v14110_v28 = vrot.slane %v8554_v33, 5  ;;  %v7744_v58 = vrot.slane %v6967_v10, 5  ;;  %v9069_v3 = vrot.slane %v14101_v51, 5  ;;  %v14119_v29 = vld [vmem:[#allocation3 + $0xc4] sm:$0xf] }
 0x442   : > { %14988 = vst [vmem:[#allocation60_spill] sm:$0xff] %v14091_v42  ;;  %10223 = vmatmul.msk.bf16.gmra.mxu1 %vm1391_vm10, %v7402_v47  ;;  %v6902_v1 = vadd.f32 %v14990_v43, %v14989_v27  ;;  %v7329_v47 = vrot.slane %v7327_v57, 5  ;;  %v10369_v33 = vrot.slane %v8928_v4, 9  ;;  %v7315_v31 = vrot.slane %v7314_v2, 4  ;;  %v6968_v4 = vld [vmem:[#allocation3 + $0xc0] sm:$0xf] }
 0x443   : > { %10251 = vmatmul.msk.bf16.gmra.mxu2 %vm1391_vm10, %v13658_v14  ;;  %v7742_v14 = vsel %vm11082_vm2, %v10240_v19, %v7741_v26  ;;  %v14123_v17 = vunpack.c.l.b16 %v8549_v34  ;;  %v7745_v62 = vsel %vm11082_vm2, %v7743_v6, %v7744_v58  ;;  %v9070_v10 = vsel %vm11082_vm2, %v9068_v60, %v9069_v3  ;;  %v14138_v6 = vld [vmem:[#allocation3 + $0xb8] sm:$0xf] }
 0x444   : > { %10349 = vmatmul.msk.bf16.gmra.mxu0 %vm1391_vm10, %v8736_v36  ;;  %v7330_v26 = vsel %vm10695_vm13, %v7325_v0, %v7329_v47  ;;  %v9067_v2 = vsel %vm11082_vm2, %v10369_v33, %v9066_v49  ;;  %v7341_v34 = vshll.u32 %v14119_v29, 16  ;;  %v7345_v19 = vshrl.u32 %v14119_v29, 16  ;;  %v10483_v47 = vld [vmem:[#allocation3 + $0x84] sm:$0xff] }
 0x445   : > { %v7783_v58 = vunpack.c.l.b16 %v7742_v14  ;;  %v7784_v60 = vunpack.c.l.b16 %v7745_v62  ;;  %v14144_v43 = vrot.slane %v8560_v45, 5  ;;  %v8566_v0 = vrot.slane %v8564_v7, 4 }
 0x446   : > { %v7863_v36 = vpop.f32.mrf.mxu2  ;;  %v7320_v49 = vsel %vm10695_vm13, %v7315_v31, %v14077_v41  ;;  %v7332_v33 = vshrl.u32 %v6968_v4, 16  ;;  %v9118_v62 = vunpack.c.l.b16 %v9067_v2  ;;  %v14157_v7 = vrot.slane %v7341_v34, 5 }
 0x447   : > { %v7492_v40 = vpop.f32.mrf.mxu1  ;;  %v7943_v27 = vadd.f32 %v7863_v36, %v13731_v50  ;;  %v8557_v50 = vor.u32 %v14110_v28, %v14106_v32  ;;  %v14149_v36 = vld [vmem:[#allocation3 + $0xbc] sm:$0x1]  ;;  %v14151_v14 = vpack.c.b16 %v7784_v60, %v7783_v58  ;;  %v9073_v32 = vrot.slane %v14138_v6, 5 }
 0x448   : > { %v14129_v42 = vadd.f32 %v7492_v40, %v6902_v1  ;;  %v8929_v1 = vld [vmem:[#allocation3 + $0xb4] sm:$0xe]  ;;  %v7335_v40 = vshll.u32 %v6968_v4, 16  ;;  %v14993_v28 = vld [vmem:[#allocation36_spill] sm:$0xff]  ;;  %v7385_v31 = vunpack.c.l.b16 %v7320_v49  ;;  %v9076_v58 = vrot.slane %v14149_v36, 5 }
 0x449   : > { %v8152_v57 = vpop.f32.mrf.mxu3  ;;  %v14140_v3 = vadd.f32 %v8150_v59, %v7943_v27  ;;  %v7386_v59 = vunpack.c.l.b16 %v7330_v26  ;;  %v9119_v27 = vunpack.c.l.b16 %v9070_v10  ;;  %v6903_v45 = vadd.f32 %v14993_v28, %v13447_v53  ;;  %v7592_v53 = vld [vmem:[#allocation3 + $0xc0] sm:$0xe] }
 0x44a   : > { %14991 = vst [vmem:[#allocation21_spill] sm:$0xff] %v14129_v42  ;;  %v7347_v42 = vrot.slane %v7345_v19, 4  ;;  %v10370_v41 = vrot.slane %v8929_v1, 9  ;;  %v9075_v18 = vrot.slane %v9073_v32, 4  ;;  %v8737_v10 = vpack.c.b16 %v14123_v17, %v14099_v21 }
 0x44b   : > { %14992 = vst [vmem:[#allocation25_spill] sm:$0xff] %v14140_v3  ;;  %v14159_v4 = vpack.c.b16 %v9119_v27, %v9118_v62  ;;  %v7334_v60 = vrot.slane %v7332_v33, 4  ;;  %v7337_v3 = vrot.slane %v7335_v40, 5  ;;  %v7403_v1 = vpack.c.b16 %v7386_v59, %v7385_v31  ;;  %v6970_v27 = vld [vmem:[#allocation3 + $0xc8] sm:$0x1] }
 0x44c   : > { %v9074_v34 = vsel %vm11082_vm2, %v10370_v41, %v9073_v32  ;;  %v9077_v28 = vsel %vm11082_vm2, %v9075_v18, %v9076_v58  ;;  %v7348_v21 = vor.u32 %v7347_v42, %v14157_v7  ;;  %v8567_v17 = vor.u32 %v8566_v0, %v14144_v43  ;;  %v14176_v40 = vld [vmem:[#allocation3 + $0xc4] sm:$0xf]  ;;  %v14183_v42 = vld [vmem:[#allocation3 + $0xc8] sm:$0x1] }
 0x44d   : > { %14994 = vst [vmem:[#allocation13_spill] sm:$0xff] %v14159_v4  ;;  %v8930_v4 = vld [vmem:[#allocation3 + $0xc0] sm:$0xe]  ;;  %v8570_v33 = vshll.u32 %v13903_v52, 16  ;;  %v7748_v32 = vrot.slane %v14119_v29, 5  ;;  %v9121_v41 = vunpack.c.l.b16 %v9077_v28  ;;  %v7338_v18 = vor.u32 %v7337_v3, %v7334_v60 }
 0x44e   : > { %10333 = vmatmul.msk.bf16.gmra.mxu3 %vm1391_vm10, %v10483_v47  ;;  %v7865_v2 = vpop.f32.mrf.mxu2  ;;  %v14166_v47 = vpop.f32.mrf.mxu0  ;;  %v7351_v31 = vshll.u32 %v6970_v27, 16  ;;  %v7751_v0 = vrot.slane %v6970_v27, 5  ;;  %v10371_v58 = vrot.slane %v8930_v4, 9  ;;  %v7349_v3 = vrot.slane %v7348_v21, 4 }
 0x44f   : > { %v7495_v26 = vpop.f32.mrf.mxu1  ;;  %v7944_v62 = vadd.f32 %v7865_v2, %v13770_v54  ;;  %v10241_v54 = vrot.slane %v7592_v53, 9  ;;  %v7750_v29 = vrot.slane %v7748_v32, 4  ;;  %v14996_v2 = vld [vmem:[#allocation66_spill] sm:$0xff]  ;;  %v14997_v53 = vld [vmem:[#allocation65_spill] sm:$0xff]  ;;  %v8558_v60 = vrot.slane %v8557_v50, 4 }
 0x450   : > { %v14168_v19 = vadd.f32 %v7495_v26, %v6903_v45  ;;  %v9120_v45 = vunpack.c.l.b16 %v9074_v34  ;;  %v9080_v26 = vrot.slane %v14176_v40, 5  ;;  %v8568_v34 = vrot.slane %v8567_v17, 4 }
 0x451   : > { %v8155_v49 = vpop.f32.mrf.mxu3  ;;  %v14180_v59 = vadd.f32 %v8152_v57, %v7944_v62  ;;  %v7749_v52 = vsel %vm11082_vm2, %v10241_v54, %v7748_v32  ;;  %v7752_v4 = vsel %vm11082_vm2, %v7750_v29, %v7751_v0  ;;  %v9083_v62 = vrot.slane %v14183_v42, 5 }
 0x452   : > { %14995 = vst [vmem:[#allocation33_spill] sm:$0xff] %v14168_v19  ;;  %10224 = vmatmul.msk.bf16.gmra.mxu1 %vm1391_vm10, %v7403_v1  ;;  %v14189_v57 = vpack.c.b16 %v9121_v41, %v9120_v45  ;;  %v9082_v1 = vrot.slane %v9080_v26, 4  ;;  %v7353_v32 = vrot.slane %v7351_v31, 5  ;;  %v8572_v54 = vrot.slane %v8570_v33, 5 }
 0x453   : > { %10252 = vmatmul.msk.bf16.gmra.mxu2 %vm1391_vm10, %v13717_v5  ;;  %v9081_v5 = vsel %vm11082_vm2, %v10371_v58, %v9080_v26  ;;  %v7785_v45 = vunpack.c.l.b16 %v7749_v52  ;;  %v7786_v41 = vunpack.c.l.b16 %v7752_v4  ;;  %v7339_v17 = vrot.slane %v7338_v18, 4 }
 0x454   : > { %10350 = vmatmul.msk.bf16.gmra.mxu0 %vm1391_vm10, %v8737_v10  ;;  %v6904_v10 = vadd.f32 %v14997_v53, %v14996_v2  ;;  %v9084_v0 = vsel %vm11082_vm2, %v9082_v1, %v9083_v62  ;;  %v7354_v58 = vsel %vm10695_vm13, %v7349_v3, %v7353_v32  ;;  %v9122_v26 = vunpack.c.l.b16 %v9081_v5  ;;  %v8295_v53 = vld [vmem:[#allocation3 + $0x9c] sm:$0xf] }
 0x455   : > { %v14206_v29 = vpack.c.b16 %v7786_v41, %v7785_v45  ;;  %v9123_v2 = vunpack.c.l.b16 %v9084_v0  ;;  %v8573_v52 = vsel %vm10695_vm13, %v8568_v34, %v8572_v54  ;;  %v8588_v18 = vshrl.u32 %v13978_v15, 16 }
 0x456   : > { %v7868_v28 = vpop.f32.mrf.mxu2  ;;  %v14208_v31 = vpop.f32.mrf.mxu0  ;;  %v7344_v3 = vsel %vm10695_vm13, %v7339_v17, %v14157_v7  ;;  %v7388_v5 = vunpack.c.l.b16 %v7354_v58  ;;  %v8717_v34 = vunpack.c.l.b16 %v8573_v52  ;;  %v8575_v1 = vshrl.u32 %v8295_v53, 16 }
 0x457   : > { %v7497_v27 = vpop.f32.mrf.mxu1  ;;  %v7945_v50 = vadd.f32 %v7868_v28, %v13809_v25  ;;  %v8584_v25 = vshll.u32 %v13978_v15, 16  ;;  %v14219_v4 = vpack.c.b16 %v9123_v2, %v9122_v26  ;;  %v8578_v62 = vshll.u32 %v8295_v53, 16  ;;  %v14999_v28 = vld [vmem:[#allocation67_spill] sm:$0xff] }
 0x458   : > { %v14199_v19 = vadd.f32 %v7497_v27, %v6904_v10  ;;  %v10484_v10 = vld [vmem:[#allocation3 + $0x90] sm:$0xff]  ;;  %v14998_v27 = vld [vmem:[#allocation68_spill] sm:$0xff]  ;;  %v7387_v32 = vunpack.c.l.b16 %v7344_v3  ;;  %v8590_v45 = vrot.slane %v8588_v18, 4  ;;  %v8594_v18 = vshll.u32 %v14000_v9, 16  ;;  %v15001_v3 = vld [vmem:[#allocation70_spill] sm:$0xff] }
 0x459   : > { %v8157_v21 = vpop.f32.mrf.mxu3  ;;  %v14210_v33 = vadd.f32 %v8155_v49, %v7945_v50  ;;  %v8563_v49 = vsel %vm10695_vm13, %v8558_v60, %v14144_v43  ;;  %v6905_v15 = vadd.f32 %v14999_v28, %v14998_v27  ;;  %v8586_v54 = vrot.slane %v8584_v25, 5 }
 0x45a   : > { %v8716_v50 = vunpack.c.l.b16 %v8563_v49  ;;  %v7404_v0 = vpack.c.b16 %v7388_v5, %v7387_v32  ;;  %v8577_v60 = vrot.slane %v8575_v1, 4  ;;  %v8580_v26 = vrot.slane %v8578_v62, 5  ;;  %v8298_v32 = vld [vmem:[#allocation3 + $0xa8] sm:$0xf] }
 0x45b   : > { %v8591_v53 = vor.u32 %v8590_v45, %v8586_v54  ;;  %v8596_v27 = vrot.slane %v8594_v18, 5  ;;  %v8608_v9 = vshll.u32 %v14079_v30, 16  ;;  %v8612_v45 = vshrl.u32 %v14079_v30, 16 }
 0x45c   : > { %v8738_v43 = vpack.c.b16 %v8717_v34, %v8716_v50 }
 0x45d   : > { %v8592_v49 = vrot.slane %v8591_v53, 4  ;;  %v8610_v53 = vrot.slane %v8608_v9, 5  ;;  %v8614_v18 = vrot.slane %v8612_v45, 4  ;;  %v15005_v9 = vld [vmem:[#allocation74_spill] sm:$0xff] }
 0x45e   : > { %10334 = vmatmul.msk.bf16.gmra.mxu3 %vm1391_vm10, %v10484_v10  ;;  %v7870_v7 = vpop.f32.mrf.mxu2  ;;  %v14234_v25 = vpop.f32.mrf.mxu0  ;;  %v8581_v10 = vor.u32 %v8580_v26, %v8577_v60  ;;  %v15002_v60 = vld [vmem:[#allocation72_spill] sm:$0xff]  ;;  %v15003_v26 = vld [vmem:[#allocation73_spill] sm:$0xff] }
 0x45f   : > { %v7500_v41 = vpop.f32.mrf.mxu1  ;;  %v7946_v58 = vadd.f32 %v7870_v7, %v13848_v39  ;;  %v15000_v39 = vld [vmem:[#allocation69_spill] sm:$0xff] }
 0x460   : > { %v14227_v17 = vadd.f32 %v7500_v41, %v6905_v15  ;;  %v6906_v5 = vadd.f32 %v15001_v3, %v15000_v39  ;;  %v8582_v28 = vrot.slane %v8581_v10, 4  ;;  %v10485_v41 = vld [vmem:[#allocation3 + $0x9c] sm:$0xff] }
 0x461   : > { %v8160_v2 = vpop.f32.mrf.mxu3  ;;  %v14231_v52 = vadd.f32 %v8157_v21, %v7946_v58  ;;  %v8602_v58 = vshll.u32 %v8298_v32, 16 }
 0x462   : > { %10225 = vmatmul.msk.bf16.gmra.mxu1 %vm1391_vm10, %v7404_v0  ;;  %v8587_v50 = vsel %vm10695_vm13, %v8582_v28, %v8586_v54  ;;  %v8599_v0 = vshrl.u32 %v8298_v32, 16  ;;  %v8618_v28 = vshll.u32 %v14101_v51, 16  ;;  %v8301_v51 = vld [vmem:[#allocation3 + $0xb4] sm:$0xf] }
 0x463   : > { %10253 = vmatmul.msk.bf16.gmra.mxu2 %vm1391_vm10, %v13791_v63  ;;  %v8597_v63 = vsel %vm10695_vm13, %v8592_v49, %v8596_v27  ;;  %v8718_v30 = vunpack.c.l.b16 %v8587_v50  ;;  %v8615_v27 = vor.u32 %v8614_v18, %v8610_v53  ;;  %v8632_v18 = vshll.u32 %v14138_v6, 16 }
 0x464   : > { %10351 = vmatmul.msk.bf16.gmra.mxu0 %vm1391_vm10, %v8738_v43  ;;  %v8601_v49 = vrot.slane %v8599_v0, 4 }
 0x466   : > { %v7873_v1 = vpop.f32.mrf.mxu2  ;;  %v14253_v43 = vpop.f32.mrf.mxu0 }
 0x467   : > { %v7502_v34 = vpop.f32.mrf.mxu1  ;;  %v7947_v21 = vadd.f32 %v7873_v1, %v13882_v38  ;;  %v8719_v38 = vunpack.c.l.b16 %v8597_v63  ;;  %v15004_v1 = vld [vmem:[#allocation26_spill] sm:$0xff] }
 0x468   : > { %v14241_v62 = vadd.f32 %v7502_v34, %v6906_v5  ;;  %v8604_v34 = vrot.slane %v8602_v58, 5  ;;  %v8620_v58 = vrot.slane %v8618_v28, 5 }
 0x469   : > { %v14244_v15 = vadd.f32 %v8160_v2, %v7947_v21  ;;  %v8162_v7 = vpop.f32.mrf.mxu3  ;;  %v6907_v2 = vadd.f32 %v15003_v26, %v15002_v60  ;;  %v8739_v54 = vpack.c.b16 %v8719_v38, %v8718_v30 }
 0x46a   : > { %v8605_v63 = vor.u32 %v8604_v34, %v8601_v49  ;;  %v8626_v34 = vshll.u32 %v8301_v51, 16 }
 0x46c   : > { %v8606_v26 = vrot.slane %v8605_v63, 4 }
 0x46e   : > { %10335 = vmatmul.msk.bf16.gmra.mxu3 %vm1391_vm10, %v10485_v41  ;;  %v7875_v39 = vpop.f32.mrf.mxu2  ;;  %v8616_v41 = vrot.slane %v8615_v27, 4  ;;  %v14273_v60 = vpop.f32.mrf.mxu0  ;;  %v8611_v30 = vsel %vm10695_vm13, %v8606_v26, %v8610_v53  ;;  %v15008_v53 = vld [vmem:[#allocation29_spill] sm:$0xff] }
 0x46f   : > { %v7505_v10 = vpop.f32.mrf.mxu1  ;;  %v7948_v5 = vadd.f32 %v7875_v39, %v13921_v56  ;;  %v15006_v56 = vld [vmem:[#allocation76_spill] sm:$0xff]  ;;  %v10486_v39 = vld [vmem:[#allocation3 + $0xa8] sm:$0xff] }
 0x470   : > { %v14257_v3 = vadd.f32 %v7505_v10, %v6907_v2  ;;  %v6908_v45 = vadd.f32 %v15006_v56, %v15005_v9  ;;  %v8636_v10 = vshrl.u32 %v14138_v6, 16 }
 0x471   : > { %v14262_v21 = vadd.f32 %v8162_v7, %v7948_v5  ;;  %v8165_v32 = vpop.f32.mrf.mxu3  ;;  %v8623_v5 = vshrl.u32 %v8301_v51, 16 }
 0x472   : > { %10374 = vmatmul.msk.bf16.vlgmr.msra.gmra.mxu1 %vm1391_vm10, %v15004_v1  ;;  %v8634_v1 = vrot.slane %v8632_v18, 5  ;;  %v8638_v27 = vrot.slane %v8636_v10, 4 }
 0x473   : > { %10254 = vmatmul.msk.bf16.gmra.mxu2 %vm1391_vm10, %v13930_v48  ;;  %v8621_v48 = vsel %vm10695_vm13, %v8616_v41, %v8620_v58  ;;  %v8642_v58 = vshll.u32 %v14149_v36, 16 }
 0x474   : > { %10352 = vmatmul.msk.bf16.gmra.mxu0 %vm1391_vm10, %v8739_v54  ;;  %v15007_v54 = vld [vmem:[#allocation77_spill] sm:$0xff] }
 0x475   : > { %v6909_v49 = vadd.f32 %v13671_v16, %v15007_v54  ;;  %v8639_v16 = vor.u32 %v8638_v27, %v8634_v1  ;;  %v8656_v54 = vshll.u32 %v14176_v40, 16 }
 0x476   : > { %v7878_v38 = vpop.f32.mrf.mxu2 }
 0x477   : > { %v7507_v50 = vpop.f32.mrf.mxu1  ;;  %v7949_v7 = vadd.f32 %v7878_v38, %v13950_v46  ;;  %v8721_v46 = vunpack.c.l.b16 %v8621_v48  ;;  %v8628_v38 = vrot.slane %v8626_v34, 5  ;;  %v8640_v51 = vrot.slane %v8639_v16, 4  ;;  %v15012_v16 = vld [vmem:[#allocation62_spill] sm:$0xff] }
 0x478   : > { %v14270_v0 = vadd.f32 %v7507_v50, %v6908_v45  ;;  %v8625_v50 = vrot.slane %v8623_v5, 4  ;;  %v8304_v5 = vld [vmem:[#allocation3 + $0xc0] sm:$0xf] }
 0x479   : > { %v14275_v2 = vadd.f32 %v8165_v32, %v7949_v7  ;;  %v8720_v32 = vunpack.c.l.b16 %v8611_v30  ;;  %v8167_v56 = vpop.f32.mrf.mxu3  ;;  %v14293_v7 = vpop.f32.mrf.mxu0  ;;  %v8647_v27 = vshrl.u32 %v8304_v5, 16 }
 0x47a   : > { %v8629_v48 = vor.u32 %v8628_v38, %v8625_v50 }
 0x47b   : > { %v8740_v45 = vpack.c.b16 %v8721_v46, %v8720_v32 }
 0x47c   : > { %v8630_v30 = vrot.slane %v8629_v48, 4  ;;  %v15013_v48 = vld [vmem:[#allocation81_spill] sm:$0xff] }
 0x47e   : > { %10336 = vmatmul.msk.bf16.gmra.mxu3 %vm1391_vm10, %v10486_v39  ;;  %v7880_v63 = vpop.f32.mrf.mxu2  ;;  %v8644_v39 = vrot.slane %v8642_v58, 5  ;;  %v8635_v36 = vsel %vm10695_vm13, %v8630_v30, %v8634_v1  ;;  %v8649_v1 = vrot.slane %v8647_v27, 4 }
 0x47f   : > { %v7510_v28 = vpop.f32.mrf.mxu1  ;;  %v7950_v6 = vadd.f32 %v7880_v63, %v13982_v35  ;;  %v15009_v35 = vld [vmem:[#allocation80_spill] sm:$0xff]  ;;  %v15011_v63 = vld [vmem:[#allocation82_spill] sm:$0xff]  ;;  %v8722_v50 = vunpack.c.l.b16 %v8635_v36 }
 0x480   : > { %v14286_v9 = vadd.f32 %v7510_v28, %v6909_v49  ;;  %v6910_v26 = vadd.f32 %v15009_v35, %v13674_v11  ;;  %v8645_v46 = vsel %vm10695_vm13, %v8640_v51, %v8644_v39  ;;  %v10487_v49 = vld [vmem:[#allocation3 + $0xb4] sm:$0xff]  ;;  %v15014_v51 = vld [vmem:[#allocation37_spill] sm:$0xff] }
 0x481   : > { %v14291_v41 = vadd.f32 %v8167_v56, %v7950_v6  ;;  %v14309_v11 = vpop.f32.mrf.mxu0  ;;  %v8723_v34 = vunpack.c.l.b16 %v8645_v46  ;;  %v15010_v28 = vld [vmem:[#allocation79_spill] sm:$0xff]  ;;  %v8650_v6 = vshll.u32 %v8304_v5, 16  ;;  %v8658_v56 = vrot.slane %v8656_v54, 5 }
 0x482   : > { %10375 = vmatmul.msk.bf16.gmra.mxu1 %vm1391_vm10, %v15008_v53  ;;  %v6911_v32 = vadd.f32 %v15011_v63, %v15010_v28 }
 0x483   : > { %10255 = vmatmul.msk.bf16.gmra.mxu2 %vm1391_vm10, %v14008_v55  ;;  %v8660_v55 = vshrl.u32 %v14176_v40, 16  ;;  %v8741_v40 = vpack.c.b16 %v8723_v34, %v8722_v50  ;;  %v8652_v58 = vrot.slane %v8650_v6, 5  ;;  %v15017_v6 = vld [vmem:[#allocation50_spill] sm:$0xff] }
 0x484   : > { %10353 = vmatmul.msk.bf16.gmra.mxu0 %vm1391_vm10, %v8740_v45 }
 0x485   : > { %v8662_v45 = vrot.slane %v8660_v55, 4  ;;  %v8653_v39 = vor.u32 %v8652_v58, %v8649_v1  ;;  %v15018_v58 = vld [vmem:[#allocation64_spill] sm:$0xff] }
 0x487   : > { %v7512_v18 = vpop.f32.mrf.mxu1  ;;  %v8663_v35 = vor.u32 %v8662_v45, %v8658_v56  ;;  %v8654_v27 = vrot.slane %v8653_v39, 4 }
 0x488   : > { %v14301_v10 = vadd.f32 %v7512_v18, %v6910_v26  ;;  %v8666_v26 = vshll.u32 %v14183_v42, 16  ;;  %v6912_v18 = vadd.f32 %v15014_v51, %v15013_v48  ;;  %v10488_v42 = vld [vmem:[#allocation3 + $0xc0] sm:$0xff]  ;;  %v14343_v48 = vld [vmem:[#allocation3 + $0xd0] sm:$0xf] }
 0x489   : > { %v8664_v30 = vrot.slane %v8663_v35, 4  ;;  %v14324_v46 = vpop.f32.mrf.mxu0  ;;  %v8659_v28 = vsel %vm10695_vm13, %v8654_v27, %v8658_v56  ;;  %v433_v35 = vld [vmem:[#allocation3 + $0xd4] sm:$0x1]  ;;  %v15021_v27 = vld [vmem:[#allocation84_spill] sm:$0xff]  ;;  %v15023_v56 = vld [vmem:[#allocation53_spill] sm:$0xff] }
 0x48a   : > { %v8668_v55 = vrot.slane %v8666_v26, 5  ;;  %v8724_v50 = vunpack.c.l.b16 %v8659_v28  ;;  %v434_v51 = vsel %vm10649_vm9, 0, %v433_v35 }
 0x48b   : > { %435 = vst [vmem:[#allocation3 + $0xd4] sm:$0x1] %v434_v51 }
 0x48e   : > { %10337 = vmatmul.msk.bf16.gmra.mxu3 %vm1391_vm10, %v10487_v49  ;;  %v379_v49 = vld [vmem:[#allocation3 + $0xcc] sm:$0x1] }
 0x48f   : > { %v7515_v53 = vpop.f32.mrf.mxu1  ;;  %v380_v34 = vsel %vm10589_vm4, 0, %v379_v49 }
 0x490   : > { %v14314_v38 = vadd.f32 %v7515_v53, %v6911_v32  ;;  %381 = vst [vmem:[#allocation3 + $0xcc] sm:$0x1] %v380_v34  ;;  %v15016_v32 = vld [vmem:[#allocation83_spill] sm:$0xff] }
 0x491   : > { %v6913_v45 = vadd.f32 %v15017_v6, %v15016_v32  ;;  %v15020_v34 = vld [vmem:[#allocation63_spill] sm:$0xff] }
 0x492   : > { %10376 = vmatmul.msk.bf16.gmra.mxu1 %vm1391_vm10, %v15012_v16  ;;  %v14339_v16 = vpop.f32.mrf.mxu0 }
 0x493   : > { %10256 = vmatmul.msk.bf16.gmra.mxu2 %vm1391_vm10, %v14073_v23  ;;  %v8669_v23 = vsel %vm10695_vm13, %v8664_v30, %v8668_v55  ;;  %v8680_v30 = vshll.u32 %v14343_v48, 16 }
 0x494   : > { %10354 = vmatmul.msk.bf16.gmra.mxu0 %vm1391_vm10, %v8741_v40  ;;  %v8725_v63 = vunpack.c.l.b16 %v8669_v23  ;;  %v6914_v23 = vadd.f32 %v15021_v27, %v15020_v34  ;;  %v15024_v34 = vld [vmem:[#allocation71_spill] sm:$0xff] }
 0x495   : > { %v8682_v36 = vrot.slane %v8680_v30, 5 }
 0x496   : > { %v8742_v1 = vpack.c.b16 %v8725_v63, %v8724_v50 }
 0x497   : > { %v7517_v5 = vpop.f32.mrf.mxu1  ;;  %v8307_v26 = vld [vmem:[#allocation3 + $0xcc] sm:$0xf] }
 0x498   : > { %v14326_v54 = vadd.f32 %v7517_v5, %v6912_v18  ;;  %v8671_v18 = vshrl.u32 %v8307_v26, 16  ;;  %v8674_v39 = vshll.u32 %v8307_v26, 16  ;;  %v8684_v5 = vshrl.u32 %v14343_v48, 16  ;;  %v15022_v26 = vld [vmem:[#allocation40_spill] sm:$0xff] }
 0x499   : > { %v6915_v51 = vadd.f32 %v15023_v56, %v15022_v26 }
 0x49a   : > { %v8673_v55 = vrot.slane %v8671_v18, 4  ;;  %v8676_v49 = vrot.slane %v8674_v39, 5  ;;  %v14356_v50 = vpop.f32.mrf.mxu0 }
 0x49c   : > { %v8677_v63 = vor.u32 %v8676_v49, %v8673_v55 }
 0x49e   : > { %10338 = vmatmul.msk.bf16.gmra.mxu3 %vm1391_vm10, %v10488_v42  ;;  %v8686_v42 = vrot.slane %v8684_v5, 4 }
 0x49f   : > { %v7520_v53 = vpop.f32.mrf.mxu1 }
 0x4a0   : > { %v14337_v40 = vadd.f32 %v7520_v53, %v6913_v45  ;;  %v8687_v6 = vor.u32 %v8686_v42, %v8682_v36  ;;  %v10489_v45 = vld [vmem:[#allocation3 + $0xcc] sm:$0xff]  ;;  %v8678_v53 = vrot.slane %v8677_v63, 4 }
 0x4a2   : > { %10377 = vmatmul.msk.bf16.gmra.mxu1 %vm1391_vm10, %v15018_v58  ;;  %v8688_v58 = vrot.slane %v8687_v6, 4  ;;  %v14374_v27 = vpop.f32.mrf.mxu0  ;;  %v6917_v6 = vadd.f32 %v14028_v8, %v15026_v13  ;;  %v15029_v8 = vld [vmem:[#allocation14_spill] sm:$0xff] }
 0x4a3   : > { %10257 = vmatmul.msk.bf16.gmra.mxu2 %vm1391_vm10, %v14151_v14  ;;  %v14358_v14 = vld [vmem:[#allocation3 + $0xd4] sm:$0x1]  ;;  %v14421_v13 = vld [vmem:[%s14739_s3 + $0x3] ss:$0 sm:$0xff] }
 0x4a4   : > { %10355 = vmatmul.msk.bf16.gmra.mxu0 %vm1391_vm10, %v8742_v1  ;;  %v8683_v1 = vsel %vm10695_vm13, %v8678_v53, %v8682_v36  ;;  %v8690_v35 = vshll.u32 %v14358_v14, 16 }
 0x4a5   : > { %v8726_v30 = vunpack.c.l.b16 %v8683_v1  ;;  %v15027_v1 = vld [vmem:[#allocation75_spill] sm:$0xff] }
 0x4a6   : > { %v8692_v18 = vrot.slane %v8690_v35, 5 }
 0x4a7   : > { %v7522_v28 = vpop.f32.mrf.mxu1 }
 0x4a8   : > { %v14354_v32 = vadd.f32 %v7522_v28, %v6914_v23  ;;  %v8693_v55 = vsel %vm10695_vm13, %v8688_v58, %v8692_v18  ;;  %v15025_v23 = vld [vmem:[#allocation54_spill] sm:$0xff]  ;;  %v6920_v18 = vadd.f32 %v14166_v47, %v15029_v8 }
 0x4a9   : > { %v8727_v49 = vunpack.c.l.b16 %v8693_v55  ;;  %v6916_v42 = vadd.f32 %v13980_v12, %v15025_v23  ;;  %v6919_v12 = vadd.f32 %v14115_v44, %v13993_v22  ;;  %v15030_v55 = vld [vmem:[#allocation22_spill] sm:$0xff]  ;;  %v6922_v22 = vadd.f32 %v14234_v25, %v14097_v24  ;;  %v15032_v23 = vld [vmem:[#allocation25_spill] sm:$0xff]  ;;  %v15033_v25 = vld [vmem:[#allocation7_spill] sm:$0xff] }
 0x4aa   : > { %v8884_v47 = vadd.f32 %v14253_v43, %v15032_v23 }
 0x4ab   : > { %v8743_v36 = vpack.c.b16 %v8727_v49, %v8726_v30 }
 0x4ae   : > { %10339 = vmatmul.msk.bf16.gmra.mxu3 %vm1391_vm10, %v10489_v45 }
 0x4af   : > { %v7525_v39 = vpop.f32.mrf.mxu1 }
 0x4b0   : > { %v14366_v5 = vadd.f32 %v7525_v39, %v6915_v51  ;;  %v15028_v51 = vld [vmem:[#allocation78_spill] sm:$0xff] }
 0x4b2   : > { %10378 = vmatmul.msk.bf16.gmra.mxu1 %vm1391_vm10, %v15024_v34  ;;  %v15031_v34 = vld [vmem:[#allocation47_spill] sm:$0xff] }
 0x4b3   : > { %10258 = vmatmul.msk.bf16.gmra.mxu2 %vm1391_vm10, %v14206_v29  ;;  %v6918_v29 = vadd.f32 %v14075_v20, %v13958_v61  ;;  %v6921_v61 = vadd.f32 %v14208_v31, %v15030_v55  ;;  %v14416_v31 = vld [vmem:[%s14739_s3 + $0x2] ss:$0 sm:$0xff] }
 0x4b4   : > { %10356 = vmatmul.msk.bf16.gmra.mxu0 %vm1391_vm10, %v8743_v36 }
 0x4b7   : > { %v7527_v28 = vpop.f32.mrf.mxu1 }
 0x4b8   : > { %v14379_v63 = vadd.f32 %v7527_v28, %v6916_v42 }
 0x4bf   : > { %v7530_v45 = vpop.f32.mrf.mxu1 }
 0x4c0   : > { %v14383_v53 = vadd.f32 %v7530_v45, %v6917_v6  ;;  %v9382_v6 = vunpack.c.l.bf16 %v15033_v25  ;;  %v15034_v45 = vld [vmem:[#allocation61_spill] sm:$0xff] }
 0x4c2   : > { %10379 = vmatmul.msk.bf16.gmra.mxu1 %vm1391_vm10, %v15027_v1  ;;  %v14428_v1 = vpop.f32.mrf.mxu2 }
 0x4c7   : > { %v7532_v58 = vpop.f32.mrf.mxu1 }
 0x4c8   : > { %v14389_v35 = vadd.f32 %v7532_v58, %v6918_v29  ;;  %v8885_v58 = vadd.f32 %v14273_v60, %v14180_v59  ;;  %v14446_v60 = vpop.f32.mrf.mxu0 }
 0x4cf   : > { %v7535_v26 = vpop.f32.mrf.mxu1 }
 0x4d0   : > { %v14393_v56 = vadd.f32 %v7535_v26, %v6919_v12 }
 0x4d2   : > { %10380 = vmatmul.msk.bf16.gmra.mxu1 %vm1391_vm10, %v15028_v51 }
 0x4d7   : > { %v7537_v39 = vpop.f32.mrf.mxu1 }
 0x4d8   : > { %v14399_v30 = vadd.f32 %v7537_v39, %v6920_v18  ;;  %v15035_v39 = vld [vmem:[#allocation8_spill] sm:$0xff] }
 0x4d9   : > { %v9383_v55 = vunpack.c.l.bf16 %v15035_v39 }
 0x4df   : > { %v7540_v20 = vpop.f32.mrf.mxu1 }
 0x4e0   : > { %v14403_v49 = vadd.f32 %v7540_v20, %v6921_v61  ;;  %v14441_v61 = vpop.f32.mrf.mxu3 }
 0x4e2   : > { %10381 = vmatmul.msk.bf16.gmra.mxu1 %vm1391_vm10, %v15031_v34  ;;  %v8886_v34 = vadd.f32 %v14293_v7, %v14210_v33  ;;  %v8887_v7 = vadd.f32 %v14309_v11, %v14231_v52  ;;  %v8888_v52 = vadd.f32 %v14324_v46, %v14244_v15 }
 0x4e7   : > { %v7542_v44 = vpop.f32.mrf.mxu1 }
 0x4e8   : > { %v14409_v36 = vadd.f32 %v7542_v44, %v6922_v22  ;;  %v14450_v22 = vpop.f32.mrf.mxu2 }
 0x4ef   : > { %v9202_v42 = vpop.f32.mrf.mxu1 }
 0x4f0   : > { %v9282_v28 = vadd.f32 %v9202_v42, %v8884_v47  ;;  %v15036_v42 = vld [vmem:[#allocation10_spill] sm:$0xff] }
 0x4f2   : > { %v9316_v24 = vmul.f32 %v14416_v31, %v9282_v28  ;;  %10382 = vmatmul.msk.bf16.gmra.mxu1 %vm1391_vm10, %v15034_v45  ;;  %v9384_v28 = vunpack.c.l.bf16 %v15036_v42 }
 0x4f4   : > { %v9350_v43 = vadd.f32 %v14421_v13, %v9316_v24 }
 0x4f6   : > { %v9414_v29 = vadd.f32 %v9382_v6, %v9350_v43  ;;  %v15037_v6 = vld [vmem:[#allocation59_spill] sm:$0xff]  ;;  %v14459_v43 = vpop.f32.mrf.mxu3 }
 0x4f7   : > { %v9204_v12 = vpop.f32.mrf.mxu1 }
 0x4f8   : > { %v9446_v26 = vmax.f32 %v9414_v29, 0.0  ;;  %v9283_v51 = vadd.f32 %v9204_v12, %v8885_v58  ;;  %v14463_v58 = vpop.f32.mrf.mxu0 }
 0x4fa   : > { %v9478_v8 = vpack.c.bf16 %v9446_v26, %v9446_v26  ;;  %v9317_v18 = vmul.f32 %v14416_v31, %v9283_v51  ;;  %v14465_v51 = vpop.f32.mrf.mxu2 }
 0x4fc   : > { %9510 = vst.msk [vmem:[%s14437_s29] sm:$0xf] %vm199_vm1, %v9478_v8  ;;  %v9351_v59 = vadd.f32 %v14421_v13, %v9317_v18  ;;  %v15038_v8 = vld [vmem:[#allocation11_spill] sm:$0xff] }
 0x4fd   : > { %v9385_v18 = vunpack.c.l.bf16 %v15038_v8  ;;  %v15041_v8 = vld [vmem:[#allocation16_spill] sm:$0xff] }
 0x4fe   : > { %v9415_v20 = vadd.f32 %v9383_v55, %v9351_v59  ;;  %v14474_v11 = vpop.f32.mrf.mxu3 }
 0x4ff   : > { %v9207_v44 = vpop.f32.mrf.mxu1 }
 0x500   : > { %v9447_v23 = vmax.f32 %v9415_v20, 0.0  ;;  %v9284_v47 = vadd.f32 %v9207_v44, %v8886_v34 }
 0x502   : > { %v9479_v24 = vpack.c.bf16 %v9447_v23, %v9447_v23  ;;  %v9318_v25 = vmul.f32 %v14416_v31, %v9284_v47  ;;  %10383 = vmatmul.msk.bf16.gmra.mxu1 %vm1391_vm10, %v15037_v6  ;;  %v15039_v47 = vld [vmem:[#allocation15_spill] sm:$0xff]  ;;  %v15040_v6 = vld [vmem:[#allocation17_spill] sm:$0xff] }
 0x503   : > { %v9386_v42 = vunpack.c.l.bf16 %v15039_v47  ;;  %v15042_v47 = vld [vmem:[#allocation19_spill] sm:$0xff] }
 0x504   : > { %9511 = vst.msk [vmem:[%s14437_s29 + $0x4] sm:$0xf] %vm199_vm1, %v9479_v24  ;;  %v9352_v45 = vadd.f32 %v14421_v13, %v9318_v25 }
 0x506   : > { %v9416_v33 = vadd.f32 %v9384_v28, %v9352_v45  ;;  %v14477_v28 = vpop.f32.mrf.mxu0  ;;  %v14482_v45 = vpop.f32.mrf.mxu2 }
 0x507   : > { %v9209_v29 = vpop.f32.mrf.mxu1 }
 0x508   : > { %v9448_v12 = vmax.f32 %v9416_v33, 0.0  ;;  %v9285_v26 = vadd.f32 %v9209_v29, %v8887_v7  ;;  %v8889_v33 = vadd.f32 %v14339_v16, %v14262_v21  ;;  %v8890_v16 = vadd.f32 %v14356_v50, %v14275_v2 }
 0x50a   : > { %v9480_v39 = vpack.c.bf16 %v9448_v12, %v9448_v12  ;;  %v9319_v55 = vmul.f32 %v14416_v31, %v9285_v26  ;;  %v14489_v26 = vpop.f32.mrf.mxu3 }
 0x50c   : > { %9512 = vst.msk [vmem:[%s14437_s29 + $0x8] sm:$0xf] %vm199_vm1, %v9480_v39  ;;  %v9353_v59 = vadd.f32 %v14421_v13, %v9319_v55 }
 0x50e   : > { %v9417_v20 = vadd.f32 %v9385_v18, %v9353_v59  ;;  %v9387_v18 = vunpack.c.l.bf16 %v15041_v8  ;;  %v14493_v59 = vpop.f32.mrf.mxu0 }
 0x50f   : > { %v9212_v34 = vpop.f32.mrf.mxu1 }
 0x510   : > { %v9449_v44 = vmax.f32 %v9417_v20, 0.0  ;;  %v9286_v23 = vadd.f32 %v9212_v34, %v8888_v52  ;;  %v14498_v52 = vpop.f32.mrf.mxu2 }
 0x512   : > { %v9481_v24 = vpack.c.bf16 %v9449_v44, %v9449_v44  ;;  %v9320_v25 = vmul.f32 %v14416_v31, %v9286_v23  ;;  %10384 = vmatmul.msk.bf16.gmra.mxu1 %vm1391_vm10, %v15040_v6  ;;  %v15043_v6 = vld [vmem:[#allocation18_spill] sm:$0xff] }
 0x514   : > { %9513 = vst.msk [vmem:[%s14437_s29 + $0xc] sm:$0xf] %vm199_vm1, %v9481_v24  ;;  %v9354_v15 = vadd.f32 %v14421_v13, %v9320_v25 }
 0x516   : > { %v9418_v46 = vadd.f32 %v9386_v42, %v9354_v15  ;;  %v9388_v42 = vunpack.c.l.bf16 %v15042_v47  ;;  %v14506_v15 = vpop.f32.mrf.mxu3  ;;  %v14513_v50 = vpop.f32.mrf.mxu0 }
 0x517   : > { %v9214_v7 = vpop.f32.mrf.mxu1 }
 0x518   : > { %v9450_v29 = vmax.f32 %v9418_v46, 0.0  ;;  %v9287_v12 = vadd.f32 %v9214_v7, %v8889_v33  ;;  %v15044_v33 = vld [vmem:[#allocation12_spill] sm:$0xff] }
 0x519   : > { %v7951_v2 = vadd.f32 %v14428_v1, %v15044_v33 }
 0x51a   : > { %v9482_v39 = vpack.c.bf16 %v9450_v29, %v9450_v29  ;;  %v9321_v55 = vmul.f32 %v14416_v31, %v9287_v12  ;;  %v8891_v29 = vadd.f32 %v14374_v27, %v14291_v41  ;;  %v14517_v12 = vpop.f32.mrf.mxu2  ;;  %v15046_v41 = vld [vmem:[#allocation6_spill] sm:$0xff] }
 0x51b   : > { %v7952_v27 = vadd.f32 %v14450_v22, %v15046_v41  ;;  %v15049_v22 = vld [vmem:[#allocation60_spill] sm:$0xff] }
 0x51c   : > { %9514 = vst.msk [vmem:[%s14437_s29 + $0x10] sm:$0xf] %vm199_vm1, %v9482_v39  ;;  %v9355_v20 = vadd.f32 %v14421_v13, %v9321_v55  ;;  %v15045_v55 = vld [vmem:[#allocation20_spill] sm:$0xff] }
 0x51e   : > { %v9419_v21 = vadd.f32 %v9387_v18, %v9355_v20  ;;  %v9389_v20 = vunpack.c.l.bf16 %v15045_v55 }
 0x51f   : > { %v9217_v34 = vpop.f32.mrf.mxu1 }
 0x520   : > { %v9451_v44 = vmax.f32 %v9419_v21, 0.0  ;;  %v9288_v23 = vadd.f32 %v9217_v34, %v8890_v16  ;;  %v8238_v21 = vadd.f32 %v14441_v61, %v7951_v2 }
 0x522   : > { %v9483_v24 = vpack.c.bf16 %v9451_v44, %v9451_v44  ;;  %v9322_v25 = vmul.f32 %v14416_v31, %v9288_v23  ;;  %10385 = vmatmul.msk.bf16.gmra.mxu1 %vm1391_vm10, %v15043_v6  ;;  %v14525_v44 = vpop.f32.mrf.mxu3  ;;  %v8892_v47 = vadd.f32 %v14446_v60, %v8238_v21  ;;  %v14532_v6 = vpop.f32.mrf.mxu2 }
 0x524   : > { %9515 = vst.msk [vmem:[%s14437_s29 + $0x14] sm:$0xf] %vm199_vm1, %v9483_v24  ;;  %v9356_v46 = vadd.f32 %v14421_v13, %v9322_v25  ;;  %v14530_v24 = vpop.f32.mrf.mxu0 }
 0x526   : > { %v9420_v7 = vadd.f32 %v9388_v42, %v9356_v46  ;;  %v8239_v46 = vadd.f32 %v14459_v43, %v7952_v27 }
 0x527   : > { %v9219_v8 = vpop.f32.mrf.mxu1 }
 0x528   : > { %v9452_v18 = vmax.f32 %v9420_v7, 0.0  ;;  %v9289_v39 = vadd.f32 %v9219_v8, %v8891_v29  ;;  %v15047_v7 = vld [vmem:[#allocation23_spill] sm:$0xff]  ;;  %v15048_v8 = vld [vmem:[#allocation13_spill] sm:$0xff]  ;;  %v8893_v55 = vadd.f32 %v14463_v58, %v8239_v46 }
 0x529   : > { %v9390_v29 = vunpack.c.l.bf16 %v15047_v7 }
 0x52a   : > { %v9484_v16 = vpack.c.bf16 %v9452_v18, %v9452_v18  ;;  %v9323_v34 = vmul.f32 %v14416_v31, %v9289_v39  ;;  %v7953_v18 = vadd.f32 %v14465_v51, %v15049_v22  ;;  %v14545_v43 = vpop.f32.mrf.mxu3  ;;  %v15051_v51 = vld [vmem:[#allocation21_spill] sm:$0xff]  ;;  %v15052_v22 = vld [vmem:[#allocation27_spill] sm:$0xff] }
 0x52c   : > { %9516 = vst.msk [vmem:[%s14437_s29 + $0x18] sm:$0xf] %vm199_vm1, %v9484_v16  ;;  %v9357_v1 = vadd.f32 %v14421_v13, %v9323_v34  ;;  %v8240_v34 = vadd.f32 %v14474_v11, %v7953_v18  ;;  %v9392_v18 = vunpack.c.l.bf16 %v15052_v22 }
 0x52e   : > { %v9421_v23 = vadd.f32 %v9389_v20, %v9357_v1  ;;  %v14548_v1 = vpop.f32.mrf.mxu0  ;;  %v8894_v11 = vadd.f32 %v14477_v28, %v8240_v34 }
 0x52f   : > { %v9222_v42 = vpop.f32.mrf.mxu1 }
 0x530   : > { %v9453_v61 = vmax.f32 %v9421_v23, 0.0  ;;  %v9290_v25 = vadd.f32 %v9222_v42, %v8892_v47  ;;  %v15050_v23 = vld [vmem:[#allocation24_spill] sm:$0xff]  ;;  %v14552_v42 = vpop.f32.mrf.mxu2 }
 0x531   : > { %v9391_v47 = vunpack.c.l.bf16 %v15050_v23  ;;  %v7958_v37 = vadd.f32 %v14552_v42, %v14241_v62 }
 0x532   : > { %v9485_v33 = vpack.c.bf16 %v9453_v61, %v9453_v61  ;;  %v9324_v2 = vmul.f32 %v14416_v31, %v9290_v25  ;;  %10386 = vmatmul.msk.bf16.gmra.mxu1 %vm1391_vm10, %v15048_v8  ;;  %v7954_v61 = vadd.f32 %v14482_v45, %v15051_v51  ;;  %v14560_v7 = vpop.f32.mrf.mxu3 }
 0x534   : > { %9517 = vst.msk [vmem:[%s14437_s29 + $0x1c] sm:$0xf] %vm199_vm1, %v9485_v33  ;;  %v9358_v60 = vadd.f32 %v14421_v13, %v9324_v2 }
 0x536   : > { %v9422_v39 = vadd.f32 %v9390_v29, %v9358_v60  ;;  %v8241_v29 = vadd.f32 %v14489_v26, %v7954_v61  ;;  %v14567_v45 = vpop.f32.mrf.mxu0 }
 0x537   : > { %v9224_v20 = vpop.f32.mrf.mxu1 }
 0x538   : > { %v9454_v21 = vmax.f32 %v9422_v39, 0.0  ;;  %v9291_v16 = vadd.f32 %v9224_v20, %v8893_v55  ;;  %v14572_v39 = vpop.f32.mrf.mxu2  ;;  %v15053_v55 = vld [vmem:[#allocation33_spill] sm:$0xff] }
 0x539   : > { %v7955_v26 = vadd.f32 %v14498_v52, %v15053_v55  ;;  %v7956_v52 = vadd.f32 %v14517_v12, %v14199_v19  ;;  %v15055_v19 = vld [vmem:[#allocation30_spill] sm:$0xff]  ;;  %v9090_v55 = vrot.slane %v14358_v14, 5  ;;  %v7959_v42 = vadd.f32 %v14572_v39, %v14257_v3 }
 0x53a   : > { %v9486_v41 = vpack.c.bf16 %v9454_v21, %v9454_v21  ;;  %v9325_v27 = vmul.f32 %v14416_v31, %v9291_v16  ;;  %v8895_v21 = vadd.f32 %v14493_v59, %v8241_v29  ;;  %v14580_v51 = vpop.f32.mrf.mxu3  ;;  %v9394_v12 = vunpack.c.l.bf16 %v15055_v19  ;;  %v15057_v19 = vld [vmem:[#allocation34_spill] sm:$0xff] }
 0x53c   : > { %9518 = vst.msk [vmem:[%s14437_s29 + $0x20] sm:$0xf] %vm199_vm1, %v9486_v41  ;;  %v9359_v58 = vadd.f32 %v14421_v13, %v9325_v27 }
 0x53e   : > { %v9423_v25 = vadd.f32 %v9391_v47, %v9359_v58  ;;  %v15054_v47 = vld [vmem:[#allocation28_spill] sm:$0xff]  ;;  %v14587_v59 = vpop.f32.mrf.mxu0 }
 0x53f   : > { %v9227_v46 = vpop.f32.mrf.mxu1  ;;  %v9393_v58 = vunpack.c.l.bf16 %v15054_v47  ;;  %v15056_v47 = vld [vmem:[#allocation31_spill] sm:$0xff] }
 0x540   : > { %v9455_v33 = vmax.f32 %v9423_v25, 0.0  ;;  %v9292_v2 = vadd.f32 %v9227_v46, %v8894_v11  ;;  %v14590_v11 = vpop.f32.mrf.mxu2 }
 0x542   : > { %v9487_v8 = vpack.c.bf16 %v9455_v33, %v9455_v33  ;;  %v9326_v60 = vmul.f32 %v14416_v31, %v9292_v2  ;;  %10387 = vmatmul.msk.bf16.gmra.mxu1 %vm1391_vm10, %v14189_v57  ;;  %v8242_v57 = vadd.f32 %v14506_v15, %v7955_v26  ;;  %v9087_v33 = vrot.slane %v14343_v48, 5 }
 0x543   : > { %v7957_v26 = vadd.f32 %v14532_v6, %v14227_v17  ;;  %v9395_v17 = vunpack.c.l.bf16 %v15056_v47 }
 0x544   : > { %9519 = vst.msk [vmem:[%s14437_s29 + $0x24] sm:$0xf] %vm199_vm1, %v9487_v8  ;;  %v9360_v28 = vadd.f32 %v14421_v13, %v9326_v60  ;;  %v8896_v15 = vadd.f32 %v14513_v50, %v8242_v57  ;;  %v8931_v8 = vld [vmem:[#allocation3 + $0xcc] sm:$0xe]  ;;  %v8243_v60 = vadd.f32 %v14525_v44, %v7956_v52  ;;  %v9089_v50 = vrot.slane %v9087_v33, 4  ;;  %v8192_v44 = vpop.f32.mrf.mxu3 }
 0x546   : > { %v9424_v20 = vadd.f32 %v9392_v18, %v9360_v28  ;;  %v10372_v28 = vrot.slane %v8931_v8, 9  ;;  %v8846_v14 = vpop.f32.mrf.mxu0  ;;  %v8245_v8 = vadd.f32 %v14560_v7, %v7958_v37 }
 0x547   : > { %v9229_v16 = vpop.f32.mrf.mxu1 }
 0x548   : > { %v9456_v34 = vmax.f32 %v9424_v20, 0.0  ;;  %v9293_v41 = vadd.f32 %v9229_v16, %v8895_v21  ;;  %v8897_v21 = vadd.f32 %v14530_v24, %v8243_v60  ;;  %v8899_v7 = vadd.f32 %v14567_v45, %v8245_v8 }
 0x549   : > { %v7960_v45 = vadd.f32 %v14590_v11, %v14270_v0 }
 0x54a   : > { %v9488_v27 = vpack.c.bf16 %v9456_v34, %v9456_v34  ;;  %v9327_v23 = vmul.f32 %v14416_v31, %v9293_v41  ;;  %v9091_v34 = vsel %vm11082_vm2, %v9089_v50, %v9090_v55 }
 0x54b   : > { %v9125_v24 = vunpack.c.l.b16 %v9091_v34 }
 0x54c   : > { %9520 = vst.msk [vmem:[%s14437_s29 + $0x28] sm:$0xf] %vm199_vm1, %v9488_v27  ;;  %v9361_v61 = vadd.f32 %v14421_v13, %v9327_v23  ;;  %v8244_v27 = vadd.f32 %v14545_v43, %v7957_v26  ;;  %v7908_v23 = vpop.f32.mrf.mxu2 }
 0x54d   : > { %v7961_v0 = vadd.f32 %v7908_v23, %v14286_v9 }
 0x54e   : > { %v9425_v25 = vadd.f32 %v9393_v58, %v9361_v61  ;;  %v8849_v60 = vpop.f32.mrf.mxu0 }
 0x54f   : > { %v9232_v46 = vpop.f32.mrf.mxu1 }
 0x550   : > { %v9457_v2 = vmax.f32 %v9425_v25, 0.0  ;;  %v9294_v29 = vadd.f32 %v9232_v46, %v8896_v15  ;;  %v8898_v15 = vadd.f32 %v14548_v1, %v8244_v27  ;;  %v8195_v46 = vpop.f32.mrf.mxu3 }
 0x552   : > { %v9489_v22 = vpack.c.bf16 %v9457_v2, %v9457_v2  ;;  %v9328_v18 = vmul.f32 %v14416_v31, %v9294_v29  ;;  %10388 = vmatmul.msk.bf16.gmra.mxu1 %vm1391_vm10, %v14219_v4  ;;  %v9088_v4 = vsel %vm11082_vm2, %v10372_v28, %v9087_v33 }
 0x553   : > { %v9124_v61 = vunpack.c.l.b16 %v9088_v4  ;;  %v15058_v4 = vld [vmem:[#allocation35_spill] sm:$0xff] }
 0x554   : > { %9521 = vst.msk [vmem:[%s14437_s29 + $0x2c] sm:$0xf] %vm199_vm1, %v9489_v22  ;;  %v9362_v48 = vadd.f32 %v14421_v13, %v9328_v18  ;;  %v7910_v62 = vpop.f32.mrf.mxu2  ;;  %v9397_v34 = vunpack.c.l.bf16 %v15058_v4 }
 0x555   : > { %v9141_v43 = vpack.c.b16 %v9125_v24, %v9124_v61  ;;  %v15059_v24 = vld [vmem:[#allocation38_spill] sm:$0xff]  ;;  %v7962_v9 = vadd.f32 %v7910_v62, %v14301_v10 }
 0x556   : > { %v9426_v20 = vadd.f32 %v9394_v12, %v9362_v48  ;;  %v9396_v12 = vunpack.c.l.bf16 %v15057_v19 }
 0x557   : > { %v9234_v16 = vpop.f32.mrf.mxu1 }
 0x558   : > { %v9458_v41 = vmax.f32 %v9426_v20, 0.0  ;;  %v9295_v57 = vadd.f32 %v9234_v16, %v8897_v21  ;;  %v8197_v26 = vpop.f32.mrf.mxu3  ;;  %v8246_v20 = vadd.f32 %v14580_v51, %v7959_v42 }
 0x55a   : > { %v9490_v6 = vpack.c.bf16 %v9458_v41, %v9458_v41  ;;  %v9329_v58 = vmul.f32 %v14416_v31, %v9295_v57  ;;  %v8851_v41 = vpop.f32.mrf.mxu0  ;;  %v8900_v27 = vadd.f32 %v14587_v59, %v8246_v20 }
 0x55c   : > { %9522 = vst.msk [vmem:[%s14437_s29 + $0x30] sm:$0xf] %vm199_vm1, %v9490_v6  ;;  %v9363_v52 = vadd.f32 %v14421_v13, %v9329_v58  ;;  %v7913_v39 = vpop.f32.mrf.mxu2  ;;  %v8247_v6 = vadd.f32 %v8192_v44, %v7960_v45 }
 0x55d   : > { %v7963_v10 = vadd.f32 %v7913_v39, %v14314_v38 }
 0x55e   : > { %v9427_v25 = vadd.f32 %v9395_v17, %v9363_v52  ;;  %v9398_v52 = vunpack.c.l.bf16 %v15059_v24  ;;  %v8901_v59 = vadd.f32 %v8846_v14, %v8247_v6 }
 0x55f   : > { %v9237_v33 = vpop.f32.mrf.mxu1 }
 0x560   : > { %v9459_v2 = vmax.f32 %v9427_v25, 0.0  ;;  %v9296_v29 = vadd.f32 %v9237_v33, %v8898_v15  ;;  %v8200_v37 = vpop.f32.mrf.mxu3 }
 0x562   : > { %v9491_v22 = vpack.c.bf16 %v9459_v2, %v9459_v2  ;;  %v9330_v18 = vmul.f32 %v14416_v31, %v9296_v29  ;;  %10389 = vmatmul.msk.bf16.gmra.mxu1 %vm1391_vm10, %v9141_v43  ;;  %v8854_v11 = vpop.f32.mrf.mxu0  ;;  %v8248_v29 = vadd.f32 %v8195_v46, %v7961_v0 }
 0x564   : > { %9523 = vst.msk [vmem:[%s14437_s29 + $0x34] sm:$0xf] %vm199_vm1, %v9491_v22  ;;  %v9364_v1 = vadd.f32 %v14421_v13, %v9330_v18  ;;  %v7915_v43 = vpop.f32.mrf.mxu2  ;;  %v15060_v18 = vld [vmem:[#allocation39_spill] sm:$0xff]  ;;  %v8902_v14 = vadd.f32 %v8849_v60, %v8248_v29 }
 0x565   : > { %v9399_v19 = vunpack.c.l.bf16 %v15060_v18  ;;  %v7964_v38 = vadd.f32 %v7915_v43, %v14326_v54 }
 0x566   : > { %v9428_v28 = vadd.f32 %v9396_v12, %v9364_v1 }
 0x567   : > { %v9239_v50 = vpop.f32.mrf.mxu1 }
 0x568   : > { %v9460_v55 = vmax.f32 %v9428_v28, 0.0  ;;  %v9297_v48 = vadd.f32 %v9239_v50, %v8899_v7  ;;  %v8202_v1 = vpop.f32.mrf.mxu3 }
 0x569   : > { %v8251_v0 = vadd.f32 %v8202_v1, %v7964_v38  ;;  %v15066_v38 = vld [vmem:[#allocation46_spill] sm:$0xff] }
 0x56a   : > { %v9492_v21 = vpack.c.bf16 %v9460_v55, %v9460_v55  ;;  %v9331_v16 = vmul.f32 %v14416_v31, %v9297_v48  ;;  %v8856_v28 = vpop.f32.mrf.mxu0  ;;  %v8249_v55 = vadd.f32 %v8197_v26, %v7962_v9 }
 0x56b   : > { %v8905_v43 = vadd.f32 %v8856_v28, %v8251_v0 }
 0x56c   : > { %9524 = vst.msk [vmem:[%s14437_s29 + $0x38] sm:$0xf] %vm199_vm1, %v9492_v21  ;;  %v9365_v3 = vadd.f32 %v14421_v13, %v9331_v16  ;;  %v7918_v46 = vpop.f32.mrf.mxu2  ;;  %v15061_v21 = vld [vmem:[#allocation41_spill] sm:$0xff]  ;;  %v8903_v60 = vadd.f32 %v8851_v41, %v8249_v55 }
 0x56d   : > { %v9400_v16 = vunpack.c.l.bf16 %v15061_v21  ;;  %v7965_v54 = vadd.f32 %v7918_v46, %v14337_v40 }
 0x56e   : > { %v9429_v57 = vadd.f32 %v9397_v34, %v9365_v3 }
 0x56f   : > { %v9242_v47 = vpop.f32.mrf.mxu1 }
 0x570   : > { %v9461_v51 = vmax.f32 %v9429_v57, 0.0  ;;  %v9298_v17 = vadd.f32 %v9242_v47, %v8900_v27  ;;  %v8205_v34 = vpop.f32.mrf.mxu3  ;;  %v8250_v27 = vadd.f32 %v8200_v37, %v7963_v10 }
 0x572   : > { %v9493_v58 = vpack.c.bf16 %v9461_v51, %v9461_v51  ;;  %v9332_v61 = vmul.f32 %v14416_v31, %v9298_v17  ;;  %v8859_v26 = vpop.f32.mrf.mxu0  ;;  %v15062_v17 = vld [vmem:[#allocation42_spill] sm:$0xff]  ;;  %v8904_v39 = vadd.f32 %v8854_v11, %v8250_v27 }
 0x573   : > { %v9401_v6 = vunpack.c.l.bf16 %v15062_v17 }
 0x574   : > { %9525 = vst.msk [vmem:[%s14437_s29 + $0x3c] sm:$0xf] %vm199_vm1, %v9493_v58  ;;  %v9366_v25 = vadd.f32 %v14421_v13, %v9332_v61  ;;  %v7920_v58 = vpop.f32.mrf.mxu2 }
 0x575   : > { %v7966_v40 = vadd.f32 %v7920_v58, %v14354_v32 }
 0x576   : > { %v9430_v15 = vadd.f32 %v9398_v52, %v9366_v25 }
 0x577   : > { %v9244_v33 = vpop.f32.mrf.mxu1 }
 0x578   : > { %v9462_v2 = vmax.f32 %v9430_v15, 0.0  ;;  %v9299_v44 = vadd.f32 %v9244_v33, %v8901_v59  ;;  %v8207_v37 = vpop.f32.mrf.mxu3  ;;  %v15063_v33 = vld [vmem:[#allocation43_spill] sm:$0xff] }
 0x57a   : > { %v9494_v8 = vpack.c.bf16 %v9462_v2, %v9462_v2  ;;  %v9333_v22 = vmul.f32 %v14416_v31, %v9299_v44  ;;  %v9402_v2 = vunpack.c.l.bf16 %v15063_v33  ;;  %v8861_v44 = vpop.f32.mrf.mxu0 }
 0x57c   : > { %9526 = vst.msk [vmem:[%s14437_s29 + $0x40] sm:$0xf] %vm199_vm1, %v9494_v8  ;;  %v9367_v12 = vadd.f32 %v14421_v13, %v9333_v22  ;;  %v7923_v8 = vpop.f32.mrf.mxu2 }
 0x57d   : > { %v7967_v32 = vadd.f32 %v7923_v8, %v14366_v5 }
 0x57e   : > { %v9431_v23 = vadd.f32 %v9399_v19, %v9367_v12  ;;  %v8252_v12 = vadd.f32 %v8205_v34, %v7965_v54 }
 0x57f   : > { %v9247_v42 = vpop.f32.mrf.mxu1 }
 0x580   : > { %v9463_v7 = vmax.f32 %v9431_v23, 0.0  ;;  %v9300_v50 = vadd.f32 %v9247_v42, %v8902_v14  ;;  %v15064_v23 = vld [vmem:[#allocation44_spill] sm:$0xff]  ;;  %v8210_v42 = vpop.f32.mrf.mxu3  ;;  %v8906_v28 = vadd.f32 %v8859_v26, %v8252_v12 }
 0x581   : > { %v9403_v14 = vunpack.c.l.bf16 %v15064_v23 }
 0x582   : > { %v9495_v48 = vpack.c.bf16 %v9463_v7, %v9463_v7  ;;  %v9334_v20 = vmul.f32 %v14416_v31, %v9300_v50  ;;  %v8864_v50 = vpop.f32.mrf.mxu0 }
 0x584   : > { %9527 = vst.msk [vmem:[%s14437_s29 + $0x44] sm:$0xf] %vm199_vm1, %v9495_v48  ;;  %v9368_v4 = vadd.f32 %v14421_v13, %v9334_v20  ;;  %v7925_v55 = vpop.f32.mrf.mxu2 }
 0x585   : > { %v7968_v5 = vadd.f32 %v7925_v55, %v14379_v63 }
 0x586   : > { %v9432_v62 = vadd.f32 %v9400_v16, %v9368_v4  ;;  %v8253_v16 = vadd.f32 %v8207_v37, %v7966_v40 }
 0x587   : > { %v9249_v3 = vpop.f32.mrf.mxu1 }
 0x588   : > { %v9464_v45 = vmax.f32 %v9432_v62, 0.0  ;;  %v9301_v57 = vadd.f32 %v9249_v3, %v8903_v60  ;;  %v15065_v62 = vld [vmem:[#allocation45_spill] sm:$0xff]  ;;  %v8212_v3 = vpop.f32.mrf.mxu3 }
 0x589   : > { %v9404_v60 = vunpack.c.l.bf16 %v15065_v62  ;;  %v8255_v33 = vadd.f32 %v8212_v3, %v7968_v5  ;;  %v15069_v62 = vld [vmem:[#allocation51_spill] sm:$0xff] }
 0x58a   : > { %v9496_v47 = vpack.c.bf16 %v9464_v45, %v9464_v45  ;;  %v9335_v51 = vmul.f32 %v14416_v31, %v9301_v57  ;;  %v8907_v57 = vadd.f32 %v8861_v44, %v8253_v16  ;;  %v8866_v26 = vpop.f32.mrf.mxu0 }
 0x58c   : > { %9528 = vst.msk [vmem:[%s14437_s29 + $0x48] sm:$0xf] %vm199_vm1, %v9496_v47  ;;  %v9369_v61 = vadd.f32 %v14421_v13, %v9335_v51  ;;  %v7928_v17 = vpop.f32.mrf.mxu2 }
 0x58d   : > { %v7969_v63 = vadd.f32 %v7928_v17, %v14383_v53 }
 0x58e   : > { %v9433_v41 = vadd.f32 %v9401_v6, %v9369_v61  ;;  %v8254_v6 = vadd.f32 %v8210_v42, %v7967_v32  ;;  %v15068_v42 = vld [vmem:[#allocation49_spill] sm:$0xff] }
 0x58f   : > { %v9252_v24 = vpop.f32.mrf.mxu1 }
 0x590   : > { %v9465_v52 = vmax.f32 %v9433_v41, 0.0  ;;  %v9302_v25 = vadd.f32 %v9252_v24, %v8904_v39  ;;  %v9405_v41 = vunpack.c.l.bf16 %v15066_v38 }
 0x592   : > { %v9497_v15 = vpack.c.bf16 %v9465_v52, %v9465_v52  ;;  %v9336_v59 = vmul.f32 %v14416_v31, %v9302_v25  ;;  %v8908_v52 = vadd.f32 %v8864_v50, %v8254_v6  ;;  %v8215_v25 = vpop.f32.mrf.mxu3 }
 0x594   : > { %9529 = vst.msk [vmem:[%s14437_s29 + $0x4c] sm:$0xf] %vm199_vm1, %v9497_v15  ;;  %v9370_v29 = vadd.f32 %v14421_v13, %v9336_v59  ;;  %v8869_v59 = vpop.f32.mrf.mxu0  ;;  %v7930_v54 = vpop.f32.mrf.mxu2 }
 0x595   : > { %v7970_v53 = vadd.f32 %v7930_v54, %v14389_v35 }
 0x596   : > { %v9434_v11 = vadd.f32 %v9402_v2, %v9370_v29  ;;  %v15067_v29 = vld [vmem:[#allocation48_spill] sm:$0xff] }
 0x597   : > { %v9254_v22 = vpop.f32.mrf.mxu1  ;;  %v9406_v8 = vunpack.c.l.bf16 %v15067_v29 }
 0x598   : > { %v9466_v18 = vmax.f32 %v9434_v11, 0.0  ;;  %v9303_v19 = vadd.f32 %v9254_v22, %v8905_v43  ;;  %v8909_v22 = vadd.f32 %v8866_v26, %v8255_v33 }
 0x59a   : > { %v9498_v1 = vpack.c.bf16 %v9466_v18, %v9466_v18  ;;  %v9337_v9 = vmul.f32 %v14416_v31, %v9303_v19 }
 0x59c   : > { %9530 = vst.msk [vmem:[%s14437_s29 + $0x50] sm:$0xf] %vm199_vm1, %v9498_v1  ;;  %v9371_v7 = vadd.f32 %v14421_v13, %v9337_v9  ;;  %v8217_v1 = vpop.f32.mrf.mxu3  ;;  %v8256_v9 = vadd.f32 %v8215_v25, %v7969_v63  ;;  %v8871_v50 = vpop.f32.mrf.mxu0 }
 0x59d   : > { %v8257_v16 = vadd.f32 %v8217_v1, %v7970_v53 }
 0x59e   : > { %v9435_v46 = vadd.f32 %v9403_v14, %v9371_v7  ;;  %v9407_v7 = vunpack.c.l.bf16 %v15068_v42  ;;  %v8910_v55 = vadd.f32 %v8869_v59, %v8256_v9 }
 0x59f   : > { %v9257_v48 = vpop.f32.mrf.mxu1 }
 0x5a0   : > { %v9467_v20 = vmax.f32 %v9435_v46, 0.0  ;;  %v9304_v21 = vadd.f32 %v9257_v48, %v8906_v28  ;;  %v7933_v46 = vpop.f32.mrf.mxu2 }
 0x5a1   : > { %v7971_v35 = vadd.f32 %v7933_v46, %v14393_v56 }
 0x5a2   : > { %v9499_v4 = vpack.c.bf16 %v9467_v20, %v9467_v20  ;;  %v9338_v10 = vmul.f32 %v14416_v31, %v9304_v21 }
 0x5a4   : > { %9531 = vst.msk [vmem:[%s14437_s29 + $0x54] sm:$0xf] %vm199_vm1, %v9499_v4  ;;  %v9372_v34 = vadd.f32 %v14421_v13, %v9338_v10  ;;  %v8874_v32 = vpop.f32.mrf.mxu0 }
 0x5a6   : > { %v9436_v45 = vadd.f32 %v9404_v60, %v9372_v34  ;;  %v9408_v60 = vunpack.c.l.bf16 %v15069_v62  ;;  %v8220_v34 = vpop.f32.mrf.mxu3 }
 0x5a7   : > { %v9259_v27 = vpop.f32.mrf.mxu1  ;;  %v8258_v17 = vadd.f32 %v8220_v34, %v7971_v35 }
 0x5a8   : > { %v9468_v47 = vmax.f32 %v9436_v45, 0.0  ;;  %v9305_v51 = vadd.f32 %v9259_v27, %v8907_v57  ;;  %v8911_v57 = vadd.f32 %v8871_v50, %v8257_v16  ;;  %v7935_v27 = vpop.f32.mrf.mxu2  ;;  %v15073_v16 = vld [vmem:[#allocation57_spill] sm:$0xff] }
 0x5a9   : > { %v7972_v56 = vadd.f32 %v7935_v27, %v14399_v30 }
 0x5aa   : > { %v9500_v58 = vpack.c.bf16 %v9468_v47, %v9468_v47  ;;  %v9339_v61 = vmul.f32 %v14416_v31, %v9305_v51 }
 0x5ac   : > { %9532 = vst.msk [vmem:[%s14437_s29 + $0x58] sm:$0xf] %vm199_vm1, %v9500_v58  ;;  %v9373_v39 = vadd.f32 %v14421_v13, %v9339_v61  ;;  %v15070_v61 = vld [vmem:[#allocation52_spill] sm:$0xff] }
 0x5ad   : > { %v9409_v38 = vunpack.c.l.bf16 %v15070_v61 }
 0x5ae   : > { %v9437_v24 = vadd.f32 %v9405_v41, %v9373_v39  ;;  %v8222_v39 = vpop.f32.mrf.mxu3 }
 0x5af   : > { %v9262_v37 = vpop.f32.mrf.mxu1  ;;  %v8259_v59 = vadd.f32 %v8222_v39, %v7972_v56 }
 0x5b0   : > { %v9469_v0 = vmax.f32 %v9437_v24, 0.0  ;;  %v9306_v15 = vadd.f32 %v9262_v37, %v8908_v52  ;;  %v8912_v24 = vadd.f32 %v8874_v32, %v8258_v17 }
 0x5b2   : > { %v9501_v2 = vpack.c.bf16 %v9469_v0, %v9469_v0  ;;  %v9340_v44 = vmul.f32 %v14416_v31, %v9306_v15  ;;  %v8876_v0 = vpop.f32.mrf.mxu0  ;;  %v7938_v15 = vpop.f32.mrf.mxu2 }
 0x5b3   : > { %v7973_v30 = vadd.f32 %v7938_v15, %v14403_v49  ;;  %v8913_v63 = vadd.f32 %v8876_v0, %v8259_v59 }
 0x5b4   : > { %9533 = vst.msk [vmem:[%s14437_s29 + $0x5c] sm:$0xf] %vm199_vm1, %v9501_v2  ;;  %v9374_v11 = vadd.f32 %v14421_v13, %v9340_v44  ;;  %v15071_v44 = vld [vmem:[#allocation55_spill] sm:$0xff] }
 0x5b5   : > { %v9410_v29 = vunpack.c.l.bf16 %v15071_v44 }
 0x5b6   : > { %v9438_v43 = vadd.f32 %v9406_v8, %v9374_v11  ;;  %v8225_v54 = vpop.f32.mrf.mxu3 }
 0x5b7   : > { %v9264_v18 = vpop.f32.mrf.mxu1 }
 0x5b8   : > { %v9470_v19 = vmax.f32 %v9438_v43, 0.0  ;;  %v9307_v12 = vadd.f32 %v9264_v18, %v8909_v22 }
 0x5ba   : > { %v9502_v23 = vpack.c.bf16 %v9470_v19, %v9470_v19  ;;  %v9341_v14 = vmul.f32 %v14416_v31, %v9307_v12  ;;  %v8879_v19 = vpop.f32.mrf.mxu0  ;;  %v8260_v12 = vadd.f32 %v8225_v54, %v7973_v30  ;;  %v7940_v42 = vpop.f32.mrf.mxu2 }
 0x5bb   : > { %v7974_v49 = vadd.f32 %v7940_v42, %v14409_v36 }
 0x5bc   : > { %9534 = vst.msk [vmem:[%s14437_s29 + $0x60] sm:$0xf] %vm199_vm1, %v9502_v23  ;;  %v9375_v40 = vadd.f32 %v14421_v13, %v9341_v14  ;;  %v15072_v23 = vld [vmem:[#allocation56_spill] sm:$0xff]  ;;  %v8914_v50 = vadd.f32 %v8879_v19, %v8260_v12 }
 0x5bd   : > { %v9411_v14 = vunpack.c.l.bf16 %v15072_v23 }
 0x5be   : > { %v9439_v28 = vadd.f32 %v9407_v7, %v9375_v40  ;;  %v8227_v46 = vpop.f32.mrf.mxu3 }
 0x5bf   : > { %v9267_v48 = vpop.f32.mrf.mxu1 }
 0x5c0   : > { %v9471_v20 = vmax.f32 %v9439_v28, 0.0  ;;  %v9308_v21 = vadd.f32 %v9267_v48, %v8910_v55  ;;  %v8261_v48 = vadd.f32 %v8227_v46, %v7974_v49 }
 0x5c2   : > { %v9503_v4 = vpack.c.bf16 %v9471_v20, %v9471_v20  ;;  %v9342_v10 = vmul.f32 %v14416_v31, %v9308_v21 }
 0x5c4   : > { %9535 = vst.msk [vmem:[%s14437_s29 + $0x64] sm:$0xf] %vm199_vm1, %v9503_v4  ;;  %v9376_v3 = vadd.f32 %v14421_v13, %v9342_v10  ;;  %v9412_v4 = vunpack.c.l.bf16 %v15073_v16  ;;  %v8881_v10 = vpop.f32.mrf.mxu0 }
 0x5c6   : > { %v9440_v45 = vadd.f32 %v9408_v60, %v9376_v3  ;;  %v8915_v60 = vadd.f32 %v8881_v10, %v8261_v48 }
 0x5c7   : > { %v9269_v26 = vpop.f32.mrf.mxu1 }
 0x5c8   : > { %v9472_v47 = vmax.f32 %v9440_v45, 0.0  ;;  %v9309_v51 = vadd.f32 %v9269_v26, %v8911_v57  ;;  %v15074_v57 = vld [vmem:[#allocation58_spill] sm:$0xff] }
 0x5c9   : > { %v9413_v27 = vunpack.c.l.bf16 %v15074_v57 }
 0x5ca   : > { %v9504_v6 = vpack.c.bf16 %v9472_v47, %v9472_v47  ;;  %v9343_v58 = vmul.f32 %v14416_v31, %v9309_v51 }
 0x5cc   : > { %9536 = vst.msk [vmem:[%s14437_s29 + $0x68] sm:$0xf] %vm199_vm1, %v9504_v6  ;;  %v9377_v41 = vadd.f32 %v14421_v13, %v9343_v58 }
 0x5ce   : > { %v9441_v5 = vadd.f32 %v9409_v38, %v9377_v41 }
 0x5cf   : > { %v9272_v52 = vpop.f32.mrf.mxu1 }
 0x5d0   : > { %v9473_v25 = vmax.f32 %v9441_v5, 0.0  ;;  %v9310_v37 = vadd.f32 %v9272_v52, %v8912_v24 }
 0x5d2   : > { %v9505_v33 = vpack.c.bf16 %v9473_v25, %v9473_v25  ;;  %v9344_v2 = vmul.f32 %v14416_v31, %v9310_v37 }
 0x5d4   : > { %9537 = vst.msk [vmem:[%s14437_s29 + $0x6c] sm:$0xf] %vm199_vm1, %v9505_v33  ;;  %v9378_v8 = vadd.f32 %v14421_v13, %v9344_v2 }
 0x5d6   : > { %v9442_v11 = vadd.f32 %v9410_v29, %v9378_v8 }
 0x5d7   : > { %v9274_v43 = vpop.f32.mrf.mxu1 }
 0x5d8   : > { %v9474_v22 = vmax.f32 %v9442_v11, 0.0  ;;  %v9311_v18 = vadd.f32 %v9274_v43, %v8913_v63 }
 0x5da   : > { %v9506_v1 = vpack.c.bf16 %v9474_v22, %v9474_v22  ;;  %v9345_v9 = vmul.f32 %v14416_v31, %v9311_v18 }
 0x5dc   : > { %9538 = vst.msk [vmem:[%s14437_s29 + $0x70] sm:$0xf] %vm199_vm1, %v9506_v1  ;;  %v9379_v7 = vadd.f32 %v14421_v13, %v9345_v9 }
 0x5de   : > { %v9443_v40 = vadd.f32 %v9411_v14, %v9379_v7 }
 0x5df   : > { %v9277_v53 = vpop.f32.mrf.mxu1 }
 0x5e0   : > { %v9475_v28 = vmax.f32 %v9443_v40, 0.0  ;;  %v9312_v55 = vadd.f32 %v9277_v53, %v8914_v50 }
 0x5e2   : > { %v9507_v20 = vpack.c.bf16 %v9475_v28, %v9475_v28  ;;  %v9346_v21 = vmul.f32 %v14416_v31, %v9312_v55 }
 0x5e4   : > { %9539 = vst.msk [vmem:[%s14437_s29 + $0x74] sm:$0xf] %vm199_vm1, %v9507_v20  ;;  %v9380_v62 = vadd.f32 %v14421_v13, %v9346_v21 }
 0x5e6   : > { %v9444_v36 = vadd.f32 %v9412_v4, %v9380_v62 }
 0x5e7   : > { %v9279_v34 = vpop.f32.mrf.mxu1 }
 0x5e8   : > { %v9476_v3 = vmax.f32 %v9444_v36, 0.0  ;;  %v9313_v32 = vadd.f32 %v9279_v34, %v8915_v60 }
 0x5ea   : > { %v9508_v35 = vpack.c.bf16 %v9476_v3, %v9476_v3  ;;  %v9347_v45 = vmul.f32 %v14416_v31, %v9313_v32 }
 0x5ec   : > { %9540 = vst.msk [vmem:[%s14437_s29 + $0x78] sm:$0xf] %vm199_vm1, %v9508_v35  ;;  %v9381_v26 = vadd.f32 %v14421_v13, %v9347_v45 }
 0x5ee   : > { %v9445_v47 = vadd.f32 %v9413_v27, %v9381_v26 }
 0x5f0   : > { %v9477_v51 = vmax.f32 %v9445_v47, 0.0 }
 0x5f2   : > { %v9509_v17 = vpack.c.bf16 %v9477_v51, %v9477_v51 }
 0x5f4   : > { %9541 = vst.msk [vmem:[%s14437_s29 + $0x7c] sm:$0xf] %vm199_vm1, %v9509_v17 }
 0x5f5 PF: > { %s14_s15 = sadd.s32 1, %s10545_s15  }
 0x5f6   : > { %p11_p4 = scmp.ge.s32.totalorder %s14_s15, 4  }
 0x5f8   :  { %13 = sbr.rel (!%p11_p4) target bundleno = 1 (0x1), region = 88 }

</bundles_post_ra>
